<compile_context>
chip_gen: v6e
topology: v6e:2x2x1
jax: 0.10.0
libtpu: 0.0.40
codegen_flags: <defaults>
</compile_context>

<pallas_src>
import jax
import jax.numpy as jnp
from jax import lax
from jax.experimental import pallas as pl
from jax.experimental.pallas import tpu as pltpu


def _softmax(x):
    m = jnp.max(x, axis=1, keepdims=True)
    e = jnp.exp(x - m)
    return e / jnp.sum(e, axis=1, keepdims=True)


def combine_kernel(
    ohflat_ref, xlast_ref,
    wih_i_ref, wih_f_ref, wih_g_ref, wih_o_ref,
    whh_i_ref, whh_f_ref, whh_g_ref, whh_o_ref,
    bi_ref, bf_ref, bg_ref, bo_ref,
    wep_ref, bep_ref, eps_ref, ept_ref,
    wn1_ref, bn1_ref, n1s_ref, n1t_ref,
    wn2_ref, bn2_ref, n2s_ref, n2t_ref,
    wd1_ref, bd1_ref,
    wd2_ref, bd2_ref, d2s_ref, d2t_ref,
    wd3_ref, bd3_ref, d3s_ref, d3t_ref,
    wm1_ref, bm1_ref, wm2_ref, bm2_ref,
    coef_ref,
    out_ref,
):
    f32 = jnp.float32
    B = xlast_ref.shape[0]
    T = ohflat_ref.shape[0] // B
    H = whh_i_ref.shape[0]           # LSTM hidden = embed_size * 10

    def dot(a, b):
        return jnp.dot(a, b, preferred_element_type=f32)

    # ---- Hoisted LSTM input projection: one batched matmul per gate, bias folded
    #      in once.  Each gate output is its own array -> lane-0 aligned. ----
    oh = ohflat_ref[...]                                  # (T*B, C), time-major rows
    gx_i = dot(oh, wih_i_ref[...]) + bi_ref[...]          # (T*B, H)
    gx_f = dot(oh, wih_f_ref[...]) + bf_ref[...]
    gx_g = dot(oh, wih_g_ref[...]) + bg_ref[...]
    gx_o = dot(oh, wih_o_ref[...]) + bo_ref[...]

    whh_i = whh_i_ref[...]
    whh_f = whh_f_ref[...]
    whh_g = whh_g_ref[...]
    whh_o = whh_o_ref[...]

    # ---- Fully unrolled recurrence over T (static, small); static row slices are
    #      sublane-aligned (B is a multiple of 8) and each per-gate dot output
    #      starts at lane 0, so no per-step relayouts. ----
    h = jnp.zeros((B, H), f32)
    c = jnp.zeros((B, H), f32)
    for t in range(T):
        s = t * B
        gi = gx_i[s:s + B, :] + dot(h, whh_i)
        gf = gx_f[s:s + B, :] + dot(h, whh_f)
        gg = gx_g[s:s + B, :] + dot(h, whh_g)
        go = gx_o[s:s + B, :] + dot(h, whh_o)
        c = jax.nn.sigmoid(gf) * c + jax.nn.sigmoid(gi) * jnp.tanh(gg)
        h = jax.nn.sigmoid(go) * jnp.tanh(c)

    # ---- embed_past: Linear -> BN(eval, folded) -> ReLU ----
    ep = dot(h, wep_ref[...]) + bep_ref[...]
    ep = jnp.maximum(ep * eps_ref[...] + ept_ref[...], 0.0)

    # ---- embed_now: inputs[:, -1, :2] -> Linear/BN/ReLU x2.
    #      K=2 first layer on the VPU (two broadcast FMAs) instead of the MXU. ----
    x_last = xlast_ref[...]
    wn1 = wn1_ref[...]                                    # (2, E//2)
    en = (x_last[:, 0:1] * wn1[0:1, :]
          + x_last[:, 1:2] * wn1[1:2, :]
          + bn1_ref[...])
    en = jnp.maximum(en * n1s_ref[...] + n1t_ref[...], 0.0)
    en = dot(en, wn2_ref[...]) + bn2_ref[...]
    en = jnp.maximum(en * n2s_ref[...] + n2t_ref[...], 0.0)

    # ---- decode stack on (embed_now + embed_past) ----
    z = en + ep
    z = jnp.maximum(dot(z, wd1_ref[...]) + bd1_ref[...], 0.0)
    z = dot(z, wd2_ref[...]) + bd2_ref[...]
    z = jnp.maximum(z * d2s_ref[...] + d2t_ref[...], 0.0)
    z = dot(z, wd3_ref[...]) + bd3_ref[...]
    z = jnp.maximum(z * d3s_ref[...] + d3t_ref[...], 0.0)
    seq_p = _softmax(z)                                   # = exp(log_softmax(z))

    # ---- MLP branch on inputs[:, -1, :] ----
    m = jnp.maximum(dot(x_last, wm1_ref[...]) + bm1_ref[...], 0.0)
    m = dot(m, wm2_ref[...]) + bm2_ref[...]
    mlp_p = _softmax(m)                                   # = exp(log_softmax(m))

    # ---- mixture:  log(softmax_mlp * sig(c) + softmax_seq * (1 - sig(c))) ----
    coef = jax.nn.sigmoid(coef_ref[...])                  # (1, C), broadcasts over batch
    out_ref[...] = jnp.log(mlp_p * coef + seq_p * (1.0 - coef))


def combine_mlp_setime(params, inputs, targets):
    B, T, Din = inputs.shape
    C = params["wm2"].shape[1]
    H = params["whh"].shape[0]
    E = params["wep"].shape[1]
    MH = params["wm1"].shape[1]

    onehot = jax.nn.one_hot(targets, C, dtype=jnp.float32)      # (B, T, C)
    ohflat = jnp.transpose(onehot, (1, 0, 2)).reshape(T * B, C)  # time-major rows
    x_last = inputs[:, -1, :].astype(jnp.float32)               # (B, Din)

    # Per-gate splits (PyTorch gate order i, f, g, o) so in-kernel dots are lane-aligned.
    def split4(w, axis):
        return tuple(
            lax.slice_in_dim(w, k * H, (k + 1) * H, axis=axis) for k in range(4)
        )
    wih_i, wih_f, wih_g, wih_o = split4(params["wih"], 1)
    whh_i, whh_f, whh_g, whh_o = split4(params["whh"], 1)
    b_i, b_f, b_g, b_o = split4(params["blstm"], 1)

    args = (ohflat, x_last,
            wih_i, wih_f, wih_g, wih_o,
            whh_i, whh_f, whh_g, whh_o,
            b_i, b_f, b_g, b_o,
            params["wep"], params["bep"], params["eps"], params["ept"],
            params["wn1"], params["bn1"], params["n1s"], params["n1t"],
            params["wn2"], params["bn2"], params["n2s"], params["n2t"],
            params["wd1"], params["bd1"],
            params["wd2"], params["bd2"], params["d2s"], params["d2t"],
            params["wd3"], params["bd3"], params["d3s"], params["d3t"],
            params["wm1"], params["bm1"], params["wm2"], params["bm2"],
            params["coef"])

    flops = int(
        2 * T * B * C * 4 * H            # hoisted input projection
        + 2 * T * B * H * 4 * H          # recurrence (h @ whh per gate)
        + 2 * B * H * E                  # embed_past
        + 2 * B * 2 * (E // 2) + 2 * B * (E // 2) * E
        + 2 * B * E * 4 * E + 2 * B * 4 * E * 20 * E + 2 * B * 20 * E * C
        + 2 * B * Din * MH + 2 * B * MH * C)
    transcendentals = int(T * B * 5 * H + 4 * B * C)
    bytes_accessed = int(sum(a.size for a in args) * 4 + B * C * 4)

    vmem = pl.BlockSpec(memory_space=pltpu.MemorySpace.VMEM)
    # NOTE: no grid — single-TensorCore latency-bound problem at these shapes.
    # If batch scales, add a leading batch grid axis with dimension_semantics=("parallel",)
    # so v7x's two TensorCores split the batch.
    return pl.pallas_call(
        combine_kernel,
        out_shape=jax.ShapeDtypeStruct((B, C), jnp.float32),
        in_specs=[vmem] * len(args),
        out_specs=vmem,
        cost_estimate=pl.CostEstimate(
            flops=flops, transcendentals=transcendentals,
            bytes_accessed=bytes_accessed),
    )(*args)


# ------------------------- parameter setup (glue) -------------------------
def _bn_fold(key, n, eps=1e-5):
    k1, k2, k3, k4 = jax.random.split(key, 4)
    gamma = 1.0 + 0.1 * jax.random.normal(k1, (n,), jnp.float32)
    beta = 0.05 * jax.random.normal(k2, (n,), jnp.float32)
    rmean = 0.05 * jax.random.normal(k3, (n,), jnp.float32)
    rvar = 1.0 + 0.1 * jax.random.uniform(k4, (n,), jnp.float32)
    scale = gamma / jnp.sqrt(rvar + eps)
    shift = beta - rmean * scale
    return scale.reshape(1, n), shift.reshape(1, n)


def make_params(key, target_num, embed_size, d_in, mlp_hidden):
    C, E = target_num, embed_size
    H = E * 10
    ks = jax.random.split(key, 32)
    nrm = lambda k, shape, s=0.1: (s * jax.random.normal(k, shape, jnp.float32))
    p = {}
    # LSTM (PyTorch gate order i, f, g, o); weights stored transposed (in, 4H)
    p["wih"] = nrm(ks[0], (C, 4 * H))
    p["whh"] = nrm(ks[1], (H, 4 * H))
    p["blstm"] = nrm(ks[2], (1, 4 * H))          # b_ih + b_hh pre-summed
    # embed_past
    p["wep"], p["bep"] = nrm(ks[3], (H, E)), nrm(ks[4], (1, E))
    p["eps"], p["ept"] = _bn_fold(ks[5], E)
    # embed_now
    p["wn1"], p["bn1"] = nrm(ks[6], (2, E // 2)), nrm(ks[7], (1, E // 2))
    p["n1s"], p["n1t"] = _bn_fold(ks[8], E // 2)
    p["wn2"], p["bn2"] = nrm(ks[9], (E // 2, E)), nrm(ks[10], (1, E))
    p["n2s"], p["n2t"] = _bn_fold(ks[11], E)
    # decode
    p["wd1"], p["bd1"] = nrm(ks[12], (E, 4 * E)), nrm(ks[13], (1, 4 * E))
    p["wd2"], p["bd2"] = nrm(ks[14], (4 * E, 20 * E)), nrm(ks[15], (1, 20 * E))
    p["d2s"], p["d2t"] = _bn_fold(ks[16], 20 * E)
    p["wd3"], p["bd3"] = nrm(ks[17], (20 * E, C)), nrm(ks[18], (1, C))
    p["d3s"], p["d3t"] = _bn_fold(ks[19], C)
    # external MLP (Linear -> ReLU -> Linear -> log_softmax)
    p["wm1"], p["bm1"] = nrm(ks[20], (d_in, mlp_hidden)), nrm(ks[21], (1, mlp_hidden))
    p["wm2"], p["bm2"] = nrm(ks[22], (mlp_hidden, C)), nrm(ks[23], (1, C))
    # combine coefficient (nn.Parameter(zeros) in the module; zeros -> sigmoid = 0.5)
    p["coef"] = jnp.zeros((1, C), jnp.float32)
    return p


# ------------------------- pure-JAX reference -------------------------
def reference(params, inputs, targets):
    C = params["wm2"].shape[1]
    H = params["whh"].shape[0]
    B, T, _ = inputs.shape
    oh = jax.nn.one_hot(targets, C, dtype=jnp.float32)
    h = jnp.zeros((B, H), jnp.float32)
    c = jnp.zeros((B, H), jnp.float32)
    for t in range(T):
        g = oh[:, t, :] @ params["wih"] + h @ params["whh"] + params["blstm"]
        i = jax.nn.sigmoid(g[:, 0 * H:1 * H]); f = jax.nn.sigmoid(g[:, 1 * H:2 * H])
        gg = jnp.tanh(g[:, 2 * H:3 * H]); o = jax.nn.sigmoid(g[:, 3 * H:4 * H])
        c = f * c + i * gg
        h = o * jnp.tanh(c)
    ep = jnp.maximum((h @ params["wep"] + params["bep"]) * params["eps"] + params["ept"], 0.0)
    x_last = inputs[:, -1, :]
    en = jnp.maximum((x_last[:, :2] @ params["wn1"] + params["bn1"]) * params["n1s"] + params["n1t"], 0.0)
    en = jnp.maximum((en @ params["wn2"] + params["bn2"]) * params["n2s"] + params["n2t"], 0.0)
    z = en + ep
    z = jnp.maximum(z @ params["wd1"] + params["bd1"], 0.0)
    z = jnp.maximum((z @ params["wd2"] + params["bd2"]) * params["d2s"] + params["d2t"], 0.0)
    z = jnp.maximum((z @ params["wd3"] + params["bd3"]) * params["d3s"] + params["d3t"], 0.0)
    seq_log = jax.nn.log_softmax(z, axis=1)
    m = jnp.maximum(x_last @ params["wm1"] + params["bm1"], 0.0)
    mlp_log = jax.nn.log_softmax(m @ params["wm2"] + params["bm2"], axis=1)
    coef = jax.nn.sigmoid(params["coef"])
    return jnp.log(jnp.exp(mlp_log) * coef + jnp.exp(seq_log) * (1 - coef))


if __name__ == "__main__":
    B, T, D_IN = 8, 8, 4           # _inputs: (batch, seq, features>=2)
    TARGET_NUM = 8                 # output_size == target_num
    EMBED_SIZE = 16
    MLP_HIDDEN = 32

    key = jax.random.PRNGKey(0)
    kp, kx, kt = jax.random.split(key, 3)
    params = make_params(kp, TARGET_NUM, EMBED_SIZE, D_IN, MLP_HIDDEN)
    inputs = jax.random.normal(kx, (B, T, D_IN), jnp.float32)
    targets = jax.random.randint(kt, (B, T), 0, TARGET_NUM, jnp.int32)

    out = combine_mlp_setime(params, inputs, targets)
    out = jax.block_until_ready(out)

    ref = jax.block_until_ready(reference(params, inputs, targets))
    assert out.shape == (B, TARGET_NUM)
    assert bool(jnp.allclose(out, ref, atol=2e-3, rtol=2e-3)), "mismatch vs pure-JAX reference"
    print("KERNEL_OK")
</pallas_src>

<mosaic_0001>
module attributes {stable_mosaic.version = 11 : i64} {
  func.func @combine_kernel(%arg0: memref<64x8xf32, #tpu.memory_space<vmem>>, %arg1: memref<8x4xf32, #tpu.memory_space<vmem>>, %arg2: memref<8x160xf32, #tpu.memory_space<vmem>>, %arg3: memref<8x160xf32, #tpu.memory_space<vmem>>, %arg4: memref<8x160xf32, #tpu.memory_space<vmem>>, %arg5: memref<8x160xf32, #tpu.memory_space<vmem>>, %arg6: memref<160x160xf32, #tpu.memory_space<vmem>>, %arg7: memref<160x160xf32, #tpu.memory_space<vmem>>, %arg8: memref<160x160xf32, #tpu.memory_space<vmem>>, %arg9: memref<160x160xf32, #tpu.memory_space<vmem>>, %arg10: memref<1x160xf32, #tpu.memory_space<vmem>>, %arg11: memref<1x160xf32, #tpu.memory_space<vmem>>, %arg12: memref<1x160xf32, #tpu.memory_space<vmem>>, %arg13: memref<1x160xf32, #tpu.memory_space<vmem>>, %arg14: memref<160x16xf32, #tpu.memory_space<vmem>>, %arg15: memref<1x16xf32, #tpu.memory_space<vmem>>, %arg16: memref<1x16xf32, #tpu.memory_space<vmem>>, %arg17: memref<1x16xf32, #tpu.memory_space<vmem>>, %arg18: memref<2x8xf32, #tpu.memory_space<vmem>>, %arg19: memref<1x8xf32, #tpu.memory_space<vmem>>, %arg20: memref<1x8xf32, #tpu.memory_space<vmem>>, %arg21: memref<1x8xf32, #tpu.memory_space<vmem>>, %arg22: memref<8x16xf32, #tpu.memory_space<vmem>>, %arg23: memref<1x16xf32, #tpu.memory_space<vmem>>, %arg24: memref<1x16xf32, #tpu.memory_space<vmem>>, %arg25: memref<1x16xf32, #tpu.memory_space<vmem>>, %arg26: memref<16x64xf32, #tpu.memory_space<vmem>>, %arg27: memref<1x64xf32, #tpu.memory_space<vmem>>, %arg28: memref<64x320xf32, #tpu.memory_space<vmem>>, %arg29: memref<1x320xf32, #tpu.memory_space<vmem>>, %arg30: memref<1x320xf32, #tpu.memory_space<vmem>>, %arg31: memref<1x320xf32, #tpu.memory_space<vmem>>, %arg32: memref<320x8xf32, #tpu.memory_space<vmem>>, %arg33: memref<1x8xf32, #tpu.memory_space<vmem>>, %arg34: memref<1x8xf32, #tpu.memory_space<vmem>>, %arg35: memref<1x8xf32, #tpu.memory_space<vmem>>, %arg36: memref<4x32xf32, #tpu.memory_space<vmem>>, %arg37: memref<1x32xf32, #tpu.memory_space<vmem>>, %arg38: memref<32x8xf32, #tpu.memory_space<vmem>>, %arg39: memref<1x8xf32, #tpu.memory_space<vmem>>, %arg40: memref<1x8xf32, #tpu.memory_space<vmem>>, %arg41: memref<8x8xf32, #tpu.memory_space<vmem>>) attributes {dimension_semantics = [], scalar_prefetch = 0 : i64, scratch_operands = 0 : i64, tpu.core_type = #tpu.core_type<tc>} {
    %c0 = arith.constant 0 : index
    %c0_0 = arith.constant 0 : index
    %0 = vector.load %arg0[%c0, %c0_0] : memref<64x8xf32, #tpu.memory_space<vmem>>, vector<64x8xf32>
    %c0_1 = arith.constant 0 : index
    %c0_2 = arith.constant 0 : index
    %1 = vector.load %arg2[%c0_1, %c0_2] : memref<8x160xf32, #tpu.memory_space<vmem>>, vector<8x160xf32>
    %cst = arith.constant dense<0.000000e+00> : vector<64x160xf32>
    %2 = tpu.matmul %0, %1, %cst {dimension_numbers = #tpu.dot_dimension_numbers<[1], [0], [0], [1], [0, 0, 1, 1], [], []>} : vector<64x8xf32>, vector<8x160xf32>, vector<64x160xf32> -> vector<64x160xf32>
    %c0_3 = arith.constant 0 : index
    %c0_4 = arith.constant 0 : index
    %3 = vector.load %arg10[%c0_3, %c0_4] : memref<1x160xf32, #tpu.memory_space<vmem>>, vector<1x160xf32>
    %4 = vector.broadcast %3 : vector<1x160xf32> to vector<64x160xf32>
    %5 = arith.addf %2, %4 : vector<64x160xf32>
    %c0_5 = arith.constant 0 : index
    %c0_6 = arith.constant 0 : index
    %6 = vector.load %arg3[%c0_5, %c0_6] : memref<8x160xf32, #tpu.memory_space<vmem>>, vector<8x160xf32>
    %cst_7 = arith.constant dense<0.000000e+00> : vector<64x160xf32>
    %7 = tpu.matmul %0, %6, %cst_7 {dimension_numbers = #tpu.dot_dimension_numbers<[1], [0], [0], [1], [0, 0, 1, 1], [], []>} : vector<64x8xf32>, vector<8x160xf32>, vector<64x160xf32> -> vector<64x160xf32>
    %c0_8 = arith.constant 0 : index
    %c0_9 = arith.constant 0 : index
    %8 = vector.load %arg11[%c0_8, %c0_9] : memref<1x160xf32, #tpu.memory_space<vmem>>, vector<1x160xf32>
    %9 = vector.broadcast %8 : vector<1x160xf32> to vector<64x160xf32>
    %10 = arith.addf %7, %9 : vector<64x160xf32>
    %c0_10 = arith.constant 0 : index
    %c0_11 = arith.constant 0 : index
    %11 = vector.load %arg4[%c0_10, %c0_11] : memref<8x160xf32, #tpu.memory_space<vmem>>, vector<8x160xf32>
    %cst_12 = arith.constant dense<0.000000e+00> : vector<64x160xf32>
    %12 = tpu.matmul %0, %11, %cst_12 {dimension_numbers = #tpu.dot_dimension_numbers<[1], [0], [0], [1], [0, 0, 1, 1], [], []>} : vector<64x8xf32>, vector<8x160xf32>, vector<64x160xf32> -> vector<64x160xf32>
    %c0_13 = arith.constant 0 : index
    %c0_14 = arith.constant 0 : index
    %13 = vector.load %arg12[%c0_13, %c0_14] : memref<1x160xf32, #tpu.memory_space<vmem>>, vector<1x160xf32>
    %14 = vector.broadcast %13 : vector<1x160xf32> to vector<64x160xf32>
    %15 = arith.addf %12, %14 : vector<64x160xf32>
    %c0_15 = arith.constant 0 : index
    %c0_16 = arith.constant 0 : index
    %16 = vector.load %arg5[%c0_15, %c0_16] : memref<8x160xf32, #tpu.memory_space<vmem>>, vector<8x160xf32>
    %cst_17 = arith.constant dense<0.000000e+00> : vector<64x160xf32>
    %17 = tpu.matmul %0, %16, %cst_17 {dimension_numbers = #tpu.dot_dimension_numbers<[1], [0], [0], [1], [0, 0, 1, 1], [], []>} : vector<64x8xf32>, vector<8x160xf32>, vector<64x160xf32> -> vector<64x160xf32>
    %c0_18 = arith.constant 0 : index
    %c0_19 = arith.constant 0 : index
    %18 = vector.load %arg13[%c0_18, %c0_19] : memref<1x160xf32, #tpu.memory_space<vmem>>, vector<1x160xf32>
    %19 = vector.broadcast %18 : vector<1x160xf32> to vector<64x160xf32>
    %20 = arith.addf %17, %19 : vector<64x160xf32>
    %c0_20 = arith.constant 0 : index
    %c0_21 = arith.constant 0 : index
    %21 = vector.load %arg6[%c0_20, %c0_21] : memref<160x160xf32, #tpu.memory_space<vmem>>, vector<160x160xf32>
    %c0_22 = arith.constant 0 : index
    %c0_23 = arith.constant 0 : index
    %22 = vector.load %arg7[%c0_22, %c0_23] : memref<160x160xf32, #tpu.memory_space<vmem>>, vector<160x160xf32>
    %c0_24 = arith.constant 0 : index
    %c0_25 = arith.constant 0 : index
    %23 = vector.load %arg8[%c0_24, %c0_25] : memref<160x160xf32, #tpu.memory_space<vmem>>, vector<160x160xf32>
    %c0_26 = arith.constant 0 : index
    %c0_27 = arith.constant 0 : index
    %24 = vector.load %arg9[%c0_26, %c0_27] : memref<160x160xf32, #tpu.memory_space<vmem>>, vector<160x160xf32>
    %cst_28 = arith.constant 0.000000e+00 : f32
    %25 = vector.broadcast %cst_28 : f32 to vector<8x160xf32>
    %cst_29 = arith.constant 0.000000e+00 : f32
    %26 = vector.broadcast %cst_29 : f32 to vector<8x160xf32>
    %27 = vector.extract_strided_slice %5 {offsets = [0, 0], sizes = [8, 160], strides = [1, 1]} : vector<64x160xf32> to vector<8x160xf32>
    %cst_30 = arith.constant dense<0.000000e+00> : vector<8x160xf32>
    %28 = tpu.matmul %25, %21, %cst_30 {dimension_numbers = #tpu.dot_dimension_numbers<[1], [0], [0], [1], [0, 0, 1, 1], [], []>} : vector<8x160xf32>, vector<160x160xf32>, vector<8x160xf32> -> vector<8x160xf32>
    %29 = arith.addf %27, %28 : vector<8x160xf32>
    %30 = vector.extract_strided_slice %10 {offsets = [0, 0], sizes = [8, 160], strides = [1, 1]} : vector<64x160xf32> to vector<8x160xf32>
    %cst_31 = arith.constant dense<0.000000e+00> : vector<8x160xf32>
    %31 = tpu.matmul %25, %22, %cst_31 {dimension_numbers = #tpu.dot_dimension_numbers<[1], [0], [0], [1], [0, 0, 1, 1], [], []>} : vector<8x160xf32>, vector<160x160xf32>, vector<8x160xf32> -> vector<8x160xf32>
    %32 = arith.addf %30, %31 : vector<8x160xf32>
    %33 = vector.extract_strided_slice %15 {offsets = [0, 0], sizes = [8, 160], strides = [1, 1]} : vector<64x160xf32> to vector<8x160xf32>
    %cst_32 = arith.constant dense<0.000000e+00> : vector<8x160xf32>
    %34 = tpu.matmul %25, %23, %cst_32 {dimension_numbers = #tpu.dot_dimension_numbers<[1], [0], [0], [1], [0, 0, 1, 1], [], []>} : vector<8x160xf32>, vector<160x160xf32>, vector<8x160xf32> -> vector<8x160xf32>
    %35 = arith.addf %33, %34 : vector<8x160xf32>
    %36 = vector.extract_strided_slice %20 {offsets = [0, 0], sizes = [8, 160], strides = [1, 1]} : vector<64x160xf32> to vector<8x160xf32>
    %cst_33 = arith.constant dense<0.000000e+00> : vector<8x160xf32>
    %37 = tpu.matmul %25, %24, %cst_33 {dimension_numbers = #tpu.dot_dimension_numbers<[1], [0], [0], [1], [0, 0, 1, 1], [], []>} : vector<8x160xf32>, vector<160x160xf32>, vector<8x160xf32> -> vector<8x160xf32>
    %38 = arith.addf %36, %37 : vector<8x160xf32>
    %39 = arith.negf %32 : vector<8x160xf32>
    %40 = math.exp %39 : vector<8x160xf32>
    %cst_34 = arith.constant 1.000000e+00 : f32
    %41 = vector.broadcast %cst_34 : f32 to vector<8x160xf32>
    %42 = arith.addf %41, %40 : vector<8x160xf32>
    %43 = arith.divf %41, %42 : vector<8x160xf32>
    %44 = arith.mulf %43, %26 : vector<8x160xf32>
    %45 = arith.negf %29 : vector<8x160xf32>
    %46 = math.exp %45 : vector<8x160xf32>
    %cst_35 = arith.constant 1.000000e+00 : f32
    %47 = vector.broadcast %cst_35 : f32 to vector<8x160xf32>
    %48 = arith.addf %47, %46 : vector<8x160xf32>
    %49 = arith.divf %47, %48 : vector<8x160xf32>
    %50 = math.tanh %35 : vector<8x160xf32>
    %51 = arith.mulf %49, %50 : vector<8x160xf32>
    %52 = arith.addf %44, %51 : vector<8x160xf32>
    %53 = arith.negf %38 : vector<8x160xf32>
    %54 = math.exp %53 : vector<8x160xf32>
    %cst_36 = arith.constant 1.000000e+00 : f32
    %55 = vector.broadcast %cst_36 : f32 to vector<8x160xf32>
    %56 = arith.addf %55, %54 : vector<8x160xf32>
    %57 = arith.divf %55, %56 : vector<8x160xf32>
    %58 = math.tanh %52 : vector<8x160xf32>
    %59 = arith.mulf %57, %58 : vector<8x160xf32>
    %60 = vector.extract_strided_slice %5 {offsets = [8, 0], sizes = [8, 160], strides = [1, 1]} : vector<64x160xf32> to vector<8x160xf32>
    %cst_37 = arith.constant dense<0.000000e+00> : vector<8x160xf32>
    %61 = tpu.matmul %59, %21, %cst_37 {dimension_numbers = #tpu.dot_dimension_numbers<[1], [0], [0], [1], [0, 0, 1, 1], [], []>} : vector<8x160xf32>, vector<160x160xf32>, vector<8x160xf32> -> vector<8x160xf32>
    %62 = arith.addf %60, %61 : vector<8x160xf32>
    %63 = vector.extract_strided_slice %10 {offsets = [8, 0], sizes = [8, 160], strides = [1, 1]} : vector<64x160xf32> to vector<8x160xf32>
    %cst_38 = arith.constant dense<0.000000e+00> : vector<8x160xf32>
    %64 = tpu.matmul %59, %22, %cst_38 {dimension_numbers = #tpu.dot_dimension_numbers<[1], [0], [0], [1], [0, 0, 1, 1], [], []>} : vector<8x160xf32>, vector<160x160xf32>, vector<8x160xf32> -> vector<8x160xf32>
    %65 = arith.addf %63, %64 : vector<8x160xf32>
    %66 = vector.extract_strided_slice %15 {offsets = [8, 0], sizes = [8, 160], strides = [1, 1]} : vector<64x160xf32> to vector<8x160xf32>
    %cst_39 = arith.constant dense<0.000000e+00> : vector<8x160xf32>
    %67 = tpu.matmul %59, %23, %cst_39 {dimension_numbers = #tpu.dot_dimension_numbers<[1], [0], [0], [1], [0, 0, 1, 1], [], []>} : vector<8x160xf32>, vector<160x160xf32>, vector<8x160xf32> -> vector<8x160xf32>
    %68 = arith.addf %66, %67 : vector<8x160xf32>
    %69 = vector.extract_strided_slice %20 {offsets = [8, 0], sizes = [8, 160], strides = [1, 1]} : vector<64x160xf32> to vector<8x160xf32>
    %cst_40 = arith.constant dense<0.000000e+00> : vector<8x160xf32>
    %70 = tpu.matmul %59, %24, %cst_40 {dimension_numbers = #tpu.dot_dimension_numbers<[1], [0], [0], [1], [0, 0, 1, 1], [], []>} : vector<8x160xf32>, vector<160x160xf32>, vector<8x160xf32> -> vector<8x160xf32>
    %71 = arith.addf %69, %70 : vector<8x160xf32>
    %72 = arith.negf %65 : vector<8x160xf32>
    %73 = math.exp %72 : vector<8x160xf32>
    %cst_41 = arith.constant 1.000000e+00 : f32
    %74 = vector.broadcast %cst_41 : f32 to vector<8x160xf32>
    %75 = arith.addf %74, %73 : vector<8x160xf32>
    %76 = arith.divf %74, %75 : vector<8x160xf32>
    %77 = arith.mulf %76, %52 : vector<8x160xf32>
    %78 = arith.negf %62 : vector<8x160xf32>
    %79 = math.exp %78 : vector<8x160xf32>
    %cst_42 = arith.constant 1.000000e+00 : f32
    %80 = vector.broadcast %cst_42 : f32 to vector<8x160xf32>
    %81 = arith.addf %80, %79 : vector<8x160xf32>
    %82 = arith.divf %80, %81 : vector<8x160xf32>
    %83 = math.tanh %68 : vector<8x160xf32>
    %84 = arith.mulf %82, %83 : vector<8x160xf32>
    %85 = arith.addf %77, %84 : vector<8x160xf32>
    %86 = arith.negf %71 : vector<8x160xf32>
    %87 = math.exp %86 : vector<8x160xf32>
    %cst_43 = arith.constant 1.000000e+00 : f32
    %88 = vector.broadcast %cst_43 : f32 to vector<8x160xf32>
    %89 = arith.addf %88, %87 : vector<8x160xf32>
    %90 = arith.divf %88, %89 : vector<8x160xf32>
    %91 = math.tanh %85 : vector<8x160xf32>
    %92 = arith.mulf %90, %91 : vector<8x160xf32>
    %93 = vector.extract_strided_slice %5 {offsets = [16, 0], sizes = [8, 160], strides = [1, 1]} : vector<64x160xf32> to vector<8x160xf32>
    %cst_44 = arith.constant dense<0.000000e+00> : vector<8x160xf32>
    %94 = tpu.matmul %92, %21, %cst_44 {dimension_numbers = #tpu.dot_dimension_numbers<[1], [0], [0], [1], [0, 0, 1, 1], [], []>} : vector<8x160xf32>, vector<160x160xf32>, vector<8x160xf32> -> vector<8x160xf32>
    %95 = arith.addf %93, %94 : vector<8x160xf32>
    %96 = vector.extract_strided_slice %10 {offsets = [16, 0], sizes = [8, 160], strides = [1, 1]} : vector<64x160xf32> to vector<8x160xf32>
    %cst_45 = arith.constant dense<0.000000e+00> : vector<8x160xf32>
    %97 = tpu.matmul %92, %22, %cst_45 {dimension_numbers = #tpu.dot_dimension_numbers<[1], [0], [0], [1], [0, 0, 1, 1], [], []>} : vector<8x160xf32>, vector<160x160xf32>, vector<8x160xf32> -> vector<8x160xf32>
    %98 = arith.addf %96, %97 : vector<8x160xf32>
    %99 = vector.extract_strided_slice %15 {offsets = [16, 0], sizes = [8, 160], strides = [1, 1]} : vector<64x160xf32> to vector<8x160xf32>
    %cst_46 = arith.constant dense<0.000000e+00> : vector<8x160xf32>
    %100 = tpu.matmul %92, %23, %cst_46 {dimension_numbers = #tpu.dot_dimension_numbers<[1], [0], [0], [1], [0, 0, 1, 1], [], []>} : vector<8x160xf32>, vector<160x160xf32>, vector<8x160xf32> -> vector<8x160xf32>
    %101 = arith.addf %99, %100 : vector<8x160xf32>
    %102 = vector.extract_strided_slice %20 {offsets = [16, 0], sizes = [8, 160], strides = [1, 1]} : vector<64x160xf32> to vector<8x160xf32>
    %cst_47 = arith.constant dense<0.000000e+00> : vector<8x160xf32>
    %103 = tpu.matmul %92, %24, %cst_47 {dimension_numbers = #tpu.dot_dimension_numbers<[1], [0], [0], [1], [0, 0, 1, 1], [], []>} : vector<8x160xf32>, vector<160x160xf32>, vector<8x160xf32> -> vector<8x160xf32>
    %104 = arith.addf %102, %103 : vector<8x160xf32>
    %105 = arith.negf %98 : vector<8x160xf32>
    %106 = math.exp %105 : vector<8x160xf32>
    %cst_48 = arith.constant 1.000000e+00 : f32
    %107 = vector.broadcast %cst_48 : f32 to vector<8x160xf32>
    %108 = arith.addf %107, %106 : vector<8x160xf32>
    %109 = arith.divf %107, %108 : vector<8x160xf32>
    %110 = arith.mulf %109, %85 : vector<8x160xf32>
    %111 = arith.negf %95 : vector<8x160xf32>
    %112 = math.exp %111 : vector<8x160xf32>
    %cst_49 = arith.constant 1.000000e+00 : f32
    %113 = vector.broadcast %cst_49 : f32 to vector<8x160xf32>
    %114 = arith.addf %113, %112 : vector<8x160xf32>
    %115 = arith.divf %113, %114 : vector<8x160xf32>
    %116 = math.tanh %101 : vector<8x160xf32>
    %117 = arith.mulf %115, %116 : vector<8x160xf32>
    %118 = arith.addf %110, %117 : vector<8x160xf32>
    %119 = arith.negf %104 : vector<8x160xf32>
    %120 = math.exp %119 : vector<8x160xf32>
    %cst_50 = arith.constant 1.000000e+00 : f32
    %121 = vector.broadcast %cst_50 : f32 to vector<8x160xf32>
    %122 = arith.addf %121, %120 : vector<8x160xf32>
    %123 = arith.divf %121, %122 : vector<8x160xf32>
    %124 = math.tanh %118 : vector<8x160xf32>
    %125 = arith.mulf %123, %124 : vector<8x160xf32>
    %126 = vector.extract_strided_slice %5 {offsets = [24, 0], sizes = [8, 160], strides = [1, 1]} : vector<64x160xf32> to vector<8x160xf32>
    %cst_51 = arith.constant dense<0.000000e+00> : vector<8x160xf32>
    %127 = tpu.matmul %125, %21, %cst_51 {dimension_numbers = #tpu.dot_dimension_numbers<[1], [0], [0], [1], [0, 0, 1, 1], [], []>} : vector<8x160xf32>, vector<160x160xf32>, vector<8x160xf32> -> vector<8x160xf32>
    %128 = arith.addf %126, %127 : vector<8x160xf32>
    %129 = vector.extract_strided_slice %10 {offsets = [24, 0], sizes = [8, 160], strides = [1, 1]} : vector<64x160xf32> to vector<8x160xf32>
    %cst_52 = arith.constant dense<0.000000e+00> : vector<8x160xf32>
    %130 = tpu.matmul %125, %22, %cst_52 {dimension_numbers = #tpu.dot_dimension_numbers<[1], [0], [0], [1], [0, 0, 1, 1], [], []>} : vector<8x160xf32>, vector<160x160xf32>, vector<8x160xf32> -> vector<8x160xf32>
    %131 = arith.addf %129, %130 : vector<8x160xf32>
    %132 = vector.extract_strided_slice %15 {offsets = [24, 0], sizes = [8, 160], strides = [1, 1]} : vector<64x160xf32> to vector<8x160xf32>
    %cst_53 = arith.constant dense<0.000000e+00> : vector<8x160xf32>
    %133 = tpu.matmul %125, %23, %cst_53 {dimension_numbers = #tpu.dot_dimension_numbers<[1], [0], [0], [1], [0, 0, 1, 1], [], []>} : vector<8x160xf32>, vector<160x160xf32>, vector<8x160xf32> -> vector<8x160xf32>
    %134 = arith.addf %132, %133 : vector<8x160xf32>
    %135 = vector.extract_strided_slice %20 {offsets = [24, 0], sizes = [8, 160], strides = [1, 1]} : vector<64x160xf32> to vector<8x160xf32>
    %cst_54 = arith.constant dense<0.000000e+00> : vector<8x160xf32>
    %136 = tpu.matmul %125, %24, %cst_54 {dimension_numbers = #tpu.dot_dimension_numbers<[1], [0], [0], [1], [0, 0, 1, 1], [], []>} : vector<8x160xf32>, vector<160x160xf32>, vector<8x160xf32> -> vector<8x160xf32>
    %137 = arith.addf %135, %136 : vector<8x160xf32>
    %138 = arith.negf %131 : vector<8x160xf32>
    %139 = math.exp %138 : vector<8x160xf32>
    %cst_55 = arith.constant 1.000000e+00 : f32
    %140 = vector.broadcast %cst_55 : f32 to vector<8x160xf32>
    %141 = arith.addf %140, %139 : vector<8x160xf32>
    %142 = arith.divf %140, %141 : vector<8x160xf32>
    %143 = arith.mulf %142, %118 : vector<8x160xf32>
    %144 = arith.negf %128 : vector<8x160xf32>
    %145 = math.exp %144 : vector<8x160xf32>
    %cst_56 = arith.constant 1.000000e+00 : f32
    %146 = vector.broadcast %cst_56 : f32 to vector<8x160xf32>
    %147 = arith.addf %146, %145 : vector<8x160xf32>
    %148 = arith.divf %146, %147 : vector<8x160xf32>
    %149 = math.tanh %134 : vector<8x160xf32>
    %150 = arith.mulf %148, %149 : vector<8x160xf32>
    %151 = arith.addf %143, %150 : vector<8x160xf32>
    %152 = arith.negf %137 : vector<8x160xf32>
    %153 = math.exp %152 : vector<8x160xf32>
    %cst_57 = arith.constant 1.000000e+00 : f32
    %154 = vector.broadcast %cst_57 : f32 to vector<8x160xf32>
    %155 = arith.addf %154, %153 : vector<8x160xf32>
    %156 = arith.divf %154, %155 : vector<8x160xf32>
    %157 = math.tanh %151 : vector<8x160xf32>
    %158 = arith.mulf %156, %157 : vector<8x160xf32>
    %159 = vector.extract_strided_slice %5 {offsets = [32, 0], sizes = [8, 160], strides = [1, 1]} : vector<64x160xf32> to vector<8x160xf32>
    %cst_58 = arith.constant dense<0.000000e+00> : vector<8x160xf32>
    %160 = tpu.matmul %158, %21, %cst_58 {dimension_numbers = #tpu.dot_dimension_numbers<[1], [0], [0], [1], [0, 0, 1, 1], [], []>} : vector<8x160xf32>, vector<160x160xf32>, vector<8x160xf32> -> vector<8x160xf32>
    %161 = arith.addf %159, %160 : vector<8x160xf32>
    %162 = vector.extract_strided_slice %10 {offsets = [32, 0], sizes = [8, 160], strides = [1, 1]} : vector<64x160xf32> to vector<8x160xf32>
    %cst_59 = arith.constant dense<0.000000e+00> : vector<8x160xf32>
    %163 = tpu.matmul %158, %22, %cst_59 {dimension_numbers = #tpu.dot_dimension_numbers<[1], [0], [0], [1], [0, 0, 1, 1], [], []>} : vector<8x160xf32>, vector<160x160xf32>, vector<8x160xf32> -> vector<8x160xf32>
    %164 = arith.addf %162, %163 : vector<8x160xf32>
    %165 = vector.extract_strided_slice %15 {offsets = [32, 0], sizes = [8, 160], strides = [1, 1]} : vector<64x160xf32> to vector<8x160xf32>
    %cst_60 = arith.constant dense<0.000000e+00> : vector<8x160xf32>
    %166 = tpu.matmul %158, %23, %cst_60 {dimension_numbers = #tpu.dot_dimension_numbers<[1], [0], [0], [1], [0, 0, 1, 1], [], []>} : vector<8x160xf32>, vector<160x160xf32>, vector<8x160xf32> -> vector<8x160xf32>
    %167 = arith.addf %165, %166 : vector<8x160xf32>
    %168 = vector.extract_strided_slice %20 {offsets = [32, 0], sizes = [8, 160], strides = [1, 1]} : vector<64x160xf32> to vector<8x160xf32>
    %cst_61 = arith.constant dense<0.000000e+00> : vector<8x160xf32>
    %169 = tpu.matmul %158, %24, %cst_61 {dimension_numbers = #tpu.dot_dimension_numbers<[1], [0], [0], [1], [0, 0, 1, 1], [], []>} : vector<8x160xf32>, vector<160x160xf32>, vector<8x160xf32> -> vector<8x160xf32>
    %170 = arith.addf %168, %169 : vector<8x160xf32>
    %171 = arith.negf %164 : vector<8x160xf32>
    %172 = math.exp %171 : vector<8x160xf32>
    %cst_62 = arith.constant 1.000000e+00 : f32
    %173 = vector.broadcast %cst_62 : f32 to vector<8x160xf32>
    %174 = arith.addf %173, %172 : vector<8x160xf32>
    %175 = arith.divf %173, %174 : vector<8x160xf32>
    %176 = arith.mulf %175, %151 : vector<8x160xf32>
    %177 = arith.negf %161 : vector<8x160xf32>
    %178 = math.exp %177 : vector<8x160xf32>
    %cst_63 = arith.constant 1.000000e+00 : f32
    %179 = vector.broadcast %cst_63 : f32 to vector<8x160xf32>
    %180 = arith.addf %179, %178 : vector<8x160xf32>
    %181 = arith.divf %179, %180 : vector<8x160xf32>
    %182 = math.tanh %167 : vector<8x160xf32>
    %183 = arith.mulf %181, %182 : vector<8x160xf32>
    %184 = arith.addf %176, %183 : vector<8x160xf32>
    %185 = arith.negf %170 : vector<8x160xf32>
    %186 = math.exp %185 : vector<8x160xf32>
    %cst_64 = arith.constant 1.000000e+00 : f32
    %187 = vector.broadcast %cst_64 : f32 to vector<8x160xf32>
    %188 = arith.addf %187, %186 : vector<8x160xf32>
    %189 = arith.divf %187, %188 : vector<8x160xf32>
    %190 = math.tanh %184 : vector<8x160xf32>
    %191 = arith.mulf %189, %190 : vector<8x160xf32>
    %192 = vector.extract_strided_slice %5 {offsets = [40, 0], sizes = [8, 160], strides = [1, 1]} : vector<64x160xf32> to vector<8x160xf32>
    %cst_65 = arith.constant dense<0.000000e+00> : vector<8x160xf32>
    %193 = tpu.matmul %191, %21, %cst_65 {dimension_numbers = #tpu.dot_dimension_numbers<[1], [0], [0], [1], [0, 0, 1, 1], [], []>} : vector<8x160xf32>, vector<160x160xf32>, vector<8x160xf32> -> vector<8x160xf32>
    %194 = arith.addf %192, %193 : vector<8x160xf32>
    %195 = vector.extract_strided_slice %10 {offsets = [40, 0], sizes = [8, 160], strides = [1, 1]} : vector<64x160xf32> to vector<8x160xf32>
    %cst_66 = arith.constant dense<0.000000e+00> : vector<8x160xf32>
    %196 = tpu.matmul %191, %22, %cst_66 {dimension_numbers = #tpu.dot_dimension_numbers<[1], [0], [0], [1], [0, 0, 1, 1], [], []>} : vector<8x160xf32>, vector<160x160xf32>, vector<8x160xf32> -> vector<8x160xf32>
    %197 = arith.addf %195, %196 : vector<8x160xf32>
    %198 = vector.extract_strided_slice %15 {offsets = [40, 0], sizes = [8, 160], strides = [1, 1]} : vector<64x160xf32> to vector<8x160xf32>
    %cst_67 = arith.constant dense<0.000000e+00> : vector<8x160xf32>
    %199 = tpu.matmul %191, %23, %cst_67 {dimension_numbers = #tpu.dot_dimension_numbers<[1], [0], [0], [1], [0, 0, 1, 1], [], []>} : vector<8x160xf32>, vector<160x160xf32>, vector<8x160xf32> -> vector<8x160xf32>
    %200 = arith.addf %198, %199 : vector<8x160xf32>
    %201 = vector.extract_strided_slice %20 {offsets = [40, 0], sizes = [8, 160], strides = [1, 1]} : vector<64x160xf32> to vector<8x160xf32>
    %cst_68 = arith.constant dense<0.000000e+00> : vector<8x160xf32>
    %202 = tpu.matmul %191, %24, %cst_68 {dimension_numbers = #tpu.dot_dimension_numbers<[1], [0], [0], [1], [0, 0, 1, 1], [], []>} : vector<8x160xf32>, vector<160x160xf32>, vector<8x160xf32> -> vector<8x160xf32>
    %203 = arith.addf %201, %202 : vector<8x160xf32>
    %204 = arith.negf %197 : vector<8x160xf32>
    %205 = math.exp %204 : vector<8x160xf32>
    %cst_69 = arith.constant 1.000000e+00 : f32
    %206 = vector.broadcast %cst_69 : f32 to vector<8x160xf32>
    %207 = arith.addf %206, %205 : vector<8x160xf32>
    %208 = arith.divf %206, %207 : vector<8x160xf32>
    %209 = arith.mulf %208, %184 : vector<8x160xf32>
    %210 = arith.negf %194 : vector<8x160xf32>
    %211 = math.exp %210 : vector<8x160xf32>
    %cst_70 = arith.constant 1.000000e+00 : f32
    %212 = vector.broadcast %cst_70 : f32 to vector<8x160xf32>
    %213 = arith.addf %212, %211 : vector<8x160xf32>
    %214 = arith.divf %212, %213 : vector<8x160xf32>
    %215 = math.tanh %200 : vector<8x160xf32>
    %216 = arith.mulf %214, %215 : vector<8x160xf32>
    %217 = arith.addf %209, %216 : vector<8x160xf32>
    %218 = arith.negf %203 : vector<8x160xf32>
    %219 = math.exp %218 : vector<8x160xf32>
    %cst_71 = arith.constant 1.000000e+00 : f32
    %220 = vector.broadcast %cst_71 : f32 to vector<8x160xf32>
    %221 = arith.addf %220, %219 : vector<8x160xf32>
    %222 = arith.divf %220, %221 : vector<8x160xf32>
    %223 = math.tanh %217 : vector<8x160xf32>
    %224 = arith.mulf %222, %223 : vector<8x160xf32>
    %225 = vector.extract_strided_slice %5 {offsets = [48, 0], sizes = [8, 160], strides = [1, 1]} : vector<64x160xf32> to vector<8x160xf32>
    %cst_72 = arith.constant dense<0.000000e+00> : vector<8x160xf32>
    %226 = tpu.matmul %224, %21, %cst_72 {dimension_numbers = #tpu.dot_dimension_numbers<[1], [0], [0], [1], [0, 0, 1, 1], [], []>} : vector<8x160xf32>, vector<160x160xf32>, vector<8x160xf32> -> vector<8x160xf32>
    %227 = arith.addf %225, %226 : vector<8x160xf32>
    %228 = vector.extract_strided_slice %10 {offsets = [48, 0], sizes = [8, 160], strides = [1, 1]} : vector<64x160xf32> to vector<8x160xf32>
    %cst_73 = arith.constant dense<0.000000e+00> : vector<8x160xf32>
    %229 = tpu.matmul %224, %22, %cst_73 {dimension_numbers = #tpu.dot_dimension_numbers<[1], [0], [0], [1], [0, 0, 1, 1], [], []>} : vector<8x160xf32>, vector<160x160xf32>, vector<8x160xf32> -> vector<8x160xf32>
    %230 = arith.addf %228, %229 : vector<8x160xf32>
    %231 = vector.extract_strided_slice %15 {offsets = [48, 0], sizes = [8, 160], strides = [1, 1]} : vector<64x160xf32> to vector<8x160xf32>
    %cst_74 = arith.constant dense<0.000000e+00> : vector<8x160xf32>
    %232 = tpu.matmul %224, %23, %cst_74 {dimension_numbers = #tpu.dot_dimension_numbers<[1], [0], [0], [1], [0, 0, 1, 1], [], []>} : vector<8x160xf32>, vector<160x160xf32>, vector<8x160xf32> -> vector<8x160xf32>
    %233 = arith.addf %231, %232 : vector<8x160xf32>
    %234 = vector.extract_strided_slice %20 {offsets = [48, 0], sizes = [8, 160], strides = [1, 1]} : vector<64x160xf32> to vector<8x160xf32>
    %cst_75 = arith.constant dense<0.000000e+00> : vector<8x160xf32>
    %235 = tpu.matmul %224, %24, %cst_75 {dimension_numbers = #tpu.dot_dimension_numbers<[1], [0], [0], [1], [0, 0, 1, 1], [], []>} : vector<8x160xf32>, vector<160x160xf32>, vector<8x160xf32> -> vector<8x160xf32>
    %236 = arith.addf %234, %235 : vector<8x160xf32>
    %237 = arith.negf %230 : vector<8x160xf32>
    %238 = math.exp %237 : vector<8x160xf32>
    %cst_76 = arith.constant 1.000000e+00 : f32
    %239 = vector.broadcast %cst_76 : f32 to vector<8x160xf32>
    %240 = arith.addf %239, %238 : vector<8x160xf32>
    %241 = arith.divf %239, %240 : vector<8x160xf32>
    %242 = arith.mulf %241, %217 : vector<8x160xf32>
    %243 = arith.negf %227 : vector<8x160xf32>
    %244 = math.exp %243 : vector<8x160xf32>
    %cst_77 = arith.constant 1.000000e+00 : f32
    %245 = vector.broadcast %cst_77 : f32 to vector<8x160xf32>
    %246 = arith.addf %245, %244 : vector<8x160xf32>
    %247 = arith.divf %245, %246 : vector<8x160xf32>
    %248 = math.tanh %233 : vector<8x160xf32>
    %249 = arith.mulf %247, %248 : vector<8x160xf32>
    %250 = arith.addf %242, %249 : vector<8x160xf32>
    %251 = arith.negf %236 : vector<8x160xf32>
    %252 = math.exp %251 : vector<8x160xf32>
    %cst_78 = arith.constant 1.000000e+00 : f32
    %253 = vector.broadcast %cst_78 : f32 to vector<8x160xf32>
    %254 = arith.addf %253, %252 : vector<8x160xf32>
    %255 = arith.divf %253, %254 : vector<8x160xf32>
    %256 = math.tanh %250 : vector<8x160xf32>
    %257 = arith.mulf %255, %256 : vector<8x160xf32>
    %258 = vector.extract_strided_slice %5 {offsets = [56, 0], sizes = [8, 160], strides = [1, 1]} : vector<64x160xf32> to vector<8x160xf32>
    %cst_79 = arith.constant dense<0.000000e+00> : vector<8x160xf32>
    %259 = tpu.matmul %257, %21, %cst_79 {dimension_numbers = #tpu.dot_dimension_numbers<[1], [0], [0], [1], [0, 0, 1, 1], [], []>} : vector<8x160xf32>, vector<160x160xf32>, vector<8x160xf32> -> vector<8x160xf32>
    %260 = arith.addf %258, %259 : vector<8x160xf32>
    %261 = vector.extract_strided_slice %10 {offsets = [56, 0], sizes = [8, 160], strides = [1, 1]} : vector<64x160xf32> to vector<8x160xf32>
    %cst_80 = arith.constant dense<0.000000e+00> : vector<8x160xf32>
    %262 = tpu.matmul %257, %22, %cst_80 {dimension_numbers = #tpu.dot_dimension_numbers<[1], [0], [0], [1], [0, 0, 1, 1], [], []>} : vector<8x160xf32>, vector<160x160xf32>, vector<8x160xf32> -> vector<8x160xf32>
    %263 = arith.addf %261, %262 : vector<8x160xf32>
    %264 = vector.extract_strided_slice %15 {offsets = [56, 0], sizes = [8, 160], strides = [1, 1]} : vector<64x160xf32> to vector<8x160xf32>
    %cst_81 = arith.constant dense<0.000000e+00> : vector<8x160xf32>
    %265 = tpu.matmul %257, %23, %cst_81 {dimension_numbers = #tpu.dot_dimension_numbers<[1], [0], [0], [1], [0, 0, 1, 1], [], []>} : vector<8x160xf32>, vector<160x160xf32>, vector<8x160xf32> -> vector<8x160xf32>
    %266 = arith.addf %264, %265 : vector<8x160xf32>
    %267 = vector.extract_strided_slice %20 {offsets = [56, 0], sizes = [8, 160], strides = [1, 1]} : vector<64x160xf32> to vector<8x160xf32>
    %cst_82 = arith.constant dense<0.000000e+00> : vector<8x160xf32>
    %268 = tpu.matmul %257, %24, %cst_82 {dimension_numbers = #tpu.dot_dimension_numbers<[1], [0], [0], [1], [0, 0, 1, 1], [], []>} : vector<8x160xf32>, vector<160x160xf32>, vector<8x160xf32> -> vector<8x160xf32>
    %269 = arith.addf %267, %268 : vector<8x160xf32>
    %270 = arith.negf %263 : vector<8x160xf32>
    %271 = math.exp %270 : vector<8x160xf32>
    %cst_83 = arith.constant 1.000000e+00 : f32
    %272 = vector.broadcast %cst_83 : f32 to vector<8x160xf32>
    %273 = arith.addf %272, %271 : vector<8x160xf32>
    %274 = arith.divf %272, %273 : vector<8x160xf32>
    %275 = arith.mulf %274, %250 : vector<8x160xf32>
    %276 = arith.negf %260 : vector<8x160xf32>
    %277 = math.exp %276 : vector<8x160xf32>
    %cst_84 = arith.constant 1.000000e+00 : f32
    %278 = vector.broadcast %cst_84 : f32 to vector<8x160xf32>
    %279 = arith.addf %278, %277 : vector<8x160xf32>
    %280 = arith.divf %278, %279 : vector<8x160xf32>
    %281 = math.tanh %266 : vector<8x160xf32>
    %282 = arith.mulf %280, %281 : vector<8x160xf32>
    %283 = arith.addf %275, %282 : vector<8x160xf32>
    %284 = arith.negf %269 : vector<8x160xf32>
    %285 = math.exp %284 : vector<8x160xf32>
    %cst_85 = arith.constant 1.000000e+00 : f32
    %286 = vector.broadcast %cst_85 : f32 to vector<8x160xf32>
    %287 = arith.addf %286, %285 : vector<8x160xf32>
    %288 = arith.divf %286, %287 : vector<8x160xf32>
    %289 = math.tanh %283 : vector<8x160xf32>
    %290 = arith.mulf %288, %289 : vector<8x160xf32>
    %c0_86 = arith.constant 0 : index
    %c0_87 = arith.constant 0 : index
    %291 = vector.load %arg14[%c0_86, %c0_87] : memref<160x16xf32, #tpu.memory_space<vmem>>, vector<160x16xf32>
    %cst_88 = arith.constant dense<0.000000e+00> : vector<8x16xf32>
    %292 = tpu.matmul %290, %291, %cst_88 {dimension_numbers = #tpu.dot_dimension_numbers<[1], [0], [0], [1], [0, 0, 1, 1], [], []>} : vector<8x160xf32>, vector<160x16xf32>, vector<8x16xf32> -> vector<8x16xf32>
    %c0_89 = arith.constant 0 : index
    %c0_90 = arith.constant 0 : index
    %293 = vector.load %arg15[%c0_89, %c0_90] : memref<1x16xf32, #tpu.memory_space<vmem>>, vector<1x16xf32>
    %294 = vector.broadcast %293 : vector<1x16xf32> to vector<8x16xf32>
    %295 = arith.addf %292, %294 : vector<8x16xf32>
    %c0_91 = arith.constant 0 : index
    %c0_92 = arith.constant 0 : index
    %296 = vector.load %arg16[%c0_91, %c0_92] : memref<1x16xf32, #tpu.memory_space<vmem>>, vector<1x16xf32>
    %297 = vector.broadcast %296 : vector<1x16xf32> to vector<8x16xf32>
    %298 = arith.mulf %295, %297 : vector<8x16xf32>
    %c0_93 = arith.constant 0 : index
    %c0_94 = arith.constant 0 : index
    %299 = vector.load %arg17[%c0_93, %c0_94] : memref<1x16xf32, #tpu.memory_space<vmem>>, vector<1x16xf32>
    %300 = vector.broadcast %299 : vector<1x16xf32> to vector<8x16xf32>
    %301 = arith.addf %298, %300 : vector<8x16xf32>
    %cst_95 = arith.constant 0.000000e+00 : f32
    %302 = vector.broadcast %cst_95 : f32 to vector<8x16xf32>
    %303 = arith.maximumf %301, %302 : vector<8x16xf32>
    %c0_96 = arith.constant 0 : index
    %c0_97 = arith.constant 0 : index
    %304 = vector.load %arg1[%c0_96, %c0_97] : memref<8x4xf32, #tpu.memory_space<vmem>>, vector<8x4xf32>
    %c0_98 = arith.constant 0 : index
    %c0_99 = arith.constant 0 : index
    %305 = vector.load %arg18[%c0_98, %c0_99] : memref<2x8xf32, #tpu.memory_space<vmem>>, vector<2x8xf32>
    %306 = vector.extract_strided_slice %304 {offsets = [0, 0], sizes = [8, 1], strides = [1, 1]} : vector<8x4xf32> to vector<8x1xf32>
    %307 = vector.extract_strided_slice %305 {offsets = [0, 0], sizes = [1, 8], strides = [1, 1]} : vector<2x8xf32> to vector<1x8xf32>
    %308 = vector.broadcast %306 : vector<8x1xf32> to vector<8x8xf32>
    %309 = vector.broadcast %307 : vector<1x8xf32> to vector<8x8xf32>
    %310 = arith.mulf %308, %309 : vector<8x8xf32>
    %311 = vector.extract_strided_slice %304 {offsets = [0, 1], sizes = [8, 1], strides = [1, 1]} : vector<8x4xf32> to vector<8x1xf32>
    %312 = vector.extract_strided_slice %305 {offsets = [1, 0], sizes = [1, 8], strides = [1, 1]} : vector<2x8xf32> to vector<1x8xf32>
    %313 = vector.broadcast %311 : vector<8x1xf32> to vector<8x8xf32>
    %314 = vector.broadcast %312 : vector<1x8xf32> to vector<8x8xf32>
    %315 = arith.mulf %313, %314 : vector<8x8xf32>
    %316 = arith.addf %310, %315 : vector<8x8xf32>
    %c0_100 = arith.constant 0 : index
    %c0_101 = arith.constant 0 : index
    %317 = vector.load %arg19[%c0_100, %c0_101] : memref<1x8xf32, #tpu.memory_space<vmem>>, vector<1x8xf32>
    %318 = vector.broadcast %317 : vector<1x8xf32> to vector<8x8xf32>
    %319 = arith.addf %316, %318 : vector<8x8xf32>
    %c0_102 = arith.constant 0 : index
    %c0_103 = arith.constant 0 : index
    %320 = vector.load %arg20[%c0_102, %c0_103] : memref<1x8xf32, #tpu.memory_space<vmem>>, vector<1x8xf32>
    %321 = vector.broadcast %320 : vector<1x8xf32> to vector<8x8xf32>
    %322 = arith.mulf %319, %321 : vector<8x8xf32>
    %c0_104 = arith.constant 0 : index
    %c0_105 = arith.constant 0 : index
    %323 = vector.load %arg21[%c0_104, %c0_105] : memref<1x8xf32, #tpu.memory_space<vmem>>, vector<1x8xf32>
    %324 = vector.broadcast %323 : vector<1x8xf32> to vector<8x8xf32>
    %325 = arith.addf %322, %324 : vector<8x8xf32>
    %cst_106 = arith.constant 0.000000e+00 : f32
    %326 = vector.broadcast %cst_106 : f32 to vector<8x8xf32>
    %327 = arith.maximumf %325, %326 : vector<8x8xf32>
    %c0_107 = arith.constant 0 : index
    %c0_108 = arith.constant 0 : index
    %328 = vector.load %arg22[%c0_107, %c0_108] : memref<8x16xf32, #tpu.memory_space<vmem>>, vector<8x16xf32>
    %cst_109 = arith.constant dense<0.000000e+00> : vector<8x16xf32>
    %329 = tpu.matmul %327, %328, %cst_109 {dimension_numbers = #tpu.dot_dimension_numbers<[1], [0], [0], [1], [0, 0, 1, 1], [], []>} : vector<8x8xf32>, vector<8x16xf32>, vector<8x16xf32> -> vector<8x16xf32>
    %c0_110 = arith.constant 0 : index
    %c0_111 = arith.constant 0 : index
    %330 = vector.load %arg23[%c0_110, %c0_111] : memref<1x16xf32, #tpu.memory_space<vmem>>, vector<1x16xf32>
    %331 = vector.broadcast %330 : vector<1x16xf32> to vector<8x16xf32>
    %332 = arith.addf %329, %331 : vector<8x16xf32>
    %c0_112 = arith.constant 0 : index
    %c0_113 = arith.constant 0 : index
    %333 = vector.load %arg24[%c0_112, %c0_113] : memref<1x16xf32, #tpu.memory_space<vmem>>, vector<1x16xf32>
    %334 = vector.broadcast %333 : vector<1x16xf32> to vector<8x16xf32>
    %335 = arith.mulf %332, %334 : vector<8x16xf32>
    %c0_114 = arith.constant 0 : index
    %c0_115 = arith.constant 0 : index
    %336 = vector.load %arg25[%c0_114, %c0_115] : memref<1x16xf32, #tpu.memory_space<vmem>>, vector<1x16xf32>
    %337 = vector.broadcast %336 : vector<1x16xf32> to vector<8x16xf32>
    %338 = arith.addf %335, %337 : vector<8x16xf32>
    %cst_116 = arith.constant 0.000000e+00 : f32
    %339 = vector.broadcast %cst_116 : f32 to vector<8x16xf32>
    %340 = arith.maximumf %338, %339 : vector<8x16xf32>
    %341 = arith.addf %340, %303 : vector<8x16xf32>
    %c0_117 = arith.constant 0 : index
    %c0_118 = arith.constant 0 : index
    %342 = vector.load %arg26[%c0_117, %c0_118] : memref<16x64xf32, #tpu.memory_space<vmem>>, vector<16x64xf32>
    %cst_119 = arith.constant dense<0.000000e+00> : vector<8x64xf32>
    %343 = tpu.matmul %341, %342, %cst_119 {dimension_numbers = #tpu.dot_dimension_numbers<[1], [0], [0], [1], [0, 0, 1, 1], [], []>} : vector<8x16xf32>, vector<16x64xf32>, vector<8x64xf32> -> vector<8x64xf32>
    %c0_120 = arith.constant 0 : index
    %c0_121 = arith.constant 0 : index
    %344 = vector.load %arg27[%c0_120, %c0_121] : memref<1x64xf32, #tpu.memory_space<vmem>>, vector<1x64xf32>
    %345 = vector.broadcast %344 : vector<1x64xf32> to vector<8x64xf32>
    %346 = arith.addf %343, %345 : vector<8x64xf32>
    %cst_122 = arith.constant 0.000000e+00 : f32
    %347 = vector.broadcast %cst_122 : f32 to vector<8x64xf32>
    %348 = arith.maximumf %346, %347 : vector<8x64xf32>
    %c0_123 = arith.constant 0 : index
    %c0_124 = arith.constant 0 : index
    %349 = vector.load %arg28[%c0_123, %c0_124] : memref<64x320xf32, #tpu.memory_space<vmem>>, vector<64x320xf32>
    %cst_125 = arith.constant dense<0.000000e+00> : vector<8x320xf32>
    %350 = tpu.matmul %348, %349, %cst_125 {dimension_numbers = #tpu.dot_dimension_numbers<[1], [0], [0], [1], [0, 0, 1, 1], [], []>} : vector<8x64xf32>, vector<64x320xf32>, vector<8x320xf32> -> vector<8x320xf32>
    %c0_126 = arith.constant 0 : index
    %c0_127 = arith.constant 0 : index
    %351 = vector.load %arg29[%c0_126, %c0_127] : memref<1x320xf32, #tpu.memory_space<vmem>>, vector<1x320xf32>
    %352 = vector.broadcast %351 : vector<1x320xf32> to vector<8x320xf32>
    %353 = arith.addf %350, %352 : vector<8x320xf32>
    %c0_128 = arith.constant 0 : index
    %c0_129 = arith.constant 0 : index
    %354 = vector.load %arg30[%c0_128, %c0_129] : memref<1x320xf32, #tpu.memory_space<vmem>>, vector<1x320xf32>
    %355 = vector.broadcast %354 : vector<1x320xf32> to vector<8x320xf32>
    %356 = arith.mulf %353, %355 : vector<8x320xf32>
    %c0_130 = arith.constant 0 : index
    %c0_131 = arith.constant 0 : index
    %357 = vector.load %arg31[%c0_130, %c0_131] : memref<1x320xf32, #tpu.memory_space<vmem>>, vector<1x320xf32>
    %358 = vector.broadcast %357 : vector<1x320xf32> to vector<8x320xf32>
    %359 = arith.addf %356, %358 : vector<8x320xf32>
    %cst_132 = arith.constant 0.000000e+00 : f32
    %360 = vector.broadcast %cst_132 : f32 to vector<8x320xf32>
    %361 = arith.maximumf %359, %360 : vector<8x320xf32>
    %c0_133 = arith.constant 0 : index
    %c0_134 = arith.constant 0 : index
    %362 = vector.load %arg32[%c0_133, %c0_134] : memref<320x8xf32, #tpu.memory_space<vmem>>, vector<320x8xf32>
    %cst_135 = arith.constant dense<0.000000e+00> : vector<8x8xf32>
    %363 = tpu.matmul %361, %362, %cst_135 {dimension_numbers = #tpu.dot_dimension_numbers<[1], [0], [0], [1], [0, 0, 1, 1], [], []>} : vector<8x320xf32>, vector<320x8xf32>, vector<8x8xf32> -> vector<8x8xf32>
    %c0_136 = arith.constant 0 : index
    %c0_137 = arith.constant 0 : index
    %364 = vector.load %arg33[%c0_136, %c0_137] : memref<1x8xf32, #tpu.memory_space<vmem>>, vector<1x8xf32>
    %365 = vector.broadcast %364 : vector<1x8xf32> to vector<8x8xf32>
    %366 = arith.addf %363, %365 : vector<8x8xf32>
    %c0_138 = arith.constant 0 : index
    %c0_139 = arith.constant 0 : index
    %367 = vector.load %arg34[%c0_138, %c0_139] : memref<1x8xf32, #tpu.memory_space<vmem>>, vector<1x8xf32>
    %368 = vector.broadcast %367 : vector<1x8xf32> to vector<8x8xf32>
    %369 = arith.mulf %366, %368 : vector<8x8xf32>
    %c0_140 = arith.constant 0 : index
    %c0_141 = arith.constant 0 : index
    %370 = vector.load %arg35[%c0_140, %c0_141] : memref<1x8xf32, #tpu.memory_space<vmem>>, vector<1x8xf32>
    %371 = vector.broadcast %370 : vector<1x8xf32> to vector<8x8xf32>
    %372 = arith.addf %369, %371 : vector<8x8xf32>
    %cst_142 = arith.constant 0.000000e+00 : f32
    %373 = vector.broadcast %cst_142 : f32 to vector<8x8xf32>
    %374 = arith.maximumf %372, %373 : vector<8x8xf32>
    %cst_143 = arith.constant dense<0xFF800000> : vector<8xf32>
    %375 = vector.multi_reduction <maximumf>, %374, %cst_143 [1] : vector<8x8xf32> to vector<8xf32>
    %376 = vector.shape_cast %375 : vector<8xf32> to vector<8x1xf32>
    %377 = vector.broadcast %376 : vector<8x1xf32> to vector<8x8xf32>
    %378 = arith.subf %374, %377 : vector<8x8xf32>
    %379 = math.exp %378 : vector<8x8xf32>
    %cst_144 = arith.constant dense<0.000000e+00> : vector<8xf32>
    %380 = vector.multi_reduction <add>, %379, %cst_144 [1] : vector<8x8xf32> to vector<8xf32>
    %381 = vector.shape_cast %380 : vector<8xf32> to vector<8x1xf32>
    %382 = vector.broadcast %381 : vector<8x1xf32> to vector<8x8xf32>
    %383 = arith.divf %379, %382 : vector<8x8xf32>
    %c0_145 = arith.constant 0 : index
    %c0_146 = arith.constant 0 : index
    %384 = vector.load %arg36[%c0_145, %c0_146] : memref<4x32xf32, #tpu.memory_space<vmem>>, vector<4x32xf32>
    %cst_147 = arith.constant dense<0.000000e+00> : vector<8x32xf32>
    %385 = tpu.matmul %304, %384, %cst_147 {dimension_numbers = #tpu.dot_dimension_numbers<[1], [0], [0], [1], [0, 0, 1, 1], [], []>} : vector<8x4xf32>, vector<4x32xf32>, vector<8x32xf32> -> vector<8x32xf32>
    %c0_148 = arith.constant 0 : index
    %c0_149 = arith.constant 0 : index
    %386 = vector.load %arg37[%c0_148, %c0_149] : memref<1x32xf32, #tpu.memory_space<vmem>>, vector<1x32xf32>
    %387 = vector.broadcast %386 : vector<1x32xf32> to vector<8x32xf32>
    %388 = arith.addf %385, %387 : vector<8x32xf32>
    %cst_150 = arith.constant 0.000000e+00 : f32
    %389 = vector.broadcast %cst_150 : f32 to vector<8x32xf32>
    %390 = arith.maximumf %388, %389 : vector<8x32xf32>
    %c0_151 = arith.constant 0 : index
    %c0_152 = arith.constant 0 : index
    %391 = vector.load %arg38[%c0_151, %c0_152] : memref<32x8xf32, #tpu.memory_space<vmem>>, vector<32x8xf32>
    %cst_153 = arith.constant dense<0.000000e+00> : vector<8x8xf32>
    %392 = tpu.matmul %390, %391, %cst_153 {dimension_numbers = #tpu.dot_dimension_numbers<[1], [0], [0], [1], [0, 0, 1, 1], [], []>} : vector<8x32xf32>, vector<32x8xf32>, vector<8x8xf32> -> vector<8x8xf32>
    %c0_154 = arith.constant 0 : index
    %c0_155 = arith.constant 0 : index
    %393 = vector.load %arg39[%c0_154, %c0_155] : memref<1x8xf32, #tpu.memory_space<vmem>>, vector<1x8xf32>
    %394 = vector.broadcast %393 : vector<1x8xf32> to vector<8x8xf32>
    %395 = arith.addf %392, %394 : vector<8x8xf32>
    %cst_156 = arith.constant dense<0xFF800000> : vector<8xf32>
    %396 = vector.multi_reduction <maximumf>, %395, %cst_156 [1] : vector<8x8xf32> to vector<8xf32>
    %397 = vector.shape_cast %396 : vector<8xf32> to vector<8x1xf32>
    %398 = vector.broadcast %397 : vector<8x1xf32> to vector<8x8xf32>
    %399 = arith.subf %395, %398 : vector<8x8xf32>
    %400 = math.exp %399 : vector<8x8xf32>
    %cst_157 = arith.constant dense<0.000000e+00> : vector<8xf32>
    %401 = vector.multi_reduction <add>, %400, %cst_157 [1] : vector<8x8xf32> to vector<8xf32>
    %402 = vector.shape_cast %401 : vector<8xf32> to vector<8x1xf32>
    %403 = vector.broadcast %402 : vector<8x1xf32> to vector<8x8xf32>
    %404 = arith.divf %400, %403 : vector<8x8xf32>
    %c0_158 = arith.constant 0 : index
    %c0_159 = arith.constant 0 : index
    %405 = vector.load %arg40[%c0_158, %c0_159] : memref<1x8xf32, #tpu.memory_space<vmem>>, vector<1x8xf32>
    %406 = arith.negf %405 : vector<1x8xf32>
    %407 = math.exp %406 : vector<1x8xf32>
    %cst_160 = arith.constant 1.000000e+00 : f32
    %408 = vector.broadcast %cst_160 : f32 to vector<1x8xf32>
    %409 = arith.addf %408, %407 : vector<1x8xf32>
    %410 = arith.divf %408, %409 : vector<1x8xf32>
    %411 = vector.broadcast %410 : vector<1x8xf32> to vector<8x8xf32>
    %412 = arith.mulf %404, %411 : vector<8x8xf32>
    %cst_161 = arith.constant 1.000000e+00 : f32
    %413 = vector.broadcast %cst_161 : f32 to vector<1x8xf32>
    %414 = arith.subf %413, %410 : vector<1x8xf32>
    %415 = vector.broadcast %414 : vector<1x8xf32> to vector<8x8xf32>
    %416 = arith.mulf %383, %415 : vector<8x8xf32>
    %417 = arith.addf %412, %416 : vector<8x8xf32>
    %418 = math.log %417 : vector<8x8xf32>
    %c0_162 = arith.constant 0 : index
    %c0_163 = arith.constant 0 : index
    %419 = vector.load %arg41[%c0_162, %c0_163] : memref<8x8xf32, #tpu.memory_space<vmem>>, vector<8x8xf32>
    tpu.vector_store %arg41[%c0_162, %c0_163], %418 {strides = array<i32>} : memref<8x8xf32, #tpu.memory_space<vmem>>, vector<8x8xf32>,
    return
  }
}

</mosaic_0001>

<bundles_post_ra>
// kernel: tpu_custom_call.1
= control target key start
LH: loop header
LB: loop body
LE: loop exit
PB: predicated region body
PF: predicated region fallthrough
CT: control target
= control target key end

     0   :  { %s6500_s6 = smov 1   ;;  %s6501_s10 = smov 2   ;;  %s9995_s0 = inlined_call_operand.smem [shape: u32[42], index: -1, kind: input, shape index: {}] }
   0x1   :  { %s6586_s5 = sld [smem:[%s9995_s0]]   ;;  %s6502_s14 = smov 3  }
   0x2   :  { %s6591_s9 = sld [smem:[%s9995_s0 + %s6500_s6]]   ;;  %s6503_s18 = smov 4  }
   0x3   :  { %s6596_s13 = sld [smem:[%s9995_s0 + %s6501_s10]]   ;;  %s6504_s22 = smov 5  }
   0x4   :  { %s6601_s17 = sld [smem:[%s9995_s0 + %s6502_s14]]   ;;  %s6505_s26 = smov 6  }
   0x5   :  { %s6606_s21 = sld [smem:[%s9995_s0 + %s6503_s18]]   ;;  %s6506_s30 = smov 7  }
   0x6   :  { %s6611_s25 = sld [smem:[%s9995_s0 + %s6504_s22]]   ;;  %s6507_s4 = smov 8  }
   0x7   :  { %10541 = sst [smem:[#allocation59_spill]] %s6586_s5  ;;  %s6508_s10 = smov 9  }
   0x8   :  { %10542 = sst [smem:[#allocation60_spill]] %s6591_s9  ;;  %s6509_s15 = smov 10  }
   0x9   :  { %s6616_s29 = sld [smem:[%s9995_s0 + %s6505_s26]]   ;;  %s6510_s20 = smov 11  }
   0xa   :  { %s6621_s3 = sld [smem:[%s9995_s0 + %s6506_s30]]   ;;  %s6511_s26 = smov 12  }
   0xb   :  { %s6626_s8 = sld [smem:[%s9995_s0 + %s6507_s4]]   ;;  %s6512_s1 = smov 13  }
   0xc   :  { %s6631_s14 = sld [smem:[%s9995_s0 + %s6508_s10]]   ;;  %s6513_s7 = smov 14  }
   0xd   :  { %s6636_s19 = sld [smem:[%s9995_s0 + %s6509_s15]]   ;;  %s6514_s15 = smov 15  }
   0xe   :  { %s6641_s24 = sld [smem:[%s9995_s0 + %s6510_s20]]   ;;  %s6515_s22 = smov 16  }
   0xf   :  { %10543 = sst [smem:[#allocation61_spill]] %s6616_s29  ;;  %s6516_s28 = smov 17  }
  0x10   :  { %10544 = sst [smem:[#allocation62_spill]] %s6621_s3 }
  0x11   :  { %10545 = sst [smem:[#allocation63_spill]] %s6626_s8 }
  0x12   :  { %s6646_s30 = sld [smem:[%s9995_s0 + %s6511_s26]]  }
  0x13   :  { %10546 = sst [smem:[#allocation64_spill]] %s6636_s19 }
  0x14   :  { %s6651_s6 = sld [smem:[%s9995_s0 + %s6512_s1]]  }
  0x15   :  { %s6656_s12 = sld [smem:[%s9995_s0 + %s6513_s7]]   ;;  %s6517_s7 = smov 18  }
  0x16   :  { %s6661_s20 = sld [smem:[%s9995_s0 + %s6514_s15]]   ;;  %s6518_s15 = smov 19  }
  0x17   :  { %s6666_s27 = sld [smem:[%s9995_s0 + %s6515_s22]]   ;;  %s6519_s22 = smov 20  }
  0x18   :  { %10547 = sst [smem:[#allocation65_spill]] %s6646_s30 }
  0x19   :  { %s6671_s4 = sld [smem:[%s9995_s0 + %s6516_s28]]   ;;  %s6520_s28 = smov 21  }
  0x1a   :  { %s6681_s9 = sld [smem:[%s9995_s0 + %s6518_s15]]   ;;  %s6522_s15 = smov 23  }
  0x1b   :  { %10548 = sst [smem:[#allocation66_spill]] %s6656_s12 }
  0x1c   :  { %10549 = sst [smem:[#allocation67_spill]] %s6661_s20 }
  0x1d   :  { %s6676_s12 = sld [smem:[%s9995_s0 + %s6517_s7]]   ;;  %s6521_s7 = smov 22  }
  0x1e   :  { %s6686_s3 = sld [smem:[%s9995_s0 + %s6519_s22]]   ;;  %s6523_s22 = smov 24  }
  0x1f   :  { %10550 = sst [smem:[#allocation68_spill]] %s6671_s4 }
  0x20   :  { %10551 = sst [smem:[#allocation69_spill]] %s6681_s9 }
  0x21   :  { %s6691_s29 = sld [smem:[%s9995_s0 + %s6520_s28]]   ;;  %s6524_s28 = smov 25  }
  0x22   :  { %s6696_s5 = sld [smem:[%s9995_s0 + %s6521_s7]]   ;;  %s6525_s7 = smov 26  }
  0x23   :  { %s6701_s9 = sld [smem:[%s9995_s0 + %s6522_s15]]   ;;  %s6526_s15 = smov 27  }
  0x24   :  { %s6706_s4 = sld [smem:[%s9995_s0 + %s6523_s22]]   ;;  %s6527_s22 = smov 28  }
  0x25   :  { %s6716_s20 = sld [smem:[%s9995_s0 + %s6525_s7]]   ;;  %s6529_s7 = smov 30  }
  0x26   :  { %s6726_s30 = sld [smem:[%s9995_s0 + %s6527_s22]]   ;;  %s6531_s22 = smov 32  }
  0x27   :  { %10552 = sst [smem:[#allocation70_spill]] %s6691_s29 }
  0x28   :  { %s6711_s29 = sld [smem:[%s9995_s0 + %s6524_s28]]   ;;  %s6528_s28 = smov 29  }
  0x29   :  { %10553 = sst [smem:[#allocation71_spill]] %s6701_s9 }
  0x2a   :  { %s6721_s9 = sld [smem:[%s9995_s0 + %s6526_s15]]   ;;  %s6530_s15 = smov 31  }
  0x2b   :  { %s6736_s19 = sld [smem:[%s9995_s0 + %s6529_s7]]   ;;  %s6533_s7 = smov 34  }
  0x2c   :  { %s6746_s8 = sld [smem:[%s9995_s0 + %s6531_s22]]   ;;  %s6535_s22 = smov 36  }
  0x2e   :  { %10554 = sst [smem:[#allocation72_spill]] %s6711_s29 }
  0x2f   :  { %s6731_s29 = sld [smem:[%s9995_s0 + %s6528_s28]]   ;;  %s6532_s28 = smov 33  }
  0x30   :  { %10555 = sst [smem:[#allocation73_spill]] %s6721_s9 }
  0x31   :  { %10557 = sst [smem:[#allocation75_spill]] %s6736_s19 }
  0x32   :  { %s6741_s9 = sld [smem:[%s9995_s0 + %s6530_s15]]   ;;  %s6534_s15 = smov 35  }
  0x33   :  { %10559 = sst [smem:[#allocation77_spill]] %s6746_s8 }
  0x34   :  { %s6756_s19 = sld [smem:[%s9995_s0 + %s6533_s7]]   ;;  %s6537_s7 = smov 38  }
  0x35   :  { %10556 = sst [smem:[#allocation74_spill]] %s6731_s29 }
  0x36   :  { %s6751_s29 = sld [smem:[%s9995_s0 + %s6532_s28]]   ;;  %s6536_s28 = smov 37  }
  0x37   :  { %s6766_s8 = sld [smem:[%s9995_s0 + %s6535_s22]]   ;;  %s6539_s22 = smov 40  }
  0x38   :  { %10558 = sst [smem:[#allocation76_spill]] %s6741_s9 }
  0x39   :  { %s6761_s9 = sld [smem:[%s9995_s0 + %s6534_s15]]   ;;  %s6538_s15 = smov 39  }
  0x3a   :  { %10561 = sst [smem:[#allocation79_spill]] %s6756_s19 }
  0x3b   :  { %s6776_s19 = sld [smem:[%s9995_s0 + %s6537_s7]]  }
  0x3c   :  { %10560 = sst [smem:[#allocation78_spill]] %s6751_s29 }
  0x3d   :  { %10563 = sst [smem:[#allocation81_spill]] %s6766_s8 }
  0x3e   :  { %s6771_s29 = sld [smem:[%s9995_s0 + %s6536_s28]]   ;;  %s6540_s28 = smov 41  }
  0x3f   :  { %10562 = sst [smem:[#allocation80_spill]] %s6761_s9 }
  0x40   :  { %s6781_s9 = sld [smem:[%s9995_s0 + %s6538_s15]]  }
  0x41   :  { %s6786_s8 = sld [smem:[%s9995_s0 + %s6539_s22]]  }
  0x44   :  { %10564 = sst [smem:[#allocation82_spill]] %s6771_s29 }
  0x45   :  { %s6791_s29 = sld [smem:[%s9995_s0 + %s6540_s28]]  }
  0x46   :  { %88 = vsyncpa [#allocation3], 0 }
  0x47   :  { %89 = vsyncpa [#allocation6], 0 }
  0x48   :  { %90 = vsyncpa [#allocation9], 0 }
  0x49   :  { %91 = vsyncpa [#allocation12], 0 }
  0x4a   :  { %92 = vsyncpa [#allocation15], 0 }
  0x4b   :  { %93 = vsyncpa [#allocation18], 0 }
  0x4c   :  { %94 = vsyncpa [#allocation21], 0 }
  0x4d   :  { %95 = vsyncpa [#allocation24], 0 }
  0x4e   :  { %96 = vsyncpa [#allocation27], 0 }
  0x4f   :  { %97 = vsyncpa [#allocation30], 0 }
  0x50   :  { %98 = vsyncpa [#allocation33], 0 }
  0x51   :  { %99 = vsyncpa [#allocation36], 0 }
  0x52   :  { %100 = vsyncpa [#allocation39], 0 }
  0x53   :  { %101 = vsyncpa [#allocation42], 0 }
  0x54   :  { %102 = vsyncpa [#allocation4], 0  ;;  %s6541_s7 = smov [#allocation5]   ;;  %s6542_s11 = smov [#allocation8]  }
  0x55   :  { %s123_s10 = sshll.u32 %s6541_s7, 4  ;;  %s143_s0 = sshll.u32 %s6542_s11, 4  ;;  %s124_s10 = int_to_ptr.vmem [resolvable:$true] %s123_s10  ;;  %s144_s0 = int_to_ptr.vmem [resolvable:$true] %s143_s0 }
  0x56   :  { %s5938_s15 = scalar_lea.vmem %s124_s10, 256  ;;  %p5943_p1 = scmp.lt.s32.totalorder %s124_s10, %s124_s10 }
  0x57   :  { %p5939_p0 = scmp.ne.s32.totalorder %s124_s10, %s5938_s15  ;;  %p5944_p2 = scmp.lt.s32.totalorder %s5938_s15, %s5938_s15 }
  0x59   :  { %p5945_p3 = por %p5944_p2, %p5943_p1 }
  0x5b   :  { %p5946_p4 = pnand %p5945_p3, %p5939_p0 }
  0x5d   :  { %5949 = shalt.err (!%p5946_p4)
}
  0x5e   :  { %126 = dma.hbm_to_vmem [thread:$0]  %s6601_s17, 256, %s124_s10, [#allocation6]  }
  0x5f   :  { %s5958_s16 = scalar_lea.vmem %s144_s0, 256  ;;  %p5963_p6 = scmp.lt.s32.totalorder %s144_s0, %s144_s0 }
  0x60   :  { %p5959_p5 = scmp.ne.s32.totalorder %s144_s0, %s5958_s16  ;;  %p5964_p7 = scmp.lt.s32.totalorder %s5958_s16, %s5958_s16 }
  0x62   :  { %p5965_p8 = por %p5964_p7, %p5963_p6 }
  0x64   :  { %p5966_p9 = pnand %p5965_p8, %p5959_p5 }
  0x66   :  { %5969 = shalt.err (!%p5966_p9)
}
  0x67   :  { %146 = dma.hbm_to_vmem [thread:$0]  %s6611_s25, 256, %s144_s0, [#allocation9]  }
  0x68   :  { %s6543_s18 = smov [#allocation11]   ;;  %s6544_s23 = smov [#allocation14]  }
  0x69   :  { %s168_s22 = sshll.u32 %s6543_s18, 4  ;;  %s191_s26 = sshll.u32 %s6544_s23, 4  ;;  %s169_s22 = int_to_ptr.vmem [resolvable:$true] %s168_s22  ;;  %s192_s26 = int_to_ptr.vmem [resolvable:$true] %s191_s26 }
  0x6a   :  { %s5978_s28 = scalar_lea.vmem %s169_s22, 5120  ;;  %p5983_p11 = scmp.lt.s32.totalorder %s169_s22, %s169_s22 }
  0x6b   :  { %p5979_p10 = scmp.ne.s32.totalorder %s169_s22, %s5978_s28  ;;  %p5984_p12 = scmp.lt.s32.totalorder %s5978_s28, %s5978_s28 }
  0x6d   :  { %p5985_p13 = por %p5984_p12, %p5983_p11 }
  0x6f   :  { %p5986_p0 = pnand %p5985_p13, %p5979_p10 }
  0x71   :  { %5989 = shalt.err (!%p5986_p0)
}
  0x72   :  { %s6545_s17 = smov 256   ;;  %s6546_s1 = smov 16  }
  0x73   :  { %174 = dma.hbm_to_vmem [thread:$0]  %s6631_s14, 5120, %s169_s22, [#allocation12], %s6545_s17, %s6545_s17, %s6546_s1  }
  0x74   :  { %s5998_s25 = scalar_lea.vmem %s192_s26, 32  ;;  %p6003_p2 = scmp.lt.s32.totalorder %s192_s26, %s192_s26 }
  0x75   :  { %p5999_p1 = scmp.ne.s32.totalorder %s192_s26, %s5998_s25  ;;  %p6004_p3 = scmp.lt.s32.totalorder %s5998_s25, %s5998_s25 }
  0x77   :  { %p6005_p4 = por %p6004_p3, %p6003_p2 }
  0x79   :  { %p6006_p5 = pnand %p6005_p4, %p5999_p1 }
  0x7b   :  { %6009 = shalt.err (!%p6006_p5)
}
  0x7c   :  { %194 = dma.hbm_to_vmem [thread:$0]  %s6641_s24, 32, %s192_s26, [#allocation15]  }
  0x7d   :  { %s6547_s2 = smov [#allocation17]   ;;  %s6548_s10 = smov [#allocation20]  }
  0x7e   :  { %s211_s7 = sshll.u32 %s6547_s2, 4  ;;  %s233_s11 = sshll.u32 %s6548_s10, 4  ;;  %s212_s7 = int_to_ptr.vmem [resolvable:$true] %s211_s7  ;;  %s234_s11 = int_to_ptr.vmem [resolvable:$true] %s233_s11 }
  0x7f   :  { %s6018_s0 = scalar_lea.vmem %s212_s7, 32  ;;  %p6023_p7 = scmp.lt.s32.totalorder %s212_s7, %s212_s7 }
  0x80   :  { %p6019_p6 = scmp.ne.s32.totalorder %s212_s7, %s6018_s0  ;;  %p6024_p8 = scmp.lt.s32.totalorder %s6018_s0, %s6018_s0 }
  0x82   :  { %p6025_p9 = por %p6024_p8, %p6023_p7 }
  0x84   :  { %p6026_p10 = pnand %p6025_p9, %p6019_p6 }
  0x86   :  { %6029 = shalt.err (!%p6026_p10)
}
  0x87   :  { %214 = dma.hbm_to_vmem [thread:$0]  %s6651_s6, 32, %s212_s7, [#allocation18]  }
  0x88   :  { %s6038_s14 = scalar_lea.vmem %s234_s11, 16  ;;  %s6042_s15 = scalar_lea.vmem %s234_s11, 32 }
  0x89   :  { %p6039_p11 = scmp.ne.s32.totalorder %s234_s11, %s6038_s14  ;;  %p6043_p12 = scmp.lt.s32.totalorder %s234_s11, %s234_s11 }
  0x8a   :  { %p6044_p13 = scmp.lt.s32.totalorder %s6042_s15, %s6038_s14 }
  0x8c   :  { %p6045_p0 = por %p6044_p13, %p6043_p12 }
  0x8e   :  { %p6046_p1 = pnand %p6045_p0, %p6039_p11 }
  0x90   :  { %6049 = shalt.err (!%p6046_p1)
}
  0x91   :  { %236 = dma.hbm_to_vmem [thread:$0]  %s6666_s27, 16, %s234_s11, [#allocation21]  }
  0x92   :  { %s6549_s24 = smov [#allocation23]   ;;  %s6550_s18 = smov [#allocation26]  }
  0x93   :  { %s253_s16 = sshll.u32 %s6549_s24, 4  ;;  %s273_s22 = sshll.u32 %s6550_s18, 4  ;;  %s254_s16 = int_to_ptr.vmem [resolvable:$true] %s253_s16  ;;  %s274_s22 = int_to_ptr.vmem [resolvable:$true] %s273_s22 }
  0x94   :  { %s6058_s23 = scalar_lea.vmem %s254_s16, 32  ;;  %p6063_p3 = scmp.lt.s32.totalorder %s254_s16, %s254_s16 }
  0x95   :  { %p6059_p2 = scmp.ne.s32.totalorder %s254_s16, %s6058_s23  ;;  %p6064_p4 = scmp.lt.s32.totalorder %s6058_s23, %s6058_s23 }
  0x97   :  { %p6065_p5 = por %p6064_p4, %p6063_p3 }
  0x99   :  { %p6066_p6 = pnand %p6065_p5, %p6059_p2 }
  0x9b   :  { %6069 = shalt.err (!%p6066_p6)
}
  0x9c   :  { %256 = dma.hbm_to_vmem [thread:$0]  %s6676_s12, 32, %s254_s16, [#allocation24]  }
  0x9d   :  { %s6078_s6 = scalar_lea.vmem %s274_s22, 16  ;;  %s6082_s26 = scalar_lea.vmem %s274_s22, 32 }
  0x9e   :  { %p6079_p7 = scmp.ne.s32.totalorder %s274_s22, %s6078_s6  ;;  %p6083_p8 = scmp.lt.s32.totalorder %s274_s22, %s274_s22 }
  0x9f   :  { %p6084_p9 = scmp.lt.s32.totalorder %s6082_s26, %s6078_s6 }
  0xa1   :  { %p6085_p10 = por %p6084_p9, %p6083_p8 }
  0xa3   :  { %p6086_p11 = pnand %p6085_p10, %p6079_p7 }
  0xa5   :  { %6089 = shalt.err (!%p6086_p11)
}
  0xa6   :  { %276 = dma.hbm_to_vmem [thread:$0]  %s6686_s3, 16, %s274_s22, [#allocation27]  }
  0xa7   :  { %s6551_s27 = smov [#allocation29]   ;;  %s6552_s25 = smov [#allocation32]  }
  0xa8   :  { %s293_s28 = sshll.u32 %s6551_s27, 4  ;;  %s313_s2 = sshll.u32 %s6552_s25, 4  ;;  %s294_s28 = int_to_ptr.vmem [resolvable:$true] %s293_s28  ;;  %s314_s2 = int_to_ptr.vmem [resolvable:$true] %s313_s2 }
  0xa9   :  { %s6098_s7 = scalar_lea.vmem %s294_s28, 128  ;;  %p6103_p13 = scmp.lt.s32.totalorder %s294_s28, %s294_s28 }
  0xaa   :  { %p6099_p12 = scmp.ne.s32.totalorder %s294_s28, %s6098_s7  ;;  %p6104_p0 = scmp.lt.s32.totalorder %s6098_s7, %s6098_s7 }
  0xac   :  { %p6105_p1 = por %p6104_p0, %p6103_p13 }
  0xae   :  { %p6106_p2 = pnand %p6105_p1, %p6099_p12 }
  0xb0   :  { %6109 = shalt.err (!%p6106_p2)
}
  0xb1   :  { %296 = dma.hbm_to_vmem [thread:$0]  %s6696_s5, 128, %s294_s28, [#allocation30]  }
  0xb2   :  { %s6118_s12 = scalar_lea.vmem %s314_s2, 16  ;;  %s6122_s10 = scalar_lea.vmem %s314_s2, 32 }
  0xb3   :  { %p6119_p3 = scmp.ne.s32.totalorder %s314_s2, %s6118_s12  ;;  %p6123_p4 = scmp.lt.s32.totalorder %s314_s2, %s314_s2 }
  0xb4   :  { %p6124_p5 = scmp.lt.s32.totalorder %s6122_s10, %s6118_s12 }
  0xb6   :  { %p6125_p6 = por %p6124_p5, %p6123_p4 }
  0xb8   :  { %p6126_p7 = pnand %p6125_p6, %p6119_p3 }
  0xba   :  { %6129 = shalt.err (!%p6126_p7)
}
  0xbb   :  { %316 = dma.hbm_to_vmem [thread:$0]  %s6706_s4, 16, %s314_s2, [#allocation33]  }
  0xbc   :  { %s6553_s3 = smov [#allocation35]  }
  0xbd   :  { %s332_s11 = sshll.u32 %s6553_s3, 4  ;;  %s333_s11 = int_to_ptr.vmem [resolvable:$true] %s332_s11 }
  0xbe   :  { %s6138_s0 = scalar_lea.vmem %s333_s11, 256  ;;  %p6143_p9 = scmp.lt.s32.totalorder %s333_s11, %s333_s11 }
  0xbf   :  { %p6139_p8 = scmp.ne.s32.totalorder %s333_s11, %s6138_s0  ;;  %p6144_p10 = scmp.lt.s32.totalorder %s6138_s0, %s6138_s0 }
  0xc1   :  { %p6145_p11 = por %p6144_p10, %p6143_p9 }
  0xc3   :  { %p6146_p12 = pnand %p6145_p11, %p6139_p8 }
  0xc5   :  { %6149 = shalt.err (!%p6146_p12)
}
  0xc6   :  { %s6554_s5 = smov 128   ;;  %s6555_s14 = smov 8  }
  0xc7   :  { %338 = dma.hbm_to_vmem [thread:$0]  %s6716_s20, 256, %s333_s11, [#allocation36], %s6554_s5, %s6554_s5, %s6555_s14  }
  0xc8   :  { %s6556_s15 = smov [#allocation38]  }
  0xc9   :  { %s354_s24 = sshll.u32 %s6556_s15, 4  ;;  %s355_s24 = int_to_ptr.vmem [resolvable:$true] %s354_s24 }
  0xca   :  { %s6158_s16 = scalar_lea.vmem %s355_s24, 3072  ;;  %p6163_p0 = scmp.lt.s32.totalorder %s355_s24, %s355_s24 }
  0xcb   :  { %p6159_p13 = scmp.ne.s32.totalorder %s355_s24, %s6158_s16  ;;  %p6164_p1 = scmp.lt.s32.totalorder %s6158_s16, %s6158_s16 }
  0xcd   :  { %p6165_p2 = por %p6164_p1, %p6163_p0 }
  0xcf   :  { %p6166_p3 = pnand %p6165_p2, %p6159_p13 }
  0xd1   :  { %6169 = shalt.err (!%p6166_p3)
}
  0xd2   :  { %s6557_s4 = smov 384   ;;  %s6558_s18 = smov 24  }
  0xd3   :  { %360 = dma.hbm_to_vmem [thread:$0]  %s6726_s30, 3072, %s355_s24, [#allocation39], %s6557_s4, %s6557_s4, %s6558_s18  }
  0xd4   :  { %s6559_s22 = smov [#allocation2]   ;;  %s6560_s6 = smov [#allocation7]  }
  0xd5   :  { %s113_s23 = sshll.u32 %s6559_s22, 4  ;;  %s133_s26 = sshll.u32 %s6560_s6, 4  ;;  %s114_s23 = int_to_ptr.vmem [resolvable:$true] %s113_s23  ;;  %s134_s26 = int_to_ptr.vmem [resolvable:$true] %s133_s26 }
  0xd6   :  { %s6178_s20 = scalar_lea.vmem %s114_s23, 256  ;;  %p6183_p5 = scmp.lt.s32.totalorder %s114_s23, %s114_s23 }
  0xd7   :  { %p6179_p4 = scmp.ne.s32.totalorder %s114_s23, %s6178_s20  ;;  %p6184_p6 = scmp.lt.s32.totalorder %s6178_s20, %s6178_s20 }
  0xd9   :  { %p6185_p7 = por %p6184_p6, %p6183_p5 }
  0xdb   :  { %p6186_p8 = pnand %p6185_p7, %p6179_p4 }
  0xdd   :  { %6189 = shalt.err (!%p6186_p8)
}
  0xde   :  { %116 = dma.hbm_to_vmem [thread:$0]  %s6596_s13, 256, %s114_s23, [#allocation3]  }
  0xdf   :  { %s6198_s27 = scalar_lea.vmem %s134_s26, 256  ;;  %p6203_p10 = scmp.lt.s32.totalorder %s134_s26, %s134_s26 }
  0xe0   :  { %p6199_p9 = scmp.ne.s32.totalorder %s134_s26, %s6198_s27  ;;  %p6204_p11 = scmp.lt.s32.totalorder %s6198_s27, %s6198_s27 }
  0xe2   :  { %p6205_p12 = por %p6204_p11, %p6203_p10 }
  0xe4   :  { %p6206_p13 = pnand %p6205_p12, %p6199_p9 }
  0xe6   :  { %6209 = shalt.err (!%p6206_p13)
}
  0xe7   :  { %136 = dma.hbm_to_vmem [thread:$0]  %s6606_s21, 256, %s134_s26, [#allocation6]  }
  0xe8   :  { %s6561_s30 = smov [#allocation10]   ;;  %s6562_s25 = smov [#allocation13]  }
  0xe9   :  { %s156_s28 = sshll.u32 %s6561_s30, 4  ;;  %s181_s2 = sshll.u32 %s6562_s25, 4  ;;  %s157_s28 = int_to_ptr.vmem [resolvable:$true] %s156_s28  ;;  %s182_s2 = int_to_ptr.vmem [resolvable:$true] %s181_s2 }
  0xea   :  { %s6218_s7 = scalar_lea.vmem %s157_s28, 5120  ;;  %p6223_p1 = scmp.lt.s32.totalorder %s157_s28, %s157_s28 }
  0xeb   :  { %p6219_p0 = scmp.ne.s32.totalorder %s157_s28, %s6218_s7  ;;  %p6224_p2 = scmp.lt.s32.totalorder %s6218_s7, %s6218_s7 }
  0xed   :  { %p6225_p3 = por %p6224_p2, %p6223_p1 }
  0xef   :  { %p6226_p4 = pnand %p6225_p3, %p6219_p0 }
  0xf1   :  { %6229 = shalt.err (!%p6226_p4)
}
  0xf2   :  { %s10565_s13 = sld [smem:[#allocation63_spill]]  ;;  %s6238_s12 = scalar_lea.vmem %s182_s2, 32 }
  0xf3   :  { %p6239_p5 = scmp.ne.s32.totalorder %s182_s2, %s6238_s12  ;;  %p6243_p6 = scmp.lt.s32.totalorder %s182_s2, %s182_s2 }
  0xf4   :  { %p6244_p7 = scmp.lt.s32.totalorder %s6238_s12, %s6238_s12 }
  0xf6   :  { %p6245_p8 = por %p6244_p7, %p6243_p6 }
  0xf8   :  { %162 = dma.hbm_to_vmem [thread:$0]  %s10565_s13, 5120, %s157_s28, [#allocation9], %s6545_s17, %s6545_s17, %s6546_s1  }
  0xf9   :  { %p6246_p9 = pnand %p6245_p8, %p6239_p5 }
  0xfb   :  { %6249 = shalt.err (!%p6246_p9)
}
  0xfc   :  { %s10566_s21 = sld [smem:[#allocation64_spill]]  ;;  %s6563_s10 = smov [#allocation16]  }
  0xfd   :  { %s201_s3 = sshll.u32 %s6563_s10, 4  ;;  %s6564_s11 = smov [#allocation19]   ;;  %s202_s3 = int_to_ptr.vmem [resolvable:$true] %s201_s3 }
  0xfe   :  { %s223_s0 = sshll.u32 %s6564_s11, 4  ;;  %s6258_s5 = scalar_lea.vmem %s202_s3, 32  ;;  %s224_s0 = int_to_ptr.vmem [resolvable:$true] %s223_s0 }
  0xff   :  { %p6259_p10 = scmp.ne.s32.totalorder %s202_s3, %s6258_s5  ;;  %p6263_p11 = scmp.lt.s32.totalorder %s202_s3, %s202_s3 }
 0x100   :  { %p6264_p12 = scmp.lt.s32.totalorder %s6258_s5, %s6258_s5 }
 0x102   :  { %184 = dma.hbm_to_vmem [thread:$0]  %s10566_s21, 32, %s182_s2, [#allocation12]  }
 0x103   :  { %p6265_p13 = por %p6264_p12, %p6263_p11 }
 0x105   :  { %p6266_p0 = pnand %p6265_p13, %p6259_p10 }
 0x107   :  { %6269 = shalt.err (!%p6266_p0)
}
 0x108   :  { %s10567_s17 = sld [smem:[#allocation65_spill]]  ;;  %s6278_s1 = scalar_lea.vmem %s224_s0, 16 }
 0x109   :  { %p6279_p1 = scmp.ne.s32.totalorder %s224_s0, %s6278_s1  ;;  %s6282_s14 = scalar_lea.vmem %s224_s0, 32 }
 0x10a   :  { %p6283_p2 = scmp.lt.s32.totalorder %s224_s0, %s224_s0  ;;  %p6284_p3 = scmp.lt.s32.totalorder %s6282_s14, %s6278_s1 }
 0x10c   :  { %p6285_p4 = por %p6284_p3, %p6283_p2 }
 0x10e   :  { %204 = dma.hbm_to_vmem [thread:$0]  %s10567_s17, 32, %s202_s3, [#allocation15]  }
 0x10f   :  { %p6286_p5 = pnand %p6285_p4, %p6279_p1 }
 0x111   :  { %6289 = shalt.err (!%p6286_p5)
}
 0x112   :  { %s10568_s15 = sld [smem:[#allocation67_spill]]  ;;  %s6565_s24 = smov [#allocation22]  }
 0x113   :  { %s243_s16 = sshll.u32 %s6565_s24, 4  ;;  %s6566_s4 = smov [#allocation25]   ;;  %s244_s16 = int_to_ptr.vmem [resolvable:$true] %s243_s16 }
 0x114   :  { %s263_s18 = sshll.u32 %s6566_s4, 4  ;;  %s6298_s22 = scalar_lea.vmem %s244_s16, 16  ;;  %s264_s18 = int_to_ptr.vmem [resolvable:$true] %s263_s18 }
 0x115   :  { %p6299_p6 = scmp.ne.s32.totalorder %s244_s16, %s6298_s22  ;;  %s6302_s23 = scalar_lea.vmem %s244_s16, 32 }
 0x116   :  { %p6303_p7 = scmp.lt.s32.totalorder %s244_s16, %s244_s16  ;;  %p6304_p8 = scmp.lt.s32.totalorder %s6302_s23, %s6298_s22 }
 0x118   :  { %226 = dma.hbm_to_vmem [thread:$0]  %s10568_s15, 16, %s224_s0, [#allocation18]  }
 0x119   :  { %p6305_p9 = por %p6304_p8, %p6303_p7 }
 0x11b   :  { %p6306_p10 = pnand %p6305_p9, %p6299_p6 }
 0x11d   :  { %6309 = shalt.err (!%p6306_p10)
}
 0x11e   :  { %s10569_s6 = sld [smem:[#allocation68_spill]]  ;;  %s6318_s26 = scalar_lea.vmem %s264_s18, 16 }
 0x11f   :  { %p6319_p11 = scmp.ne.s32.totalorder %s264_s18, %s6318_s26  ;;  %s6322_s20 = scalar_lea.vmem %s264_s18, 32 }
 0x120   :  { %p6323_p12 = scmp.lt.s32.totalorder %s264_s18, %s264_s18  ;;  %p6324_p13 = scmp.lt.s32.totalorder %s6322_s20, %s6318_s26 }
 0x122   :  { %p6325_p0 = por %p6324_p13, %p6323_p12 }
 0x124   :  { %246 = dma.hbm_to_vmem [thread:$0]  %s10569_s6, 16, %s244_s16, [#allocation21]  }
 0x125   :  { %p6326_p1 = pnand %p6325_p0, %p6319_p11 }
 0x127   :  { %6329 = shalt.err (!%p6326_p1)
}
 0x128   :  { %s10570_s27 = sld [smem:[#allocation69_spill]]  ;;  %s6567_s30 = smov [#allocation28]  }
 0x129   :  { %s283_s28 = sshll.u32 %s6567_s30, 4  ;;  %s6568_s25 = smov [#allocation31]   ;;  %s284_s28 = int_to_ptr.vmem [resolvable:$true] %s283_s28 }
 0x12a   :  { %s303_s2 = sshll.u32 %s6568_s25, 4  ;;  %s6338_s7 = scalar_lea.vmem %s284_s28, 16  ;;  %s304_s2 = int_to_ptr.vmem [resolvable:$true] %s303_s2 }
 0x12b   :  { %p6339_p2 = scmp.ne.s32.totalorder %s284_s28, %s6338_s7  ;;  %s6342_s13 = scalar_lea.vmem %s284_s28, 32 }
 0x12c   :  { %p6343_p3 = scmp.lt.s32.totalorder %s284_s28, %s284_s28  ;;  %p6344_p4 = scmp.lt.s32.totalorder %s6342_s13, %s6338_s7 }
 0x12e   :  { %266 = dma.hbm_to_vmem [thread:$0]  %s10570_s27, 16, %s264_s18, [#allocation24]  }
 0x12f   :  { %p6345_p5 = por %p6344_p4, %p6343_p3 }
 0x131   :  { %p6346_p6 = pnand %p6345_p5, %p6339_p2 }
 0x133   :  { %6349 = shalt.err (!%p6346_p6)
}
 0x134   :  { %s10571_s12 = sld [smem:[#allocation70_spill]]  ;;  %s6358_s21 = scalar_lea.vmem %s304_s2, 16 }
 0x135   :  { %p6359_p7 = scmp.ne.s32.totalorder %s304_s2, %s6358_s21  ;;  %s6362_s10 = scalar_lea.vmem %s304_s2, 32 }
 0x136   :  { %p6363_p8 = scmp.lt.s32.totalorder %s304_s2, %s304_s2  ;;  %p6364_p9 = scmp.lt.s32.totalorder %s6362_s10, %s6358_s21 }
 0x138   :  { %p6365_p10 = por %p6364_p9, %p6363_p8 }
 0x13a   :  { %286 = dma.hbm_to_vmem [thread:$0]  %s10571_s12, 16, %s284_s28, [#allocation27]  }
 0x13b   :  { %p6366_p11 = pnand %p6365_p10, %p6359_p7 }
 0x13d   :  { %6369 = shalt.err (!%p6366_p11)
}
 0x13e   :  { %s10572_s3 = sld [smem:[#allocation71_spill]]  ;;  %s6569_s11 = smov [#allocation34]  }
 0x13f   :  { %s323_s0 = sshll.u32 %s6569_s11, 4  ;;  %s6570_s5 = smov [#allocation37]   ;;  %s324_s0 = int_to_ptr.vmem [resolvable:$true] %s323_s0 }
 0x140   :  { %s345_s17 = sshll.u32 %s6570_s5, 4  ;;  %s6378_s1 = scalar_lea.vmem %s324_s0, 16  ;;  %s346_s17 = int_to_ptr.vmem [resolvable:$true] %s345_s17 }
 0x141   :  { %p6379_p12 = scmp.ne.s32.totalorder %s324_s0, %s6378_s1  ;;  %s6382_s14 = scalar_lea.vmem %s324_s0, 32 }
 0x142   :  { %p6383_p13 = scmp.lt.s32.totalorder %s324_s0, %s324_s0  ;;  %p6384_p0 = scmp.lt.s32.totalorder %s6382_s14, %s6378_s1 }
 0x144   :  { %306 = dma.hbm_to_vmem [thread:$0]  %s10572_s3, 16, %s304_s2, [#allocation30]  }
 0x145   :  { %p6385_p1 = por %p6384_p0, %p6383_p13 }
 0x147   :  { %p6386_p2 = pnand %p6385_p1, %p6379_p12 }
 0x149   :  { %6389 = shalt.err (!%p6386_p2)
}
 0x14a   :  { %s10573_s15 = sld [smem:[#allocation72_spill]]  ;;  %s6398_s24 = scalar_lea.vmem %s346_s17, 16 }
 0x14b   :  { %p6399_p3 = scmp.ne.s32.totalorder %s346_s17, %s6398_s24  ;;  %s6402_s16 = scalar_lea.vmem %s346_s17, 32 }
 0x14c   :  { %p6403_p4 = scmp.lt.s32.totalorder %s346_s17, %s346_s17  ;;  %p6404_p5 = scmp.lt.s32.totalorder %s6402_s16, %s6398_s24 }
 0x14e   :  { %p6405_p6 = por %p6404_p5, %p6403_p4 }
 0x150   :  { %326 = dma.hbm_to_vmem [thread:$0]  %s10573_s15, 16, %s324_s0, [#allocation33]  }
 0x151   :  { %p6406_p7 = pnand %p6405_p6, %p6399_p3 }
 0x153   :  { %6409 = shalt.err (!%p6406_p7)
}
 0x154   :  { %s10574_s4 = sld [smem:[#allocation73_spill]]  ;;  %s6571_s18 = smov [#allocation40]  }
 0x155   :  { %s369_s22 = sshll.u32 %s6571_s18, 4  ;;  %s6572_s23 = smov [#allocation41]   ;;  %s370_s22 = int_to_ptr.vmem [resolvable:$true] %s369_s22 }
 0x156   :  { %s379_s6 = sshll.u32 %s6572_s23, 4  ;;  %s6418_s26 = scalar_lea.vmem %s370_s22, 48  ;;  %s380_s6 = int_to_ptr.vmem [resolvable:$true] %s379_s6 }
 0x157   :  { %p6419_p8 = scmp.ne.s32.totalorder %s370_s22, %s6418_s26  ;;  %s6422_s20 = scalar_lea.vmem %s370_s22, 64 }
 0x158   :  { %p6423_p9 = scmp.lt.s32.totalorder %s370_s22, %s370_s22  ;;  %p6424_p10 = scmp.lt.s32.totalorder %s6422_s20, %s6418_s26 }
 0x15a   :  { %348 = dma.hbm_to_vmem [thread:$0]  %s10574_s4, 16, %s346_s17, [#allocation36]  }
 0x15b   :  { %p6425_p11 = por %p6424_p10, %p6423_p9 }
 0x15d   :  { %p6426_p12 = pnand %p6425_p11, %p6419_p8 }
 0x15f   :  { %6429 = shalt.err (!%p6426_p12)
}
 0x160   :  { %s10575_s27 = sld [smem:[#allocation75_spill]]  ;;  %s6438_s30 = scalar_lea.vmem %s380_s6, 48 }
 0x161   :  { %p6439_p13 = scmp.ne.s32.totalorder %s380_s6, %s6438_s30  ;;  %s6442_s28 = scalar_lea.vmem %s380_s6, 64 }
 0x162   :  { %p6443_p0 = scmp.lt.s32.totalorder %s380_s6, %s380_s6  ;;  %p6444_p1 = scmp.lt.s32.totalorder %s6442_s28, %s6438_s30 }
 0x164   :  { %p6445_p2 = por %p6444_p1, %p6443_p0 }
 0x166   :  { %372 = dma.hbm_to_vmem [thread:$0]  %s10575_s27, 48, %s370_s22, [#allocation39]  }
 0x167   :  { %p6446_p3 = pnand %p6445_p2, %p6439_p13 }
 0x169   :  { %6449 = shalt.err (!%p6446_p3)
}
 0x16a   :  { %s10576_s25 = sld [smem:[#allocation76_spill]] }
 0x170   :  { %382 = dma.hbm_to_vmem [thread:$0]  %s10576_s25, 48, %s380_s6, [#allocation42]  }
 0x171   :  { %6470 = dma.done.wait [#allocation3], 256  }
 0x172   :  { %6471 = vsyncadd [#allocation3], 4294967040 }
 0x173   :  { %6472 = dma.done.wait [#allocation6], 512  }
 0x174   :  { %6473 = vsyncadd [#allocation6], 4294966784 }
 0x175   :  { %6474 = dma.done.wait [#allocation9], 5376  }
 0x176   :  { %6475 = vsyncadd [#allocation9], 4294961920 }
 0x177   :  { %6476 = dma.done.wait [#allocation12], 5152  }
 0x178   :  { %6477 = vsyncadd [#allocation12], 4294962144 }
 0x179   :  { %6478 = dma.done.wait [#allocation15], 64  }
 0x17a   :  { %6479 = vsyncadd [#allocation15], 4294967232 }
 0x17b   :  { %6480 = dma.done.wait [#allocation18], 48  }
 0x17c   :  { %6481 = vsyncadd [#allocation18], 4294967248 }
 0x17d   :  { %6482 = dma.done.wait [#allocation21], 32  }
 0x17e   :  { %6483 = vsyncadd [#allocation21], 4294967264 }
 0x17f   :  { %6484 = dma.done.wait [#allocation24], 48  }
 0x180   :  { %6485 = vsyncadd [#allocation24], 4294967248 }
 0x181   :  { %6486 = dma.done.wait [#allocation27], 32  }
 0x182   :  { %6487 = vsyncadd [#allocation27], 4294967264 }
 0x183   :  { %6488 = dma.done.wait [#allocation30], 144  }
 0x184   :  { %6489 = vsyncadd [#allocation30], 4294967152 }
 0x185   :  { %6490 = dma.done.wait [#allocation33], 32  }
 0x186   :  { %6491 = vsyncadd [#allocation33], 4294967264 }
 0x187   :  { %6492 = dma.done.wait [#allocation36], 272  }
 0x188   :  { %6493 = vsyncadd [#allocation36], 4294967024 }
 0x189   :  { %6494 = dma.done.wait [#allocation39], 3120  }
 0x18a   :  { %6495 = vsyncadd [#allocation39], 4294964176 }
 0x18b   :  { %6496 = dma.done.wait [#allocation42], 48  }
 0x18c   :  { %6497 = vsyncadd [#allocation42], 4294967248  ;;  %s10577_s2 = sld [smem:[#allocation59_spill]]  ;;  %v10002_v0 = vmov 0.0   ;;  %v488_v1 = vld [vmem:[#allocation2 + $0x8] sm:$0xff]  ;;  %v640_v2 = vld [vmem:[#allocation5 + $0x8] sm:$0xff] }
 0x18d   :  { %590 = vmatprep.mubr.f32.mxu0 %v10002_v0  ;;  %717 = vmatprep.mubr.f32.mxu1 %v10002_v0  ;;  %v487_v3 = vld [vmem:[#allocation2] sm:$0xff]  ;;  %vm501_vm0 = vcmask 64512   ;;  %v639_v4 = vld [vmem:[#allocation5] sm:$0xff]  ;;  %s10578_s7 = sld [smem:[#allocation61_spill]]  ;;  %v767_v6 = vld [vmem:[#allocation7 + $0x8] sm:$0xff]  ;;  %vm1180_vm1 = vcmask 261120  }
 0x18e   :  { %556 = vmatprep.subr.mxu0 %v488_v1  ;;  %683 = vmatprep.subr.mxu1 %v640_v2  ;;  %s10579_s13 = sld [smem:[#allocation62_spill]]  ;;  %v894_v7 = vld [vmem:[#allocation8 + $0x8] sm:$0xff]  ;;  %v766_v8 = vld [vmem:[#allocation7] sm:$0xff]  ;;  %v893_v9 = vld [vmem:[#allocation8] sm:$0xff]  ;;  %vm6576_vm2 = vmmov 0   ;;  %vm4197_vm3 = vcmask 130048  }
 0x18f   :  { %557 = vmatpush1.msra.mxu0 %v487_v3  ;;  %684 = vmatpush1.msra.mxu1 %v639_v4  ;;  %s11436_s12 = sld [smem:[#allocation60_spill]]  ;;  %vm4313_vm4 = vcmask 523264   ;;  %vm4730_vm5 = vcmask 1043456   ;;  %vm4727_vm6 = vcmask 31744  }
 0x190   :  { %810 = vmatprep.subr.mxu0 %v767_v6  ;;  %937 = vmatprep.subr.mxu1 %v894_v7  ;;  %s11499_s21 = sld [smem:[#allocation66_spill]] }
 0x191   :  { %s11511_s10 = sld [smem:[#allocation77_spill]] }
 0x192   :  { %v479_v5 = vld [vmem:[%s10577_s2] sm:$0xff]  ;;  %v6831_v10 = vld [vmem:[%s10577_s2 + $0x8] sm:$0xff]  ;;  %v6848_v13 = vld [vmem:[%s10577_s2 + $0x10] sm:$0xff]  ;;  %s11512_s3 = sld [smem:[#allocation74_spill]] }
 0x193   :  { %4995 = vmatmul.mubr.msk.f32.vlgmr.msra.gmra.mxu0 %vm501_vm0, %v479_v5  ;;  %5003 = vmatmul.mubr.msk.f32.vlgmr.msra.gmra.mxu1 %vm501_vm0, %v479_v5  ;;  %v6836_v11 = vld [vmem:[%s10578_s7 + $0xf8] sm:$0xff]  ;;  %v6868_v15 = vld [vmem:[%s10577_s2 + $0x20] sm:$0xff]  ;;  %v6877_v16 = vld [vmem:[%s10577_s2 + $0x28] sm:$0xff]  ;;  %s11513_s11 = sld [smem:[#allocation81_spill]] }
 0x194   :  { %811 = vmatpush1.msra.mxu0 %v766_v8  ;;  %938 = vmatpush1.msra.mxu1 %v893_v9  ;;  %v6839_v12 = vld [vmem:[%s10579_s13 + $0xf8] sm:$0xff]  ;;  %v6886_v17 = vld [vmem:[%s10577_s2 + $0x30] sm:$0xff]  ;;  %v6910_v21 = vld [vmem:[%s10578_s7 + $0xe8] sm:$0xff]  ;;  %s11515_s0 = sld [smem:[#allocation78_spill]] }
 0x195   :  { %596 = vmatprep.mubr.f32.mxu0 %v10002_v0  ;;  %723 = vmatprep.mubr.f32.mxu1 %v10002_v0  ;;  %v6859_v14 = vld [vmem:[%s10577_s2 + $0x18] sm:$0xff]  ;;  %v6904_v19 = vld [vmem:[%s10578_s7 + $0xf0] sm:$0xff]  ;;  %v6913_v22 = vld [vmem:[%s10579_s13 + $0xe8] sm:$0xff]  ;;  %s11516_s5 = sld [smem:[#allocation79_spill]] }
 0x196   :  { %1184 = vmatprep.subr.mxu0 %v6836_v11  ;;  %1257 = vmatprep.subr.mxu1 %v6839_v12  ;;  %v6895_v18 = vld [vmem:[%s10577_s2 + $0x38] sm:$0xff]  ;;  %v6907_v20 = vld [vmem:[%s10579_s13 + $0xf0] sm:$0xff]  ;;  %v6918_v23 = vld [vmem:[%s10578_s7 + $0xe0] sm:$0xff]  ;;  %s11517_s17 = sld [smem:[#allocation82_spill]] }
 0x197   :  { %4996 = vmatmul.mubr.msk.f32.gmra.mxu0 %vm501_vm0, %v6831_v10  ;;  %5004 = vmatmul.mubr.msk.f32.gmra.mxu1 %vm501_vm0, %v6831_v10  ;;  %v6921_v24 = vld [vmem:[%s10579_s13 + $0xe0] sm:$0xff]  ;;  %v6926_v25 = vld [vmem:[%s10578_s7 + $0xd8] sm:$0xff]  ;;  %v6934_v27 = vld [vmem:[%s10578_s7 + $0xd0] sm:$0xff]  ;;  %s11518_s1 = sld [smem:[#allocation80_spill]] }
 0x198   :  { %602 = vmatprep.mubr.f32.mxu0 %v10002_v0  ;;  %729 = vmatprep.mubr.f32.mxu1 %v10002_v0  ;;  %v6929_v26 = vld [vmem:[%s10579_s13 + $0xd8] sm:$0xff]  ;;  %v6937_v28 = vld [vmem:[%s10579_s13 + $0xd0] sm:$0xff]  ;;  %v6942_v29 = vld [vmem:[%s10578_s7 + $0xc8] sm:$0xff] }
 0x199   :  { %v6945_v30 = vld [vmem:[%s10579_s13 + $0xc8] sm:$0xff]  ;;  %v6950_v31 = vld [vmem:[%s10578_s7 + $0xc0] sm:$0xff]  ;;  %v6958_v33 = vld [vmem:[%s10578_s7 + $0xb8] sm:$0xff] }
 0x19a   :  { %v6953_v32 = vld [vmem:[%s10579_s13 + $0xc0] sm:$0xff]  ;;  %v6961_v34 = vld [vmem:[%s10579_s13 + $0xb8] sm:$0xff]  ;;  %v6966_v35 = vld [vmem:[%s10578_s7 + $0xb0] sm:$0xff] }
 0x19b   :  { %4997 = vmatmul.mubr.msk.f32.gmra.mxu0 %vm501_vm0, %v6848_v13  ;;  %5005 = vmatmul.mubr.msk.f32.gmra.mxu1 %vm501_vm0, %v6848_v13  ;;  %v6969_v36 = vld [vmem:[%s10579_s13 + $0xb0] sm:$0xff]  ;;  %v6974_v37 = vld [vmem:[%s10578_s7 + $0xa8] sm:$0xff]  ;;  %v6984_v39 = vld [vmem:[%s10578_s7 + $0xa0] sm:$0xff] }
 0x19c   :  { %608 = vmatprep.mubr.f32.mxu0 %v10002_v0  ;;  %735 = vmatprep.mubr.f32.mxu1 %v10002_v0  ;;  %v6977_v38 = vld [vmem:[%s10579_s13 + $0xa8] sm:$0xff]  ;;  %v6987_v40 = vld [vmem:[%s10579_s13 + $0xa0] sm:$0xff]  ;;  %v6994_v41 = vld [vmem:[%s10578_s7 + $0x98] sm:$0xff] }
 0x19d   :  { %v6997_v42 = vld [vmem:[%s10579_s13 + $0x98] sm:$0xff]  ;;  %v7002_v43 = vld [vmem:[%s10578_s7 + $0x90] sm:$0xff]  ;;  %v7012_v45 = vld [vmem:[%s10578_s7 + $0x88] sm:$0xff] }
 0x19e   :  { %v7005_v44 = vld [vmem:[%s10579_s13 + $0x90] sm:$0xff]  ;;  %v7015_v46 = vld [vmem:[%s10579_s13 + $0x88] sm:$0xff]  ;;  %v7022_v47 = vld [vmem:[%s10578_s7 + $0x80] sm:$0xff] }
 0x19f   :  { %4998 = vmatmul.mubr.msk.f32.gmra.mxu0 %vm501_vm0, %v6859_v14  ;;  %5006 = vmatmul.mubr.msk.f32.gmra.mxu1 %vm501_vm0, %v6859_v14  ;;  %v7025_v48 = vld [vmem:[%s10579_s13 + $0x80] sm:$0xff]  ;;  %v7032_v49 = vld [vmem:[%s10578_s7 + $0x78] sm:$0xff]  ;;  %v7040_v51 = vld [vmem:[%s10578_s7 + $0x70] sm:$0xff] }
 0x1a0   :  { %614 = vmatprep.mubr.f32.mxu0 %v10002_v0  ;;  %741 = vmatprep.mubr.f32.mxu1 %v10002_v0  ;;  %v7035_v50 = vld [vmem:[%s10579_s13 + $0x78] sm:$0xff]  ;;  %v7043_v52 = vld [vmem:[%s10579_s13 + $0x70] sm:$0xff]  ;;  %v7050_v53 = vld [vmem:[%s10578_s7 + $0x68] sm:$0xff] }
 0x1a1   :  { %v7053_v54 = vld [vmem:[%s10579_s13 + $0x68] sm:$0xff]  ;;  %v7060_v55 = vld [vmem:[%s10578_s7 + $0x60] sm:$0xff]  ;;  %v7070_v57 = vld [vmem:[%s10578_s7 + $0x58] sm:$0xff] }
 0x1a2   :  { %v7063_v56 = vld [vmem:[%s10579_s13 + $0x60] sm:$0xff]  ;;  %v7073_v58 = vld [vmem:[%s10579_s13 + $0x58] sm:$0xff]  ;;  %v7078_v59 = vld [vmem:[%s10578_s7 + $0x50] sm:$0xff] }
 0x1a3   :  { %4999 = vmatmul.mubr.msk.f32.gmra.mxu0 %vm501_vm0, %v6868_v15  ;;  %5007 = vmatmul.mubr.msk.f32.gmra.mxu1 %vm501_vm0, %v6868_v15  ;;  %v7081_v60 = vld [vmem:[%s10579_s13 + $0x50] sm:$0xff]  ;;  %v7088_v61 = vld [vmem:[%s10578_s7 + $0x48] sm:$0xff]  ;;  %v7098_v63 = vld [vmem:[%s10578_s7 + $0x40] sm:$0xff] }
 0x1a4   :  { %620 = vmatprep.mubr.f32.mxu0 %v10002_v0  ;;  %747 = vmatprep.mubr.f32.mxu1 %v10002_v0  ;;  %v7091_v62 = vld [vmem:[%s10579_s13 + $0x48] sm:$0xff]  ;;  %v7101_v1 = vld [vmem:[%s10579_s13 + $0x40] sm:$0xff]  ;;  %v7108_v2 = vld [vmem:[%s10578_s7 + $0x38] sm:$0xff] }
 0x1a5   :  { %v7111_v3 = vld [vmem:[%s10579_s13 + $0x38] sm:$0xff]  ;;  %v7116_v4 = vld [vmem:[%s10578_s7 + $0x30] sm:$0xff]  ;;  %v7126_v6 = vld [vmem:[%s10578_s7 + $0x28] sm:$0xff] }
 0x1a6   :  { %10580 = vst [vmem:[#allocation83_spill] sm:$0xff] %v7126_v6  ;;  %v7129_v7 = vld [vmem:[%s10579_s13 + $0x28] sm:$0xff]  ;;  %v7136_v8 = vld [vmem:[%s10578_s7 + $0x20] sm:$0xff] }
 0x1a7   :  { %5000 = vmatmul.mubr.msk.f32.gmra.mxu0 %vm501_vm0, %v6877_v16  ;;  %5008 = vmatmul.mubr.msk.f32.gmra.mxu1 %vm501_vm0, %v6877_v16  ;;  %10581 = vst [vmem:[#allocation84_spill] sm:$0xff] %v7129_v7  ;;  %10582 = vst [vmem:[#allocation85_spill] sm:$0xff] %v7136_v8  ;;  %v7139_v9 = vld [vmem:[%s10579_s13 + $0x20] sm:$0xff] }
 0x1a8   :  { %626 = vmatprep.mubr.f32.mxu0 %v10002_v0  ;;  %753 = vmatprep.mubr.f32.mxu1 %v10002_v0  ;;  %10583 = vst [vmem:[#allocation86_spill] sm:$0xff] %v7139_v9 }
 0x1ab   :  { %5001 = vmatmul.mubr.msk.f32.gmra.mxu0 %vm501_vm0, %v6886_v17  ;;  %5009 = vmatmul.mubr.msk.f32.gmra.mxu1 %vm501_vm0, %v6886_v17 }
 0x1ac   :  { %632 = vmatprep.mubr.f32.mxu0 %v10002_v0  ;;  %759 = vmatprep.mubr.f32.mxu1 %v10002_v0 }
 0x1af   :  { %5002 = vmatmul.mubr.msk.f32.gmra.mxu0 %vm501_vm0, %v6895_v18  ;;  %5010 = vmatmul.mubr.msk.f32.gmra.mxu1 %vm501_vm0, %v6895_v18 }
 0x1b0   :  { %844 = vmatprep.mubr.f32.mxu0 %v10002_v0  ;;  %971 = vmatprep.mubr.f32.mxu1 %v10002_v0 }
 0x1b3   :  { %5011 = vmatmul.mubr.msk.f32.vlgmr.msra.gmra.mxu0 %vm501_vm0, %v479_v5  ;;  %5019 = vmatmul.mubr.msk.f32.vlgmr.msra.gmra.mxu1 %vm501_vm0, %v479_v5  ;;  %v7119_v5 = vld [vmem:[%s10579_s13 + $0x30] sm:$0xff] }
 0x1b4   :  { %1185 = vmatpush1.msra.mxu0 %v6904_v19  ;;  %1258 = vmatpush1.msra.mxu1 %v6907_v20 }
 0x1b5   :  { %1186 = vmatprep.subr.mxu0 %v6910_v21  ;;  %1259 = vmatprep.subr.mxu1 %v6913_v22 }
 0x1b6   :  { %1187 = vmatpush1.msra.mxu0 %v6918_v23  ;;  %1260 = vmatpush1.msra.mxu1 %v6921_v24 }
 0x1b7   :  { %1188 = vmatprep.subr.mxu0 %v6926_v25  ;;  %1261 = vmatprep.subr.mxu1 %v6929_v26 }
 0x1b8   :  { %1189 = vmatpush1.msra.mxu0 %v6934_v27  ;;  %1262 = vmatpush1.msra.mxu1 %v6937_v28 }
 0x1b9   :  { %1190 = vmatprep.subr.mxu0 %v6942_v29  ;;  %1263 = vmatprep.subr.mxu1 %v6945_v30 }
 0x1ba   :  { %1191 = vmatpush1.msra.mxu0 %v6950_v31  ;;  %1264 = vmatpush1.msra.mxu1 %v6953_v32 }
 0x1bb   :  { %1192 = vmatprep.subr.mxu0 %v6958_v33  ;;  %1265 = vmatprep.subr.mxu1 %v6961_v34 }
 0x1bc   :  { %1193 = vmatpush1.msra.mxu0 %v6966_v35  ;;  %1266 = vmatpush1.msra.mxu1 %v6969_v36 }
 0x1bd   :  { %1194 = vmatprep.subr.mxu0 %v6974_v37  ;;  %1267 = vmatprep.subr.mxu1 %v6977_v38 }
 0x1be   :  { %850 = vmatprep.mubr.f32.mxu0 %v10002_v0  ;;  %977 = vmatprep.mubr.f32.mxu1 %v10002_v0 }
 0x1bf   :  { %1195 = vmatpush1.msra.mxu0 %v6984_v39  ;;  %1268 = vmatpush1.msra.mxu1 %v6987_v40 }
 0x1c0   :  { %5012 = vmatmul.mubr.msk.f32.gmra.mxu0 %vm501_vm0, %v6831_v10  ;;  %5020 = vmatmul.mubr.msk.f32.gmra.mxu1 %vm501_vm0, %v6831_v10  ;;  %v7146_v10 = vld [vmem:[%s10578_s7 + $0x18] sm:$0xff] }
 0x1c1   :  { %1196 = vmatprep.subr.mxu0 %v6994_v41  ;;  %1269 = vmatprep.subr.mxu1 %v6997_v42  ;;  %10584 = vst [vmem:[#allocation87_spill] sm:$0xff] %v7146_v10 }
 0x1c2   :  { %1197 = vmatpush1.msra.mxu0 %v7002_v43  ;;  %1270 = vmatpush1.msra.mxu1 %v7005_v44 }
 0x1c3   :  { %1198 = vmatprep.subr.mxu0 %v7012_v45  ;;  %1271 = vmatprep.subr.mxu1 %v7015_v46 }
 0x1c4   :  { %856 = vmatprep.mubr.f32.mxu0 %v10002_v0  ;;  %983 = vmatprep.mubr.f32.mxu1 %v10002_v0 }
 0x1c5   :  { %1199 = vmatpush1.msra.mxu0 %v7022_v47  ;;  %1272 = vmatpush1.msra.mxu1 %v7025_v48 }
 0x1c6   :  { %5013 = vmatmul.mubr.msk.f32.gmra.mxu0 %vm501_vm0, %v6848_v13  ;;  %5021 = vmatmul.mubr.msk.f32.gmra.mxu1 %vm501_vm0, %v6848_v13  ;;  %v7149_v13 = vld [vmem:[%s10579_s13 + $0x18] sm:$0xff] }
 0x1c7   :  { %1200 = vmatprep.subr.mxu0 %v7032_v49  ;;  %1273 = vmatprep.subr.mxu1 %v7035_v50  ;;  %10585 = vst [vmem:[#allocation88_spill] sm:$0xff] %v7149_v13 }
 0x1c8   :  { %1201 = vmatpush1.msra.mxu0 %v7040_v51  ;;  %1274 = vmatpush1.msra.mxu1 %v7043_v52 }
 0x1c9   :  { %1202 = vmatprep.subr.mxu0 %v7050_v53  ;;  %1275 = vmatprep.subr.mxu1 %v7053_v54 }
 0x1ca   :  { %862 = vmatprep.mubr.f32.mxu0 %v10002_v0  ;;  %989 = vmatprep.mubr.f32.mxu1 %v10002_v0 }
 0x1cb   :  { %1203 = vmatpush1.msra.mxu0 %v7060_v55  ;;  %1276 = vmatpush1.msra.mxu1 %v7063_v56 }
 0x1cc   :  { %5014 = vmatmul.mubr.msk.f32.gmra.mxu0 %vm501_vm0, %v6859_v14  ;;  %5022 = vmatmul.mubr.msk.f32.gmra.mxu1 %vm501_vm0, %v6859_v14  ;;  %v7154_v14 = vld [vmem:[%s10578_s7 + $0x10] sm:$0xff] }
 0x1cd   :  { %1204 = vmatprep.subr.mxu0 %v7070_v57  ;;  %1277 = vmatprep.subr.mxu1 %v7073_v58  ;;  %10586 = vst [vmem:[#allocation89_spill] sm:$0xff] %v7154_v14 }
 0x1ce   :  { %1205 = vmatpush1.msra.mxu0 %v7078_v59  ;;  %1278 = vmatpush1.msra.mxu1 %v7081_v60 }
 0x1cf   :  { %1206 = vmatprep.subr.mxu0 %v7088_v61  ;;  %1279 = vmatprep.subr.mxu1 %v7091_v62 }
 0x1d0   :  { %868 = vmatprep.mubr.f32.mxu0 %v10002_v0  ;;  %995 = vmatprep.mubr.f32.mxu1 %v10002_v0 }
 0x1d1   :  { %1207 = vmatpush1.msra.mxu0 %v7098_v63  ;;  %1280 = vmatpush1.msra.mxu1 %v7101_v1 }
 0x1d2   :  { %5015 = vmatmul.mubr.msk.f32.gmra.mxu0 %vm501_vm0, %v6868_v15  ;;  %5023 = vmatmul.mubr.msk.f32.gmra.mxu1 %vm501_vm0, %v6868_v15  ;;  %v7157_v15 = vld [vmem:[%s10579_s13 + $0x10] sm:$0xff] }
 0x1d3   :  { %1208 = vmatprep.subr.mxu0 %v7108_v2  ;;  %1281 = vmatprep.subr.mxu1 %v7111_v3  ;;  %10587 = vst [vmem:[#allocation90_spill] sm:$0xff] %v7157_v15 }
 0x1d4   :  { %1209 = vmatpush1.msra.mxu0 %v7116_v4  ;;  %1282 = vmatpush1.msra.mxu1 %v7119_v5 }
 0x1d5   :  { %1210 = vmatprep.subr.mxu0 %v7126_v6  ;;  %1283 = vmatprep.subr.mxu1 %v7129_v7  ;;  %v7167_v7 = vld [vmem:[%s10579_s13 + $0x8] sm:$0xff]  ;;  %v7289_v6 = vld [vmem:[#allocation10 + $0xd0] sm:$0xff] }
 0x1d6   :  { %874 = vmatprep.mubr.f32.mxu0 %v10002_v0  ;;  %1001 = vmatprep.mubr.f32.mxu1 %v10002_v0  ;;  %v7164_v0 = vld [vmem:[%s10578_s7 + $0x8] sm:$0xff]  ;;  %10589 = vst [vmem:[#allocation92_spill] sm:$0xff] %v7167_v7  ;;  %10619 = vst [vmem:[#allocation121_spill] sm:$0xff] %v7289_v6 }
 0x1d7   :  { %1211 = vmatpush1.msra.mxu0 %v7136_v8  ;;  %1284 = vmatpush1.msra.mxu1 %v7139_v9  ;;  %10588 = vst [vmem:[#allocation91_spill] sm:$0xff] %v7164_v0  ;;  %v7174_v9 = vld [vmem:[%s10578_s7] sm:$0xff] }
 0x1d8   :  { %5016 = vmatmul.mubr.msk.f32.gmra.mxu0 %vm501_vm0, %v6877_v16  ;;  %5024 = vmatmul.mubr.msk.f32.gmra.mxu1 %vm501_vm0, %v6877_v16  ;;  %10590 = vst [vmem:[#allocation93_spill] sm:$0xff] %v7174_v9  ;;  %v7177_v8 = vld [vmem:[%s10579_s13] sm:$0xff]  ;;  %v10592_v16 = vmov 0.0  }
 0x1d9   :  { %1212 = vmatprep.subr.mxu0 %v7146_v10  ;;  %1285 = vmatprep.subr.mxu1 %v7149_v13  ;;  %10591 = vst [vmem:[#allocation94_spill] sm:$0xff] %v7177_v8  ;;  %v7184_v13 = vld [vmem:[%s10578_s7 + $0x138] sm:$0xff]  ;;  %v7205_v10 = vld [vmem:[%s10579_s13 + $0x128] sm:$0xff] }
 0x1da   :  { %1213 = vmatpush1.msra.mxu0 %v7154_v14  ;;  %1286 = vmatpush1.msra.mxu1 %v7157_v15  ;;  %10593 = vst [vmem:[#allocation95_spill] sm:$0xff] %v7184_v13  ;;  %v7187_v14 = vld [vmem:[%s10579_s13 + $0x138] sm:$0xff]  ;;  %v7192_v15 = vld [vmem:[%s10578_s7 + $0x130] sm:$0xff]  ;;  %10598 = vst [vmem:[#allocation100_spill] sm:$0xff] %v7205_v10 }
 0x1db   :  { %1214 = vmatprep.subr.mxu0 %v7164_v0  ;;  %1287 = vmatprep.subr.mxu1 %v7167_v7  ;;  %10594 = vst [vmem:[#allocation96_spill] sm:$0xff] %v7187_v14  ;;  %10595 = vst [vmem:[#allocation97_spill] sm:$0xff] %v7192_v15  ;;  %v7195_v0 = vld [vmem:[%s10579_s13 + $0x130] sm:$0xff]  ;;  %v7202_v7 = vld [vmem:[%s10578_s7 + $0x128] sm:$0xff] }
 0x1dc   :  { %880 = vmatprep.mubr.f32.mxu0 %v10592_v16  ;;  %1007 = vmatprep.mubr.f32.mxu1 %v10592_v16  ;;  %10596 = vst [vmem:[#allocation98_spill] sm:$0xff] %v7195_v0  ;;  %10597 = vst [vmem:[#allocation99_spill] sm:$0xff] %v7202_v7 }
 0x1dd   :  { %1215 = vmatpush1.msra.mxu0 %v7174_v9  ;;  %1288 = vmatpush1.msra.mxu1 %v7177_v8  ;;  %v7212_v8 = vld [vmem:[%s10578_s7 + $0x120] sm:$0xff] }
 0x1de   :  { %5017 = vmatmul.mubr.msk.f32.gmra.mxu0 %vm501_vm0, %v6886_v17  ;;  %5025 = vmatmul.mubr.msk.f32.gmra.mxu1 %vm501_vm0, %v6886_v17  ;;  %10599 = vst [vmem:[#allocation101_spill] sm:$0xff] %v7212_v8  ;;  %v7215_v9 = vld [vmem:[%s10579_s13 + $0x120] sm:$0xff]  ;;  %v7222_v17 = vld [vmem:[%s10578_s7 + $0x118] sm:$0xff] }
 0x1df   :  { %1240 = vmatprep.subr.mxu0 %v7184_v13  ;;  %1313 = vmatprep.subr.mxu1 %v7187_v14  ;;  %10600 = vst [vmem:[#allocation102_spill] sm:$0xff] %v7215_v9  ;;  %10601 = vst [vmem:[#allocation103_spill] sm:$0xff] %v7222_v17  ;;  %v7233_v14 = vld [vmem:[%s10579_s13 + $0x110] sm:$0xff]  ;;  %v7285_v13 = vld [vmem:[#allocation11 + $0xd8] sm:$0xff] }
 0x1e0   :  { %1241 = vmatpush2.msra.mxu0 %v7192_v15  ;;  %1314 = vmatpush2.msra.mxu1 %v7195_v0  ;;  %v7225_v15 = vld [vmem:[%s10579_s13 + $0x118] sm:$0xff]  ;;  %v7230_v0 = vld [vmem:[%s10578_s7 + $0x110] sm:$0xff]  ;;  %10604 = vst [vmem:[#allocation106_spill] sm:$0xff] %v7233_v14  ;;  %10618 = vst [vmem:[#allocation120_spill] sm:$0xff] %v7285_v13 }
 0x1e1   :  { %1242 = vmatprep.subr.mxu0 %v7202_v7  ;;  %1315 = vmatprep.subr.mxu1 %v7205_v10  ;;  %10602 = vst [vmem:[#allocation104_spill] sm:$0xff] %v7225_v15  ;;  %10603 = vst [vmem:[#allocation105_spill] sm:$0xff] %v7230_v0  ;;  %v7240_v10 = vld [vmem:[%s10578_s7 + $0x108] sm:$0xff] }
 0x1e2   :  { %886 = vmatprep.mubr.f32.mxu0 %v10592_v16  ;;  %1013 = vmatprep.mubr.f32.mxu1 %v10592_v16  ;;  %10605 = vst [vmem:[#allocation107_spill] sm:$0xff] %v7240_v10  ;;  %v7243_v7 = vld [vmem:[%s10579_s13 + $0x108] sm:$0xff] }
 0x1e3   :  { %1243 = vmatpush2.msra.mxu0 %v7212_v8  ;;  %1316 = vmatpush2.msra.mxu1 %v7215_v9  ;;  %10606 = vst [vmem:[#allocation108_spill] sm:$0xff] %v7243_v7  ;;  %v7248_v8 = vld [vmem:[%s10578_s7 + $0x100] sm:$0xff] }
 0x1e4   :  { %5018 = vmatmul.mubr.msk.f32.gmra.mxu0 %vm501_vm0, %v6895_v18  ;;  %5026 = vmatmul.mubr.msk.f32.gmra.mxu1 %vm501_vm0, %v6895_v18  ;;  %10607 = vst [vmem:[#allocation109_spill] sm:$0xff] %v7248_v8  ;;  %v7253_v9 = vld [vmem:[%s10579_s13 + $0x100] sm:$0xff]  ;;  %v7259_v18 = vld [vmem:[#allocation10 + $0xf8] sm:$0xff] }
 0x1e5   :  { %1244 = vmatprep.subr.mxu0 %v7222_v17  ;;  %1317 = vmatprep.subr.mxu1 %v7225_v15  ;;  %10608 = vst [vmem:[#allocation110_spill] sm:$0xff] %v7253_v9  ;;  %10609 = vst [vmem:[#allocation111_spill] sm:$0xff] %v7259_v18  ;;  %v7261_v17 = vld [vmem:[#allocation11 + $0xf8] sm:$0xff] }
 0x1e6   :  { %1245 = vmatpush2.msra.mxu0 %v7230_v0  ;;  %1318 = vmatpush2.msra.mxu1 %v7233_v14  ;;  %10610 = vst [vmem:[#allocation112_spill] sm:$0xff] %v7261_v17  ;;  %v7265_v0 = vld [vmem:[#allocation10 + $0xf0] sm:$0xff]  ;;  %v7283_v15 = vld [vmem:[#allocation10 + $0xd8] sm:$0xff] }
 0x1e7   :  { %1246 = vmatprep.subr.mxu0 %v7240_v10  ;;  %1319 = vmatprep.subr.mxu1 %v7243_v7  ;;  %10611 = vst [vmem:[#allocation113_spill] sm:$0xff] %v7265_v0  ;;  %v7267_v14 = vld [vmem:[#allocation11 + $0xf0] sm:$0xff]  ;;  %v7271_v7 = vld [vmem:[#allocation10 + $0xe8] sm:$0xff]  ;;  %v7277_v10 = vld [vmem:[#allocation10 + $0xe0] sm:$0xff] }
 0x1e8   :  { %1247 = vmatpush2.msra.mxu0 %v7248_v8  ;;  %1248 = vmatprep.mubr.f32.mxu0 %v10592_v16  ;;  %10612 = vst [vmem:[#allocation114_spill] sm:$0xff] %v7267_v14  ;;  %10613 = vst [vmem:[#allocation115_spill] sm:$0xff] %v7271_v7  ;;  %v7273_v8 = vld [vmem:[#allocation11 + $0xe8] sm:$0xff] }
 0x1e9   :  { %1320 = vmatpush2.msra.mxu1 %v7253_v9  ;;  %1321 = vmatprep.mubr.f32.mxu1 %v10592_v16  ;;  %10614 = vst [vmem:[#allocation116_spill] sm:$0xff] %v7273_v8  ;;  %10615 = vst [vmem:[#allocation117_spill] sm:$0xff] %v7277_v10  ;;  %v7279_v9 = vld [vmem:[#allocation11 + $0xe0] sm:$0xff] }
 0x1ea   :  { %1249 = vmatmul.mubr.f32.vlgmr.msra.gmra.mxu0 %v10592_v16  ;;  %1322 = vmatmul.mubr.f32.vlgmr.msra.gmra.mxu1 %v10592_v16  ;;  %10616 = vst [vmem:[#allocation118_spill] sm:$0xff] %v7279_v9  ;;  %10617 = vst [vmem:[#allocation119_spill] sm:$0xff] %v7283_v15 }
 0x1eb   :  { %1330 = vmatprep.subr.mxu0 %v7259_v18  ;;  %1403 = vmatprep.subr.mxu1 %v7261_v17  ;;  %v7291_v18 = vld [vmem:[#allocation11 + $0xd0] sm:$0xff]  ;;  %v7295_v17 = vld [vmem:[#allocation10 + $0xc8] sm:$0xff] }
 0x1ec   :  { %1331 = vmatpush1.msra.mxu0 %v7265_v0  ;;  %1404 = vmatpush1.msra.mxu1 %v7267_v14  ;;  %10620 = vst [vmem:[#allocation122_spill] sm:$0xff] %v7291_v18  ;;  %10621 = vst [vmem:[#allocation123_spill] sm:$0xff] %v7295_v17  ;;  %v7297_v0 = vld [vmem:[#allocation11 + $0xc8] sm:$0xff]  ;;  %v7301_v14 = vld [vmem:[#allocation10 + $0xc0] sm:$0xff] }
 0x1ed   :  { %1332 = vmatprep.subr.mxu0 %v7271_v7  ;;  %1405 = vmatprep.subr.mxu1 %v7273_v8  ;;  %10622 = vst [vmem:[#allocation124_spill] sm:$0xff] %v7297_v0  ;;  %10623 = vst [vmem:[#allocation125_spill] sm:$0xff] %v7301_v14  ;;  %v7303_v7 = vld [vmem:[#allocation11 + $0xc0] sm:$0xff]  ;;  %v7307_v8 = vld [vmem:[#allocation10 + $0xb8] sm:$0xff] }
 0x1ee   :  { %1333 = vmatpush1.msra.mxu0 %v7277_v10  ;;  %1406 = vmatpush1.msra.mxu1 %v7279_v9  ;;  %10624 = vst [vmem:[#allocation126_spill] sm:$0xff] %v7303_v7  ;;  %10625 = vst [vmem:[#allocation127_spill] sm:$0xff] %v7307_v8  ;;  %v7309_v10 = vld [vmem:[#allocation11 + $0xb8] sm:$0xff]  ;;  %v7313_v9 = vld [vmem:[#allocation10 + $0xb0] sm:$0xff] }
 0x1ef   :  { %1334 = vmatprep.subr.mxu0 %v7283_v15  ;;  %1407 = vmatprep.subr.mxu1 %v7285_v13  ;;  %10626 = vst [vmem:[#allocation128_spill] sm:$0xff] %v7309_v10  ;;  %10627 = vst [vmem:[#allocation129_spill] sm:$0xff] %v7313_v9  ;;  %v7315_v15 = vld [vmem:[#allocation11 + $0xb0] sm:$0xff]  ;;  %v7319_v13 = vld [vmem:[#allocation10 + $0xa8] sm:$0xff] }
 0x1f0   :  { %1335 = vmatpush1.msra.mxu0 %v7289_v6  ;;  %1408 = vmatpush1.msra.mxu1 %v7291_v18  ;;  %10628 = vst [vmem:[#allocation130_spill] sm:$0xff] %v7315_v15  ;;  %10629 = vst [vmem:[#allocation131_spill] sm:$0xff] %v7319_v13  ;;  %v7321_v6 = vld [vmem:[#allocation11 + $0xa8] sm:$0xff]  ;;  %v7325_v18 = vld [vmem:[#allocation10 + $0xa0] sm:$0xff] }
 0x1f1   :  { %1336 = vmatprep.subr.mxu0 %v7295_v17  ;;  %1409 = vmatprep.subr.mxu1 %v7297_v0  ;;  %10630 = vst [vmem:[#allocation132_spill] sm:$0xff] %v7321_v6  ;;  %10631 = vst [vmem:[#allocation133_spill] sm:$0xff] %v7325_v18  ;;  %v7327_v17 = vld [vmem:[#allocation11 + $0xa0] sm:$0xff]  ;;  %v7331_v0 = vld [vmem:[#allocation10 + $0x98] sm:$0xff] }
 0x1f2   :  { %1337 = vmatpush1.msra.mxu0 %v7301_v14  ;;  %1410 = vmatpush1.msra.mxu1 %v7303_v7  ;;  %10632 = vst [vmem:[#allocation134_spill] sm:$0xff] %v7327_v17  ;;  %10633 = vst [vmem:[#allocation135_spill] sm:$0xff] %v7331_v0  ;;  %v7333_v14 = vld [vmem:[#allocation11 + $0x98] sm:$0xff]  ;;  %v7337_v7 = vld [vmem:[#allocation10 + $0x90] sm:$0xff] }
 0x1f3   :  { %1338 = vmatprep.subr.mxu0 %v7307_v8  ;;  %1411 = vmatprep.subr.mxu1 %v7309_v10  ;;  %10634 = vst [vmem:[#allocation136_spill] sm:$0xff] %v7333_v14  ;;  %10635 = vst [vmem:[#allocation137_spill] sm:$0xff] %v7337_v7  ;;  %v7339_v8 = vld [vmem:[#allocation11 + $0x90] sm:$0xff]  ;;  %v7343_v10 = vld [vmem:[#allocation10 + $0x88] sm:$0xff] }
 0x1f4   :  { %1339 = vmatpush1.msra.mxu0 %v7313_v9  ;;  %1412 = vmatpush1.msra.mxu1 %v7315_v15  ;;  %10636 = vst [vmem:[#allocation138_spill] sm:$0xff] %v7339_v8  ;;  %10637 = vst [vmem:[#allocation139_spill] sm:$0xff] %v7343_v10  ;;  %v7345_v9 = vld [vmem:[#allocation11 + $0x88] sm:$0xff]  ;;  %v7349_v15 = vld [vmem:[#allocation10 + $0x80] sm:$0xff] }
 0x1f5   :  { %1340 = vmatprep.subr.mxu0 %v7319_v13  ;;  %1413 = vmatprep.subr.mxu1 %v7321_v6  ;;  %10638 = vst [vmem:[#allocation140_spill] sm:$0xff] %v7345_v9  ;;  %10639 = vst [vmem:[#allocation141_spill] sm:$0xff] %v7349_v15  ;;  %v7351_v13 = vld [vmem:[#allocation11 + $0x80] sm:$0xff]  ;;  %v7355_v6 = vld [vmem:[#allocation10 + $0x78] sm:$0xff] }
 0x1f6   :  { %1341 = vmatpush1.msra.mxu0 %v7325_v18  ;;  %1414 = vmatpush1.msra.mxu1 %v7327_v17  ;;  %10640 = vst [vmem:[#allocation142_spill] sm:$0xff] %v7351_v13  ;;  %10641 = vst [vmem:[#allocation143_spill] sm:$0xff] %v7355_v6  ;;  %v7357_v18 = vld [vmem:[#allocation11 + $0x78] sm:$0xff]  ;;  %v7361_v17 = vld [vmem:[#allocation10 + $0x70] sm:$0xff] }
 0x1f7   :  { %1342 = vmatprep.subr.mxu0 %v7331_v0  ;;  %1415 = vmatprep.subr.mxu1 %v7333_v14  ;;  %10642 = vst [vmem:[#allocation144_spill] sm:$0xff] %v7357_v18  ;;  %10643 = vst [vmem:[#allocation145_spill] sm:$0xff] %v7361_v17  ;;  %v7363_v0 = vld [vmem:[#allocation11 + $0x70] sm:$0xff]  ;;  %v7367_v14 = vld [vmem:[#allocation10 + $0x68] sm:$0xff] }
 0x1f8   :  { %1343 = vmatpush1.msra.mxu0 %v7337_v7  ;;  %1416 = vmatpush1.msra.mxu1 %v7339_v8  ;;  %10644 = vst [vmem:[#allocation146_spill] sm:$0xff] %v7363_v0  ;;  %10645 = vst [vmem:[#allocation147_spill] sm:$0xff] %v7367_v14  ;;  %v7369_v7 = vld [vmem:[#allocation11 + $0x68] sm:$0xff]  ;;  %v7373_v8 = vld [vmem:[#allocation10 + $0x60] sm:$0xff] }
 0x1f9   :  { %1344 = vmatprep.subr.mxu0 %v7343_v10  ;;  %1417 = vmatprep.subr.mxu1 %v7345_v9  ;;  %10646 = vst [vmem:[#allocation148_spill] sm:$0xff] %v7369_v7  ;;  %10647 = vst [vmem:[#allocation149_spill] sm:$0xff] %v7373_v8  ;;  %v7375_v10 = vld [vmem:[#allocation11 + $0x60] sm:$0xff]  ;;  %v7379_v9 = vld [vmem:[#allocation10 + $0x58] sm:$0xff] }
 0x1fa   :  { %1345 = vmatpush1.msra.mxu0 %v7349_v15  ;;  %1418 = vmatpush1.msra.mxu1 %v7351_v13  ;;  %10648 = vst [vmem:[#allocation150_spill] sm:$0xff] %v7375_v10  ;;  %10649 = vst [vmem:[#allocation151_spill] sm:$0xff] %v7379_v9  ;;  %v7381_v15 = vld [vmem:[#allocation11 + $0x58] sm:$0xff]  ;;  %v7385_v13 = vld [vmem:[#allocation10 + $0x50] sm:$0xff] }
 0x1fb   :  { %1346 = vmatprep.subr.mxu0 %v7355_v6  ;;  %1419 = vmatprep.subr.mxu1 %v7357_v18  ;;  %10650 = vst [vmem:[#allocation152_spill] sm:$0xff] %v7381_v15  ;;  %10651 = vst [vmem:[#allocation153_spill] sm:$0xff] %v7385_v13  ;;  %v7387_v6 = vld [vmem:[#allocation11 + $0x50] sm:$0xff]  ;;  %v7391_v18 = vld [vmem:[#allocation10 + $0x48] sm:$0xff] }
 0x1fc   :  { %1347 = vmatpush1.msra.mxu0 %v7361_v17  ;;  %1420 = vmatpush1.msra.mxu1 %v7363_v0  ;;  %10652 = vst [vmem:[#allocation154_spill] sm:$0xff] %v7387_v6  ;;  %10653 = vst [vmem:[#allocation155_spill] sm:$0xff] %v7391_v18  ;;  %v7393_v17 = vld [vmem:[#allocation11 + $0x48] sm:$0xff]  ;;  %v7397_v0 = vld [vmem:[#allocation10 + $0x40] sm:$0xff] }
 0x1fd   :  { %1348 = vmatprep.subr.mxu0 %v7367_v14  ;;  %1421 = vmatprep.subr.mxu1 %v7369_v7  ;;  %10654 = vst [vmem:[#allocation156_spill] sm:$0xff] %v7393_v17  ;;  %10655 = vst [vmem:[#allocation157_spill] sm:$0xff] %v7397_v0  ;;  %v7399_v14 = vld [vmem:[#allocation11 + $0x40] sm:$0xff]  ;;  %v7403_v7 = vld [vmem:[#allocation10 + $0x38] sm:$0xff] }
 0x1fe   :  { %1349 = vmatpush1.msra.mxu0 %v7373_v8  ;;  %1422 = vmatpush1.msra.mxu1 %v7375_v10  ;;  %10656 = vst [vmem:[#allocation158_spill] sm:$0xff] %v7399_v14  ;;  %10657 = vst [vmem:[#allocation159_spill] sm:$0xff] %v7403_v7  ;;  %v7405_v8 = vld [vmem:[#allocation11 + $0x38] sm:$0xff]  ;;  %v7409_v10 = vld [vmem:[#allocation10 + $0x30] sm:$0xff] }
 0x1ff   :  { %1350 = vmatprep.subr.mxu0 %v7379_v9  ;;  %1423 = vmatprep.subr.mxu1 %v7381_v15  ;;  %10658 = vst [vmem:[#allocation160_spill] sm:$0xff] %v7405_v8  ;;  %10659 = vst [vmem:[#allocation161_spill] sm:$0xff] %v7409_v10  ;;  %v7411_v9 = vld [vmem:[#allocation11 + $0x30] sm:$0xff]  ;;  %v7415_v15 = vld [vmem:[#allocation10 + $0x28] sm:$0xff] }
 0x200   :  { %1351 = vmatpush1.msra.mxu0 %v7385_v13  ;;  %1424 = vmatpush1.msra.mxu1 %v7387_v6  ;;  %10660 = vst [vmem:[#allocation162_spill] sm:$0xff] %v7411_v9  ;;  %10661 = vst [vmem:[#allocation163_spill] sm:$0xff] %v7415_v15  ;;  %v7417_v13 = vld [vmem:[#allocation11 + $0x28] sm:$0xff]  ;;  %v7421_v6 = vld [vmem:[#allocation10 + $0x20] sm:$0xff] }
 0x201   :  { %1352 = vmatprep.subr.mxu0 %v7391_v18  ;;  %1425 = vmatprep.subr.mxu1 %v7393_v17  ;;  %10662 = vst [vmem:[#allocation164_spill] sm:$0xff] %v7417_v13  ;;  %10663 = vst [vmem:[#allocation165_spill] sm:$0xff] %v7421_v6  ;;  %v7423_v18 = vld [vmem:[#allocation11 + $0x20] sm:$0xff]  ;;  %v7427_v17 = vld [vmem:[#allocation10 + $0x18] sm:$0xff] }
 0x202   :  { %1353 = vmatpush1.msra.mxu0 %v7397_v0  ;;  %1426 = vmatpush1.msra.mxu1 %v7399_v14  ;;  %10664 = vst [vmem:[#allocation166_spill] sm:$0xff] %v7423_v18  ;;  %10665 = vst [vmem:[#allocation167_spill] sm:$0xff] %v7427_v17  ;;  %v7429_v0 = vld [vmem:[#allocation11 + $0x18] sm:$0xff]  ;;  %v7433_v14 = vld [vmem:[#allocation10 + $0x10] sm:$0xff] }
 0x203   :  { %1354 = vmatprep.subr.mxu0 %v7403_v7  ;;  %1427 = vmatprep.subr.mxu1 %v7405_v8  ;;  %10666 = vst [vmem:[#allocation168_spill] sm:$0xff] %v7429_v0  ;;  %10667 = vst [vmem:[#allocation169_spill] sm:$0xff] %v7433_v14  ;;  %v7435_v7 = vld [vmem:[#allocation11 + $0x10] sm:$0xff]  ;;  %v7439_v8 = vld [vmem:[#allocation10 + $0x8] sm:$0xff] }
 0x204   :  { %1355 = vmatpush1.msra.mxu0 %v7409_v10  ;;  %1428 = vmatpush1.msra.mxu1 %v7411_v9  ;;  %10668 = vst [vmem:[#allocation170_spill] sm:$0xff] %v7435_v7  ;;  %10669 = vst [vmem:[#allocation171_spill] sm:$0xff] %v7439_v8  ;;  %v7441_v10 = vld [vmem:[#allocation11 + $0x8] sm:$0xff]  ;;  %v7445_v9 = vld [vmem:[#allocation10] sm:$0xff] }
 0x205   :  { %1356 = vmatprep.subr.mxu0 %v7415_v15  ;;  %1429 = vmatprep.subr.mxu1 %v7417_v13  ;;  %10670 = vst [vmem:[#allocation172_spill] sm:$0xff] %v7441_v10  ;;  %10671 = vst [vmem:[#allocation173_spill] sm:$0xff] %v7445_v9  ;;  %v7447_v15 = vld [vmem:[#allocation11] sm:$0xff]  ;;  %v7451_v13 = vld [vmem:[#allocation10 + $0x138] sm:$0xff] }
 0x206   :  { %1357 = vmatpush1.msra.mxu0 %v7421_v6  ;;  %1430 = vmatpush1.msra.mxu1 %v7423_v18  ;;  %10672 = vst [vmem:[#allocation174_spill] sm:$0xff] %v7447_v15  ;;  %10673 = vst [vmem:[#allocation175_spill] sm:$0xff] %v7451_v13  ;;  %v7453_v6 = vld [vmem:[#allocation11 + $0x138] sm:$0xff]  ;;  %v7457_v18 = vld [vmem:[#allocation10 + $0x130] sm:$0xff] }
 0x207   :  { %1358 = vmatprep.subr.mxu0 %v7427_v17  ;;  %1431 = vmatprep.subr.mxu1 %v7429_v0  ;;  %10674 = vst [vmem:[#allocation176_spill] sm:$0xff] %v7453_v6  ;;  %10675 = vst [vmem:[#allocation177_spill] sm:$0xff] %v7457_v18  ;;  %v7459_v17 = vld [vmem:[#allocation11 + $0x130] sm:$0xff]  ;;  %v7463_v0 = vld [vmem:[#allocation10 + $0x128] sm:$0xff] }
 0x208   :  { %1359 = vmatpush1.msra.mxu0 %v7433_v14  ;;  %1432 = vmatpush1.msra.mxu1 %v7435_v7  ;;  %10676 = vst [vmem:[#allocation178_spill] sm:$0xff] %v7459_v17  ;;  %v7465_v14 = vld [vmem:[#allocation11 + $0x128] sm:$0xff]  ;;  %v7469_v7 = vld [vmem:[#allocation10 + $0x120] sm:$0xff] }
 0x209   :  { %1360 = vmatprep.subr.mxu0 %v7439_v8  ;;  %1433 = vmatprep.subr.mxu1 %v7441_v10  ;;  %10677 = vst [vmem:[#allocation179_spill] sm:$0xff] %v7465_v14  ;;  %v7471_v8 = vld [vmem:[#allocation11 + $0x120] sm:$0xff]  ;;  %v7475_v10 = vld [vmem:[#allocation10 + $0x118] sm:$0xff] }
 0x20a   :  { %1361 = vmatpush1.msra.mxu0 %v7445_v9  ;;  %1434 = vmatpush1.msra.mxu1 %v7447_v15  ;;  %v7477_v9 = vld [vmem:[#allocation11 + $0x118] sm:$0xff]  ;;  %v7481_v15 = vld [vmem:[#allocation10 + $0x110] sm:$0xff] }
 0x20b   :  { %1386 = vmatprep.subr.mxu0 %v7451_v13  ;;  %1459 = vmatprep.subr.mxu1 %v7453_v6  ;;  %v7483_v13 = vld [vmem:[#allocation11 + $0x110] sm:$0xff]  ;;  %v7487_v6 = vld [vmem:[#allocation10 + $0x108] sm:$0xff] }
 0x20c   :  { %1387 = vmatpush2.msra.mxu0 %v7457_v18  ;;  %1460 = vmatpush2.msra.mxu1 %v7459_v17  ;;  %v7489_v18 = vld [vmem:[#allocation11 + $0x108] sm:$0xff]  ;;  %v7493_v17 = vld [vmem:[#allocation10 + $0x100] sm:$0xff] }
 0x20d   :  { %1388 = vmatprep.subr.mxu0 %v7463_v0  ;;  %1461 = vmatprep.subr.mxu1 %v7465_v14  ;;  %v7497_v14 = vld [vmem:[#allocation11 + $0x100] sm:$0xff] }
 0x20e   :  { %1389 = vmatpush2.msra.mxu0 %v7469_v7  ;;  %1462 = vmatpush2.msra.mxu1 %v7471_v8 }
 0x20f   :  { %1390 = vmatprep.subr.mxu0 %v7475_v10  ;;  %1463 = vmatprep.subr.mxu1 %v7477_v9 }
 0x210   :  { %1391 = vmatpush2.msra.mxu0 %v7481_v15  ;;  %1464 = vmatpush2.msra.mxu1 %v7483_v13 }
 0x211   :  { %1392 = vmatprep.subr.mxu0 %v7487_v6  ;;  %1465 = vmatprep.subr.mxu1 %v7489_v18 }
 0x212   :  { %1393 = vmatpush2.msra.mxu0 %v7493_v17  ;;  %1394 = vmatprep.mubr.f32.mxu0 %v10592_v16 }
 0x213   :  { %1466 = vmatpush2.msra.mxu1 %v7497_v14  ;;  %1467 = vmatprep.mubr.f32.mxu1 %v10592_v16 }
 0x214   :  { %1395 = vmatmul.mubr.f32.vlgmr.msra.gmra.mxu0 %v10592_v16  ;;  %1468 = vmatmul.mubr.f32.vlgmr.msra.gmra.mxu1 %v10592_v16 }
 0x215   :  { %1527 = vmatprep.subr.mxu0 %v6836_v11  ;;  %1600 = vmatprep.subr.mxu1 %v6839_v12  ;;  %v10678_v11 = vld [vmem:[#allocation83_spill] sm:$0xff]  ;;  %v10679_v12 = vld [vmem:[#allocation84_spill] sm:$0xff] }
 0x216   :  { %1528 = vmatpush1.msra.mxu0 %v6904_v19  ;;  %1601 = vmatpush1.msra.mxu1 %v6907_v20  ;;  %v10680_v19 = vld [vmem:[#allocation85_spill] sm:$0xff]  ;;  %v10681_v20 = vld [vmem:[#allocation86_spill] sm:$0xff] }
 0x217   :  { %1529 = vmatprep.subr.mxu0 %v6910_v21  ;;  %1602 = vmatprep.subr.mxu1 %v6913_v22  ;;  %v10682_v21 = vld [vmem:[#allocation87_spill] sm:$0xff]  ;;  %v10683_v22 = vld [vmem:[#allocation88_spill] sm:$0xff] }
 0x218   :  { %1530 = vmatpush1.msra.mxu0 %v6918_v23  ;;  %1603 = vmatpush1.msra.mxu1 %v6921_v24  ;;  %v10684_v23 = vld [vmem:[#allocation89_spill] sm:$0xff]  ;;  %v10685_v24 = vld [vmem:[#allocation90_spill] sm:$0xff] }
 0x219   :  { %1531 = vmatprep.subr.mxu0 %v6926_v25  ;;  %1604 = vmatprep.subr.mxu1 %v6929_v26  ;;  %v10686_v25 = vld [vmem:[#allocation91_spill] sm:$0xff]  ;;  %v10687_v26 = vld [vmem:[#allocation92_spill] sm:$0xff] }
 0x21a   :  { %1532 = vmatpush1.msra.mxu0 %v6934_v27  ;;  %1605 = vmatpush1.msra.mxu1 %v6937_v28  ;;  %v10688_v27 = vld [vmem:[#allocation93_spill] sm:$0xff]  ;;  %v10689_v28 = vld [vmem:[#allocation94_spill] sm:$0xff] }
 0x21b   :  { %1533 = vmatprep.subr.mxu0 %v6942_v29  ;;  %1606 = vmatprep.subr.mxu1 %v6945_v30  ;;  %v10690_v29 = vld [vmem:[#allocation95_spill] sm:$0xff]  ;;  %v10691_v30 = vld [vmem:[#allocation96_spill] sm:$0xff] }
 0x21c   :  { %1534 = vmatpush1.msra.mxu0 %v6950_v31  ;;  %1607 = vmatpush1.msra.mxu1 %v6953_v32  ;;  %v10692_v31 = vld [vmem:[#allocation97_spill] sm:$0xff]  ;;  %v10693_v32 = vld [vmem:[#allocation98_spill] sm:$0xff] }
 0x21d   :  { %1535 = vmatprep.subr.mxu0 %v6958_v33  ;;  %1608 = vmatprep.subr.mxu1 %v6961_v34  ;;  %v10694_v33 = vld [vmem:[#allocation99_spill] sm:$0xff]  ;;  %v10695_v34 = vld [vmem:[#allocation100_spill] sm:$0xff] }
 0x21e   :  { %1536 = vmatpush1.msra.mxu0 %v6966_v35  ;;  %1609 = vmatpush1.msra.mxu1 %v6969_v36  ;;  %v10696_v35 = vld [vmem:[#allocation101_spill] sm:$0xff]  ;;  %v10697_v36 = vld [vmem:[#allocation102_spill] sm:$0xff] }
 0x21f   :  { %1537 = vmatprep.subr.mxu0 %v6974_v37  ;;  %1610 = vmatprep.subr.mxu1 %v6977_v38  ;;  %v10698_v37 = vld [vmem:[#allocation103_spill] sm:$0xff]  ;;  %v10699_v38 = vld [vmem:[#allocation104_spill] sm:$0xff] }
 0x220   :  { %1538 = vmatpush1.msra.mxu0 %v6984_v39  ;;  %1611 = vmatpush1.msra.mxu1 %v6987_v40  ;;  %v10700_v39 = vld [vmem:[#allocation105_spill] sm:$0xff]  ;;  %v10701_v40 = vld [vmem:[#allocation106_spill] sm:$0xff] }
 0x221   :  { %1539 = vmatprep.subr.mxu0 %v6994_v41  ;;  %1612 = vmatprep.subr.mxu1 %v6997_v42  ;;  %v10702_v41 = vld [vmem:[#allocation107_spill] sm:$0xff]  ;;  %v10703_v42 = vld [vmem:[#allocation108_spill] sm:$0xff] }
 0x222   :  { %1540 = vmatpush1.msra.mxu0 %v7002_v43  ;;  %1613 = vmatpush1.msra.mxu1 %v7005_v44  ;;  %v10704_v43 = vld [vmem:[#allocation109_spill] sm:$0xff]  ;;  %v10705_v44 = vld [vmem:[#allocation110_spill] sm:$0xff] }
 0x223   :  { %1541 = vmatprep.subr.mxu0 %v7012_v45  ;;  %1614 = vmatprep.subr.mxu1 %v7015_v46  ;;  %v10706_v45 = vld [vmem:[#allocation111_spill] sm:$0xff]  ;;  %v10707_v46 = vld [vmem:[#allocation112_spill] sm:$0xff] }
 0x224   :  { %1542 = vmatpush1.msra.mxu0 %v7022_v47  ;;  %1615 = vmatpush1.msra.mxu1 %v7025_v48  ;;  %v491_v47 = vlaneseq }
 0x225   :  { %1543 = vmatprep.subr.mxu0 %v7032_v49  ;;  %1616 = vmatprep.subr.mxu1 %v7035_v50  ;;  %v489_v50 = vld [vmem:[#allocation13] sm:$0x3] }
 0x226   :  { %1544 = vmatpush1.msra.mxu0 %v7040_v51  ;;  %1617 = vmatpush1.msra.mxu1 %v7043_v52  ;;  %v7589_v48 = vshrl.u32 %v491_v47, 7  ;;  %v641_v52 = vld [vmem:[#allocation14] sm:$0x3] }
 0x227   :  { %1545 = vmatprep.subr.mxu0 %v7050_v53  ;;  %1618 = vmatprep.subr.mxu1 %v7053_v54 }
 0x228   :  { %1546 = vmatpush1.msra.mxu0 %v7060_v55  ;;  %1619 = vmatpush1.msra.mxu1 %v7063_v56  ;;  %10708 = vst [vmem:[#allocation83_spill] sm:$0xff] %v7589_v48  ;;  %v7592_v49 = vsub.s32 0, %v7589_v48  ;;  %v7599_v54 = vsub.s32 1, %v7589_v48 }
 0x229   :  { %1547 = vmatprep.subr.mxu0 %v7070_v57  ;;  %1620 = vmatprep.subr.mxu1 %v7073_v58 }
 0x22a   :  { %1548 = vmatpush1.msra.mxu0 %v7078_v59  ;;  %1621 = vmatpush1.msra.mxu1 %v7081_v60  ;;  %10709 = vst [vmem:[#allocation84_spill] sm:$0xff] %v7592_v49  ;;  %10710 = vst [vmem:[#allocation85_spill] sm:$0xff] %v7599_v54  ;;  %v7606_v57 = vrot.slane %v489_v50, %v7592_v49  ;;  %v7609_v58 = vrot.slane %v641_v52, %v7592_v49 }
 0x22b   :  { %1549 = vmatprep.subr.mxu0 %v7088_v61  ;;  %1622 = vmatprep.subr.mxu1 %v7091_v62  ;;  %v7612_v61 = vrot.slane %v489_v50, %v7599_v54  ;;  %v7615_v62 = vrot.slane %v641_v52, %v7599_v54 }
 0x22c   :  { %1550 = vmatpush1.msra.mxu0 %v7098_v63  ;;  %1623 = vmatpush1.msra.mxu1 %v7101_v1 }
 0x22d   :  { %1551 = vmatprep.subr.mxu0 %v7108_v2  ;;  %1624 = vmatprep.subr.mxu1 %v7111_v3 }
 0x22e   :  { %1552 = vmatpush1.msra.mxu0 %v7116_v4  ;;  %1625 = vmatpush1.msra.mxu1 %v7119_v5 }
 0x22f   :  { %1553 = vmatprep.subr.mxu0 %v10678_v11  ;;  %1626 = vmatprep.subr.mxu1 %v10679_v12 }
 0x230   :  { %1554 = vmatpush1.msra.mxu0 %v10680_v19  ;;  %1627 = vmatpush1.msra.mxu1 %v10681_v20 }
 0x231   :  { %1555 = vmatprep.subr.mxu0 %v10682_v21  ;;  %1628 = vmatprep.subr.mxu1 %v10683_v22 }
 0x232   :  { %1556 = vmatpush1.msra.mxu0 %v10684_v23  ;;  %1629 = vmatpush1.msra.mxu1 %v10685_v24 }
 0x233   :  { %1557 = vmatprep.subr.mxu0 %v10686_v25  ;;  %1630 = vmatprep.subr.mxu1 %v10687_v26 }
 0x234   :  { %1558 = vmatpush1.msra.mxu0 %v10688_v27  ;;  %1631 = vmatpush1.msra.mxu1 %v10689_v28 }
 0x235   :  { %1583 = vmatprep.subr.mxu0 %v10690_v29  ;;  %1656 = vmatprep.subr.mxu1 %v10691_v30 }
 0x236   :  { %1584 = vmatpush2.msra.mxu0 %v10692_v31  ;;  %1657 = vmatpush2.msra.mxu1 %v10693_v32 }
 0x237   :  { %1585 = vmatprep.subr.mxu0 %v10694_v33  ;;  %1658 = vmatprep.subr.mxu1 %v10695_v34 }
 0x238   :  { %1586 = vmatpush2.msra.mxu0 %v10696_v35  ;;  %1659 = vmatpush2.msra.mxu1 %v10697_v36 }
 0x239   :  { %1587 = vmatprep.subr.mxu0 %v10698_v37  ;;  %1660 = vmatprep.subr.mxu1 %v10699_v38 }
 0x23a   :  { %1588 = vmatpush2.msra.mxu0 %v10700_v39  ;;  %1661 = vmatpush2.msra.mxu1 %v10701_v40 }
 0x23b   :  { %1589 = vmatprep.subr.mxu0 %v10702_v41  ;;  %1662 = vmatprep.subr.mxu1 %v10703_v42 }
 0x23c   :  { %1590 = vmatpush2.msra.mxu0 %v10704_v43  ;;  %1663 = vmatpush2.msra.mxu1 %v10705_v44 }
 0x23d   :  { %1673 = vmatprep.subr.mxu0 %v10706_v45  ;;  %1746 = vmatprep.subr.mxu1 %v10707_v46 }
 0x253   :  { %v7594_v51 = vpop.f32.mrf.mxu0  ;;  %v7596_v53 = vpop.f32.mrf.mxu1 }
 0x255   :  { %v7601_v55 = vpop.f32.mrf.mxu0  ;;  %v7603_v56 = vpop.f32.mrf.mxu1 }
 0x257   :  { %v598_v59 = vpop.f32.mrf.mxu0  ;;  %v725_v60 = vpop.f32.mrf.mxu1 }
 0x258   :  { %v7618_v63 = vadd.f32 %v598_v59, %v7606_v57  ;;  %v7621_v1 = vadd.f32 %v725_v60, %v7609_v58 }
 0x259   :  { %v600_v2 = vpop.f32.mrf.mxu0  ;;  %v727_v3 = vpop.f32.mrf.mxu1 }
 0x25a   :  { %v7624_v4 = vadd.f32 %v600_v2, %v7612_v61  ;;  %v7627_v5 = vadd.f32 %v727_v3, %v7615_v62 }
 0x25b   :  { %v604_v11 = vpop.f32.mrf.mxu0  ;;  %v731_v12 = vpop.f32.mrf.mxu1 }
 0x25c   :  { %v7630_v19 = vadd.f32 %v604_v11, %v7606_v57  ;;  %v7633_v20 = vadd.f32 %v731_v12, %v7609_v58 }
 0x25d   :  { %v606_v21 = vpop.f32.mrf.mxu0  ;;  %v733_v22 = vpop.f32.mrf.mxu1 }
 0x25e   :  { %10711 = vst [vmem:[#allocation86_spill] sm:$0xff] %v7630_v19  ;;  %10712 = vst [vmem:[#allocation87_spill] sm:$0xff] %v7633_v20  ;;  %v7636_v23 = vadd.f32 %v606_v21, %v7612_v61  ;;  %v7639_v24 = vadd.f32 %v733_v22, %v7615_v62  ;;  %v8124_v20 = vld [vmem:[%s10578_s7 + $0x28] sm:$0xff] }
 0x25f   :  { %v610_v25 = vpop.f32.mrf.mxu0  ;;  %v737_v26 = vpop.f32.mrf.mxu1  ;;  %v8128_v19 = vld [vmem:[%s10579_s13 + $0x28] sm:$0xff] }
 0x260   :  { %10713 = vst [vmem:[#allocation88_spill] sm:$0xff] %v7636_v23  ;;  %10714 = vst [vmem:[#allocation89_spill] sm:$0xff] %v7639_v24  ;;  %v7642_v27 = vadd.f32 %v610_v25, %v7606_v57  ;;  %v7645_v28 = vadd.f32 %v737_v26, %v7609_v58  ;;  %v8116_v24 = vld [vmem:[%s10578_s7 + $0x30] sm:$0xff] }
 0x261   :  { %v612_v29 = vpop.f32.mrf.mxu0  ;;  %v739_v30 = vpop.f32.mrf.mxu1  ;;  %v8120_v23 = vld [vmem:[%s10579_s13 + $0x30] sm:$0xff] }
 0x262   :  { %10715 = vst [vmem:[#allocation90_spill] sm:$0xff] %v7642_v27  ;;  %10716 = vst [vmem:[#allocation91_spill] sm:$0xff] %v7645_v28  ;;  %v7648_v31 = vadd.f32 %v612_v29, %v7612_v61  ;;  %v7651_v32 = vadd.f32 %v739_v30, %v7615_v62  ;;  %v8092_v28 = vld [vmem:[%s10578_s7 + $0x48] sm:$0xff] }
 0x263   :  { %v616_v33 = vpop.f32.mrf.mxu0  ;;  %v743_v34 = vpop.f32.mrf.mxu1  ;;  %v8096_v27 = vld [vmem:[%s10579_s13 + $0x48] sm:$0xff] }
 0x264   :  { %10717 = vst [vmem:[#allocation92_spill] sm:$0xff] %v7648_v31  ;;  %10718 = vst [vmem:[#allocation93_spill] sm:$0xff] %v7651_v32  ;;  %v7654_v35 = vadd.f32 %v616_v33, %v7606_v57  ;;  %v7657_v36 = vadd.f32 %v743_v34, %v7609_v58  ;;  %v8084_v32 = vld [vmem:[%s10578_s7 + $0x50] sm:$0xff] }
 0x265   :  { %v618_v37 = vpop.f32.mrf.mxu0  ;;  %v745_v38 = vpop.f32.mrf.mxu1  ;;  %v8088_v31 = vld [vmem:[%s10579_s13 + $0x50] sm:$0xff] }
 0x266   :  { %10719 = vst [vmem:[#allocation94_spill] sm:$0xff] %v7654_v35  ;;  %10720 = vst [vmem:[#allocation95_spill] sm:$0xff] %v7657_v36  ;;  %v7660_v39 = vadd.f32 %v618_v37, %v7612_v61  ;;  %v7663_v40 = vadd.f32 %v745_v38, %v7615_v62 }
 0x267   :  { %v622_v41 = vpop.f32.mrf.mxu0  ;;  %v749_v42 = vpop.f32.mrf.mxu1 }
 0x268   :  { %10721 = vst [vmem:[#allocation96_spill] sm:$0xff] %v7660_v39  ;;  %10722 = vst [vmem:[#allocation97_spill] sm:$0xff] %v7663_v40  ;;  %v7666_v43 = vadd.f32 %v622_v41, %v7606_v57  ;;  %v7669_v44 = vadd.f32 %v749_v42, %v7609_v58  ;;  %v768_v42 = vld [vmem:[#allocation16] sm:$0x3] }
 0x269   :  { %v624_v45 = vpop.f32.mrf.mxu0  ;;  %v751_v46 = vpop.f32.mrf.mxu1 }
 0x26a   :  { %10723 = vst [vmem:[#allocation98_spill] sm:$0xff] %v7666_v43  ;;  %10724 = vst [vmem:[#allocation99_spill] sm:$0xff] %v7669_v44  ;;  %v7672_v47 = vadd.f32 %v624_v45, %v7612_v61  ;;  %v7675_v50 = vadd.f32 %v751_v46, %v7615_v62  ;;  %v895_v45 = vld [vmem:[#allocation17] sm:$0x3] }
 0x26b   :  { %v628_v52 = vpop.f32.mrf.mxu0  ;;  %v755_v59 = vpop.f32.mrf.mxu1 }
 0x26c   :  { %10725 = vst [vmem:[#allocation100_spill] sm:$0xff] %v7672_v47  ;;  %10726 = vst [vmem:[#allocation101_spill] sm:$0xff] %v7675_v50  ;;  %v7678_v60 = vadd.f32 %v628_v52, %v7606_v57  ;;  %v7681_v2 = vadd.f32 %v755_v59, %v7609_v58  ;;  %v7710_v59 = vrot.slane %v768_v42, %v7592_v49 }
 0x26d   :  { %v630_v3 = vpop.f32.mrf.mxu0  ;;  %v757_v11 = vpop.f32.mrf.mxu1 }
 0x26e   :  { %10727 = vst [vmem:[#allocation102_spill] sm:$0xff] %v7678_v60  ;;  %10728 = vst [vmem:[#allocation103_spill] sm:$0xff] %v7681_v2  ;;  %v7684_v12 = vadd.f32 %v630_v3, %v7612_v61  ;;  %v7687_v21 = vadd.f32 %v757_v11, %v7615_v62  ;;  %v7713_v3 = vrot.slane %v895_v45, %v7592_v49 }
 0x26f   :  { %v634_v22 = vpop.f32.mrf.mxu0  ;;  %v761_v25 = vpop.f32.mrf.mxu1 }
 0x270   :  { %10729 = vst [vmem:[#allocation104_spill] sm:$0xff] %v7684_v12  ;;  %10730 = vst [vmem:[#allocation105_spill] sm:$0xff] %v7687_v21  ;;  %v7690_v26 = vadd.f32 %v634_v22, %v7606_v57  ;;  %v7693_v29 = vadd.f32 %v761_v25, %v7609_v58  ;;  %v7716_v25 = vrot.slane %v768_v42, %v7599_v54 }
 0x271   :  { %v636_v30 = vpop.f32.mrf.mxu0  ;;  %v763_v33 = vpop.f32.mrf.mxu1 }
 0x272   :  { %10731 = vst [vmem:[#allocation106_spill] sm:$0xff] %v7690_v26  ;;  %10732 = vst [vmem:[#allocation107_spill] sm:$0xff] %v7693_v29  ;;  %v7696_v34 = vadd.f32 %v636_v30, %v7612_v61  ;;  %v7699_v37 = vadd.f32 %v763_v33, %v7615_v62  ;;  %v7719_v30 = vrot.slane %v895_v45, %v7599_v54 }
 0x273   :  { %v7701_v38 = vpop.f32.mrf.mxu0  ;;  %v7703_v41 = vpop.f32.mrf.mxu1 }
 0x274   :  { %10733 = vst [vmem:[#allocation108_spill] sm:$0xff] %v7696_v34  ;;  %10734 = vst [vmem:[#allocation109_spill] sm:$0xff] %v7699_v37 }
 0x275   :  { %v7705_v46 = vpop.f32.mrf.mxu0  ;;  %v7707_v52 = vpop.f32.mrf.mxu1 }
 0x280   :  { %v852_v11 = vpop.f32.mrf.mxu0  ;;  %v979_v22 = vpop.f32.mrf.mxu1 }
 0x281   :  { %v7722_v33 = vadd.f32 %v852_v11, %v7710_v59  ;;  %v7725_v48 = vadd.f32 %v979_v22, %v7713_v3 }
 0x282   :  { %v854_v37 = vpop.f32.mrf.mxu0  ;;  %v981_v34 = vpop.f32.mrf.mxu1 }
 0x283   :  { %v7728_v29 = vadd.f32 %v854_v37, %v7716_v25  ;;  %v7731_v26 = vadd.f32 %v981_v34, %v7719_v30 }
 0x286   :  { %v858_v49 = vpop.f32.mrf.mxu0  ;;  %v985_v42 = vpop.f32.mrf.mxu1 }
 0x287   :  { %v7734_v16 = vadd.f32 %v858_v49, %v7710_v59  ;;  %v7737_v45 = vadd.f32 %v985_v42, %v7713_v3 }
 0x288   :  { %v860_v11 = vpop.f32.mrf.mxu0  ;;  %v987_v54 = vpop.f32.mrf.mxu1 }
 0x289   :  { %10735 = vst [vmem:[#allocation110_spill] sm:$0xff] %v7734_v16  ;;  %10736 = vst [vmem:[#allocation111_spill] sm:$0xff] %v7737_v45  ;;  %v7740_v22 = vadd.f32 %v860_v11, %v7716_v25  ;;  %v7743_v21 = vadd.f32 %v987_v54, %v7719_v30  ;;  %v8108_v45 = vld [vmem:[%s10578_s7 + $0x38] sm:$0xff] }
 0x28a   :  { %v8112_v16 = vld [vmem:[%s10579_s13 + $0x38] sm:$0xff] }
 0x28b   :  { %10737 = vst [vmem:[#allocation112_spill] sm:$0xff] %v7740_v22  ;;  %10738 = vst [vmem:[#allocation180_spill] sm:$0xff] %v7743_v21  ;;  %v8100_v21 = vld [vmem:[%s10578_s7 + $0x40] sm:$0xff] }
 0x28c   :  { %v864_v37 = vpop.f32.mrf.mxu0  ;;  %v991_v12 = vpop.f32.mrf.mxu1  ;;  %v8104_v22 = vld [vmem:[%s10579_s13 + $0x40] sm:$0xff] }
 0x28d   :  { %v7746_v34 = vadd.f32 %v864_v37, %v7710_v59  ;;  %v7749_v2 = vadd.f32 %v991_v12, %v7713_v3 }
 0x28e   :  { %v866_v49 = vpop.f32.mrf.mxu0  ;;  %v993_v60 = vpop.f32.mrf.mxu1 }
 0x28f   :  { %10739 = vst [vmem:[#allocation181_spill] sm:$0xff] %v7746_v34  ;;  %10740 = vst [vmem:[#allocation182_spill] sm:$0xff] %v7749_v2  ;;  %v7752_v42 = vadd.f32 %v866_v49, %v7716_v25  ;;  %v7755_v50 = vadd.f32 %v993_v60, %v7719_v30  ;;  %v8076_v2 = vld [vmem:[%s10578_s7 + $0x58] sm:$0xff] }
 0x290   :  { %v8080_v34 = vld [vmem:[%s10579_s13 + $0x58] sm:$0xff] }
 0x291   :  { %10741 = vst [vmem:[#allocation183_spill] sm:$0xff] %v7752_v42  ;;  %10742 = vst [vmem:[#allocation184_spill] sm:$0xff] %v7755_v50 }
 0x292   :  { %v870_v11 = vpop.f32.mrf.mxu0  ;;  %v997_v47 = vpop.f32.mrf.mxu1 }
 0x293   :  { %v7758_v54 = vadd.f32 %v870_v11, %v7710_v59  ;;  %v7761_v44 = vadd.f32 %v997_v47, %v7713_v3 }
 0x294   :  { %v872_v37 = vpop.f32.mrf.mxu0  ;;  %v999_v43 = vpop.f32.mrf.mxu1 }
 0x295   :  { %10743 = vst [vmem:[#allocation185_spill] sm:$0xff] %v7758_v54  ;;  %10744 = vst [vmem:[#allocation186_spill] sm:$0xff] %v7761_v44  ;;  %v7764_v12 = vadd.f32 %v872_v37, %v7716_v25  ;;  %v7767_v40 = vadd.f32 %v999_v43, %v7719_v30 }
 0x297   :  { %10745 = vst [vmem:[#allocation187_spill] sm:$0xff] %v7764_v12  ;;  %10746 = vst [vmem:[#allocation188_spill] sm:$0xff] %v7767_v40 }
 0x298   :  { %v876_v49 = vpop.f32.mrf.mxu0  ;;  %v1003_v39 = vpop.f32.mrf.mxu1 }
 0x299   :  { %v7770_v60 = vadd.f32 %v876_v49, %v7710_v59  ;;  %v7773_v36 = vadd.f32 %v1003_v39, %v7713_v3 }
 0x29a   :  { %v878_v11 = vpop.f32.mrf.mxu0  ;;  %v1005_v54 = vpop.f32.mrf.mxu1 }
 0x29b   :  { %10747 = vst [vmem:[#allocation189_spill] sm:$0xff] %v7770_v60  ;;  %10748 = vst [vmem:[#allocation190_spill] sm:$0xff] %v7773_v36  ;;  %v7776_v47 = vadd.f32 %v878_v11, %v7716_v25  ;;  %v7779_v44 = vadd.f32 %v1005_v54, %v7719_v30 }
 0x29d   :  { %10749 = vst [vmem:[#allocation191_spill] sm:$0xff] %v7776_v47  ;;  %10750 = vst [vmem:[#allocation192_spill] sm:$0xff] %v7779_v44 }
 0x29e   :  { %v882_v37 = vpop.f32.mrf.mxu0  ;;  %v1009_v12 = vpop.f32.mrf.mxu1 }
 0x29f   :  { %v7782_v43 = vadd.f32 %v882_v37, %v7710_v59  ;;  %v7785_v40 = vadd.f32 %v1009_v12, %v7713_v3 }
 0x2a0   :  { %v884_v49 = vpop.f32.mrf.mxu0  ;;  %v1011_v60 = vpop.f32.mrf.mxu1 }
 0x2a1   :  { %10751 = vst [vmem:[#allocation193_spill] sm:$0xff] %v7782_v43  ;;  %10752 = vst [vmem:[#allocation194_spill] sm:$0xff] %v7785_v40  ;;  %v7788_v39 = vadd.f32 %v884_v49, %v7716_v25  ;;  %v7791_v36 = vadd.f32 %v1011_v60, %v7719_v30  ;;  %v593_v60 = vadd.f32 %v7594_v51, %v7606_v57 }
 0x2a3   :  { %10753 = vst [vmem:[#allocation195_spill] sm:$0xff] %v7788_v39  ;;  %10754 = vst [vmem:[#allocation196_spill] sm:$0xff] %v7791_v36 }
 0x2a4   :  { %v888_v11 = vpop.f32.mrf.mxu0  ;;  %v1015_v47 = vpop.f32.mrf.mxu1 }
 0x2a5   :  { %v7794_v54 = vadd.f32 %v888_v11, %v7710_v59  ;;  %v7797_v44 = vadd.f32 %v1015_v47, %v7713_v3  ;;  %v720_v11 = vadd.f32 %v7596_v53, %v7609_v58  ;;  %v595_v47 = vadd.f32 %v7601_v55, %v7612_v61 }
 0x2a6   :  { %v890_v37 = vpop.f32.mrf.mxu0  ;;  %v1017_v43 = vpop.f32.mrf.mxu1 }
 0x2a7   :  { %10755 = vst [vmem:[#allocation197_spill] sm:$0xff] %v7794_v54  ;;  %10756 = vst [vmem:[#allocation198_spill] sm:$0xff] %v7797_v44  ;;  %v7800_v12 = vadd.f32 %v890_v37, %v7716_v25  ;;  %v7803_v40 = vadd.f32 %v1017_v43, %v7719_v30  ;;  %v722_v37 = vadd.f32 %v7603_v56, %v7615_v62 }
 0x2a8   :  { %v847_v56 = vadd.f32 %v7701_v38, %v7710_v59  ;;  %v974_v62 = vadd.f32 %v7703_v41, %v7713_v3 }
 0x2a9   :  { %10757 = vst [vmem:[#allocation199_spill] sm:$0xff] %v7800_v12  ;;  %10758 = vst [vmem:[#allocation200_spill] sm:$0xff] %v7803_v40 }
 0x2aa   :  { %v1250_v49 = vpop.f32.mrf.mxu0  ;;  %v1323_v39 = vpop.f32.mrf.mxu1 }
 0x2ab   :  { %v1255_v44 = vadd.f32 %v1250_v49, %v593_v60  ;;  %v1328_v36 = vadd.f32 %v1323_v39, %v720_v11 }
 0x2ac   :  { %v1252_v54 = vpop.f32.mrf.mxu0  ;;  %v1325_v35 = vpop.f32.mrf.mxu1 }
 0x2ad   :  { %v1256_v43 = vadd.f32 %v1252_v54, %v595_v47  ;;  %v5029_v40 = vmul.f32 -1.442695, %v1255_v44  ;;  %v1329_v12 = vadd.f32 %v1325_v35, %v722_v37  ;;  %v5027_v50 = vmul.f32 -1.442695, %v1328_v36 }
 0x2ae   :  { %v849_v35 = vadd.f32 %v7705_v46, %v7716_v25 }
 0x2af   :  { %v5030_v42 = vmul.f32 -1.442695, %v1256_v43  ;;  %5339 = vpow2.f32 %v5029_v40  ;;  %v5028_v51 = vmul.f32 -1.442695, %v1329_v12 }
 0x2b0   :  { %5341 = vpow2.f32 %v5027_v50  ;;  %v976_v50 = vadd.f32 %v7707_v52, %v7719_v30 }
 0x2b1   :  { %5343 = vpow2.f32 %v5030_v42 }
 0x2b2   :  { %5345 = vpow2.f32 %v5028_v51 }
 0x2bc   :  { %v5340_v53 = vpop.eup %5339 }
 0x2bd   :  { %v5342_v57 = vpop.eup %5341  ;;  %v1496_v55 = vadd.f32 1.0, %v5340_v53 }
 0x2be   :  { %v5344_v58 = vpop.eup %5343  ;;  %v1482_v39 = vadd.f32 1.0, %v5342_v57 }
 0x2bf   :  { %v5346_v61 = vpop.eup %5345  ;;  %v1497_v49 = vadd.f32 1.0, %v5344_v58  ;;  %5347 = vrcp.f32 %v1496_v55 }
 0x2c0   :  { %v1483_v36 = vadd.f32 1.0, %v5346_v61  ;;  %5349 = vrcp.f32 %v1482_v39 }
 0x2c1   :  { %5351 = vrcp.f32 %v1497_v49 }
 0x2cc   :  { %v5348_v3 = vpop.eup %5347 }
 0x2cd   :  { %v5350_v25 = vpop.eup %5349 }
 0x2ce   :  { %v5352_v11 = vpop.eup %5351  ;;  %v1488_v30 = vmul.f32 0.0, %v5350_v25  ;;  %v10769_v25 = vld [vmem:[#allocation123_spill] sm:$0xff] }
 0x2d4   :  { %v1396_v40 = vpop.f32.mrf.mxu0  ;;  %v1469_v44 = vpop.f32.mrf.mxu1 }
 0x2d5   :  { %v1401_v42 = vadd.f32 %v1396_v40, %v847_v56  ;;  %v1474_v54 = vadd.f32 %v1469_v44, %v974_v62 }
 0x2d6   :  { %v1398_v12 = vpop.f32.mrf.mxu0  ;;  %v1471_v60 = vpop.f32.mrf.mxu1 }
 0x2d7   :  { %5353 = vtanh.f32 %v1401_v42  ;;  %v5031_v38 = vmul.f32 -1.442695, %v1474_v54  ;;  %v1402_v59 = vadd.f32 %v1398_v12, %v849_v35  ;;  %v1475_v41 = vadd.f32 %v1471_v60, %v976_v50  ;;  %v10759_v50 = vld [vmem:[#allocation113_spill] sm:$0xff]  ;;  %v10760_v42 = vld [vmem:[#allocation114_spill] sm:$0xff]  ;;  %v10761_v54 = vld [vmem:[#allocation115_spill] sm:$0xff] }
 0x2d8   :  { %5355 = vrcp.f32 %v1483_v36  ;;  %v10762_v12 = vld [vmem:[#allocation116_spill] sm:$0xff]  ;;  %v10763_v60 = vld [vmem:[#allocation117_spill] sm:$0xff] }
 0x2d9   :  { %5357 = vpow2.f32 %v5031_v38  ;;  %v5032_v46 = vmul.f32 -1.442695, %v1475_v41  ;;  %v10764_v38 = vld [vmem:[#allocation118_spill] sm:$0xff]  ;;  %v10766_v41 = vld [vmem:[#allocation120_spill] sm:$0xff] }
 0x2da   :  { %5359 = vtanh.f32 %v1402_v59  ;;  %v10765_v59 = vld [vmem:[#allocation119_spill] sm:$0xff] }
 0x2db   :  { %5361 = vpow2.f32 %v5032_v46  ;;  %v10767_v46 = vld [vmem:[#allocation121_spill] sm:$0xff] }
 0x2e4   :  { %v5354_v47 = vpop.eup %5353 }
 0x2e5   :  { %v5356_v52 = vpop.eup %5355  ;;  %v1504_v37 = vmul.f32 %v5354_v47, %v5348_v3  ;;  %v10768_v3 = vld [vmem:[#allocation122_spill] sm:$0xff]  ;;  %v10771_v47 = vld [vmem:[#allocation125_spill] sm:$0xff] }
 0x2e6   :  { %v5358_v43 = vpop.eup %5357  ;;  %v1489_v55 = vmul.f32 0.0, %v5356_v52  ;;  %v10772_v52 = vld [vmem:[#allocation126_spill] sm:$0xff] }
 0x2e7   :  { %v5360_v51 = vpop.eup %5359  ;;  %v7821_v53 = vadd.f32 %v1504_v37, %v1488_v30  ;;  %v1514_v57 = vadd.f32 1.0, %v5358_v43  ;;  %v10773_v30 = vld [vmem:[#allocation127_spill] sm:$0xff]  ;;  %v10774_v37 = vld [vmem:[#allocation128_spill] sm:$0xff]  ;;  %v10775_v43 = vld [vmem:[#allocation129_spill] sm:$0xff] }
 0x2e8   :  { %v5362_v58 = vpop.eup %5361  ;;  %v1505_v61 = vmul.f32 %v5360_v51, %v5352_v11  ;;  %v10770_v11 = vld [vmem:[#allocation124_spill] sm:$0xff]  ;;  %v10776_v51 = vld [vmem:[#allocation130_spill] sm:$0xff] }
 0x2e9   :  { %5363 = vtanh.f32 %v7821_v53  ;;  %v1515_v39 = vadd.f32 1.0, %v5362_v58  ;;  %v10778_v58 = vld [vmem:[#allocation132_spill] sm:$0xff] }
 0x2ea   :  { %5365 = vrcp.f32 %v1514_v57  ;;  %v7824_v49 = vadd.f32 %v1505_v61, %v1489_v55  ;;  %v10777_v57 = vld [vmem:[#allocation131_spill] sm:$0xff]  ;;  %v10779_v55 = vld [vmem:[#allocation133_spill] sm:$0xff]  ;;  %v10780_v61 = vld [vmem:[#allocation134_spill] sm:$0xff] }
 0x2eb   :  { %5367 = vrcp.f32 %v1515_v39  ;;  %v10781_v39 = vld [vmem:[#allocation135_spill] sm:$0xff]  ;;  %10847 = vst [vmem:[#allocation134_spill] sm:$0xff] %v8076_v2 }
 0x2ec   :  { %5369 = vtanh.f32 %v7824_v49  ;;  %10848 = vst [vmem:[#allocation135_spill] sm:$0xff] %v8080_v34 }
 0x2f6   :  { %v5364_v56 = vpop.eup %5363 }
 0x2f7   :  { %v5366_v62 = vpop.eup %5365 }
 0x2f8   :  { %v5368_v35 = vpop.eup %5367  ;;  %v7827_v44 = vmul.f32 %v5366_v62, %v5364_v56  ;;  %v10782_v56 = vld [vmem:[#allocation136_spill] sm:$0xff]  ;;  %v10783_v62 = vld [vmem:[#allocation137_spill] sm:$0xff] }
 0x2f9   :  { %v5370_v36 = vpop.eup %5369  ;;  %10849 = vst [vmem:[#allocation136_spill] sm:$0xff] %v8084_v32  ;;  %10850 = vst [vmem:[#allocation137_spill] sm:$0xff] %v8088_v31 }
 0x2fa   :  { %v1523_v40 = vmul.f32 %v5370_v36, %v5368_v35  ;;  %v10784_v35 = vld [vmem:[#allocation138_spill] sm:$0xff]  ;;  %v10785_v36 = vld [vmem:[#allocation139_spill] sm:$0xff] }
 0x2fb   :  { %10851 = vst [vmem:[#allocation138_spill] sm:$0xff] %v8092_v28  ;;  %10852 = vst [vmem:[#allocation139_spill] sm:$0xff] %v8096_v27 }
 0x2fc   :  { %5033 = vmatprep.mubr.msk.f32.mxu0 %vm1180_vm1, %v1523_v40  ;;  %5034 = vmatprep.mubr.msk.f32.mxu1 %vm1180_vm1, %v1523_v40 }
 0x2fd   :  { %1592 = vmatmul.mubr.f32.vlgmr.msra.gmra.mxu0 %v7827_v44  ;;  %1665 = vmatmul.mubr.f32.vlgmr.msra.gmra.mxu1 %v7827_v44 }
 0x2fe   :  { %1674 = vmatpush1.msra.mxu0 %v10759_v50  ;;  %1747 = vmatpush1.msra.mxu1 %v10760_v42  ;;  %v10787_v50 = vld [vmem:[#allocation141_spill] sm:$0xff]  ;;  %v10788_v42 = vld [vmem:[#allocation142_spill] sm:$0xff] }
 0x2ff   :  { %1675 = vmatprep.subr.mxu0 %v10761_v54  ;;  %5035 = vmatprep.mubr.msk.f32.mxu0 %vm1180_vm1, %v1523_v40  ;;  %v10789_v54 = vld [vmem:[#allocation143_spill] sm:$0xff]  ;;  %10854 = vst [vmem:[#allocation141_spill] sm:$0xff] %v8104_v22  ;;  %10855 = vst [vmem:[#allocation142_spill] sm:$0xff] %v8108_v45 }
 0x300   :  { %1748 = vmatprep.subr.mxu1 %v10762_v12  ;;  %5036 = vmatprep.mubr.msk.f32.mxu1 %vm1180_vm1, %v1523_v40  ;;  %v10786_v40 = vld [vmem:[#allocation140_spill] sm:$0xff]  ;;  %10856 = vst [vmem:[#allocation143_spill] sm:$0xff] %v8112_v16 }
 0x301   :  { %1676 = vmatpush1.msra.mxu0 %v10763_v60  ;;  %1749 = vmatpush1.msra.mxu1 %v10764_v38  ;;  %v10790_v12 = vld [vmem:[#allocation144_spill] sm:$0xff]  ;;  %v10791_v60 = vld [vmem:[#allocation145_spill] sm:$0xff]  ;;  %v10792_v38 = vld [vmem:[#allocation146_spill] sm:$0xff]  ;;  %10853 = vst [vmem:[#allocation140_spill] sm:$0xff] %v8100_v21 }
 0x302   :  { %1677 = vmatprep.subr.mxu0 %v10765_v59  ;;  %1750 = vmatprep.subr.mxu1 %v10766_v41  ;;  %v10793_v59 = vld [vmem:[#allocation147_spill] sm:$0xff]  ;;  %v10794_v41 = vld [vmem:[#allocation148_spill] sm:$0xff]  ;;  %10857 = vst [vmem:[#allocation144_spill] sm:$0xff] %v8116_v24  ;;  %10858 = vst [vmem:[#allocation145_spill] sm:$0xff] %v8120_v23 }
 0x303   :  { %1678 = vmatpush1.msra.mxu0 %v10767_v46  ;;  %1751 = vmatpush1.msra.mxu1 %v10768_v3  ;;  %v10795_v46 = vld [vmem:[#allocation149_spill] sm:$0xff]  ;;  %v10796_v3 = vld [vmem:[#allocation150_spill] sm:$0xff]  ;;  %10859 = vst [vmem:[#allocation146_spill] sm:$0xff] %v8124_v20  ;;  %10860 = vst [vmem:[#allocation147_spill] sm:$0xff] %v8128_v19 }
 0x304   :  { %1679 = vmatprep.subr.mxu0 %v10769_v25  ;;  %1752 = vmatprep.subr.mxu1 %v10770_v11  ;;  %v10797_v25 = vld [vmem:[#allocation151_spill] sm:$0xff]  ;;  %v10798_v11 = vld [vmem:[#allocation152_spill] sm:$0xff] }
 0x305   :  { %1680 = vmatpush1.msra.mxu0 %v10771_v47  ;;  %1753 = vmatpush1.msra.mxu1 %v10772_v52  ;;  %v10799_v47 = vld [vmem:[#allocation153_spill] sm:$0xff]  ;;  %v10800_v52 = vld [vmem:[#allocation154_spill] sm:$0xff] }
 0x306   :  { %1681 = vmatprep.subr.mxu0 %v10773_v30  ;;  %1754 = vmatprep.subr.mxu1 %v10774_v37  ;;  %v10801_v30 = vld [vmem:[#allocation155_spill] sm:$0xff]  ;;  %v10802_v37 = vld [vmem:[#allocation156_spill] sm:$0xff] }
 0x307   :  { %1682 = vmatpush1.msra.mxu0 %v10775_v43  ;;  %1755 = vmatpush1.msra.mxu1 %v10776_v51  ;;  %v10803_v43 = vld [vmem:[#allocation157_spill] sm:$0xff]  ;;  %v10804_v51 = vld [vmem:[#allocation158_spill] sm:$0xff] }
 0x308   :  { %1683 = vmatprep.subr.mxu0 %v10777_v57  ;;  %1756 = vmatprep.subr.mxu1 %v10778_v58  ;;  %v10805_v57 = vld [vmem:[#allocation159_spill] sm:$0xff]  ;;  %v10806_v58 = vld [vmem:[#allocation160_spill] sm:$0xff] }
 0x309   :  { %1684 = vmatpush1.msra.mxu0 %v10779_v55  ;;  %1757 = vmatpush1.msra.mxu1 %v10780_v61  ;;  %v10807_v55 = vld [vmem:[#allocation161_spill] sm:$0xff]  ;;  %v10808_v61 = vld [vmem:[#allocation162_spill] sm:$0xff] }
 0x30a   :  { %1685 = vmatprep.subr.mxu0 %v10781_v39  ;;  %1758 = vmatprep.subr.mxu1 %v10782_v56  ;;  %v10809_v39 = vld [vmem:[#allocation163_spill] sm:$0xff]  ;;  %v10810_v56 = vld [vmem:[#allocation164_spill] sm:$0xff] }
 0x30b   :  { %1686 = vmatpush1.msra.mxu0 %v10783_v62  ;;  %1759 = vmatpush1.msra.mxu1 %v10784_v35  ;;  %v10811_v62 = vld [vmem:[#allocation165_spill] sm:$0xff]  ;;  %v10812_v35 = vld [vmem:[#allocation166_spill] sm:$0xff] }
 0x30c   :  { %1687 = vmatprep.subr.mxu0 %v10785_v36  ;;  %1760 = vmatprep.subr.mxu1 %v10786_v40  ;;  %v10813_v36 = vld [vmem:[#allocation167_spill] sm:$0xff]  ;;  %v10814_v40 = vld [vmem:[#allocation168_spill] sm:$0xff] }
 0x30d   :  { %1688 = vmatpush1.msra.mxu0 %v10787_v50  ;;  %1761 = vmatpush1.msra.mxu1 %v10788_v42  ;;  %v10815_v50 = vld [vmem:[#allocation169_spill] sm:$0xff]  ;;  %v10816_v42 = vld [vmem:[#allocation170_spill] sm:$0xff] }
 0x30e   :  { %1689 = vmatprep.subr.mxu0 %v10789_v54  ;;  %1762 = vmatprep.subr.mxu1 %v10790_v12  ;;  %v10817_v54 = vld [vmem:[#allocation171_spill] sm:$0xff]  ;;  %v10818_v12 = vld [vmem:[#allocation172_spill] sm:$0xff] }
 0x30f   :  { %1690 = vmatpush1.msra.mxu0 %v10791_v60  ;;  %1763 = vmatpush1.msra.mxu1 %v10792_v38  ;;  %v10819_v60 = vld [vmem:[#allocation173_spill] sm:$0xff]  ;;  %v10820_v38 = vld [vmem:[#allocation174_spill] sm:$0xff] }
 0x310   :  { %1691 = vmatprep.subr.mxu0 %v10793_v59  ;;  %1764 = vmatprep.subr.mxu1 %v10794_v41  ;;  %v10821_v59 = vld [vmem:[#allocation175_spill] sm:$0xff]  ;;  %v10822_v41 = vld [vmem:[#allocation176_spill] sm:$0xff] }
 0x311   :  { %1692 = vmatpush1.msra.mxu0 %v10795_v46  ;;  %1765 = vmatpush1.msra.mxu1 %v10796_v3  ;;  %v10823_v46 = vld [vmem:[#allocation177_spill] sm:$0xff]  ;;  %v10824_v3 = vld [vmem:[#allocation178_spill] sm:$0xff] }
 0x312   :  { %1693 = vmatprep.subr.mxu0 %v10797_v25  ;;  %1766 = vmatprep.subr.mxu1 %v10798_v11  ;;  %v10825_v25 = vld [vmem:[#allocation179_spill] sm:$0xff] }
 0x313   :  { %1694 = vmatpush1.msra.mxu0 %v10799_v47  ;;  %1767 = vmatpush1.msra.mxu1 %v10800_v52  ;;  %v7964_v11 = vld [vmem:[%s10578_s7 + $0xc8] sm:$0xff]  ;;  %v7972_v52 = vld [vmem:[%s10578_s7 + $0xc0] sm:$0xff] }
 0x314   :  { %1695 = vmatprep.subr.mxu0 %v10801_v30  ;;  %1768 = vmatprep.subr.mxu1 %v10802_v37  ;;  %v7968_v47 = vld [vmem:[%s10579_s13 + $0xc8] sm:$0xff]  ;;  %v7976_v30 = vld [vmem:[%s10579_s13 + $0xc0] sm:$0xff]  ;;  %v7980_v37 = vld [vmem:[%s10578_s7 + $0xb8] sm:$0xff] }
 0x315   :  { %1696 = vmatpush1.msra.mxu0 %v10803_v43  ;;  %1769 = vmatpush1.msra.mxu1 %v10804_v51  ;;  %v7984_v43 = vld [vmem:[%s10579_s13 + $0xb8] sm:$0xff]  ;;  %v7988_v51 = vld [vmem:[%s10578_s7 + $0xb0] sm:$0xff] }
 0x316   :  { %1697 = vmatprep.subr.mxu0 %v10805_v57  ;;  %1770 = vmatprep.subr.mxu1 %v10806_v58  ;;  %v7992_v57 = vld [vmem:[%s10579_s13 + $0xb0] sm:$0xff]  ;;  %v7996_v58 = vld [vmem:[%s10578_s7 + $0xa8] sm:$0xff] }
 0x317   :  { %1698 = vmatpush1.msra.mxu0 %v10807_v55  ;;  %1771 = vmatpush1.msra.mxu1 %v10808_v61  ;;  %10826 = vst [vmem:[#allocation113_spill] sm:$0xff] %v7992_v57  ;;  %10827 = vst [vmem:[#allocation114_spill] sm:$0xff] %v7996_v58  ;;  %v8000_v55 = vld [vmem:[%s10579_s13 + $0xa8] sm:$0xff]  ;;  %v8004_v61 = vld [vmem:[%s10578_s7 + $0xa0] sm:$0xff] }
 0x318   :  { %1699 = vmatprep.subr.mxu0 %v10809_v39  ;;  %1772 = vmatprep.subr.mxu1 %v10810_v56  ;;  %10828 = vst [vmem:[#allocation115_spill] sm:$0xff] %v8000_v55  ;;  %10829 = vst [vmem:[#allocation116_spill] sm:$0xff] %v8004_v61  ;;  %v8008_v39 = vld [vmem:[%s10579_s13 + $0xa0] sm:$0xff]  ;;  %v8012_v56 = vld [vmem:[%s10578_s7 + $0x98] sm:$0xff] }
 0x319   :  { %1700 = vmatpush1.msra.mxu0 %v10811_v62  ;;  %1773 = vmatpush1.msra.mxu1 %v10812_v35  ;;  %10830 = vst [vmem:[#allocation117_spill] sm:$0xff] %v8008_v39  ;;  %10831 = vst [vmem:[#allocation118_spill] sm:$0xff] %v8012_v56  ;;  %v8016_v62 = vld [vmem:[%s10579_s13 + $0x98] sm:$0xff]  ;;  %v8020_v35 = vld [vmem:[%s10578_s7 + $0x90] sm:$0xff] }
 0x31a   :  { %1701 = vmatprep.subr.mxu0 %v10813_v36  ;;  %1774 = vmatprep.subr.mxu1 %v10814_v40  ;;  %10832 = vst [vmem:[#allocation119_spill] sm:$0xff] %v8016_v62  ;;  %10833 = vst [vmem:[#allocation120_spill] sm:$0xff] %v8020_v35  ;;  %v8024_v36 = vld [vmem:[%s10579_s13 + $0x90] sm:$0xff]  ;;  %v8028_v40 = vld [vmem:[%s10578_s7 + $0x88] sm:$0xff] }
 0x31b   :  { %1702 = vmatpush1.msra.mxu0 %v10815_v50  ;;  %1775 = vmatpush1.msra.mxu1 %v10816_v42  ;;  %10834 = vst [vmem:[#allocation121_spill] sm:$0xff] %v8024_v36  ;;  %10835 = vst [vmem:[#allocation122_spill] sm:$0xff] %v8028_v40  ;;  %v8032_v50 = vld [vmem:[%s10579_s13 + $0x88] sm:$0xff]  ;;  %v8036_v42 = vld [vmem:[%s10578_s7 + $0x80] sm:$0xff] }
 0x31c   :  { %1703 = vmatprep.subr.mxu0 %v10817_v54  ;;  %1776 = vmatprep.subr.mxu1 %v10818_v12  ;;  %10836 = vst [vmem:[#allocation123_spill] sm:$0xff] %v8032_v50  ;;  %10837 = vst [vmem:[#allocation124_spill] sm:$0xff] %v8036_v42  ;;  %v8040_v54 = vld [vmem:[%s10579_s13 + $0x80] sm:$0xff]  ;;  %v8044_v12 = vld [vmem:[%s10578_s7 + $0x78] sm:$0xff] }
 0x31d   :  { %1704 = vmatpush1.msra.mxu0 %v10819_v60  ;;  %1777 = vmatpush1.msra.mxu1 %v10820_v38  ;;  %10838 = vst [vmem:[#allocation125_spill] sm:$0xff] %v8040_v54  ;;  %10839 = vst [vmem:[#allocation126_spill] sm:$0xff] %v8044_v12  ;;  %v8048_v60 = vld [vmem:[%s10579_s13 + $0x78] sm:$0xff]  ;;  %v8052_v38 = vld [vmem:[%s10578_s7 + $0x70] sm:$0xff] }
 0x31e   :  { %1729 = vmatprep.subr.mxu0 %v10821_v59  ;;  %1802 = vmatprep.subr.mxu1 %v10822_v41  ;;  %10840 = vst [vmem:[#allocation127_spill] sm:$0xff] %v8048_v60  ;;  %10841 = vst [vmem:[#allocation128_spill] sm:$0xff] %v8052_v38  ;;  %v8056_v59 = vld [vmem:[%s10579_s13 + $0x70] sm:$0xff]  ;;  %v8060_v41 = vld [vmem:[%s10578_s7 + $0x68] sm:$0xff] }
 0x31f   :  { %1730 = vmatpush2.msra.mxu0 %v10823_v46  ;;  %1803 = vmatpush2.msra.mxu1 %v10824_v3  ;;  %10842 = vst [vmem:[#allocation129_spill] sm:$0xff] %v8056_v59  ;;  %10843 = vst [vmem:[#allocation130_spill] sm:$0xff] %v8060_v41  ;;  %v8064_v46 = vld [vmem:[%s10579_s13 + $0x68] sm:$0xff]  ;;  %v8068_v3 = vld [vmem:[%s10578_s7 + $0x60] sm:$0xff] }
 0x320   :  { %1731 = vmatprep.subr.mxu0 %v7463_v0  ;;  %1804 = vmatprep.subr.mxu1 %v10825_v25  ;;  %v7916_v0 = vld [vmem:[%s10578_s7 + $0xf8] sm:$0xff]  ;;  %10844 = vst [vmem:[#allocation131_spill] sm:$0xff] %v8064_v46  ;;  %10845 = vst [vmem:[#allocation132_spill] sm:$0xff] %v8068_v3  ;;  %v8072_v25 = vld [vmem:[%s10579_s13 + $0x60] sm:$0xff] }
 0x321   :  { %1732 = vmatpush2.msra.mxu0 %v7469_v7  ;;  %1805 = vmatpush2.msra.mxu1 %v7471_v8  ;;  %v7920_v7 = vld [vmem:[%s10579_s13 + $0xf8] sm:$0xff]  ;;  %v7928_v8 = vld [vmem:[%s10579_s13 + $0xf0] sm:$0xff]  ;;  %10846 = vst [vmem:[#allocation133_spill] sm:$0xff] %v8072_v25 }
 0x322   :  { %1733 = vmatprep.subr.mxu0 %v7475_v10  ;;  %1806 = vmatprep.subr.mxu1 %v7477_v9  ;;  %v7932_v9 = vld [vmem:[%s10578_s7 + $0xe8] sm:$0xff] }
 0x323   :  { %1734 = vmatpush2.msra.mxu0 %v7481_v15  ;;  %1807 = vmatpush2.msra.mxu1 %v7483_v13  ;;  %v7936_v10 = vld [vmem:[%s10579_s13 + $0xe8] sm:$0xff]  ;;  %v7940_v13 = vld [vmem:[%s10578_s7 + $0xe0] sm:$0xff]  ;;  %v7948_v15 = vld [vmem:[%s10578_s7 + $0xd8] sm:$0xff] }
 0x324   :  { %1735 = vmatprep.subr.mxu0 %v7487_v6  ;;  %1808 = vmatprep.subr.mxu1 %v7489_v18  ;;  %v7924_v6 = vld [vmem:[%s10578_s7 + $0xf0] sm:$0xff] }
 0x325   :  { %1736 = vmatpush2.msra.mxu0 %v7493_v17  ;;  %1809 = vmatpush2.msra.mxu1 %v7497_v14  ;;  %v7944_v14 = vld [vmem:[%s10579_s13 + $0xe0] sm:$0xff]  ;;  %v7952_v17 = vld [vmem:[%s10579_s13 + $0xd8] sm:$0xff]  ;;  %v7956_v18 = vld [vmem:[%s10578_s7 + $0xd0] sm:$0xff] }
 0x326   :  { %1738 = vmatmul.mubr.f32.vlgmr.msra.gmra.mxu0 %v7827_v44  ;;  %1811 = vmatmul.mubr.f32.vlgmr.msra.gmra.mxu1 %v7827_v44  ;;  %v7960_v44 = vld [vmem:[%s10579_s13 + $0xd0] sm:$0xff] }
 0x327   :  { %1870 = vmatprep.subr.mxu0 %v7916_v0  ;;  %1943 = vmatprep.subr.mxu1 %v7920_v7 }
 0x328   :  { %1871 = vmatpush1.msra.mxu0 %v7924_v6  ;;  %1944 = vmatpush1.msra.mxu1 %v7928_v8 }
 0x329   :  { %1872 = vmatprep.subr.mxu0 %v7932_v9  ;;  %1945 = vmatprep.subr.mxu1 %v7936_v10 }
 0x32a   :  { %1873 = vmatpush1.msra.mxu0 %v7940_v13  ;;  %1946 = vmatpush1.msra.mxu1 %v7944_v14 }
 0x32b   :  { %1874 = vmatprep.subr.mxu0 %v7948_v15  ;;  %1947 = vmatprep.subr.mxu1 %v7952_v17 }
 0x32c   :  { %1875 = vmatpush1.msra.mxu0 %v7956_v18  ;;  %1948 = vmatpush1.msra.mxu1 %v7960_v44 }
 0x32d   :  { %1876 = vmatprep.subr.mxu0 %v7964_v11  ;;  %1949 = vmatprep.subr.mxu1 %v7968_v47 }
 0x32e   :  { %1877 = vmatpush1.msra.mxu0 %v7972_v52  ;;  %1950 = vmatpush1.msra.mxu1 %v7976_v30 }
 0x32f   :  { %1878 = vmatprep.subr.mxu0 %v7980_v37  ;;  %1951 = vmatprep.subr.mxu1 %v7984_v43 }
 0x330   :  { %1879 = vmatpush1.msra.mxu0 %v7988_v51  ;;  %1952 = vmatpush1.msra.mxu1 %v7992_v57 }
 0x331   :  { %1880 = vmatprep.subr.mxu0 %v7996_v58  ;;  %1953 = vmatprep.subr.mxu1 %v8000_v55 }
 0x332   :  { %1881 = vmatpush1.msra.mxu0 %v8004_v61  ;;  %1954 = vmatpush1.msra.mxu1 %v8008_v39 }
 0x333   :  { %1882 = vmatprep.subr.mxu0 %v8012_v56  ;;  %1955 = vmatprep.subr.mxu1 %v8016_v62 }
 0x334   :  { %1883 = vmatpush1.msra.mxu0 %v8020_v35  ;;  %1956 = vmatpush1.msra.mxu1 %v8024_v36 }
 0x335   :  { %1884 = vmatprep.subr.mxu0 %v8028_v40  ;;  %1957 = vmatprep.subr.mxu1 %v8032_v50 }
 0x336   :  { %1885 = vmatpush1.msra.mxu0 %v8036_v42  ;;  %1958 = vmatpush1.msra.mxu1 %v8040_v54 }
 0x337   :  { %1886 = vmatprep.subr.mxu0 %v8044_v12  ;;  %1959 = vmatprep.subr.mxu1 %v8048_v60 }
 0x338   :  { %1887 = vmatpush1.msra.mxu0 %v8052_v38  ;;  %1960 = vmatpush1.msra.mxu1 %v8056_v59 }
 0x339   :  { %1888 = vmatprep.subr.mxu0 %v8060_v41  ;;  %1961 = vmatprep.subr.mxu1 %v8064_v46 }
 0x33a   :  { %1889 = vmatpush1.msra.mxu0 %v8068_v3  ;;  %1962 = vmatpush1.msra.mxu1 %v8072_v25 }
 0x33b   :  { %1890 = vmatprep.subr.mxu0 %v8076_v2  ;;  %1963 = vmatprep.subr.mxu1 %v8080_v34 }
 0x33c   :  { %1891 = vmatpush1.msra.mxu0 %v8084_v32  ;;  %1964 = vmatpush1.msra.mxu1 %v8088_v31 }
 0x33d   :  { %1892 = vmatprep.subr.mxu0 %v8092_v28  ;;  %1965 = vmatprep.subr.mxu1 %v8096_v27 }
 0x33e   :  { %1893 = vmatpush1.msra.mxu0 %v8100_v21  ;;  %1966 = vmatpush1.msra.mxu1 %v8104_v22 }
 0x33f   :  { %1894 = vmatprep.subr.mxu0 %v8108_v45  ;;  %1967 = vmatprep.subr.mxu1 %v8112_v16  ;;  %v8132_v16 = vld [vmem:[%s10578_s7 + $0x20] sm:$0xff]  ;;  %v8212_v45 = vld [vmem:[%s10578_s7 + $0x110] sm:$0xff] }
 0x340   :  { %1895 = vmatpush1.msra.mxu0 %v8116_v24  ;;  %1968 = vmatpush1.msra.mxu1 %v8120_v23  ;;  %10861 = vst [vmem:[#allocation148_spill] sm:$0xff] %v8132_v16  ;;  %v8136_v24 = vld [vmem:[%s10579_s13 + $0x20] sm:$0xff]  ;;  %v8140_v23 = vld [vmem:[%s10578_s7 + $0x18] sm:$0xff]  ;;  %10881 = vst [vmem:[#allocation168_spill] sm:$0xff] %v8212_v45 }
 0x341   :  { %1896 = vmatprep.subr.mxu0 %v8124_v20  ;;  %1969 = vmatprep.subr.mxu1 %v8128_v19  ;;  %10862 = vst [vmem:[#allocation149_spill] sm:$0xff] %v8136_v24  ;;  %10863 = vst [vmem:[#allocation150_spill] sm:$0xff] %v8140_v23  ;;  %v8144_v20 = vld [vmem:[%s10579_s13 + $0x18] sm:$0xff]  ;;  %v8148_v19 = vld [vmem:[%s10578_s7 + $0x10] sm:$0xff] }
 0x342   :  { %1897 = vmatpush1.msra.mxu0 %v8132_v16  ;;  %1970 = vmatpush1.msra.mxu1 %v8136_v24  ;;  %10864 = vst [vmem:[#allocation151_spill] sm:$0xff] %v8144_v20  ;;  %10865 = vst [vmem:[#allocation152_spill] sm:$0xff] %v8148_v19  ;;  %v8152_v16 = vld [vmem:[%s10579_s13 + $0x10] sm:$0xff]  ;;  %v8156_v24 = vld [vmem:[%s10578_s7 + $0x8] sm:$0xff] }
 0x343   :  { %1898 = vmatprep.subr.mxu0 %v8140_v23  ;;  %1971 = vmatprep.subr.mxu1 %v8144_v20  ;;  %10866 = vst [vmem:[#allocation153_spill] sm:$0xff] %v8152_v16  ;;  %10867 = vst [vmem:[#allocation154_spill] sm:$0xff] %v8156_v24  ;;  %v8160_v23 = vld [vmem:[%s10579_s13 + $0x8] sm:$0xff]  ;;  %v8164_v20 = vld [vmem:[%s10578_s7] sm:$0xff] }
 0x344   :  { %1899 = vmatpush1.msra.mxu0 %v8148_v19  ;;  %1972 = vmatpush1.msra.mxu1 %v8152_v16  ;;  %10868 = vst [vmem:[#allocation155_spill] sm:$0xff] %v8160_v23  ;;  %10869 = vst [vmem:[#allocation156_spill] sm:$0xff] %v8164_v20  ;;  %v8168_v19 = vld [vmem:[%s10579_s13] sm:$0xff]  ;;  %v8172_v16 = vld [vmem:[%s10578_s7 + $0x138] sm:$0xff] }
 0x345   :  { %1900 = vmatprep.subr.mxu0 %v8156_v24  ;;  %1973 = vmatprep.subr.mxu1 %v8160_v23  ;;  %10870 = vst [vmem:[#allocation157_spill] sm:$0xff] %v8168_v19  ;;  %10871 = vst [vmem:[#allocation158_spill] sm:$0xff] %v8172_v16  ;;  %v8176_v24 = vld [vmem:[%s10579_s13 + $0x138] sm:$0xff]  ;;  %v8180_v23 = vld [vmem:[%s10578_s7 + $0x130] sm:$0xff] }
 0x346   :  { %1901 = vmatpush1.msra.mxu0 %v8164_v20  ;;  %1974 = vmatpush1.msra.mxu1 %v8168_v19  ;;  %10872 = vst [vmem:[#allocation159_spill] sm:$0xff] %v8176_v24  ;;  %10873 = vst [vmem:[#allocation160_spill] sm:$0xff] %v8180_v23  ;;  %v8184_v20 = vld [vmem:[%s10579_s13 + $0x130] sm:$0xff]  ;;  %v8188_v19 = vld [vmem:[%s10578_s7 + $0x128] sm:$0xff] }
 0x347   :  { %1926 = vmatprep.subr.mxu0 %v8172_v16  ;;  %1999 = vmatprep.subr.mxu1 %v8176_v24  ;;  %10874 = vst [vmem:[#allocation161_spill] sm:$0xff] %v8184_v20  ;;  %10875 = vst [vmem:[#allocation162_spill] sm:$0xff] %v8188_v19  ;;  %v8192_v16 = vld [vmem:[%s10579_s13 + $0x128] sm:$0xff]  ;;  %v8196_v24 = vld [vmem:[%s10578_s7 + $0x120] sm:$0xff] }
 0x348   :  { %1927 = vmatpush2.msra.mxu0 %v8180_v23  ;;  %2000 = vmatpush2.msra.mxu1 %v8184_v20  ;;  %10876 = vst [vmem:[#allocation163_spill] sm:$0xff] %v8192_v16  ;;  %10877 = vst [vmem:[#allocation164_spill] sm:$0xff] %v8196_v24  ;;  %v8200_v23 = vld [vmem:[%s10579_s13 + $0x120] sm:$0xff]  ;;  %v8204_v20 = vld [vmem:[%s10578_s7 + $0x118] sm:$0xff] }
 0x349   :  { %1928 = vmatprep.subr.mxu0 %v8188_v19  ;;  %2001 = vmatprep.subr.mxu1 %v8192_v16  ;;  %10878 = vst [vmem:[#allocation165_spill] sm:$0xff] %v8200_v23  ;;  %10879 = vst [vmem:[#allocation166_spill] sm:$0xff] %v8204_v20  ;;  %v8208_v19 = vld [vmem:[%s10579_s13 + $0x118] sm:$0xff]  ;;  %v8216_v16 = vld [vmem:[%s10579_s13 + $0x110] sm:$0xff] }
 0x34a   :  { %1929 = vmatpush2.msra.mxu0 %v8196_v24  ;;  %2002 = vmatpush2.msra.mxu1 %v8200_v23  ;;  %10880 = vst [vmem:[#allocation167_spill] sm:$0xff] %v8208_v19  ;;  %10882 = vst [vmem:[#allocation169_spill] sm:$0xff] %v8216_v16  ;;  %v8220_v24 = vld [vmem:[%s10578_s7 + $0x108] sm:$0xff] }
 0x34b   :  { %1930 = vmatprep.subr.mxu0 %v8204_v20  ;;  %2003 = vmatprep.subr.mxu1 %v8208_v19  ;;  %10883 = vst [vmem:[#allocation170_spill] sm:$0xff] %v8220_v24  ;;  %v8224_v23 = vld [vmem:[%s10579_s13 + $0x108] sm:$0xff]  ;;  %v8228_v20 = vld [vmem:[%s10578_s7 + $0x100] sm:$0xff] }
 0x34c   :  { %1931 = vmatpush2.msra.mxu0 %v8212_v45  ;;  %2004 = vmatpush2.msra.mxu1 %v8216_v16  ;;  %10884 = vst [vmem:[#allocation171_spill] sm:$0xff] %v8224_v23  ;;  %10885 = vst [vmem:[#allocation172_spill] sm:$0xff] %v8228_v20  ;;  %v8232_v19 = vld [vmem:[%s10579_s13 + $0x100] sm:$0xff]  ;;  %v8235_v45 = vld [vmem:[#allocation10 + $0xf8] sm:$0xff] }
 0x34d   :  { %1932 = vmatprep.subr.mxu0 %v8220_v24  ;;  %2005 = vmatprep.subr.mxu1 %v8224_v23  ;;  %10886 = vst [vmem:[#allocation173_spill] sm:$0xff] %v8232_v19  ;;  %10887 = vst [vmem:[#allocation174_spill] sm:$0xff] %v8235_v45  ;;  %v8238_v16 = vld [vmem:[#allocation11 + $0xf8] sm:$0xff] }
 0x34e   :  { %1933 = vmatpush2.msra.mxu0 %v8228_v20  ;;  %2006 = vmatpush2.msra.mxu1 %v8232_v19  ;;  %10888 = vst [vmem:[#allocation175_spill] sm:$0xff] %v8238_v16 }
 0x34f   :  { %2016 = vmatprep.subr.mxu0 %v8235_v45  ;;  %2089 = vmatprep.subr.mxu1 %v8238_v16 }
 0x3bd   :  { %v1593_v24 = vpop.f32.mrf.mxu0  ;;  %v1666_v22 = vpop.f32.mrf.mxu1 }
 0x3be   :  { %v1598_v23 = vadd.f32 %v1593_v24, %v7618_v63  ;;  %v1671_v27 = vadd.f32 %v1666_v22, %v7621_v1 }
 0x3bf   :  { %v1595_v21 = vpop.f32.mrf.mxu0  ;;  %v1668_v20 = vpop.f32.mrf.mxu1 }
 0x3c0   :  { %v1599_v28 = vadd.f32 %v1595_v21, %v7624_v4  ;;  %v5039_v31 = vmul.f32 -1.442695, %v1598_v23  ;;  %v1672_v19 = vadd.f32 %v1668_v20, %v7627_v5  ;;  %v5037_v32 = vmul.f32 -1.442695, %v1671_v27 }
 0x3c2   :  { %v5040_v34 = vmul.f32 -1.442695, %v1599_v28  ;;  %5371 = vpow2.f32 %v5039_v31  ;;  %v5038_v45 = vmul.f32 -1.442695, %v1672_v19 }
 0x3c3   :  { %5373 = vpow2.f32 %v5037_v32 }
 0x3c4   :  { %5375 = vpow2.f32 %v5040_v34 }
 0x3c5   :  { %5377 = vpow2.f32 %v5038_v45 }
 0x3cf   :  { %v5372_v16 = vpop.eup %5371 }
 0x3d0   :  { %v5374_v2 = vpop.eup %5373  ;;  %v1839_v3 = vadd.f32 1.0, %v5372_v16 }
 0x3d1   :  { %v5376_v25 = vpop.eup %5375  ;;  %v1825_v24 = vadd.f32 1.0, %v5374_v2 }
 0x3d2   :  { %v5378_v63 = vpop.eup %5377  ;;  %v1840_v1 = vadd.f32 1.0, %v5376_v25  ;;  %5379 = vrcp.f32 %v1839_v3 }
 0x3d3   :  { %v1826_v22 = vadd.f32 1.0, %v5378_v63  ;;  %5381 = vrcp.f32 %v1825_v24 }
 0x3d4   :  { %5383 = vrcp.f32 %v1840_v1 }
 0x3df   :  { %v5380_v2 = vpop.eup %5379 }
 0x3e0   :  { %v5382_v21 = vpop.eup %5381 }
 0x3e1   :  { %v5384_v45 = vpop.eup %5383 }
 0x3e6   :  { %v1739_v4 = vpop.f32.mrf.mxu0  ;;  %v1812_v23 = vpop.f32.mrf.mxu1 }
 0x3e7   :  { %v1744_v5 = vadd.f32 %v1739_v4, %v7722_v33  ;;  %v1817_v20 = vadd.f32 %v1812_v23, %v7725_v48  ;;  %v1831_v48 = vmul.f32 %v5382_v21, %v7821_v53  ;;  %v8280_v21 = vld [vmem:[#allocation11 + $0xe0] sm:$0xff] }
 0x3e8   :  { %v1741_v19 = vpop.f32.mrf.mxu0  ;;  %v1814_v27 = vpop.f32.mrf.mxu1 }
 0x3e9   :  { %5385 = vtanh.f32 %v1744_v5  ;;  %v5041_v28 = vmul.f32 -1.442695, %v1817_v20  ;;  %v1745_v31 = vadd.f32 %v1741_v19, %v7728_v29  ;;  %v1818_v16 = vadd.f32 %v1814_v27, %v7731_v26 }
 0x3ea   :  { %5387 = vrcp.f32 %v1826_v22 }
 0x3eb   :  { %5389 = vpow2.f32 %v5041_v28  ;;  %v5042_v32 = vmul.f32 -1.442695, %v1818_v16  ;;  %v8269_v16 = vld [vmem:[#allocation10 + $0xe8] sm:$0xff] }
 0x3ec   :  { %5391 = vtanh.f32 %v1745_v31  ;;  %v8266_v31 = vld [vmem:[#allocation11 + $0xf0] sm:$0xff] }
 0x3ed   :  { %5393 = vpow2.f32 %v5042_v32  ;;  %v8273_v32 = vld [vmem:[#allocation11 + $0xe8] sm:$0xff] }
 0x3f6   :  { %v5386_v33 = vpop.eup %5385 }
 0x3f7   :  { %v5388_v34 = vpop.eup %5387  ;;  %v1847_v3 = vmul.f32 %v5386_v33, %v5380_v2  ;;  %v8277_v2 = vld [vmem:[#allocation10 + $0xe0] sm:$0xff]  ;;  %v8286_v33 = vld [vmem:[#allocation11 + $0xd8] sm:$0xff] }
 0x3f8   :  { %v5390_v25 = vpop.eup %5389  ;;  %v1832_v26 = vmul.f32 %v5388_v34, %v7824_v49  ;;  %v8263_v49 = vld [vmem:[#allocation10 + $0xf0] sm:$0xff] }
 0x3f9   :  { %v5392_v63 = vpop.eup %5391  ;;  %v8250_v24 = vadd.f32 %v1847_v3, %v1831_v48  ;;  %v1857_v29 = vadd.f32 1.0, %v5390_v25  ;;  %v8289_v34 = vld [vmem:[#allocation10 + $0xd0] sm:$0xff]  ;;  %v8295_v3 = vld [vmem:[#allocation10 + $0xc8] sm:$0xff] }
 0x3fa   :  { %v5394_v1 = vpop.eup %5393  ;;  %v1848_v22 = vmul.f32 %v5392_v63, %v5384_v45  ;;  %v8283_v45 = vld [vmem:[#allocation10 + $0xd8] sm:$0xff]  ;;  %v8292_v48 = vld [vmem:[#allocation11 + $0xd0] sm:$0xff]  ;;  %v8298_v25 = vld [vmem:[#allocation11 + $0xc8] sm:$0xff] }
 0x3fb   :  { %5395 = vtanh.f32 %v8250_v24  ;;  %v1858_v4 = vadd.f32 1.0, %v5394_v1  ;;  %v8301_v63 = vld [vmem:[#allocation10 + $0xc0] sm:$0xff]  ;;  %v8307_v1 = vld [vmem:[#allocation10 + $0xb8] sm:$0xff] }
 0x3fc   :  { %5397 = vrcp.f32 %v1857_v29  ;;  %v8254_v23 = vadd.f32 %v1848_v22, %v1832_v26  ;;  %v8304_v29 = vld [vmem:[#allocation11 + $0xc0] sm:$0xff]  ;;  %v8310_v26 = vld [vmem:[#allocation11 + $0xb8] sm:$0xff]  ;;  %v8313_v22 = vld [vmem:[#allocation10 + $0xb0] sm:$0xff] }
 0x3fd   :  { %5399 = vrcp.f32 %v1858_v4  ;;  %v8316_v4 = vld [vmem:[#allocation11 + $0xb0] sm:$0xff] }
 0x3fe   :  { %5401 = vtanh.f32 %v8254_v23  ;;  %10889 = vst [vmem:[#allocation176_spill] sm:$0xff] %v8316_v4 }
 0x408   :  { %v5396_v53 = vpop.eup %5395 }
 0x409   :  { %v5398_v5 = vpop.eup %5397 }
 0x40a   :  { %v5400_v20 = vpop.eup %5399  ;;  %v8257_v28 = vmul.f32 %v5398_v5, %v5396_v53  ;;  %v8319_v53 = vld [vmem:[#allocation10 + $0xa8] sm:$0xff] }
 0x40b   :  { %v5402_v19 = vpop.eup %5401  ;;  %10890 = vst [vmem:[#allocation177_spill] sm:$0xff] %v8319_v53  ;;  %v8322_v5 = vld [vmem:[#allocation11 + $0xa8] sm:$0xff] }
 0x40c   :  { %v1866_v27 = vmul.f32 %v5402_v19, %v5400_v20  ;;  %10891 = vst [vmem:[#allocation178_spill] sm:$0xff] %v8322_v5  ;;  %v8325_v20 = vld [vmem:[#allocation10 + $0xa0] sm:$0xff] }
 0x40d   :  { %10892 = vst [vmem:[#allocation179_spill] sm:$0xff] %v8325_v20  ;;  %v8328_v19 = vld [vmem:[#allocation11 + $0xa0] sm:$0xff] }
 0x40e   :  { %5043 = vmatprep.mubr.msk.f32.mxu0 %vm1180_vm1, %v1866_v27  ;;  %5044 = vmatprep.mubr.msk.f32.mxu1 %vm1180_vm1, %v1866_v27  ;;  %10893 = vst [vmem:[#allocation201_spill] sm:$0xff] %v8328_v19 }
 0x40f   :  { %1935 = vmatmul.mubr.f32.vlgmr.msra.gmra.mxu0 %v8257_v28  ;;  %2008 = vmatmul.mubr.f32.vlgmr.msra.gmra.mxu1 %v8257_v28 }
 0x410   :  { %2017 = vmatpush1.msra.mxu0 %v8263_v49  ;;  %2090 = vmatpush1.msra.mxu1 %v8266_v31 }
 0x411   :  { %2018 = vmatprep.subr.mxu0 %v8269_v16  ;;  %5045 = vmatprep.mubr.msk.f32.mxu0 %vm1180_vm1, %v1866_v27 }
 0x412   :  { %2091 = vmatprep.subr.mxu1 %v8273_v32  ;;  %5046 = vmatprep.mubr.msk.f32.mxu1 %vm1180_vm1, %v1866_v27  ;;  %v8331_v27 = vld [vmem:[#allocation10 + $0x98] sm:$0xff] }
 0x413   :  { %2019 = vmatpush1.msra.mxu0 %v8277_v2  ;;  %2092 = vmatpush1.msra.mxu1 %v8280_v21  ;;  %10894 = vst [vmem:[#allocation202_spill] sm:$0xff] %v8331_v27 }
 0x414   :  { %2020 = vmatprep.subr.mxu0 %v8283_v45  ;;  %2093 = vmatprep.subr.mxu1 %v8286_v33 }
 0x415   :  { %2021 = vmatpush1.msra.mxu0 %v8289_v34  ;;  %2094 = vmatpush1.msra.mxu1 %v8292_v48 }
 0x416   :  { %2022 = vmatprep.subr.mxu0 %v8295_v3  ;;  %2095 = vmatprep.subr.mxu1 %v8298_v25 }
 0x417   :  { %2023 = vmatpush1.msra.mxu0 %v8301_v63  ;;  %2096 = vmatpush1.msra.mxu1 %v8304_v29 }
 0x418   :  { %2024 = vmatprep.subr.mxu0 %v8307_v1  ;;  %2097 = vmatprep.subr.mxu1 %v8310_v26 }
 0x419   :  { %2025 = vmatpush1.msra.mxu0 %v8313_v22  ;;  %2098 = vmatpush1.msra.mxu1 %v8316_v4  ;;  %v8334_v4 = vld [vmem:[#allocation11 + $0x98] sm:$0xff] }
 0x41a   :  { %2026 = vmatprep.subr.mxu0 %v8319_v53  ;;  %2099 = vmatprep.subr.mxu1 %v8322_v5  ;;  %10895 = vst [vmem:[#allocation203_spill] sm:$0xff] %v8334_v4  ;;  %v8337_v53 = vld [vmem:[#allocation10 + $0x90] sm:$0xff] }
 0x41b   :  { %2027 = vmatpush1.msra.mxu0 %v8325_v20  ;;  %2100 = vmatpush1.msra.mxu1 %v8328_v19  ;;  %10896 = vst [vmem:[#allocation204_spill] sm:$0xff] %v8337_v53  ;;  %v8340_v5 = vld [vmem:[#allocation11 + $0x90] sm:$0xff]  ;;  %v8343_v20 = vld [vmem:[#allocation10 + $0x88] sm:$0xff] }
 0x41c   :  { %2028 = vmatprep.subr.mxu0 %v8331_v27  ;;  %2101 = vmatprep.subr.mxu1 %v8334_v4  ;;  %10897 = vst [vmem:[#allocation205_spill] sm:$0xff] %v8340_v5  ;;  %10898 = vst [vmem:[#allocation206_spill] sm:$0xff] %v8343_v20  ;;  %v8346_v19 = vld [vmem:[#allocation11 + $0x88] sm:$0xff]  ;;  %v8349_v27 = vld [vmem:[#allocation10 + $0x80] sm:$0xff] }
 0x41d   :  { %2029 = vmatpush1.msra.mxu0 %v8337_v53  ;;  %2102 = vmatpush1.msra.mxu1 %v8340_v5  ;;  %10899 = vst [vmem:[#allocation207_spill] sm:$0xff] %v8346_v19  ;;  %10900 = vst [vmem:[#allocation208_spill] sm:$0xff] %v8349_v27  ;;  %v8352_v4 = vld [vmem:[#allocation11 + $0x80] sm:$0xff]  ;;  %v8355_v53 = vld [vmem:[#allocation10 + $0x78] sm:$0xff] }
 0x41e   :  { %2030 = vmatprep.subr.mxu0 %v8343_v20  ;;  %2103 = vmatprep.subr.mxu1 %v8346_v19  ;;  %10901 = vst [vmem:[#allocation209_spill] sm:$0xff] %v8352_v4  ;;  %10902 = vst [vmem:[#allocation210_spill] sm:$0xff] %v8355_v53  ;;  %v8358_v5 = vld [vmem:[#allocation11 + $0x78] sm:$0xff]  ;;  %v8361_v20 = vld [vmem:[#allocation10 + $0x70] sm:$0xff] }
 0x41f   :  { %2031 = vmatpush1.msra.mxu0 %v8349_v27  ;;  %2104 = vmatpush1.msra.mxu1 %v8352_v4  ;;  %10903 = vst [vmem:[#allocation211_spill] sm:$0xff] %v8358_v5  ;;  %10904 = vst [vmem:[#allocation212_spill] sm:$0xff] %v8361_v20  ;;  %v8364_v19 = vld [vmem:[#allocation11 + $0x70] sm:$0xff]  ;;  %v8367_v27 = vld [vmem:[#allocation10 + $0x68] sm:$0xff] }
 0x420   :  { %2032 = vmatprep.subr.mxu0 %v8355_v53  ;;  %2105 = vmatprep.subr.mxu1 %v8358_v5  ;;  %10905 = vst [vmem:[#allocation213_spill] sm:$0xff] %v8364_v19  ;;  %10906 = vst [vmem:[#allocation214_spill] sm:$0xff] %v8367_v27  ;;  %v8370_v4 = vld [vmem:[#allocation11 + $0x68] sm:$0xff]  ;;  %v8373_v53 = vld [vmem:[#allocation10 + $0x60] sm:$0xff] }
 0x421   :  { %2033 = vmatpush1.msra.mxu0 %v8361_v20  ;;  %2106 = vmatpush1.msra.mxu1 %v8364_v19  ;;  %10907 = vst [vmem:[#allocation215_spill] sm:$0xff] %v8370_v4  ;;  %10908 = vst [vmem:[#allocation216_spill] sm:$0xff] %v8373_v53  ;;  %v8376_v5 = vld [vmem:[#allocation11 + $0x60] sm:$0xff]  ;;  %v8379_v20 = vld [vmem:[#allocation10 + $0x58] sm:$0xff] }
 0x422   :  { %2034 = vmatprep.subr.mxu0 %v8367_v27  ;;  %2107 = vmatprep.subr.mxu1 %v8370_v4  ;;  %10909 = vst [vmem:[#allocation217_spill] sm:$0xff] %v8376_v5  ;;  %10910 = vst [vmem:[#allocation218_spill] sm:$0xff] %v8379_v20  ;;  %v8382_v19 = vld [vmem:[#allocation11 + $0x58] sm:$0xff]  ;;  %v8385_v27 = vld [vmem:[#allocation10 + $0x50] sm:$0xff] }
 0x423   :  { %2035 = vmatpush1.msra.mxu0 %v8373_v53  ;;  %2108 = vmatpush1.msra.mxu1 %v8376_v5  ;;  %10911 = vst [vmem:[#allocation219_spill] sm:$0xff] %v8382_v19  ;;  %10912 = vst [vmem:[#allocation220_spill] sm:$0xff] %v8385_v27  ;;  %v8388_v4 = vld [vmem:[#allocation11 + $0x50] sm:$0xff]  ;;  %v8391_v53 = vld [vmem:[#allocation10 + $0x48] sm:$0xff] }
 0x424   :  { %2036 = vmatprep.subr.mxu0 %v8379_v20  ;;  %2109 = vmatprep.subr.mxu1 %v8382_v19  ;;  %10913 = vst [vmem:[#allocation221_spill] sm:$0xff] %v8388_v4  ;;  %10914 = vst [vmem:[#allocation222_spill] sm:$0xff] %v8391_v53  ;;  %v8394_v5 = vld [vmem:[#allocation11 + $0x48] sm:$0xff]  ;;  %v8397_v20 = vld [vmem:[#allocation10 + $0x40] sm:$0xff] }
 0x425   :  { %2037 = vmatpush1.msra.mxu0 %v8385_v27  ;;  %2110 = vmatpush1.msra.mxu1 %v8388_v4  ;;  %10915 = vst [vmem:[#allocation223_spill] sm:$0xff] %v8394_v5  ;;  %10916 = vst [vmem:[#allocation224_spill] sm:$0xff] %v8397_v20  ;;  %v8400_v19 = vld [vmem:[#allocation11 + $0x40] sm:$0xff]  ;;  %v8403_v27 = vld [vmem:[#allocation10 + $0x38] sm:$0xff] }
 0x426   :  { %2038 = vmatprep.subr.mxu0 %v8391_v53  ;;  %2111 = vmatprep.subr.mxu1 %v8394_v5  ;;  %10917 = vst [vmem:[#allocation225_spill] sm:$0xff] %v8400_v19  ;;  %10918 = vst [vmem:[#allocation226_spill] sm:$0xff] %v8403_v27  ;;  %v8406_v4 = vld [vmem:[#allocation11 + $0x38] sm:$0xff]  ;;  %v8409_v53 = vld [vmem:[#allocation10 + $0x30] sm:$0xff] }
 0x427   :  { %2039 = vmatpush1.msra.mxu0 %v8397_v20  ;;  %2112 = vmatpush1.msra.mxu1 %v8400_v19  ;;  %10919 = vst [vmem:[#allocation227_spill] sm:$0xff] %v8406_v4  ;;  %10920 = vst [vmem:[#allocation228_spill] sm:$0xff] %v8409_v53  ;;  %v8412_v5 = vld [vmem:[#allocation11 + $0x30] sm:$0xff]  ;;  %v8415_v20 = vld [vmem:[#allocation10 + $0x28] sm:$0xff] }
 0x428   :  { %2040 = vmatprep.subr.mxu0 %v8403_v27  ;;  %2113 = vmatprep.subr.mxu1 %v8406_v4  ;;  %10921 = vst [vmem:[#allocation229_spill] sm:$0xff] %v8412_v5  ;;  %10922 = vst [vmem:[#allocation230_spill] sm:$0xff] %v8415_v20  ;;  %v8418_v19 = vld [vmem:[#allocation11 + $0x28] sm:$0xff]  ;;  %v8421_v27 = vld [vmem:[#allocation10 + $0x20] sm:$0xff] }
 0x429   :  { %2041 = vmatpush1.msra.mxu0 %v8409_v53  ;;  %2114 = vmatpush1.msra.mxu1 %v8412_v5  ;;  %10923 = vst [vmem:[#allocation231_spill] sm:$0xff] %v8418_v19  ;;  %10924 = vst [vmem:[#allocation232_spill] sm:$0xff] %v8421_v27  ;;  %v8424_v4 = vld [vmem:[#allocation11 + $0x20] sm:$0xff]  ;;  %v8427_v53 = vld [vmem:[#allocation10 + $0x18] sm:$0xff] }
 0x42a   :  { %2042 = vmatprep.subr.mxu0 %v8415_v20  ;;  %2115 = vmatprep.subr.mxu1 %v8418_v19  ;;  %10925 = vst [vmem:[#allocation233_spill] sm:$0xff] %v8424_v4  ;;  %10926 = vst [vmem:[#allocation234_spill] sm:$0xff] %v8427_v53  ;;  %v8430_v5 = vld [vmem:[#allocation11 + $0x18] sm:$0xff]  ;;  %v8433_v20 = vld [vmem:[#allocation10 + $0x10] sm:$0xff] }
 0x42b   :  { %2043 = vmatpush1.msra.mxu0 %v8421_v27  ;;  %2116 = vmatpush1.msra.mxu1 %v8424_v4  ;;  %10927 = vst [vmem:[#allocation235_spill] sm:$0xff] %v8430_v5  ;;  %10928 = vst [vmem:[#allocation236_spill] sm:$0xff] %v8433_v20  ;;  %v8436_v19 = vld [vmem:[#allocation11 + $0x10] sm:$0xff]  ;;  %v8439_v27 = vld [vmem:[#allocation10 + $0x8] sm:$0xff] }
 0x42c   :  { %2044 = vmatprep.subr.mxu0 %v8427_v53  ;;  %2117 = vmatprep.subr.mxu1 %v8430_v5  ;;  %10929 = vst [vmem:[#allocation237_spill] sm:$0xff] %v8436_v19  ;;  %10930 = vst [vmem:[#allocation238_spill] sm:$0xff] %v8439_v27  ;;  %v8442_v4 = vld [vmem:[#allocation11 + $0x8] sm:$0xff]  ;;  %v8445_v53 = vld [vmem:[#allocation10] sm:$0xff] }
 0x42d   :  { %2045 = vmatpush1.msra.mxu0 %v8433_v20  ;;  %2118 = vmatpush1.msra.mxu1 %v8436_v19  ;;  %10931 = vst [vmem:[#allocation239_spill] sm:$0xff] %v8442_v4  ;;  %10932 = vst [vmem:[#allocation240_spill] sm:$0xff] %v8445_v53  ;;  %v8448_v5 = vld [vmem:[#allocation11] sm:$0xff]  ;;  %v8451_v20 = vld [vmem:[#allocation10 + $0x138] sm:$0xff] }
 0x42e   :  { %2046 = vmatprep.subr.mxu0 %v8439_v27  ;;  %2119 = vmatprep.subr.mxu1 %v8442_v4  ;;  %10933 = vst [vmem:[#allocation241_spill] sm:$0xff] %v8448_v5  ;;  %10934 = vst [vmem:[#allocation242_spill] sm:$0xff] %v8451_v20  ;;  %v8454_v19 = vld [vmem:[#allocation11 + $0x138] sm:$0xff]  ;;  %v8457_v27 = vld [vmem:[#allocation10 + $0x130] sm:$0xff] }
 0x42f   :  { %2047 = vmatpush1.msra.mxu0 %v8445_v53  ;;  %2120 = vmatpush1.msra.mxu1 %v8448_v5  ;;  %10935 = vst [vmem:[#allocation243_spill] sm:$0xff] %v8454_v19  ;;  %10936 = vst [vmem:[#allocation244_spill] sm:$0xff] %v8457_v27  ;;  %v8460_v4 = vld [vmem:[#allocation11 + $0x130] sm:$0xff]  ;;  %v8463_v53 = vld [vmem:[#allocation10 + $0x128] sm:$0xff] }
 0x430   :  { %2072 = vmatprep.subr.mxu0 %v8451_v20  ;;  %2145 = vmatprep.subr.mxu1 %v8454_v19  ;;  %10937 = vst [vmem:[#allocation245_spill] sm:$0xff] %v8460_v4  ;;  %10938 = vst [vmem:[#allocation246_spill] sm:$0xff] %v8463_v53  ;;  %v8466_v5 = vld [vmem:[#allocation11 + $0x128] sm:$0xff]  ;;  %v8469_v20 = vld [vmem:[#allocation10 + $0x120] sm:$0xff] }
 0x431   :  { %2073 = vmatpush2.msra.mxu0 %v8457_v27  ;;  %2146 = vmatpush2.msra.mxu1 %v8460_v4  ;;  %10939 = vst [vmem:[#allocation247_spill] sm:$0xff] %v8466_v5  ;;  %10940 = vst [vmem:[#allocation248_spill] sm:$0xff] %v8469_v20  ;;  %v8472_v19 = vld [vmem:[#allocation11 + $0x120] sm:$0xff]  ;;  %v8475_v27 = vld [vmem:[#allocation10 + $0x118] sm:$0xff] }
 0x432   :  { %2074 = vmatprep.subr.mxu0 %v8463_v53  ;;  %2147 = vmatprep.subr.mxu1 %v8466_v5  ;;  %10941 = vst [vmem:[#allocation249_spill] sm:$0xff] %v8472_v19  ;;  %10942 = vst [vmem:[#allocation250_spill] sm:$0xff] %v8475_v27  ;;  %v8478_v4 = vld [vmem:[#allocation11 + $0x118] sm:$0xff]  ;;  %v8481_v53 = vld [vmem:[#allocation10 + $0x110] sm:$0xff] }
 0x433   :  { %2075 = vmatpush2.msra.mxu0 %v8469_v20  ;;  %2148 = vmatpush2.msra.mxu1 %v8472_v19  ;;  %10943 = vst [vmem:[#allocation251_spill] sm:$0xff] %v8478_v4  ;;  %v8484_v5 = vld [vmem:[#allocation11 + $0x110] sm:$0xff]  ;;  %v8487_v20 = vld [vmem:[#allocation10 + $0x108] sm:$0xff] }
 0x434   :  { %2076 = vmatprep.subr.mxu0 %v8475_v27  ;;  %2149 = vmatprep.subr.mxu1 %v8478_v4  ;;  %v8490_v19 = vld [vmem:[#allocation11 + $0x108] sm:$0xff]  ;;  %v8493_v27 = vld [vmem:[#allocation10 + $0x100] sm:$0xff] }
 0x435   :  { %2077 = vmatpush2.msra.mxu0 %v8481_v53  ;;  %2150 = vmatpush2.msra.mxu1 %v8484_v5  ;;  %v8496_v4 = vld [vmem:[#allocation11 + $0x100] sm:$0xff] }
 0x436   :  { %2078 = vmatprep.subr.mxu0 %v8487_v20  ;;  %2151 = vmatprep.subr.mxu1 %v8490_v19 }
 0x437   :  { %2079 = vmatpush2.msra.mxu0 %v8493_v27  ;;  %2152 = vmatpush2.msra.mxu1 %v8496_v4 }
 0x438   :  { %2081 = vmatmul.mubr.f32.vlgmr.msra.gmra.mxu0 %v8257_v28  ;;  %2154 = vmatmul.mubr.f32.vlgmr.msra.gmra.mxu1 %v8257_v28  ;;  %v10944_v28 = vld [vmem:[#allocation132_spill] sm:$0xff] }
 0x439   :  { %2213 = vmatprep.subr.mxu0 %v7916_v0  ;;  %2286 = vmatprep.subr.mxu1 %v7920_v7 }
 0x43a   :  { %2214 = vmatpush1.msra.mxu0 %v7924_v6  ;;  %2287 = vmatpush1.msra.mxu1 %v7928_v8 }
 0x43b   :  { %2215 = vmatprep.subr.mxu0 %v7932_v9  ;;  %2288 = vmatprep.subr.mxu1 %v7936_v10 }
 0x43c   :  { %2216 = vmatpush1.msra.mxu0 %v7940_v13  ;;  %2289 = vmatpush1.msra.mxu1 %v7944_v14 }
 0x43d   :  { %2217 = vmatprep.subr.mxu0 %v7948_v15  ;;  %2290 = vmatprep.subr.mxu1 %v7952_v17 }
 0x43e   :  { %2218 = vmatpush1.msra.mxu0 %v7956_v18  ;;  %2291 = vmatpush1.msra.mxu1 %v7960_v44 }
 0x43f   :  { %2219 = vmatprep.subr.mxu0 %v7964_v11  ;;  %2292 = vmatprep.subr.mxu1 %v7968_v47 }
 0x440   :  { %2220 = vmatpush1.msra.mxu0 %v7972_v52  ;;  %2293 = vmatpush1.msra.mxu1 %v7976_v30 }
 0x441   :  { %2221 = vmatprep.subr.mxu0 %v7980_v37  ;;  %2294 = vmatprep.subr.mxu1 %v7984_v43 }
 0x442   :  { %2222 = vmatpush1.msra.mxu0 %v7988_v51  ;;  %2295 = vmatpush1.msra.mxu1 %v7992_v57 }
 0x443   :  { %2223 = vmatprep.subr.mxu0 %v7996_v58  ;;  %2296 = vmatprep.subr.mxu1 %v8000_v55 }
 0x444   :  { %2224 = vmatpush1.msra.mxu0 %v8004_v61  ;;  %2297 = vmatpush1.msra.mxu1 %v8008_v39 }
 0x445   :  { %2225 = vmatprep.subr.mxu0 %v8012_v56  ;;  %2298 = vmatprep.subr.mxu1 %v8016_v62  ;;  %v10990_v56 = vld [vmem:[#allocation88_spill] sm:$0xff] }
 0x446   :  { %2226 = vmatpush1.msra.mxu0 %v8020_v35  ;;  %2299 = vmatpush1.msra.mxu1 %v8024_v36 }
 0x447   :  { %2227 = vmatprep.subr.mxu0 %v8028_v40  ;;  %2300 = vmatprep.subr.mxu1 %v8032_v50  ;;  %v10945_v40 = vld [vmem:[#allocation133_spill] sm:$0xff]  ;;  %v10946_v50 = vld [vmem:[#allocation134_spill] sm:$0xff] }
 0x448   :  { %2228 = vmatpush1.msra.mxu0 %v8036_v42  ;;  %2301 = vmatpush1.msra.mxu1 %v8040_v54  ;;  %v10947_v42 = vld [vmem:[#allocation135_spill] sm:$0xff]  ;;  %v10948_v54 = vld [vmem:[#allocation136_spill] sm:$0xff] }
 0x449   :  { %2229 = vmatprep.subr.mxu0 %v8044_v12  ;;  %2302 = vmatprep.subr.mxu1 %v8048_v60  ;;  %v10949_v12 = vld [vmem:[#allocation137_spill] sm:$0xff]  ;;  %v10950_v60 = vld [vmem:[#allocation138_spill] sm:$0xff] }
 0x44a   :  { %2230 = vmatpush1.msra.mxu0 %v8052_v38  ;;  %2303 = vmatpush1.msra.mxu1 %v8056_v59  ;;  %v10951_v38 = vld [vmem:[#allocation139_spill] sm:$0xff]  ;;  %v10952_v59 = vld [vmem:[#allocation140_spill] sm:$0xff] }
 0x44b   :  { %2231 = vmatprep.subr.mxu0 %v8060_v41  ;;  %2304 = vmatprep.subr.mxu1 %v8064_v46  ;;  %v10953_v41 = vld [vmem:[#allocation141_spill] sm:$0xff]  ;;  %v10954_v46 = vld [vmem:[#allocation142_spill] sm:$0xff] }
 0x44c   :  { %2232 = vmatpush1.msra.mxu0 %v10944_v28  ;;  %2305 = vmatpush1.msra.mxu1 %v10945_v40  ;;  %v10955_v28 = vld [vmem:[#allocation143_spill] sm:$0xff]  ;;  %v10956_v40 = vld [vmem:[#allocation144_spill] sm:$0xff] }
 0x44d   :  { %2233 = vmatprep.subr.mxu0 %v10946_v50  ;;  %2306 = vmatprep.subr.mxu1 %v10947_v42  ;;  %v10957_v50 = vld [vmem:[#allocation145_spill] sm:$0xff]  ;;  %v10958_v42 = vld [vmem:[#allocation146_spill] sm:$0xff] }
 0x44e   :  { %2234 = vmatpush1.msra.mxu0 %v10948_v54  ;;  %2307 = vmatpush1.msra.mxu1 %v10949_v12  ;;  %v10959_v54 = vld [vmem:[#allocation147_spill] sm:$0xff]  ;;  %v10960_v12 = vld [vmem:[#allocation148_spill] sm:$0xff] }
 0x44f   :  { %2235 = vmatprep.subr.mxu0 %v10950_v60  ;;  %2308 = vmatprep.subr.mxu1 %v10951_v38  ;;  %v10961_v60 = vld [vmem:[#allocation149_spill] sm:$0xff]  ;;  %v10962_v38 = vld [vmem:[#allocation150_spill] sm:$0xff] }
 0x450   :  { %2236 = vmatpush1.msra.mxu0 %v10952_v59  ;;  %2309 = vmatpush1.msra.mxu1 %v10953_v41  ;;  %v10963_v59 = vld [vmem:[#allocation151_spill] sm:$0xff]  ;;  %v10964_v41 = vld [vmem:[#allocation152_spill] sm:$0xff] }
 0x451   :  { %2237 = vmatprep.subr.mxu0 %v10954_v46  ;;  %2310 = vmatprep.subr.mxu1 %v10955_v28  ;;  %v10965_v46 = vld [vmem:[#allocation153_spill] sm:$0xff]  ;;  %v10966_v28 = vld [vmem:[#allocation154_spill] sm:$0xff] }
 0x452   :  { %2238 = vmatpush1.msra.mxu0 %v10956_v40  ;;  %2311 = vmatpush1.msra.mxu1 %v10957_v50  ;;  %v10967_v40 = vld [vmem:[#allocation155_spill] sm:$0xff]  ;;  %v10968_v50 = vld [vmem:[#allocation156_spill] sm:$0xff] }
 0x453   :  { %2239 = vmatprep.subr.mxu0 %v10958_v42  ;;  %2312 = vmatprep.subr.mxu1 %v10959_v54  ;;  %v10969_v42 = vld [vmem:[#allocation157_spill] sm:$0xff]  ;;  %v10970_v54 = vld [vmem:[#allocation158_spill] sm:$0xff] }
 0x454   :  { %2240 = vmatpush1.msra.mxu0 %v10960_v12  ;;  %2313 = vmatpush1.msra.mxu1 %v10961_v60  ;;  %v10971_v12 = vld [vmem:[#allocation159_spill] sm:$0xff]  ;;  %v10972_v60 = vld [vmem:[#allocation160_spill] sm:$0xff] }
 0x455   :  { %2241 = vmatprep.subr.mxu0 %v10962_v38  ;;  %2314 = vmatprep.subr.mxu1 %v10963_v59  ;;  %v10973_v38 = vld [vmem:[#allocation161_spill] sm:$0xff]  ;;  %v10974_v59 = vld [vmem:[#allocation162_spill] sm:$0xff] }
 0x456   :  { %2242 = vmatpush1.msra.mxu0 %v10964_v41  ;;  %2315 = vmatpush1.msra.mxu1 %v10965_v46  ;;  %v10975_v41 = vld [vmem:[#allocation163_spill] sm:$0xff]  ;;  %v10976_v46 = vld [vmem:[#allocation164_spill] sm:$0xff] }
 0x457   :  { %2243 = vmatprep.subr.mxu0 %v10966_v28  ;;  %2316 = vmatprep.subr.mxu1 %v10967_v40  ;;  %v10977_v28 = vld [vmem:[#allocation165_spill] sm:$0xff]  ;;  %v10978_v40 = vld [vmem:[#allocation166_spill] sm:$0xff] }
 0x458   :  { %2244 = vmatpush1.msra.mxu0 %v10968_v50  ;;  %2317 = vmatpush1.msra.mxu1 %v10969_v42  ;;  %v10979_v50 = vld [vmem:[#allocation167_spill] sm:$0xff]  ;;  %v10980_v42 = vld [vmem:[#allocation168_spill] sm:$0xff] }
 0x459   :  { %2269 = vmatprep.subr.mxu0 %v10970_v54  ;;  %2342 = vmatprep.subr.mxu1 %v10971_v12  ;;  %v10981_v54 = vld [vmem:[#allocation169_spill] sm:$0xff]  ;;  %v10982_v12 = vld [vmem:[#allocation170_spill] sm:$0xff] }
 0x45a   :  { %2270 = vmatpush2.msra.mxu0 %v10972_v60  ;;  %2343 = vmatpush2.msra.mxu1 %v10973_v38  ;;  %v10983_v60 = vld [vmem:[#allocation171_spill] sm:$0xff]  ;;  %v10984_v38 = vld [vmem:[#allocation172_spill] sm:$0xff] }
 0x45b   :  { %2271 = vmatprep.subr.mxu0 %v10974_v59  ;;  %2344 = vmatprep.subr.mxu1 %v10975_v41  ;;  %v10985_v59 = vld [vmem:[#allocation173_spill] sm:$0xff]  ;;  %v10986_v41 = vld [vmem:[#allocation174_spill] sm:$0xff] }
 0x45c   :  { %2272 = vmatpush2.msra.mxu0 %v10976_v46  ;;  %2345 = vmatpush2.msra.mxu1 %v10977_v28  ;;  %v10987_v46 = vld [vmem:[#allocation175_spill] sm:$0xff] }
 0x45d   :  { %2273 = vmatprep.subr.mxu0 %v10978_v40  ;;  %2346 = vmatprep.subr.mxu1 %v10979_v50  ;;  %v10988_v50 = vld [vmem:[#allocation86_spill] sm:$0xff] }
 0x45e   :  { %2274 = vmatpush2.msra.mxu0 %v10980_v42  ;;  %2347 = vmatpush2.msra.mxu1 %v10981_v54  ;;  %v10989_v42 = vld [vmem:[#allocation87_spill] sm:$0xff] }
 0x45f   :  { %2275 = vmatprep.subr.mxu0 %v10982_v12  ;;  %2348 = vmatprep.subr.mxu1 %v10983_v60  ;;  %v10991_v60 = vld [vmem:[#allocation89_spill] sm:$0xff] }
 0x460   :  { %2276 = vmatpush2.msra.mxu0 %v10984_v38  ;;  %2349 = vmatpush2.msra.mxu1 %v10985_v59 }
 0x461   :  { %2359 = vmatprep.subr.mxu0 %v10986_v41  ;;  %2432 = vmatprep.subr.mxu1 %v10987_v46 }
 0x4cf   :  { %v1936_v28 = vpop.f32.mrf.mxu0  ;;  %v2009_v40 = vpop.f32.mrf.mxu1 }
 0x4d0   :  { %v1941_v35 = vadd.f32 %v1936_v28, %v10988_v50  ;;  %v2014_v62 = vadd.f32 %v2009_v40, %v10989_v42 }
 0x4d1   :  { %v1938_v36 = vpop.f32.mrf.mxu0  ;;  %v2011_v54 = vpop.f32.mrf.mxu1 }
 0x4d2   :  { %v1942_v12 = vadd.f32 %v1938_v36, %v10990_v56  ;;  %v5049_v39 = vmul.f32 -1.442695, %v1941_v35  ;;  %v2015_v61 = vadd.f32 %v2011_v54, %v10991_v60  ;;  %v5047_v38 = vmul.f32 -1.442695, %v2014_v62  ;;  %v10992_v36 = vld [vmem:[#allocation110_spill] sm:$0xff]  ;;  %v10993_v54 = vld [vmem:[#allocation111_spill] sm:$0xff] }
 0x4d3   :  { %v10994_v60 = vld [vmem:[#allocation112_spill] sm:$0xff] }
 0x4d4   :  { %v5050_v55 = vmul.f32 -1.442695, %v1942_v12  ;;  %5403 = vpow2.f32 %v5049_v39  ;;  %v5048_v59 = vmul.f32 -1.442695, %v2015_v61 }
 0x4d5   :  { %5405 = vpow2.f32 %v5047_v38 }
 0x4d6   :  { %5407 = vpow2.f32 %v5050_v55 }
 0x4d7   :  { %5409 = vpow2.f32 %v5048_v59  ;;  %v10995_v59 = vld [vmem:[#allocation180_spill] sm:$0xff] }
 0x4e1   :  { %v5404_v46 = vpop.eup %5403 }
 0x4e2   :  { %v5406_v41 = vpop.eup %5405  ;;  %v2182_v57 = vadd.f32 1.0, %v5404_v46 }
 0x4e3   :  { %v5408_v58 = vpop.eup %5407  ;;  %v2168_v28 = vadd.f32 1.0, %v5406_v41 }
 0x4e4   :  { %v5410_v50 = vpop.eup %5409  ;;  %v2183_v40 = vadd.f32 1.0, %v5408_v58  ;;  %5411 = vrcp.f32 %v2182_v57 }
 0x4e5   :  { %v2169_v42 = vadd.f32 1.0, %v5410_v50  ;;  %5413 = vrcp.f32 %v2168_v28 }
 0x4e6   :  { %5415 = vrcp.f32 %v2183_v40 }
 0x4f1   :  { %v5412_v58 = vpop.eup %5411 }
 0x4f2   :  { %v5414_v41 = vpop.eup %5413 }
 0x4f3   :  { %v5416_v50 = vpop.eup %5415  ;;  %v2174_v40 = vmul.f32 %v5414_v41, %v8250_v24  ;;  %v10997_v41 = vld [vmem:[#allocation177_spill] sm:$0xff] }
 0x4f8   :  { %v2082_v56 = vpop.f32.mrf.mxu0  ;;  %v2155_v35 = vpop.f32.mrf.mxu1 }
 0x4f9   :  { %v2087_v62 = vadd.f32 %v2082_v56, %v10992_v36  ;;  %v2160_v39 = vadd.f32 %v2155_v35, %v10993_v54 }
 0x4fa   :  { %v2084_v61 = vpop.f32.mrf.mxu0  ;;  %v2157_v55 = vpop.f32.mrf.mxu1 }
 0x4fb   :  { %5417 = vtanh.f32 %v2087_v62  ;;  %v5051_v12 = vmul.f32 -1.442695, %v2160_v39  ;;  %v2088_v38 = vadd.f32 %v2084_v61, %v10994_v60  ;;  %v2161_v46 = vadd.f32 %v2157_v55, %v10995_v59 }
 0x4fc   :  { %5419 = vrcp.f32 %v2169_v42 }
 0x4fd   :  { %5421 = vpow2.f32 %v5051_v12  ;;  %v5052_v57 = vmul.f32 -1.442695, %v2161_v46 }
 0x4fe   :  { %5423 = vtanh.f32 %v2088_v38 }
 0x4ff   :  { %5425 = vpow2.f32 %v5052_v57 }
 0x508   :  { %v5418_v28 = vpop.eup %5417 }
 0x509   :  { %v5420_v56 = vpop.eup %5419  ;;  %v2190_v35 = vmul.f32 %v5418_v28, %v5412_v58  ;;  %v10999_v28 = vld [vmem:[#allocation179_spill] sm:$0xff] }
 0x50a   :  { %v5422_v36 = vpop.eup %5421  ;;  %v2175_v42 = vmul.f32 %v5420_v56, %v8254_v23  ;;  %v10996_v23 = vld [vmem:[#allocation176_spill] sm:$0xff]  ;;  %v11000_v56 = vld [vmem:[#allocation201_spill] sm:$0xff] }
 0x50b   :  { %v5424_v62 = vpop.eup %5423  ;;  %v8592_v54 = vadd.f32 %v2190_v35, %v2174_v40  ;;  %v2200_v39 = vadd.f32 1.0, %v5422_v36  ;;  %v11001_v40 = vld [vmem:[#allocation202_spill] sm:$0xff]  ;;  %v11002_v35 = vld [vmem:[#allocation203_spill] sm:$0xff]  ;;  %v11003_v36 = vld [vmem:[#allocation204_spill] sm:$0xff] }
 0x50c   :  { %v5426_v61 = vpop.eup %5425  ;;  %v2191_v55 = vmul.f32 %v5424_v62, %v5416_v50  ;;  %v10998_v50 = vld [vmem:[#allocation178_spill] sm:$0xff]  ;;  %v11004_v62 = vld [vmem:[#allocation205_spill] sm:$0xff] }
 0x50d   :  { %5427 = vtanh.f32 %v8592_v54  ;;  %v2201_v12 = vadd.f32 1.0, %v5426_v61  ;;  %v11006_v61 = vld [vmem:[#allocation207_spill] sm:$0xff] }
 0x50e   :  { %5429 = vrcp.f32 %v2200_v39  ;;  %v8596_v60 = vadd.f32 %v2191_v55, %v2175_v42  ;;  %v11005_v39 = vld [vmem:[#allocation206_spill] sm:$0xff]  ;;  %v11007_v42 = vld [vmem:[#allocation208_spill] sm:$0xff]  ;;  %v11008_v55 = vld [vmem:[#allocation209_spill] sm:$0xff] }
 0x50f   :  { %5431 = vrcp.f32 %v2201_v12  ;;  %v11009_v12 = vld [vmem:[#allocation210_spill] sm:$0xff] }
 0x510   :  { %5433 = vtanh.f32 %v8596_v60 }
 0x51a   :  { %v5428_v24 = vpop.eup %5427 }
 0x51b   :  { %v5430_v38 = vpop.eup %5429 }
 0x51c   :  { %v5432_v59 = vpop.eup %5431  ;;  %v8599_v58 = vmul.f32 %v5430_v38, %v5428_v24  ;;  %v11010_v24 = vld [vmem:[#allocation211_spill] sm:$0xff]  ;;  %v11011_v38 = vld [vmem:[#allocation212_spill] sm:$0xff] }
 0x51d   :  { %v5434_v46 = vpop.eup %5433 }
 0x51e   :  { %v2209_v57 = vmul.f32 %v5434_v46, %v5432_v59  ;;  %v11012_v59 = vld [vmem:[#allocation213_spill] sm:$0xff]  ;;  %v11013_v46 = vld [vmem:[#allocation214_spill] sm:$0xff] }
 0x520   :  { %5053 = vmatprep.mubr.msk.f32.mxu0 %vm1180_vm1, %v2209_v57  ;;  %5054 = vmatprep.mubr.msk.f32.mxu1 %vm1180_vm1, %v2209_v57 }
 0x521   :  { %2278 = vmatmul.mubr.f32.vlgmr.msra.gmra.mxu0 %v8599_v58  ;;  %2351 = vmatmul.mubr.f32.vlgmr.msra.gmra.mxu1 %v8599_v58 }
 0x522   :  { %2360 = vmatpush1.msra.mxu0 %v8263_v49  ;;  %2433 = vmatpush1.msra.mxu1 %v8266_v31 }
 0x523   :  { %2361 = vmatprep.subr.mxu0 %v8269_v16  ;;  %5055 = vmatprep.mubr.msk.f32.mxu0 %vm1180_vm1, %v2209_v57 }
 0x524   :  { %2434 = vmatprep.subr.mxu1 %v8273_v32  ;;  %5056 = vmatprep.mubr.msk.f32.mxu1 %vm1180_vm1, %v2209_v57  ;;  %v11014_v57 = vld [vmem:[#allocation215_spill] sm:$0xff] }
 0x525   :  { %2362 = vmatpush1.msra.mxu0 %v8277_v2  ;;  %2435 = vmatpush1.msra.mxu1 %v8280_v21 }
 0x526   :  { %2363 = vmatprep.subr.mxu0 %v8283_v45  ;;  %2436 = vmatprep.subr.mxu1 %v8286_v33 }
 0x527   :  { %2364 = vmatpush1.msra.mxu0 %v8289_v34  ;;  %2437 = vmatpush1.msra.mxu1 %v8292_v48 }
 0x528   :  { %2365 = vmatprep.subr.mxu0 %v8295_v3  ;;  %2438 = vmatprep.subr.mxu1 %v8298_v25 }
 0x529   :  { %2366 = vmatpush1.msra.mxu0 %v8301_v63  ;;  %2439 = vmatpush1.msra.mxu1 %v8304_v29 }
 0x52a   :  { %2367 = vmatprep.subr.mxu0 %v8307_v1  ;;  %2440 = vmatprep.subr.mxu1 %v8310_v26 }
 0x52b   :  { %2368 = vmatpush1.msra.mxu0 %v8313_v22  ;;  %2441 = vmatpush1.msra.mxu1 %v10996_v23 }
 0x52c   :  { %2369 = vmatprep.subr.mxu0 %v10997_v41  ;;  %2442 = vmatprep.subr.mxu1 %v10998_v50 }
 0x52d   :  { %2370 = vmatpush1.msra.mxu0 %v10999_v28  ;;  %2443 = vmatpush1.msra.mxu1 %v11000_v56 }
 0x52e   :  { %2371 = vmatprep.subr.mxu0 %v11001_v40  ;;  %2444 = vmatprep.subr.mxu1 %v11002_v35 }
 0x52f   :  { %2372 = vmatpush1.msra.mxu0 %v11003_v36  ;;  %2445 = vmatpush1.msra.mxu1 %v11004_v62  ;;  %v11015_v62 = vld [vmem:[#allocation216_spill] sm:$0xff] }
 0x530   :  { %2373 = vmatprep.subr.mxu0 %v11005_v39  ;;  %2446 = vmatprep.subr.mxu1 %v11006_v61  ;;  %v11016_v39 = vld [vmem:[#allocation217_spill] sm:$0xff]  ;;  %v11017_v61 = vld [vmem:[#allocation218_spill] sm:$0xff] }
 0x531   :  { %2374 = vmatpush1.msra.mxu0 %v11007_v42  ;;  %2447 = vmatpush1.msra.mxu1 %v11008_v55  ;;  %v11018_v42 = vld [vmem:[#allocation219_spill] sm:$0xff]  ;;  %v11019_v55 = vld [vmem:[#allocation220_spill] sm:$0xff] }
 0x532   :  { %2375 = vmatprep.subr.mxu0 %v11009_v12  ;;  %2448 = vmatprep.subr.mxu1 %v11010_v24  ;;  %v11020_v12 = vld [vmem:[#allocation221_spill] sm:$0xff]  ;;  %v11021_v24 = vld [vmem:[#allocation222_spill] sm:$0xff] }
 0x533   :  { %2376 = vmatpush1.msra.mxu0 %v11011_v38  ;;  %2449 = vmatpush1.msra.mxu1 %v11012_v59  ;;  %v11022_v38 = vld [vmem:[#allocation223_spill] sm:$0xff]  ;;  %v11023_v59 = vld [vmem:[#allocation224_spill] sm:$0xff] }
 0x534   :  { %2377 = vmatprep.subr.mxu0 %v11013_v46  ;;  %2450 = vmatprep.subr.mxu1 %v11014_v57  ;;  %v11024_v46 = vld [vmem:[#allocation225_spill] sm:$0xff]  ;;  %v11025_v57 = vld [vmem:[#allocation226_spill] sm:$0xff] }
 0x535   :  { %2378 = vmatpush1.msra.mxu0 %v11015_v62  ;;  %2451 = vmatpush1.msra.mxu1 %v11016_v39  ;;  %v11026_v62 = vld [vmem:[#allocation227_spill] sm:$0xff]  ;;  %v11027_v39 = vld [vmem:[#allocation228_spill] sm:$0xff] }
 0x536   :  { %2379 = vmatprep.subr.mxu0 %v11017_v61  ;;  %2452 = vmatprep.subr.mxu1 %v11018_v42  ;;  %v11028_v61 = vld [vmem:[#allocation229_spill] sm:$0xff]  ;;  %v11029_v42 = vld [vmem:[#allocation230_spill] sm:$0xff] }
 0x537   :  { %2380 = vmatpush1.msra.mxu0 %v11019_v55  ;;  %2453 = vmatpush1.msra.mxu1 %v11020_v12  ;;  %v11030_v55 = vld [vmem:[#allocation231_spill] sm:$0xff]  ;;  %v11031_v12 = vld [vmem:[#allocation232_spill] sm:$0xff] }
 0x538   :  { %2381 = vmatprep.subr.mxu0 %v11021_v24  ;;  %2454 = vmatprep.subr.mxu1 %v11022_v38  ;;  %v11032_v24 = vld [vmem:[#allocation233_spill] sm:$0xff]  ;;  %v11033_v38 = vld [vmem:[#allocation234_spill] sm:$0xff] }
 0x539   :  { %2382 = vmatpush1.msra.mxu0 %v11023_v59  ;;  %2455 = vmatpush1.msra.mxu1 %v11024_v46  ;;  %v11034_v59 = vld [vmem:[#allocation235_spill] sm:$0xff]  ;;  %v11035_v46 = vld [vmem:[#allocation236_spill] sm:$0xff] }
 0x53a   :  { %2383 = vmatprep.subr.mxu0 %v11025_v57  ;;  %2456 = vmatprep.subr.mxu1 %v11026_v62  ;;  %v11036_v57 = vld [vmem:[#allocation237_spill] sm:$0xff]  ;;  %v11037_v62 = vld [vmem:[#allocation238_spill] sm:$0xff] }
 0x53b   :  { %2384 = vmatpush1.msra.mxu0 %v11027_v39  ;;  %2457 = vmatpush1.msra.mxu1 %v11028_v61  ;;  %v11038_v39 = vld [vmem:[#allocation239_spill] sm:$0xff]  ;;  %v11039_v61 = vld [vmem:[#allocation240_spill] sm:$0xff] }
 0x53c   :  { %2385 = vmatprep.subr.mxu0 %v11029_v42  ;;  %2458 = vmatprep.subr.mxu1 %v11030_v55  ;;  %v11040_v42 = vld [vmem:[#allocation241_spill] sm:$0xff]  ;;  %v11041_v55 = vld [vmem:[#allocation242_spill] sm:$0xff] }
 0x53d   :  { %2386 = vmatpush1.msra.mxu0 %v11031_v12  ;;  %2459 = vmatpush1.msra.mxu1 %v11032_v24  ;;  %v11042_v12 = vld [vmem:[#allocation243_spill] sm:$0xff]  ;;  %v11043_v24 = vld [vmem:[#allocation244_spill] sm:$0xff] }
 0x53e   :  { %2387 = vmatprep.subr.mxu0 %v11033_v38  ;;  %2460 = vmatprep.subr.mxu1 %v11034_v59  ;;  %v11044_v38 = vld [vmem:[#allocation245_spill] sm:$0xff]  ;;  %v11045_v59 = vld [vmem:[#allocation246_spill] sm:$0xff] }
 0x53f   :  { %2388 = vmatpush1.msra.mxu0 %v11035_v46  ;;  %2461 = vmatpush1.msra.mxu1 %v11036_v57  ;;  %v11046_v46 = vld [vmem:[#allocation247_spill] sm:$0xff]  ;;  %v11047_v57 = vld [vmem:[#allocation248_spill] sm:$0xff] }
 0x540   :  { %2389 = vmatprep.subr.mxu0 %v11037_v62  ;;  %2462 = vmatprep.subr.mxu1 %v11038_v39  ;;  %v11048_v62 = vld [vmem:[#allocation249_spill] sm:$0xff]  ;;  %v11049_v39 = vld [vmem:[#allocation250_spill] sm:$0xff] }
 0x541   :  { %2390 = vmatpush1.msra.mxu0 %v11039_v61  ;;  %2463 = vmatpush1.msra.mxu1 %v11040_v42  ;;  %v11050_v61 = vld [vmem:[#allocation251_spill] sm:$0xff] }
 0x542   :  { %2415 = vmatprep.subr.mxu0 %v11041_v55  ;;  %2488 = vmatprep.subr.mxu1 %v11042_v12 }
 0x543   :  { %2416 = vmatpush2.msra.mxu0 %v11043_v24  ;;  %2489 = vmatpush2.msra.mxu1 %v11044_v38 }
 0x544   :  { %2417 = vmatprep.subr.mxu0 %v11045_v59  ;;  %2490 = vmatprep.subr.mxu1 %v11046_v46 }
 0x545   :  { %2418 = vmatpush2.msra.mxu0 %v11047_v57  ;;  %2491 = vmatpush2.msra.mxu1 %v11048_v62 }
 0x546   :  { %2419 = vmatprep.subr.mxu0 %v11049_v39  ;;  %2492 = vmatprep.subr.mxu1 %v11050_v61 }
 0x547   :  { %2420 = vmatpush2.msra.mxu0 %v8481_v53  ;;  %2493 = vmatpush2.msra.mxu1 %v8484_v5 }
 0x548   :  { %2421 = vmatprep.subr.mxu0 %v8487_v20  ;;  %2494 = vmatprep.subr.mxu1 %v8490_v19 }
 0x549   :  { %2422 = vmatpush2.msra.mxu0 %v8493_v27  ;;  %2495 = vmatpush2.msra.mxu1 %v8496_v4 }
 0x54a   :  { %2424 = vmatmul.mubr.f32.vlgmr.msra.gmra.mxu0 %v8599_v58  ;;  %2497 = vmatmul.mubr.f32.vlgmr.msra.gmra.mxu1 %v8599_v58  ;;  %v11070_v58 = vld [vmem:[#allocation132_spill] sm:$0xff] }
 0x54b   :  { %2556 = vmatprep.subr.mxu0 %v7916_v0  ;;  %2629 = vmatprep.subr.mxu1 %v7920_v7  ;;  %v11051_v0 = vld [vmem:[#allocation113_spill] sm:$0xff]  ;;  %v11052_v7 = vld [vmem:[#allocation114_spill] sm:$0xff] }
 0x54c   :  { %2557 = vmatpush1.msra.mxu0 %v7924_v6  ;;  %2630 = vmatpush1.msra.mxu1 %v7928_v8  ;;  %v11053_v6 = vld [vmem:[#allocation115_spill] sm:$0xff]  ;;  %v11054_v8 = vld [vmem:[#allocation116_spill] sm:$0xff] }
 0x54d   :  { %2558 = vmatprep.subr.mxu0 %v7932_v9  ;;  %2631 = vmatprep.subr.mxu1 %v7936_v10  ;;  %v11055_v9 = vld [vmem:[#allocation117_spill] sm:$0xff]  ;;  %v11056_v10 = vld [vmem:[#allocation118_spill] sm:$0xff] }
 0x54e   :  { %2559 = vmatpush1.msra.mxu0 %v7940_v13  ;;  %2632 = vmatpush1.msra.mxu1 %v7944_v14  ;;  %v11057_v13 = vld [vmem:[#allocation119_spill] sm:$0xff]  ;;  %v11058_v14 = vld [vmem:[#allocation120_spill] sm:$0xff] }
 0x54f   :  { %2560 = vmatprep.subr.mxu0 %v7948_v15  ;;  %2633 = vmatprep.subr.mxu1 %v7952_v17  ;;  %v11059_v15 = vld [vmem:[#allocation121_spill] sm:$0xff]  ;;  %v11060_v17 = vld [vmem:[#allocation122_spill] sm:$0xff] }
 0x550   :  { %2561 = vmatpush1.msra.mxu0 %v7956_v18  ;;  %2634 = vmatpush1.msra.mxu1 %v7960_v44  ;;  %v11061_v18 = vld [vmem:[#allocation123_spill] sm:$0xff]  ;;  %v11062_v44 = vld [vmem:[#allocation124_spill] sm:$0xff] }
 0x551   :  { %2562 = vmatprep.subr.mxu0 %v7964_v11  ;;  %2635 = vmatprep.subr.mxu1 %v7968_v47  ;;  %v11063_v11 = vld [vmem:[#allocation125_spill] sm:$0xff]  ;;  %v11064_v47 = vld [vmem:[#allocation126_spill] sm:$0xff] }
 0x552   :  { %2563 = vmatpush1.msra.mxu0 %v7972_v52  ;;  %2636 = vmatpush1.msra.mxu1 %v7976_v30  ;;  %v11065_v52 = vld [vmem:[#allocation127_spill] sm:$0xff]  ;;  %v11066_v30 = vld [vmem:[#allocation128_spill] sm:$0xff] }
 0x553   :  { %2564 = vmatprep.subr.mxu0 %v7980_v37  ;;  %2637 = vmatprep.subr.mxu1 %v7984_v43  ;;  %v11067_v37 = vld [vmem:[#allocation129_spill] sm:$0xff]  ;;  %v11068_v43 = vld [vmem:[#allocation130_spill] sm:$0xff] }
 0x554   :  { %2565 = vmatpush1.msra.mxu0 %v7988_v51  ;;  %2638 = vmatpush1.msra.mxu1 %v11051_v0  ;;  %v11069_v51 = vld [vmem:[#allocation131_spill] sm:$0xff]  ;;  %v11071_v0 = vld [vmem:[#allocation133_spill] sm:$0xff] }
 0x555   :  { %2566 = vmatprep.subr.mxu0 %v11052_v7  ;;  %2639 = vmatprep.subr.mxu1 %v11053_v6  ;;  %v11072_v7 = vld [vmem:[#allocation134_spill] sm:$0xff]  ;;  %v11073_v6 = vld [vmem:[#allocation135_spill] sm:$0xff] }
 0x556   :  { %2567 = vmatpush1.msra.mxu0 %v11054_v8  ;;  %2640 = vmatpush1.msra.mxu1 %v11055_v9  ;;  %v11074_v8 = vld [vmem:[#allocation136_spill] sm:$0xff]  ;;  %v11075_v9 = vld [vmem:[#allocation137_spill] sm:$0xff] }
 0x557   :  { %2568 = vmatprep.subr.mxu0 %v11056_v10  ;;  %2641 = vmatprep.subr.mxu1 %v11057_v13  ;;  %v11076_v10 = vld [vmem:[#allocation138_spill] sm:$0xff]  ;;  %v11077_v13 = vld [vmem:[#allocation139_spill] sm:$0xff] }
 0x558   :  { %2569 = vmatpush1.msra.mxu0 %v11058_v14  ;;  %2642 = vmatpush1.msra.mxu1 %v11059_v15  ;;  %v11078_v14 = vld [vmem:[#allocation140_spill] sm:$0xff]  ;;  %v11079_v15 = vld [vmem:[#allocation141_spill] sm:$0xff] }
 0x559   :  { %2570 = vmatprep.subr.mxu0 %v11060_v17  ;;  %2643 = vmatprep.subr.mxu1 %v11061_v18  ;;  %v11080_v17 = vld [vmem:[#allocation142_spill] sm:$0xff]  ;;  %v11081_v18 = vld [vmem:[#allocation143_spill] sm:$0xff] }
 0x55a   :  { %2571 = vmatpush1.msra.mxu0 %v11062_v44  ;;  %2644 = vmatpush1.msra.mxu1 %v11063_v11  ;;  %v11082_v44 = vld [vmem:[#allocation144_spill] sm:$0xff]  ;;  %v11083_v11 = vld [vmem:[#allocation145_spill] sm:$0xff] }
 0x55b   :  { %2572 = vmatprep.subr.mxu0 %v11064_v47  ;;  %2645 = vmatprep.subr.mxu1 %v11065_v52  ;;  %v11084_v47 = vld [vmem:[#allocation146_spill] sm:$0xff]  ;;  %v11085_v52 = vld [vmem:[#allocation147_spill] sm:$0xff] }
 0x55c   :  { %2573 = vmatpush1.msra.mxu0 %v11066_v30  ;;  %2646 = vmatpush1.msra.mxu1 %v11067_v37  ;;  %v11086_v30 = vld [vmem:[#allocation148_spill] sm:$0xff]  ;;  %v11087_v37 = vld [vmem:[#allocation149_spill] sm:$0xff] }
 0x55d   :  { %2574 = vmatprep.subr.mxu0 %v11068_v43  ;;  %2647 = vmatprep.subr.mxu1 %v11069_v51  ;;  %v11088_v43 = vld [vmem:[#allocation150_spill] sm:$0xff]  ;;  %v11089_v51 = vld [vmem:[#allocation151_spill] sm:$0xff] }
 0x55e   :  { %2575 = vmatpush1.msra.mxu0 %v11070_v58  ;;  %2648 = vmatpush1.msra.mxu1 %v11071_v0  ;;  %v11090_v58 = vld [vmem:[#allocation152_spill] sm:$0xff]  ;;  %v11091_v0 = vld [vmem:[#allocation153_spill] sm:$0xff] }
 0x55f   :  { %2576 = vmatprep.subr.mxu0 %v11072_v7  ;;  %2649 = vmatprep.subr.mxu1 %v11073_v6  ;;  %v11092_v7 = vld [vmem:[#allocation154_spill] sm:$0xff]  ;;  %v11093_v6 = vld [vmem:[#allocation155_spill] sm:$0xff] }
 0x560   :  { %2577 = vmatpush1.msra.mxu0 %v11074_v8  ;;  %2650 = vmatpush1.msra.mxu1 %v11075_v9  ;;  %v11094_v8 = vld [vmem:[#allocation156_spill] sm:$0xff]  ;;  %v11095_v9 = vld [vmem:[#allocation157_spill] sm:$0xff] }
 0x561   :  { %2578 = vmatprep.subr.mxu0 %v11076_v10  ;;  %2651 = vmatprep.subr.mxu1 %v11077_v13  ;;  %v11096_v10 = vld [vmem:[#allocation158_spill] sm:$0xff]  ;;  %v11097_v13 = vld [vmem:[#allocation159_spill] sm:$0xff] }
 0x562   :  { %2579 = vmatpush1.msra.mxu0 %v11078_v14  ;;  %2652 = vmatpush1.msra.mxu1 %v11079_v15  ;;  %v11098_v14 = vld [vmem:[#allocation160_spill] sm:$0xff]  ;;  %v11099_v15 = vld [vmem:[#allocation161_spill] sm:$0xff] }
 0x563   :  { %2580 = vmatprep.subr.mxu0 %v11080_v17  ;;  %2653 = vmatprep.subr.mxu1 %v11081_v18  ;;  %v11100_v17 = vld [vmem:[#allocation162_spill] sm:$0xff]  ;;  %v11101_v18 = vld [vmem:[#allocation163_spill] sm:$0xff] }
 0x564   :  { %2581 = vmatpush1.msra.mxu0 %v11082_v44  ;;  %2654 = vmatpush1.msra.mxu1 %v11083_v11  ;;  %v11102_v44 = vld [vmem:[#allocation164_spill] sm:$0xff]  ;;  %v11103_v11 = vld [vmem:[#allocation165_spill] sm:$0xff] }
 0x565   :  { %2582 = vmatprep.subr.mxu0 %v11084_v47  ;;  %2655 = vmatprep.subr.mxu1 %v11085_v52  ;;  %v11104_v47 = vld [vmem:[#allocation166_spill] sm:$0xff]  ;;  %v11105_v52 = vld [vmem:[#allocation167_spill] sm:$0xff] }
 0x566   :  { %2583 = vmatpush1.msra.mxu0 %v11086_v30  ;;  %2656 = vmatpush1.msra.mxu1 %v11087_v37  ;;  %v11106_v30 = vld [vmem:[#allocation168_spill] sm:$0xff]  ;;  %v11107_v37 = vld [vmem:[#allocation169_spill] sm:$0xff] }
 0x567   :  { %2584 = vmatprep.subr.mxu0 %v11088_v43  ;;  %2657 = vmatprep.subr.mxu1 %v11089_v51  ;;  %v11108_v43 = vld [vmem:[#allocation170_spill] sm:$0xff]  ;;  %v11109_v51 = vld [vmem:[#allocation171_spill] sm:$0xff] }
 0x568   :  { %2585 = vmatpush1.msra.mxu0 %v11090_v58  ;;  %2658 = vmatpush1.msra.mxu1 %v11091_v0  ;;  %v11110_v58 = vld [vmem:[#allocation172_spill] sm:$0xff]  ;;  %v11111_v0 = vld [vmem:[#allocation173_spill] sm:$0xff] }
 0x569   :  { %2586 = vmatprep.subr.mxu0 %v11092_v7  ;;  %2659 = vmatprep.subr.mxu1 %v11093_v6  ;;  %v11112_v7 = vld [vmem:[#allocation174_spill] sm:$0xff]  ;;  %v11113_v6 = vld [vmem:[#allocation175_spill] sm:$0xff] }
 0x56a   :  { %2587 = vmatpush1.msra.mxu0 %v11094_v8  ;;  %2660 = vmatpush1.msra.mxu1 %v11095_v9 }
 0x56b   :  { %2612 = vmatprep.subr.mxu0 %v11096_v10  ;;  %2685 = vmatprep.subr.mxu1 %v11097_v13  ;;  %v11114_v13 = vld [vmem:[#allocation90_spill] sm:$0xff] }
 0x56c   :  { %2613 = vmatpush2.msra.mxu0 %v11098_v14  ;;  %2686 = vmatpush2.msra.mxu1 %v11099_v15  ;;  %v11115_v15 = vld [vmem:[#allocation91_spill] sm:$0xff] }
 0x56d   :  { %2614 = vmatprep.subr.mxu0 %v11100_v17  ;;  %2687 = vmatprep.subr.mxu1 %v11101_v18 }
 0x56e   :  { %2615 = vmatpush2.msra.mxu0 %v11102_v44  ;;  %2688 = vmatpush2.msra.mxu1 %v11103_v11  ;;  %v11116_v44 = vld [vmem:[#allocation92_spill] sm:$0xff] }
 0x56f   :  { %2616 = vmatprep.subr.mxu0 %v11104_v47  ;;  %2689 = vmatprep.subr.mxu1 %v11105_v52  ;;  %v11117_v52 = vld [vmem:[#allocation93_spill] sm:$0xff] }
 0x570   :  { %2617 = vmatpush2.msra.mxu0 %v11106_v30  ;;  %2690 = vmatpush2.msra.mxu1 %v11107_v37 }
 0x571   :  { %2618 = vmatprep.subr.mxu0 %v11108_v43  ;;  %2691 = vmatprep.subr.mxu1 %v11109_v51 }
 0x572   :  { %2619 = vmatpush2.msra.mxu0 %v11110_v58  ;;  %2692 = vmatpush2.msra.mxu1 %v11111_v0 }
 0x573   :  { %2702 = vmatprep.subr.mxu0 %v11112_v7  ;;  %2775 = vmatprep.subr.mxu1 %v11113_v6 }
 0x5e1   :  { %v2279_v8 = vpop.f32.mrf.mxu0  ;;  %v2352_v9 = vpop.f32.mrf.mxu1 }
 0x5e2   :  { %v2284_v14 = vadd.f32 %v2279_v8, %v11114_v13  ;;  %v2357_v17 = vadd.f32 %v2352_v9, %v11115_v15 }
 0x5e3   :  { %v2281_v10 = vpop.f32.mrf.mxu0  ;;  %v2354_v18 = vpop.f32.mrf.mxu1 }
 0x5e4   :  { %v2285_v11 = vadd.f32 %v2281_v10, %v11116_v44  ;;  %v5059_v47 = vmul.f32 -1.442695, %v2284_v14  ;;  %v2358_v30 = vadd.f32 %v2354_v18, %v11117_v52  ;;  %v5057_v37 = vmul.f32 -1.442695, %v2357_v17  ;;  %v11118_v18 = vld [vmem:[#allocation181_spill] sm:$0xff]  ;;  %v11119_v44 = vld [vmem:[#allocation182_spill] sm:$0xff] }
 0x5e6   :  { %v5060_v43 = vmul.f32 -1.442695, %v2285_v11  ;;  %5435 = vpow2.f32 %v5059_v47  ;;  %v5058_v51 = vmul.f32 -1.442695, %v2358_v30 }
 0x5e7   :  { %5437 = vpow2.f32 %v5057_v37  ;;  %v11120_v37 = vld [vmem:[#allocation183_spill] sm:$0xff] }
 0x5e8   :  { %5439 = vpow2.f32 %v5060_v43 }
 0x5e9   :  { %5441 = vpow2.f32 %v5058_v51  ;;  %v11121_v51 = vld [vmem:[#allocation184_spill] sm:$0xff] }
 0x5f3   :  { %v5436_v58 = vpop.eup %5435 }
 0x5f4   :  { %v5438_v0 = vpop.eup %5437  ;;  %v2525_v6 = vadd.f32 1.0, %v5436_v58 }
 0x5f5   :  { %v5440_v7 = vpop.eup %5439  ;;  %v2511_v13 = vadd.f32 1.0, %v5438_v0 }
 0x5f6   :  { %v5442_v8 = vpop.eup %5441  ;;  %v2526_v9 = vadd.f32 1.0, %v5440_v7  ;;  %5443 = vrcp.f32 %v2525_v6 }
 0x5f7   :  { %v2512_v15 = vadd.f32 1.0, %v5442_v8  ;;  %5445 = vrcp.f32 %v2511_v13 }
 0x5f8   :  { %5447 = vrcp.f32 %v2526_v9 }
 0x603   :  { %v5444_v7 = vpop.eup %5443 }
 0x604   :  { %v5446_v6 = vpop.eup %5445 }
 0x605   :  { %v5448_v8 = vpop.eup %5447  ;;  %v2517_v9 = vmul.f32 %v5446_v6, %v8592_v54  ;;  %v11148_v6 = vld [vmem:[#allocation231_spill] sm:$0xff] }
 0x60a   :  { %v2425_v10 = vpop.f32.mrf.mxu0  ;;  %v2498_v14 = vpop.f32.mrf.mxu1 }
 0x60b   :  { %v2430_v17 = vadd.f32 %v2425_v10, %v11118_v18  ;;  %v2503_v11 = vadd.f32 %v2498_v14, %v11119_v44 }
 0x60c   :  { %v2427_v47 = vpop.f32.mrf.mxu0  ;;  %v2500_v52 = vpop.f32.mrf.mxu1 }
 0x60d   :  { %5449 = vtanh.f32 %v2430_v17  ;;  %v5061_v30 = vmul.f32 -1.442695, %v2503_v11  ;;  %v2431_v43 = vadd.f32 %v2427_v47, %v11120_v37  ;;  %v2504_v58 = vadd.f32 %v2500_v52, %v11121_v51 }
 0x60e   :  { %5451 = vrcp.f32 %v2512_v15 }
 0x60f   :  { %5453 = vpow2.f32 %v5061_v30  ;;  %v5062_v0 = vmul.f32 -1.442695, %v2504_v58 }
 0x610   :  { %5455 = vtanh.f32 %v2431_v43 }
 0x611   :  { %5457 = vpow2.f32 %v5062_v0 }
 0x61a   :  { %v5450_v13 = vpop.eup %5449 }
 0x61b   :  { %v5452_v10 = vpop.eup %5451  ;;  %v2533_v14 = vmul.f32 %v5450_v13, %v5444_v7  ;;  %v11150_v13 = vld [vmem:[#allocation233_spill] sm:$0xff] }
 0x61c   :  { %v5454_v18 = vpop.eup %5453  ;;  %v2518_v15 = vmul.f32 %v5452_v10, %v8596_v60  ;;  %v11139_v60 = vld [vmem:[#allocation222_spill] sm:$0xff] }
 0x61d   :  { %v5456_v17 = vpop.eup %5455  ;;  %v8778_v44 = vadd.f32 %v2533_v14, %v2517_v9  ;;  %v2543_v11 = vadd.f32 1.0, %v5454_v18  ;;  %v11151_v10 = vld [vmem:[#allocation234_spill] sm:$0xff]  ;;  %v11152_v9 = vld [vmem:[#allocation235_spill] sm:$0xff]  ;;  %v11153_v14 = vld [vmem:[#allocation236_spill] sm:$0xff] }
 0x61e   :  { %v5458_v47 = vpop.eup %5457  ;;  %v2534_v52 = vmul.f32 %v5456_v17, %v5448_v8  ;;  %v11149_v8 = vld [vmem:[#allocation232_spill] sm:$0xff]  ;;  %v11154_v18 = vld [vmem:[#allocation237_spill] sm:$0xff]  ;;  %v11155_v17 = vld [vmem:[#allocation238_spill] sm:$0xff] }
 0x61f   :  { %5459 = vtanh.f32 %v8778_v44  ;;  %v2544_v30 = vadd.f32 1.0, %v5458_v47  ;;  %v11157_v47 = vld [vmem:[#allocation240_spill] sm:$0xff] }
 0x620   :  { %5461 = vrcp.f32 %v2543_v11  ;;  %v8782_v37 = vadd.f32 %v2534_v52, %v2518_v15  ;;  %v11156_v11 = vld [vmem:[#allocation239_spill] sm:$0xff]  ;;  %v8942_v15 = vld [vmem:[%s10579_s13 + $0xb8] sm:$0xff]  ;;  %v8946_v52 = vld [vmem:[%s10578_s7 + $0xb0] sm:$0xff] }
 0x621   :  { %5463 = vrcp.f32 %v2544_v30  ;;  %v8950_v30 = vld [vmem:[%s10579_s13 + $0xb0] sm:$0xff] }
 0x622   :  { %5465 = vtanh.f32 %v8782_v37 }
 0x62c   :  { %v5460_v54 = vpop.eup %5459 }
 0x62d   :  { %v5462_v43 = vpop.eup %5461 }
 0x62e   :  { %v5464_v51 = vpop.eup %5463  ;;  %v8785_v7 = vmul.f32 %v5462_v43, %v5460_v54  ;;  %v8954_v54 = vld [vmem:[%s10578_s7 + $0xa8] sm:$0xff] }
 0x62f   :  { %v5466_v58 = vpop.eup %5465  ;;  %v8958_v43 = vld [vmem:[%s10579_s13 + $0xa8] sm:$0xff] }
 0x630   :  { %v2552_v0 = vmul.f32 %v5466_v58, %v5464_v51  ;;  %v8962_v51 = vld [vmem:[%s10578_s7 + $0xa0] sm:$0xff] }
 0x631   :  { %v8966_v58 = vld [vmem:[%s10579_s13 + $0xa0] sm:$0xff] }
 0x632   :  { %5063 = vmatprep.mubr.msk.f32.mxu0 %vm1180_vm1, %v2552_v0  ;;  %5064 = vmatprep.mubr.msk.f32.mxu1 %vm1180_vm1, %v2552_v0  ;;  %11158 = vst [vmem:[#allocation86_spill] sm:$0xff] %v8966_v58 }
 0x633   :  { %2621 = vmatmul.mubr.f32.vlgmr.msra.gmra.mxu0 %v8785_v7  ;;  %2694 = vmatmul.mubr.f32.vlgmr.msra.gmra.mxu1 %v8785_v7 }
 0x634   :  { %2703 = vmatpush1.msra.mxu0 %v8263_v49  ;;  %2776 = vmatpush1.msra.mxu1 %v8266_v31  ;;  %v11122_v49 = vld [vmem:[#allocation205_spill] sm:$0xff]  ;;  %v11123_v31 = vld [vmem:[#allocation206_spill] sm:$0xff] }
 0x635   :  { %2704 = vmatprep.subr.mxu0 %v8269_v16  ;;  %5065 = vmatprep.mubr.msk.f32.mxu0 %vm1180_vm1, %v2552_v0  ;;  %v11124_v16 = vld [vmem:[#allocation207_spill] sm:$0xff] }
 0x636   :  { %2777 = vmatprep.subr.mxu1 %v8273_v32  ;;  %5066 = vmatprep.mubr.msk.f32.mxu1 %vm1180_vm1, %v2552_v0  ;;  %v11125_v32 = vld [vmem:[#allocation208_spill] sm:$0xff]  ;;  %v8970_v0 = vld [vmem:[%s10578_s7 + $0x98] sm:$0xff] }
 0x637   :  { %2705 = vmatpush1.msra.mxu0 %v8277_v2  ;;  %2778 = vmatpush1.msra.mxu1 %v8280_v21  ;;  %v11126_v2 = vld [vmem:[#allocation209_spill] sm:$0xff]  ;;  %v11127_v21 = vld [vmem:[#allocation210_spill] sm:$0xff]  ;;  %11159 = vst [vmem:[#allocation87_spill] sm:$0xff] %v8970_v0 }
 0x638   :  { %2706 = vmatprep.subr.mxu0 %v8283_v45  ;;  %2779 = vmatprep.subr.mxu1 %v8286_v33  ;;  %v11128_v45 = vld [vmem:[#allocation211_spill] sm:$0xff]  ;;  %v11129_v33 = vld [vmem:[#allocation212_spill] sm:$0xff] }
 0x639   :  { %2707 = vmatpush1.msra.mxu0 %v8289_v34  ;;  %2780 = vmatpush1.msra.mxu1 %v8292_v48  ;;  %v11130_v34 = vld [vmem:[#allocation213_spill] sm:$0xff]  ;;  %v11131_v48 = vld [vmem:[#allocation214_spill] sm:$0xff] }
 0x63a   :  { %2708 = vmatprep.subr.mxu0 %v8295_v3  ;;  %2781 = vmatprep.subr.mxu1 %v8298_v25  ;;  %v11132_v3 = vld [vmem:[#allocation215_spill] sm:$0xff]  ;;  %v11133_v25 = vld [vmem:[#allocation216_spill] sm:$0xff] }
 0x63b   :  { %2709 = vmatpush1.msra.mxu0 %v8301_v63  ;;  %2782 = vmatpush1.msra.mxu1 %v8304_v29  ;;  %v11134_v63 = vld [vmem:[#allocation217_spill] sm:$0xff]  ;;  %v11135_v29 = vld [vmem:[#allocation218_spill] sm:$0xff] }
 0x63c   :  { %2710 = vmatprep.subr.mxu0 %v8307_v1  ;;  %2783 = vmatprep.subr.mxu1 %v8310_v26  ;;  %v11136_v1 = vld [vmem:[#allocation219_spill] sm:$0xff]  ;;  %v11137_v26 = vld [vmem:[#allocation220_spill] sm:$0xff] }
 0x63d   :  { %2711 = vmatpush1.msra.mxu0 %v8313_v22  ;;  %2784 = vmatpush1.msra.mxu1 %v10996_v23  ;;  %v11138_v22 = vld [vmem:[#allocation221_spill] sm:$0xff]  ;;  %v11140_v23 = vld [vmem:[#allocation223_spill] sm:$0xff] }
 0x63e   :  { %2712 = vmatprep.subr.mxu0 %v10997_v41  ;;  %2785 = vmatprep.subr.mxu1 %v10998_v50  ;;  %v11141_v41 = vld [vmem:[#allocation224_spill] sm:$0xff]  ;;  %v11142_v50 = vld [vmem:[#allocation225_spill] sm:$0xff] }
 0x63f   :  { %2713 = vmatpush1.msra.mxu0 %v10999_v28  ;;  %2786 = vmatpush1.msra.mxu1 %v11000_v56  ;;  %v11143_v28 = vld [vmem:[#allocation226_spill] sm:$0xff]  ;;  %v11144_v56 = vld [vmem:[#allocation227_spill] sm:$0xff] }
 0x640   :  { %2714 = vmatprep.subr.mxu0 %v11001_v40  ;;  %2787 = vmatprep.subr.mxu1 %v11002_v35  ;;  %v11145_v40 = vld [vmem:[#allocation228_spill] sm:$0xff]  ;;  %v11146_v35 = vld [vmem:[#allocation229_spill] sm:$0xff] }
 0x641   :  { %2715 = vmatpush1.msra.mxu0 %v11003_v36  ;;  %2788 = vmatpush1.msra.mxu1 %v11122_v49  ;;  %v11147_v36 = vld [vmem:[#allocation230_spill] sm:$0xff]  ;;  %v8978_v49 = vld [vmem:[%s10578_s7 + $0x90] sm:$0xff] }
 0x642   :  { %2716 = vmatprep.subr.mxu0 %v11123_v31  ;;  %2789 = vmatprep.subr.mxu1 %v11124_v16  ;;  %11161 = vst [vmem:[#allocation89_spill] sm:$0xff] %v8978_v49  ;;  %v8982_v31 = vld [vmem:[%s10579_s13 + $0x90] sm:$0xff]  ;;  %v8986_v16 = vld [vmem:[%s10578_s7 + $0x88] sm:$0xff] }
 0x643   :  { %2717 = vmatpush1.msra.mxu0 %v11125_v32  ;;  %2790 = vmatpush1.msra.mxu1 %v11126_v2  ;;  %11162 = vst [vmem:[#allocation110_spill] sm:$0xff] %v8982_v31  ;;  %11163 = vst [vmem:[#allocation111_spill] sm:$0xff] %v8986_v16  ;;  %v8990_v32 = vld [vmem:[%s10579_s13 + $0x88] sm:$0xff]  ;;  %v8994_v2 = vld [vmem:[%s10578_s7 + $0x80] sm:$0xff] }
 0x644   :  { %2718 = vmatprep.subr.mxu0 %v11127_v21  ;;  %2791 = vmatprep.subr.mxu1 %v11128_v45  ;;  %11164 = vst [vmem:[#allocation112_spill] sm:$0xff] %v8990_v32  ;;  %11165 = vst [vmem:[#allocation180_spill] sm:$0xff] %v8994_v2  ;;  %v8998_v21 = vld [vmem:[%s10579_s13 + $0x80] sm:$0xff]  ;;  %v9002_v45 = vld [vmem:[%s10578_s7 + $0x78] sm:$0xff] }
 0x645   :  { %2719 = vmatpush1.msra.mxu0 %v11129_v33  ;;  %2792 = vmatpush1.msra.mxu1 %v11130_v34  ;;  %11166 = vst [vmem:[#allocation176_spill] sm:$0xff] %v8998_v21  ;;  %11167 = vst [vmem:[#allocation177_spill] sm:$0xff] %v9002_v45  ;;  %v9006_v33 = vld [vmem:[%s10579_s13 + $0x78] sm:$0xff]  ;;  %v9010_v34 = vld [vmem:[%s10578_s7 + $0x70] sm:$0xff] }
 0x646   :  { %2720 = vmatprep.subr.mxu0 %v11131_v48  ;;  %2793 = vmatprep.subr.mxu1 %v11132_v3  ;;  %11168 = vst [vmem:[#allocation178_spill] sm:$0xff] %v9006_v33  ;;  %11169 = vst [vmem:[#allocation179_spill] sm:$0xff] %v9010_v34  ;;  %v9014_v48 = vld [vmem:[%s10579_s13 + $0x70] sm:$0xff]  ;;  %v9018_v3 = vld [vmem:[%s10578_s7 + $0x68] sm:$0xff] }
 0x647   :  { %2721 = vmatpush1.msra.mxu0 %v11133_v25  ;;  %2794 = vmatpush1.msra.mxu1 %v11134_v63  ;;  %11170 = vst [vmem:[#allocation201_spill] sm:$0xff] %v9014_v48  ;;  %11171 = vst [vmem:[#allocation202_spill] sm:$0xff] %v9018_v3  ;;  %v9022_v25 = vld [vmem:[%s10579_s13 + $0x68] sm:$0xff]  ;;  %v9026_v63 = vld [vmem:[%s10578_s7 + $0x60] sm:$0xff] }
 0x648   :  { %2722 = vmatprep.subr.mxu0 %v11135_v29  ;;  %2795 = vmatprep.subr.mxu1 %v11136_v1  ;;  %11172 = vst [vmem:[#allocation203_spill] sm:$0xff] %v9022_v25  ;;  %11173 = vst [vmem:[#allocation204_spill] sm:$0xff] %v9026_v63  ;;  %v9030_v29 = vld [vmem:[%s10579_s13 + $0x60] sm:$0xff]  ;;  %v9034_v1 = vld [vmem:[%s10578_s7 + $0x58] sm:$0xff] }
 0x649   :  { %2723 = vmatpush1.msra.mxu0 %v11137_v26  ;;  %2796 = vmatpush1.msra.mxu1 %v11138_v22  ;;  %11174 = vst [vmem:[#allocation241_spill] sm:$0xff] %v9030_v29  ;;  %11175 = vst [vmem:[#allocation242_spill] sm:$0xff] %v9034_v1  ;;  %v9038_v26 = vld [vmem:[%s10579_s13 + $0x58] sm:$0xff]  ;;  %v9042_v22 = vld [vmem:[%s10578_s7 + $0x50] sm:$0xff] }
 0x64a   :  { %2724 = vmatprep.subr.mxu0 %v11139_v60  ;;  %2797 = vmatprep.subr.mxu1 %v11140_v23  ;;  %11176 = vst [vmem:[#allocation243_spill] sm:$0xff] %v9038_v26  ;;  %11177 = vst [vmem:[#allocation244_spill] sm:$0xff] %v9042_v22  ;;  %v9046_v60 = vld [vmem:[%s10579_s13 + $0x50] sm:$0xff]  ;;  %v9050_v23 = vld [vmem:[%s10578_s7 + $0x48] sm:$0xff] }
 0x64b   :  { %2725 = vmatpush1.msra.mxu0 %v11141_v41  ;;  %2798 = vmatpush1.msra.mxu1 %v11142_v50  ;;  %11178 = vst [vmem:[#allocation245_spill] sm:$0xff] %v9046_v60  ;;  %11179 = vst [vmem:[#allocation246_spill] sm:$0xff] %v9050_v23  ;;  %v9054_v41 = vld [vmem:[%s10579_s13 + $0x48] sm:$0xff]  ;;  %v9058_v50 = vld [vmem:[%s10578_s7 + $0x40] sm:$0xff] }
 0x64c   :  { %2726 = vmatprep.subr.mxu0 %v11143_v28  ;;  %2799 = vmatprep.subr.mxu1 %v11144_v56  ;;  %11180 = vst [vmem:[#allocation247_spill] sm:$0xff] %v9054_v41  ;;  %11181 = vst [vmem:[#allocation248_spill] sm:$0xff] %v9058_v50  ;;  %v9062_v28 = vld [vmem:[%s10579_s13 + $0x40] sm:$0xff]  ;;  %v9066_v56 = vld [vmem:[%s10578_s7 + $0x38] sm:$0xff] }
 0x64d   :  { %2727 = vmatpush1.msra.mxu0 %v11145_v40  ;;  %2800 = vmatpush1.msra.mxu1 %v11146_v35  ;;  %11182 = vst [vmem:[#allocation249_spill] sm:$0xff] %v9062_v28  ;;  %11183 = vst [vmem:[#allocation250_spill] sm:$0xff] %v9066_v56  ;;  %v9070_v40 = vld [vmem:[%s10579_s13 + $0x38] sm:$0xff]  ;;  %v9074_v35 = vld [vmem:[%s10578_s7 + $0x30] sm:$0xff] }
 0x64e   :  { %2728 = vmatprep.subr.mxu0 %v11147_v36  ;;  %2801 = vmatprep.subr.mxu1 %v11148_v6  ;;  %11184 = vst [vmem:[#allocation251_spill] sm:$0xff] %v9070_v40  ;;  %11185 = vst [vmem:[#allocation113_spill] sm:$0xff] %v9074_v35  ;;  %v9078_v36 = vld [vmem:[%s10579_s13 + $0x30] sm:$0xff]  ;;  %v9082_v6 = vld [vmem:[%s10578_s7 + $0x28] sm:$0xff] }
 0x64f   :  { %2729 = vmatpush1.msra.mxu0 %v11149_v8  ;;  %2802 = vmatpush1.msra.mxu1 %v11150_v13  ;;  %11186 = vst [vmem:[#allocation114_spill] sm:$0xff] %v9078_v36  ;;  %11187 = vst [vmem:[#allocation115_spill] sm:$0xff] %v9082_v6  ;;  %v9086_v8 = vld [vmem:[%s10579_s13 + $0x28] sm:$0xff]  ;;  %v9090_v13 = vld [vmem:[%s10578_s7 + $0x20] sm:$0xff] }
 0x650   :  { %2730 = vmatprep.subr.mxu0 %v11151_v10  ;;  %2803 = vmatprep.subr.mxu1 %v11152_v9  ;;  %11188 = vst [vmem:[#allocation116_spill] sm:$0xff] %v9086_v8  ;;  %11189 = vst [vmem:[#allocation117_spill] sm:$0xff] %v9090_v13  ;;  %v9094_v10 = vld [vmem:[%s10579_s13 + $0x20] sm:$0xff]  ;;  %v9098_v9 = vld [vmem:[%s10578_s7 + $0x18] sm:$0xff] }
 0x651   :  { %2731 = vmatpush1.msra.mxu0 %v11153_v14  ;;  %2804 = vmatpush1.msra.mxu1 %v11154_v18  ;;  %11190 = vst [vmem:[#allocation118_spill] sm:$0xff] %v9094_v10  ;;  %11191 = vst [vmem:[#allocation119_spill] sm:$0xff] %v9098_v9  ;;  %v9102_v14 = vld [vmem:[%s10579_s13 + $0x18] sm:$0xff]  ;;  %v9106_v18 = vld [vmem:[%s10578_s7 + $0x10] sm:$0xff] }
 0x652   :  { %2732 = vmatprep.subr.mxu0 %v11155_v17  ;;  %2805 = vmatprep.subr.mxu1 %v11156_v11  ;;  %11192 = vst [vmem:[#allocation120_spill] sm:$0xff] %v9102_v14  ;;  %11193 = vst [vmem:[#allocation121_spill] sm:$0xff] %v9106_v18  ;;  %v9110_v17 = vld [vmem:[%s10579_s13 + $0x10] sm:$0xff]  ;;  %v9114_v11 = vld [vmem:[%s10578_s7 + $0x8] sm:$0xff] }
 0x653   :  { %2733 = vmatpush1.msra.mxu0 %v11157_v47  ;;  %2806 = vmatpush1.msra.mxu1 %v11040_v42  ;;  %v8910_v42 = vld [vmem:[%s10579_s13 + $0xd8] sm:$0xff]  ;;  %11194 = vst [vmem:[#allocation122_spill] sm:$0xff] %v9110_v17  ;;  %11195 = vst [vmem:[#allocation123_spill] sm:$0xff] %v9114_v11  ;;  %v9118_v47 = vld [vmem:[%s10579_s13 + $0x8] sm:$0xff] }
 0x654   :  { %2758 = vmatprep.subr.mxu0 %v11041_v55  ;;  %2831 = vmatprep.subr.mxu1 %v11042_v12  ;;  %v8914_v55 = vld [vmem:[%s10578_s7 + $0xd0] sm:$0xff]  ;;  %11196 = vst [vmem:[#allocation124_spill] sm:$0xff] %v9118_v47 }
 0x655   :  { %2759 = vmatpush2.msra.mxu0 %v11043_v24  ;;  %2832 = vmatpush2.msra.mxu1 %v11044_v38  ;;  %v8918_v12 = vld [vmem:[%s10579_s13 + $0xd0] sm:$0xff]  ;;  %v8922_v24 = vld [vmem:[%s10578_s7 + $0xc8] sm:$0xff] }
 0x656   :  { %2760 = vmatprep.subr.mxu0 %v11045_v59  ;;  %2833 = vmatprep.subr.mxu1 %v11046_v46  ;;  %v8926_v38 = vld [vmem:[%s10579_s13 + $0xc8] sm:$0xff]  ;;  %v8930_v59 = vld [vmem:[%s10578_s7 + $0xc0] sm:$0xff] }
 0x657   :  { %2761 = vmatpush2.msra.mxu0 %v11047_v57  ;;  %2834 = vmatpush2.msra.mxu1 %v11048_v62  ;;  %v8874_v62 = vld [vmem:[%s10578_s7 + $0xf8] sm:$0xff]  ;;  %v8934_v46 = vld [vmem:[%s10579_s13 + $0xc0] sm:$0xff] }
 0x658   :  { %2762 = vmatprep.subr.mxu0 %v11049_v39  ;;  %2835 = vmatprep.subr.mxu1 %v11050_v61  ;;  %v8902_v39 = vld [vmem:[%s10579_s13 + $0xe0] sm:$0xff]  ;;  %v8906_v61 = vld [vmem:[%s10578_s7 + $0xd8] sm:$0xff] }
 0x659   :  { %2763 = vmatpush2.msra.mxu0 %v8481_v53  ;;  %2836 = vmatpush2.msra.mxu1 %v8484_v5  ;;  %v8878_v53 = vld [vmem:[%s10579_s13 + $0xf8] sm:$0xff]  ;;  %v8882_v5 = vld [vmem:[%s10578_s7 + $0xf0] sm:$0xff] }
 0x65a   :  { %2764 = vmatprep.subr.mxu0 %v8487_v20  ;;  %2837 = vmatprep.subr.mxu1 %v8490_v19  ;;  %v8890_v20 = vld [vmem:[%s10578_s7 + $0xe8] sm:$0xff]  ;;  %v8938_v57 = vld [vmem:[%s10578_s7 + $0xb8] sm:$0xff] }
 0x65b   :  { %2765 = vmatpush2.msra.mxu0 %v8493_v27  ;;  %2838 = vmatpush2.msra.mxu1 %v8496_v4  ;;  %v8886_v4 = vld [vmem:[%s10579_s13 + $0xf0] sm:$0xff]  ;;  %v8894_v19 = vld [vmem:[%s10579_s13 + $0xe8] sm:$0xff]  ;;  %v8898_v27 = vld [vmem:[%s10578_s7 + $0xe0] sm:$0xff] }
 0x65c   :  { %2767 = vmatmul.mubr.f32.vlgmr.msra.gmra.mxu0 %v8785_v7  ;;  %2840 = vmatmul.mubr.f32.vlgmr.msra.gmra.mxu1 %v8785_v7  ;;  %v8974_v7 = vld [vmem:[%s10579_s13 + $0x98] sm:$0xff] }
 0x65d   :  { %2899 = vmatprep.subr.mxu0 %v8874_v62  ;;  %2972 = vmatprep.subr.mxu1 %v8878_v53  ;;  %11160 = vst [vmem:[#allocation88_spill] sm:$0xff] %v8974_v7 }
 0x65e   :  { %2900 = vmatpush1.msra.mxu0 %v8882_v5  ;;  %2973 = vmatpush1.msra.mxu1 %v8886_v4 }
 0x65f   :  { %2901 = vmatprep.subr.mxu0 %v8890_v20  ;;  %2974 = vmatprep.subr.mxu1 %v8894_v19 }
 0x660   :  { %2902 = vmatpush1.msra.mxu0 %v8898_v27  ;;  %2975 = vmatpush1.msra.mxu1 %v8902_v39 }
 0x661   :  { %2903 = vmatprep.subr.mxu0 %v8906_v61  ;;  %2976 = vmatprep.subr.mxu1 %v8910_v42 }
 0x662   :  { %2904 = vmatpush1.msra.mxu0 %v8914_v55  ;;  %2977 = vmatpush1.msra.mxu1 %v8918_v12 }
 0x663   :  { %2905 = vmatprep.subr.mxu0 %v8922_v24  ;;  %2978 = vmatprep.subr.mxu1 %v8926_v38 }
 0x664   :  { %2906 = vmatpush1.msra.mxu0 %v8930_v59  ;;  %2979 = vmatpush1.msra.mxu1 %v8934_v46 }
 0x665   :  { %2907 = vmatprep.subr.mxu0 %v8938_v57  ;;  %2980 = vmatprep.subr.mxu1 %v8942_v15 }
 0x666   :  { %2908 = vmatpush1.msra.mxu0 %v8946_v52  ;;  %2981 = vmatpush1.msra.mxu1 %v8950_v30 }
 0x667   :  { %2909 = vmatprep.subr.mxu0 %v8954_v54  ;;  %2982 = vmatprep.subr.mxu1 %v8958_v43 }
 0x668   :  { %2910 = vmatpush1.msra.mxu0 %v8962_v51  ;;  %2983 = vmatpush1.msra.mxu1 %v8966_v58 }
 0x669   :  { %2911 = vmatprep.subr.mxu0 %v8970_v0  ;;  %2984 = vmatprep.subr.mxu1 %v8974_v7 }
 0x66a   :  { %2912 = vmatpush1.msra.mxu0 %v8978_v49  ;;  %2985 = vmatpush1.msra.mxu1 %v8982_v31 }
 0x66b   :  { %2913 = vmatprep.subr.mxu0 %v8986_v16  ;;  %2986 = vmatprep.subr.mxu1 %v8990_v32 }
 0x66c   :  { %2914 = vmatpush1.msra.mxu0 %v8994_v2  ;;  %2987 = vmatpush1.msra.mxu1 %v8998_v21 }
 0x66d   :  { %2915 = vmatprep.subr.mxu0 %v9002_v45  ;;  %2988 = vmatprep.subr.mxu1 %v9006_v33 }
 0x66e   :  { %2916 = vmatpush1.msra.mxu0 %v9010_v34  ;;  %2989 = vmatpush1.msra.mxu1 %v9014_v48 }
 0x66f   :  { %2917 = vmatprep.subr.mxu0 %v9018_v3  ;;  %2990 = vmatprep.subr.mxu1 %v9022_v25 }
 0x670   :  { %2918 = vmatpush1.msra.mxu0 %v9026_v63  ;;  %2991 = vmatpush1.msra.mxu1 %v9030_v29 }
 0x671   :  { %2919 = vmatprep.subr.mxu0 %v9034_v1  ;;  %2992 = vmatprep.subr.mxu1 %v9038_v26 }
 0x672   :  { %2920 = vmatpush1.msra.mxu0 %v9042_v22  ;;  %2993 = vmatpush1.msra.mxu1 %v9046_v60 }
 0x673   :  { %2921 = vmatprep.subr.mxu0 %v9050_v23  ;;  %2994 = vmatprep.subr.mxu1 %v9054_v41 }
 0x674   :  { %2922 = vmatpush1.msra.mxu0 %v9058_v50  ;;  %2995 = vmatpush1.msra.mxu1 %v9062_v28 }
 0x675   :  { %2923 = vmatprep.subr.mxu0 %v9066_v56  ;;  %2996 = vmatprep.subr.mxu1 %v9070_v40 }
 0x676   :  { %2924 = vmatpush1.msra.mxu0 %v9074_v35  ;;  %2997 = vmatpush1.msra.mxu1 %v9078_v36  ;;  %v11219_v35 = vld [vmem:[#allocation96_spill] sm:$0xff] }
 0x677   :  { %2925 = vmatprep.subr.mxu0 %v9082_v6  ;;  %2998 = vmatprep.subr.mxu1 %v9086_v8  ;;  %v11218_v6 = vld [vmem:[#allocation95_spill] sm:$0xff] }
 0x678   :  { %2926 = vmatpush1.msra.mxu0 %v9090_v13  ;;  %2999 = vmatpush1.msra.mxu1 %v9094_v10 }
 0x679   :  { %2927 = vmatprep.subr.mxu0 %v9098_v9  ;;  %3000 = vmatprep.subr.mxu1 %v9102_v14  ;;  %v9122_v14 = vld [vmem:[%s10578_s7] sm:$0xff]  ;;  %v9170_v9 = vld [vmem:[%s10578_s7 + $0x110] sm:$0xff] }
 0x67a   :  { %2928 = vmatpush1.msra.mxu0 %v9106_v18  ;;  %3001 = vmatpush1.msra.mxu1 %v9110_v17  ;;  %11197 = vst [vmem:[#allocation125_spill] sm:$0xff] %v9122_v14  ;;  %v9126_v18 = vld [vmem:[%s10579_s13] sm:$0xff]  ;;  %v9130_v17 = vld [vmem:[%s10578_s7 + $0x138] sm:$0xff]  ;;  %11209 = vst [vmem:[#allocation137_spill] sm:$0xff] %v9170_v9 }
 0x67b   :  { %2929 = vmatprep.subr.mxu0 %v9114_v11  ;;  %3002 = vmatprep.subr.mxu1 %v9118_v47  ;;  %11198 = vst [vmem:[#allocation126_spill] sm:$0xff] %v9126_v18  ;;  %11199 = vst [vmem:[#allocation127_spill] sm:$0xff] %v9130_v17  ;;  %v9134_v11 = vld [vmem:[%s10579_s13 + $0x138] sm:$0xff]  ;;  %v9138_v47 = vld [vmem:[%s10578_s7 + $0x130] sm:$0xff] }
 0x67c   :  { %2930 = vmatpush1.msra.mxu0 %v9122_v14  ;;  %3003 = vmatpush1.msra.mxu1 %v9126_v18  ;;  %11200 = vst [vmem:[#allocation128_spill] sm:$0xff] %v9134_v11  ;;  %11201 = vst [vmem:[#allocation129_spill] sm:$0xff] %v9138_v47  ;;  %v9142_v14 = vld [vmem:[%s10579_s13 + $0x130] sm:$0xff]  ;;  %v9146_v18 = vld [vmem:[%s10578_s7 + $0x128] sm:$0xff] }
 0x67d   :  { %2955 = vmatprep.subr.mxu0 %v9130_v17  ;;  %3028 = vmatprep.subr.mxu1 %v9134_v11  ;;  %11202 = vst [vmem:[#allocation130_spill] sm:$0xff] %v9142_v14  ;;  %11203 = vst [vmem:[#allocation131_spill] sm:$0xff] %v9146_v18  ;;  %v9150_v17 = vld [vmem:[%s10579_s13 + $0x128] sm:$0xff]  ;;  %v9154_v11 = vld [vmem:[%s10578_s7 + $0x120] sm:$0xff] }
 0x67e   :  { %2956 = vmatpush2.msra.mxu0 %v9138_v47  ;;  %3029 = vmatpush2.msra.mxu1 %v9142_v14  ;;  %11204 = vst [vmem:[#allocation132_spill] sm:$0xff] %v9150_v17  ;;  %11205 = vst [vmem:[#allocation133_spill] sm:$0xff] %v9154_v11  ;;  %v9158_v47 = vld [vmem:[%s10579_s13 + $0x120] sm:$0xff]  ;;  %v9162_v14 = vld [vmem:[%s10578_s7 + $0x118] sm:$0xff] }
 0x67f   :  { %2957 = vmatprep.subr.mxu0 %v9146_v18  ;;  %3030 = vmatprep.subr.mxu1 %v9150_v17  ;;  %11206 = vst [vmem:[#allocation134_spill] sm:$0xff] %v9158_v47  ;;  %11207 = vst [vmem:[#allocation135_spill] sm:$0xff] %v9162_v14  ;;  %v9166_v18 = vld [vmem:[%s10579_s13 + $0x118] sm:$0xff]  ;;  %v9174_v17 = vld [vmem:[%s10579_s13 + $0x110] sm:$0xff] }
 0x680   :  { %2958 = vmatpush2.msra.mxu0 %v9154_v11  ;;  %3031 = vmatpush2.msra.mxu1 %v9158_v47  ;;  %11208 = vst [vmem:[#allocation136_spill] sm:$0xff] %v9166_v18  ;;  %11210 = vst [vmem:[#allocation138_spill] sm:$0xff] %v9174_v17  ;;  %v9178_v11 = vld [vmem:[%s10578_s7 + $0x108] sm:$0xff] }
 0x681   :  { %2959 = vmatprep.subr.mxu0 %v9162_v14  ;;  %3032 = vmatprep.subr.mxu1 %v9166_v18  ;;  %11211 = vst [vmem:[#allocation139_spill] sm:$0xff] %v9178_v11  ;;  %v9182_v47 = vld [vmem:[%s10579_s13 + $0x108] sm:$0xff]  ;;  %v9186_v14 = vld [vmem:[%s10578_s7 + $0x100] sm:$0xff] }
 0x682   :  { %2960 = vmatpush2.msra.mxu0 %v9170_v9  ;;  %3033 = vmatpush2.msra.mxu1 %v9174_v17  ;;  %11212 = vst [vmem:[#allocation140_spill] sm:$0xff] %v9182_v47  ;;  %11213 = vst [vmem:[#allocation141_spill] sm:$0xff] %v9186_v14  ;;  %v9190_v18 = vld [vmem:[%s10579_s13 + $0x100] sm:$0xff]  ;;  %v9193_v9 = vld [vmem:[#allocation10 + $0xf8] sm:$0xff] }
 0x683   :  { %2961 = vmatprep.subr.mxu0 %v9178_v11  ;;  %3034 = vmatprep.subr.mxu1 %v9182_v47  ;;  %11214 = vst [vmem:[#allocation142_spill] sm:$0xff] %v9190_v18  ;;  %11215 = vst [vmem:[#allocation143_spill] sm:$0xff] %v9193_v9  ;;  %v9196_v17 = vld [vmem:[#allocation11 + $0xf8] sm:$0xff] }
 0x684   :  { %2962 = vmatpush2.msra.mxu0 %v9186_v14  ;;  %3035 = vmatpush2.msra.mxu1 %v9190_v18  ;;  %11216 = vst [vmem:[#allocation144_spill] sm:$0xff] %v9196_v17  ;;  %v11217_v47 = vld [vmem:[#allocation94_spill] sm:$0xff]  ;;  %v11220_v18 = vld [vmem:[#allocation97_spill] sm:$0xff] }
 0x685   :  { %3045 = vmatprep.subr.mxu0 %v9193_v9  ;;  %3118 = vmatprep.subr.mxu1 %v9196_v17 }
 0x6f3   :  { %v2622_v11 = vpop.f32.mrf.mxu0  ;;  %v2695_v10 = vpop.f32.mrf.mxu1 }
 0x6f4   :  { %v2627_v8 = vadd.f32 %v2622_v11, %v11217_v47  ;;  %v2700_v36 = vadd.f32 %v2695_v10, %v11218_v6 }
 0x6f5   :  { %v2624_v13 = vpop.f32.mrf.mxu0  ;;  %v2697_v14 = vpop.f32.mrf.mxu1 }
 0x6f6   :  { %v2628_v40 = vadd.f32 %v2624_v13, %v11219_v35  ;;  %v5069_v56 = vmul.f32 -1.442695, %v2627_v8  ;;  %v2701_v28 = vadd.f32 %v2697_v14, %v11220_v18  ;;  %v5067_v50 = vmul.f32 -1.442695, %v2700_v36  ;;  %v11221_v13 = vld [vmem:[#allocation185_spill] sm:$0xff]  ;;  %v11224_v18 = vld [vmem:[#allocation188_spill] sm:$0xff] }
 0x6f8   :  { %v5070_v41 = vmul.f32 -1.442695, %v2628_v40  ;;  %5467 = vpow2.f32 %v5069_v56  ;;  %v5068_v9 = vmul.f32 -1.442695, %v2701_v28  ;;  %v11222_v40 = vld [vmem:[#allocation186_spill] sm:$0xff] }
 0x6f9   :  { %5469 = vpow2.f32 %v5067_v50 }
 0x6fa   :  { %5471 = vpow2.f32 %v5070_v41 }
 0x6fb   :  { %5473 = vpow2.f32 %v5068_v9  ;;  %v11223_v9 = vld [vmem:[#allocation187_spill] sm:$0xff] }
 0x705   :  { %v5468_v17 = vpop.eup %5467 }
 0x706   :  { %v5470_v23 = vpop.eup %5469  ;;  %v2868_v22 = vadd.f32 1.0, %v5468_v17 }
 0x707   :  { %v5472_v60 = vpop.eup %5471  ;;  %v2854_v47 = vadd.f32 1.0, %v5470_v23 }
 0x708   :  { %v5474_v11 = vpop.eup %5473  ;;  %v2869_v6 = vadd.f32 1.0, %v5472_v60  ;;  %5475 = vrcp.f32 %v2868_v22 }
 0x709   :  { %v2855_v10 = vadd.f32 1.0, %v5474_v11  ;;  %5477 = vrcp.f32 %v2854_v47 }
 0x70a   :  { %5479 = vrcp.f32 %v2869_v6 }
 0x715   :  { %v5476_v60 = vpop.eup %5475 }
 0x716   :  { %v5478_v23 = vpop.eup %5477 }
 0x717   :  { %v5480_v11 = vpop.eup %5479  ;;  %v2860_v6 = vmul.f32 %v5478_v23, %v8778_v44  ;;  %v9224_v23 = vld [vmem:[#allocation11 + $0xf0] sm:$0xff] }
 0x71c   :  { %v2768_v35 = vpop.f32.mrf.mxu0  ;;  %v2841_v8 = vpop.f32.mrf.mxu1 }
 0x71d   :  { %v2773_v36 = vadd.f32 %v2768_v35, %v11221_v13  ;;  %v2846_v56 = vadd.f32 %v2841_v8, %v11222_v40 }
 0x71e   :  { %v2770_v50 = vpop.f32.mrf.mxu0  ;;  %v2843_v41 = vpop.f32.mrf.mxu1 }
 0x71f   :  { %5481 = vtanh.f32 %v2773_v36  ;;  %v5071_v28 = vmul.f32 -1.442695, %v2846_v56  ;;  %v2774_v14 = vadd.f32 %v2770_v50, %v11223_v9  ;;  %v2847_v17 = vadd.f32 %v2843_v41, %v11224_v18 }
 0x720   :  { %5483 = vrcp.f32 %v2855_v10 }
 0x721   :  { %5485 = vpow2.f32 %v5071_v28  ;;  %v5072_v22 = vmul.f32 -1.442695, %v2847_v17 }
 0x722   :  { %5487 = vtanh.f32 %v2774_v14 }
 0x723   :  { %5489 = vpow2.f32 %v5072_v22 }
 0x72c   :  { %v5482_v47 = vpop.eup %5481 }
 0x72d   :  { %v5484_v35 = vpop.eup %5483  ;;  %v2876_v8 = vmul.f32 %v5482_v47, %v5476_v60  ;;  %v9231_v47 = vld [vmem:[#allocation11 + $0xe8] sm:$0xff] }
 0x72e   :  { %v5486_v13 = vpop.eup %5485  ;;  %v2861_v10 = vmul.f32 %v5484_v35, %v8782_v37  ;;  %v9221_v37 = vld [vmem:[#allocation10 + $0xf0] sm:$0xff]  ;;  %v9235_v35 = vld [vmem:[#allocation10 + $0xe0] sm:$0xff] }
 0x72f   :  { %v5488_v36 = vpop.eup %5487  ;;  %v9208_v40 = vadd.f32 %v2876_v8, %v2860_v6  ;;  %v2886_v56 = vadd.f32 1.0, %v5486_v13  ;;  %v9238_v6 = vld [vmem:[#allocation11 + $0xe0] sm:$0xff]  ;;  %v9241_v8 = vld [vmem:[#allocation10 + $0xd8] sm:$0xff] }
 0x730   :  { %v5490_v50 = vpop.eup %5489  ;;  %v2877_v41 = vmul.f32 %v5488_v36, %v5480_v11  ;;  %v9227_v11 = vld [vmem:[#allocation10 + $0xe8] sm:$0xff]  ;;  %v9244_v13 = vld [vmem:[#allocation11 + $0xd8] sm:$0xff]  ;;  %v9247_v36 = vld [vmem:[#allocation10 + $0xd0] sm:$0xff] }
 0x731   :  { %5491 = vtanh.f32 %v9208_v40  ;;  %v2887_v28 = vadd.f32 1.0, %v5490_v50  ;;  %v9253_v50 = vld [vmem:[#allocation10 + $0xc8] sm:$0xff] }
 0x732   :  { %5493 = vrcp.f32 %v2886_v56  ;;  %v9212_v9 = vadd.f32 %v2877_v41, %v2861_v10  ;;  %v9250_v56 = vld [vmem:[#allocation11 + $0xd0] sm:$0xff]  ;;  %v9256_v10 = vld [vmem:[#allocation11 + $0xc8] sm:$0xff]  ;;  %v9259_v41 = vld [vmem:[#allocation10 + $0xc0] sm:$0xff] }
 0x733   :  { %5495 = vrcp.f32 %v2887_v28  ;;  %v9262_v28 = vld [vmem:[#allocation11 + $0xc0] sm:$0xff] }
 0x734   :  { %5497 = vtanh.f32 %v9212_v9  ;;  %11225 = vst [vmem:[#allocation145_spill] sm:$0xff] %v9262_v28 }
 0x73e   :  { %v5492_v44 = vpop.eup %5491 }
 0x73f   :  { %v5494_v14 = vpop.eup %5493 }
 0x740   :  { %v5496_v18 = vpop.eup %5495  ;;  %v9215_v60 = vmul.f32 %v5494_v14, %v5492_v44  ;;  %v9265_v44 = vld [vmem:[#allocation10 + $0xb8] sm:$0xff] }
 0x741   :  { %v5498_v17 = vpop.eup %5497  ;;  %11226 = vst [vmem:[#allocation146_spill] sm:$0xff] %v9265_v44  ;;  %v9268_v14 = vld [vmem:[#allocation11 + $0xb8] sm:$0xff] }
 0x742   :  { %v2895_v22 = vmul.f32 %v5498_v17, %v5496_v18  ;;  %11227 = vst [vmem:[#allocation147_spill] sm:$0xff] %v9268_v14  ;;  %v9271_v18 = vld [vmem:[#allocation10 + $0xb0] sm:$0xff] }
 0x743   :  { %11228 = vst [vmem:[#allocation148_spill] sm:$0xff] %v9271_v18  ;;  %v9274_v17 = vld [vmem:[#allocation11 + $0xb0] sm:$0xff] }
 0x744   :  { %5073 = vmatprep.mubr.msk.f32.mxu0 %vm1180_vm1, %v2895_v22  ;;  %5074 = vmatprep.mubr.msk.f32.mxu1 %vm1180_vm1, %v2895_v22  ;;  %11229 = vst [vmem:[#allocation149_spill] sm:$0xff] %v9274_v17 }
 0x745   :  { %2964 = vmatmul.mubr.f32.vlgmr.msra.gmra.mxu0 %v9215_v60  ;;  %3037 = vmatmul.mubr.f32.vlgmr.msra.gmra.mxu1 %v9215_v60 }
 0x746   :  { %3046 = vmatpush1.msra.mxu0 %v9221_v37  ;;  %3119 = vmatpush1.msra.mxu1 %v9224_v23 }
 0x747   :  { %3047 = vmatprep.subr.mxu0 %v9227_v11  ;;  %5075 = vmatprep.mubr.msk.f32.mxu0 %vm1180_vm1, %v2895_v22 }
 0x748   :  { %3120 = vmatprep.subr.mxu1 %v9231_v47  ;;  %5076 = vmatprep.mubr.msk.f32.mxu1 %vm1180_vm1, %v2895_v22  ;;  %v9277_v22 = vld [vmem:[#allocation10 + $0xa8] sm:$0xff] }
 0x749   :  { %3048 = vmatpush1.msra.mxu0 %v9235_v35  ;;  %3121 = vmatpush1.msra.mxu1 %v9238_v6  ;;  %11230 = vst [vmem:[#allocation150_spill] sm:$0xff] %v9277_v22 }
 0x74a   :  { %3049 = vmatprep.subr.mxu0 %v9241_v8  ;;  %3122 = vmatprep.subr.mxu1 %v9244_v13 }
 0x74b   :  { %3050 = vmatpush1.msra.mxu0 %v9247_v36  ;;  %3123 = vmatpush1.msra.mxu1 %v9250_v56 }
 0x74c   :  { %3051 = vmatprep.subr.mxu0 %v9253_v50  ;;  %3124 = vmatprep.subr.mxu1 %v9256_v10 }
 0x74d   :  { %3052 = vmatpush1.msra.mxu0 %v9259_v41  ;;  %3125 = vmatpush1.msra.mxu1 %v9262_v28  ;;  %v9280_v28 = vld [vmem:[#allocation11 + $0xa8] sm:$0xff] }
 0x74e   :  { %3053 = vmatprep.subr.mxu0 %v9265_v44  ;;  %3126 = vmatprep.subr.mxu1 %v9268_v14  ;;  %11231 = vst [vmem:[#allocation151_spill] sm:$0xff] %v9280_v28  ;;  %v9283_v44 = vld [vmem:[#allocation10 + $0xa0] sm:$0xff] }
 0x74f   :  { %3054 = vmatpush1.msra.mxu0 %v9271_v18  ;;  %3127 = vmatpush1.msra.mxu1 %v9274_v17  ;;  %11232 = vst [vmem:[#allocation152_spill] sm:$0xff] %v9283_v44  ;;  %v9286_v14 = vld [vmem:[#allocation11 + $0xa0] sm:$0xff]  ;;  %v9289_v18 = vld [vmem:[#allocation10 + $0x98] sm:$0xff] }
 0x750   :  { %3055 = vmatprep.subr.mxu0 %v9277_v22  ;;  %3128 = vmatprep.subr.mxu1 %v9280_v28  ;;  %11233 = vst [vmem:[#allocation153_spill] sm:$0xff] %v9286_v14  ;;  %11234 = vst [vmem:[#allocation154_spill] sm:$0xff] %v9289_v18  ;;  %v9292_v17 = vld [vmem:[#allocation11 + $0x98] sm:$0xff]  ;;  %v9295_v22 = vld [vmem:[#allocation10 + $0x90] sm:$0xff] }
 0x751   :  { %3056 = vmatpush1.msra.mxu0 %v9283_v44  ;;  %3129 = vmatpush1.msra.mxu1 %v9286_v14  ;;  %11235 = vst [vmem:[#allocation155_spill] sm:$0xff] %v9292_v17  ;;  %11236 = vst [vmem:[#allocation156_spill] sm:$0xff] %v9295_v22  ;;  %v9298_v28 = vld [vmem:[#allocation11 + $0x90] sm:$0xff]  ;;  %v9301_v44 = vld [vmem:[#allocation10 + $0x88] sm:$0xff] }
 0x752   :  { %3057 = vmatprep.subr.mxu0 %v9289_v18  ;;  %3130 = vmatprep.subr.mxu1 %v9292_v17  ;;  %11237 = vst [vmem:[#allocation157_spill] sm:$0xff] %v9298_v28  ;;  %11238 = vst [vmem:[#allocation158_spill] sm:$0xff] %v9301_v44  ;;  %v9304_v14 = vld [vmem:[#allocation11 + $0x88] sm:$0xff]  ;;  %v9307_v18 = vld [vmem:[#allocation10 + $0x80] sm:$0xff] }
 0x753   :  { %3058 = vmatpush1.msra.mxu0 %v9295_v22  ;;  %3131 = vmatpush1.msra.mxu1 %v9298_v28  ;;  %11239 = vst [vmem:[#allocation159_spill] sm:$0xff] %v9304_v14  ;;  %11240 = vst [vmem:[#allocation160_spill] sm:$0xff] %v9307_v18  ;;  %v9310_v17 = vld [vmem:[#allocation11 + $0x80] sm:$0xff]  ;;  %v9313_v22 = vld [vmem:[#allocation10 + $0x78] sm:$0xff] }
 0x754   :  { %3059 = vmatprep.subr.mxu0 %v9301_v44  ;;  %3132 = vmatprep.subr.mxu1 %v9304_v14  ;;  %11241 = vst [vmem:[#allocation161_spill] sm:$0xff] %v9310_v17  ;;  %11242 = vst [vmem:[#allocation162_spill] sm:$0xff] %v9313_v22  ;;  %v9316_v28 = vld [vmem:[#allocation11 + $0x78] sm:$0xff]  ;;  %v9319_v44 = vld [vmem:[#allocation10 + $0x70] sm:$0xff] }
 0x755   :  { %3060 = vmatpush1.msra.mxu0 %v9307_v18  ;;  %3133 = vmatpush1.msra.mxu1 %v9310_v17  ;;  %11243 = vst [vmem:[#allocation163_spill] sm:$0xff] %v9316_v28  ;;  %11244 = vst [vmem:[#allocation164_spill] sm:$0xff] %v9319_v44  ;;  %v9322_v14 = vld [vmem:[#allocation11 + $0x70] sm:$0xff]  ;;  %v9325_v18 = vld [vmem:[#allocation10 + $0x68] sm:$0xff] }
 0x756   :  { %3061 = vmatprep.subr.mxu0 %v9313_v22  ;;  %3134 = vmatprep.subr.mxu1 %v9316_v28  ;;  %11245 = vst [vmem:[#allocation165_spill] sm:$0xff] %v9322_v14  ;;  %11246 = vst [vmem:[#allocation166_spill] sm:$0xff] %v9325_v18  ;;  %v9328_v17 = vld [vmem:[#allocation11 + $0x68] sm:$0xff]  ;;  %v9331_v22 = vld [vmem:[#allocation10 + $0x60] sm:$0xff] }
 0x757   :  { %3062 = vmatpush1.msra.mxu0 %v9319_v44  ;;  %3135 = vmatpush1.msra.mxu1 %v9322_v14  ;;  %11247 = vst [vmem:[#allocation167_spill] sm:$0xff] %v9328_v17  ;;  %11248 = vst [vmem:[#allocation168_spill] sm:$0xff] %v9331_v22  ;;  %v9334_v28 = vld [vmem:[#allocation11 + $0x60] sm:$0xff]  ;;  %v9337_v44 = vld [vmem:[#allocation10 + $0x58] sm:$0xff] }
 0x758   :  { %3063 = vmatprep.subr.mxu0 %v9325_v18  ;;  %3136 = vmatprep.subr.mxu1 %v9328_v17  ;;  %11249 = vst [vmem:[#allocation169_spill] sm:$0xff] %v9334_v28  ;;  %11250 = vst [vmem:[#allocation170_spill] sm:$0xff] %v9337_v44  ;;  %v9340_v14 = vld [vmem:[#allocation11 + $0x58] sm:$0xff]  ;;  %v9343_v18 = vld [vmem:[#allocation10 + $0x50] sm:$0xff] }
 0x759   :  { %3064 = vmatpush1.msra.mxu0 %v9331_v22  ;;  %3137 = vmatpush1.msra.mxu1 %v9334_v28  ;;  %11251 = vst [vmem:[#allocation171_spill] sm:$0xff] %v9340_v14  ;;  %11252 = vst [vmem:[#allocation172_spill] sm:$0xff] %v9343_v18  ;;  %v9346_v17 = vld [vmem:[#allocation11 + $0x50] sm:$0xff]  ;;  %v9349_v22 = vld [vmem:[#allocation10 + $0x48] sm:$0xff] }
 0x75a   :  { %3065 = vmatprep.subr.mxu0 %v9337_v44  ;;  %3138 = vmatprep.subr.mxu1 %v9340_v14  ;;  %11253 = vst [vmem:[#allocation173_spill] sm:$0xff] %v9346_v17  ;;  %11254 = vst [vmem:[#allocation174_spill] sm:$0xff] %v9349_v22  ;;  %v9352_v28 = vld [vmem:[#allocation11 + $0x48] sm:$0xff]  ;;  %v9355_v44 = vld [vmem:[#allocation10 + $0x40] sm:$0xff] }
 0x75b   :  { %3066 = vmatpush1.msra.mxu0 %v9343_v18  ;;  %3139 = vmatpush1.msra.mxu1 %v9346_v17  ;;  %11255 = vst [vmem:[#allocation175_spill] sm:$0xff] %v9352_v28  ;;  %11256 = vst [vmem:[#allocation90_spill] sm:$0xff] %v9355_v44  ;;  %v9358_v14 = vld [vmem:[#allocation11 + $0x40] sm:$0xff]  ;;  %v9361_v18 = vld [vmem:[#allocation10 + $0x38] sm:$0xff] }
 0x75c   :  { %3067 = vmatprep.subr.mxu0 %v9349_v22  ;;  %3140 = vmatprep.subr.mxu1 %v9352_v28  ;;  %11257 = vst [vmem:[#allocation91_spill] sm:$0xff] %v9358_v14  ;;  %11258 = vst [vmem:[#allocation92_spill] sm:$0xff] %v9361_v18  ;;  %v9364_v17 = vld [vmem:[#allocation11 + $0x38] sm:$0xff]  ;;  %v9367_v22 = vld [vmem:[#allocation10 + $0x30] sm:$0xff] }
 0x75d   :  { %3068 = vmatpush1.msra.mxu0 %v9355_v44  ;;  %3141 = vmatpush1.msra.mxu1 %v9358_v14  ;;  %11259 = vst [vmem:[#allocation93_spill] sm:$0xff] %v9364_v17  ;;  %11260 = vst [vmem:[#allocation181_spill] sm:$0xff] %v9367_v22  ;;  %v9370_v28 = vld [vmem:[#allocation11 + $0x30] sm:$0xff]  ;;  %v9373_v44 = vld [vmem:[#allocation10 + $0x28] sm:$0xff] }
 0x75e   :  { %3069 = vmatprep.subr.mxu0 %v9361_v18  ;;  %3142 = vmatprep.subr.mxu1 %v9364_v17  ;;  %11261 = vst [vmem:[#allocation182_spill] sm:$0xff] %v9370_v28  ;;  %11262 = vst [vmem:[#allocation183_spill] sm:$0xff] %v9373_v44  ;;  %v9376_v14 = vld [vmem:[#allocation11 + $0x28] sm:$0xff]  ;;  %v9379_v18 = vld [vmem:[#allocation10 + $0x20] sm:$0xff] }
 0x75f   :  { %3070 = vmatpush1.msra.mxu0 %v9367_v22  ;;  %3143 = vmatpush1.msra.mxu1 %v9370_v28  ;;  %11263 = vst [vmem:[#allocation184_spill] sm:$0xff] %v9376_v14  ;;  %11264 = vst [vmem:[#allocation205_spill] sm:$0xff] %v9379_v18  ;;  %v9382_v17 = vld [vmem:[#allocation11 + $0x20] sm:$0xff]  ;;  %v9385_v22 = vld [vmem:[#allocation10 + $0x18] sm:$0xff] }
 0x760   :  { %3071 = vmatprep.subr.mxu0 %v9373_v44  ;;  %3144 = vmatprep.subr.mxu1 %v9376_v14  ;;  %11265 = vst [vmem:[#allocation206_spill] sm:$0xff] %v9382_v17  ;;  %11266 = vst [vmem:[#allocation207_spill] sm:$0xff] %v9385_v22  ;;  %v9388_v28 = vld [vmem:[#allocation11 + $0x18] sm:$0xff]  ;;  %v9391_v44 = vld [vmem:[#allocation10 + $0x10] sm:$0xff] }
 0x761   :  { %3072 = vmatpush1.msra.mxu0 %v9379_v18  ;;  %3145 = vmatpush1.msra.mxu1 %v9382_v17  ;;  %11267 = vst [vmem:[#allocation208_spill] sm:$0xff] %v9388_v28  ;;  %11268 = vst [vmem:[#allocation209_spill] sm:$0xff] %v9391_v44  ;;  %v9394_v14 = vld [vmem:[#allocation11 + $0x10] sm:$0xff]  ;;  %v9397_v18 = vld [vmem:[#allocation10 + $0x8] sm:$0xff] }
 0x762   :  { %3073 = vmatprep.subr.mxu0 %v9385_v22  ;;  %3146 = vmatprep.subr.mxu1 %v9388_v28  ;;  %11269 = vst [vmem:[#allocation210_spill] sm:$0xff] %v9394_v14  ;;  %11270 = vst [vmem:[#allocation211_spill] sm:$0xff] %v9397_v18  ;;  %v9400_v17 = vld [vmem:[#allocation11 + $0x8] sm:$0xff]  ;;  %v9403_v22 = vld [vmem:[#allocation10] sm:$0xff] }
 0x763   :  { %3074 = vmatpush1.msra.mxu0 %v9391_v44  ;;  %3147 = vmatpush1.msra.mxu1 %v9394_v14  ;;  %11271 = vst [vmem:[#allocation212_spill] sm:$0xff] %v9400_v17  ;;  %11272 = vst [vmem:[#allocation213_spill] sm:$0xff] %v9403_v22  ;;  %v9406_v28 = vld [vmem:[#allocation11] sm:$0xff]  ;;  %v9409_v44 = vld [vmem:[#allocation10 + $0x138] sm:$0xff] }
 0x764   :  { %3075 = vmatprep.subr.mxu0 %v9397_v18  ;;  %3148 = vmatprep.subr.mxu1 %v9400_v17  ;;  %11273 = vst [vmem:[#allocation214_spill] sm:$0xff] %v9406_v28  ;;  %11274 = vst [vmem:[#allocation215_spill] sm:$0xff] %v9409_v44  ;;  %v9412_v14 = vld [vmem:[#allocation11 + $0x138] sm:$0xff]  ;;  %v9415_v18 = vld [vmem:[#allocation10 + $0x130] sm:$0xff] }
 0x765   :  { %3076 = vmatpush1.msra.mxu0 %v9403_v22  ;;  %3149 = vmatpush1.msra.mxu1 %v9406_v28  ;;  %11275 = vst [vmem:[#allocation216_spill] sm:$0xff] %v9412_v14  ;;  %11276 = vst [vmem:[#allocation217_spill] sm:$0xff] %v9415_v18  ;;  %v9418_v17 = vld [vmem:[#allocation11 + $0x130] sm:$0xff]  ;;  %v9421_v22 = vld [vmem:[#allocation10 + $0x128] sm:$0xff] }
 0x766   :  { %3101 = vmatprep.subr.mxu0 %v9409_v44  ;;  %3174 = vmatprep.subr.mxu1 %v9412_v14  ;;  %11277 = vst [vmem:[#allocation218_spill] sm:$0xff] %v9418_v17  ;;  %11278 = vst [vmem:[#allocation219_spill] sm:$0xff] %v9421_v22  ;;  %v9424_v28 = vld [vmem:[#allocation11 + $0x128] sm:$0xff]  ;;  %v9427_v44 = vld [vmem:[#allocation10 + $0x120] sm:$0xff] }
 0x767   :  { %3102 = vmatpush2.msra.mxu0 %v9415_v18  ;;  %3175 = vmatpush2.msra.mxu1 %v9418_v17  ;;  %11279 = vst [vmem:[#allocation220_spill] sm:$0xff] %v9424_v28  ;;  %11280 = vst [vmem:[#allocation221_spill] sm:$0xff] %v9427_v44  ;;  %v9430_v14 = vld [vmem:[#allocation11 + $0x120] sm:$0xff]  ;;  %v9433_v18 = vld [vmem:[#allocation10 + $0x118] sm:$0xff] }
 0x768   :  { %3103 = vmatprep.subr.mxu0 %v9421_v22  ;;  %3176 = vmatprep.subr.mxu1 %v9424_v28  ;;  %11281 = vst [vmem:[#allocation222_spill] sm:$0xff] %v9430_v14  ;;  %11282 = vst [vmem:[#allocation223_spill] sm:$0xff] %v9433_v18  ;;  %v9436_v17 = vld [vmem:[#allocation11 + $0x118] sm:$0xff]  ;;  %v9439_v22 = vld [vmem:[#allocation10 + $0x110] sm:$0xff] }
 0x769   :  { %3104 = vmatpush2.msra.mxu0 %v9427_v44  ;;  %3177 = vmatpush2.msra.mxu1 %v9430_v14  ;;  %11283 = vst [vmem:[#allocation224_spill] sm:$0xff] %v9436_v17  ;;  %v9442_v28 = vld [vmem:[#allocation11 + $0x110] sm:$0xff]  ;;  %v9445_v44 = vld [vmem:[#allocation10 + $0x108] sm:$0xff] }
 0x76a   :  { %3105 = vmatprep.subr.mxu0 %v9433_v18  ;;  %3178 = vmatprep.subr.mxu1 %v9436_v17  ;;  %v9448_v14 = vld [vmem:[#allocation11 + $0x108] sm:$0xff]  ;;  %v9451_v18 = vld [vmem:[#allocation10 + $0x100] sm:$0xff] }
 0x76b   :  { %3106 = vmatpush2.msra.mxu0 %v9439_v22  ;;  %3179 = vmatpush2.msra.mxu1 %v9442_v28  ;;  %v9454_v17 = vld [vmem:[#allocation11 + $0x100] sm:$0xff] }
 0x76c   :  { %3107 = vmatprep.subr.mxu0 %v9445_v44  ;;  %3180 = vmatprep.subr.mxu1 %v9448_v14 }
 0x76d   :  { %3108 = vmatpush2.msra.mxu0 %v9451_v18  ;;  %3181 = vmatpush2.msra.mxu1 %v9454_v17 }
 0x76e   :  { %3110 = vmatmul.mubr.f32.vlgmr.msra.gmra.mxu0 %v9215_v60  ;;  %3183 = vmatmul.mubr.f32.vlgmr.msra.gmra.mxu1 %v9215_v60  ;;  %v11284_v60 = vld [vmem:[#allocation244_spill] sm:$0xff] }
 0x76f   :  { %3242 = vmatprep.subr.mxu0 %v8874_v62  ;;  %3315 = vmatprep.subr.mxu1 %v8878_v53 }
 0x770   :  { %3243 = vmatpush1.msra.mxu0 %v8882_v5  ;;  %3316 = vmatpush1.msra.mxu1 %v8886_v4 }
 0x771   :  { %3244 = vmatprep.subr.mxu0 %v8890_v20  ;;  %3317 = vmatprep.subr.mxu1 %v8894_v19 }
 0x772   :  { %3245 = vmatpush1.msra.mxu0 %v8898_v27  ;;  %3318 = vmatpush1.msra.mxu1 %v8902_v39 }
 0x773   :  { %3246 = vmatprep.subr.mxu0 %v8906_v61  ;;  %3319 = vmatprep.subr.mxu1 %v8910_v42 }
 0x774   :  { %3247 = vmatpush1.msra.mxu0 %v8914_v55  ;;  %3320 = vmatpush1.msra.mxu1 %v8918_v12 }
 0x775   :  { %3248 = vmatprep.subr.mxu0 %v8922_v24  ;;  %3321 = vmatprep.subr.mxu1 %v8926_v38 }
 0x776   :  { %3249 = vmatpush1.msra.mxu0 %v8930_v59  ;;  %3322 = vmatpush1.msra.mxu1 %v8934_v46 }
 0x777   :  { %3250 = vmatprep.subr.mxu0 %v8938_v57  ;;  %3323 = vmatprep.subr.mxu1 %v8942_v15 }
 0x778   :  { %3251 = vmatpush1.msra.mxu0 %v8946_v52  ;;  %3324 = vmatpush1.msra.mxu1 %v8950_v30 }
 0x779   :  { %3252 = vmatprep.subr.mxu0 %v8954_v54  ;;  %3325 = vmatprep.subr.mxu1 %v8958_v43 }
 0x77a   :  { %3253 = vmatpush1.msra.mxu0 %v8962_v51  ;;  %3326 = vmatpush1.msra.mxu1 %v8966_v58 }
 0x77b   :  { %3254 = vmatprep.subr.mxu0 %v8970_v0  ;;  %3327 = vmatprep.subr.mxu1 %v8974_v7 }
 0x77c   :  { %3255 = vmatpush1.msra.mxu0 %v8978_v49  ;;  %3328 = vmatpush1.msra.mxu1 %v8982_v31 }
 0x77d   :  { %3256 = vmatprep.subr.mxu0 %v8986_v16  ;;  %3329 = vmatprep.subr.mxu1 %v8990_v32  ;;  %v11326_v16 = vld [vmem:[#allocation100_spill] sm:$0xff] }
 0x77e   :  { %3257 = vmatpush1.msra.mxu0 %v8994_v2  ;;  %3330 = vmatpush1.msra.mxu1 %v8998_v21 }
 0x77f   :  { %3258 = vmatprep.subr.mxu0 %v9002_v45  ;;  %3331 = vmatprep.subr.mxu1 %v9006_v33  ;;  %v11285_v45 = vld [vmem:[#allocation245_spill] sm:$0xff]  ;;  %v11286_v33 = vld [vmem:[#allocation246_spill] sm:$0xff] }
 0x780   :  { %3259 = vmatpush1.msra.mxu0 %v9010_v34  ;;  %3332 = vmatpush1.msra.mxu1 %v9014_v48  ;;  %v11287_v34 = vld [vmem:[#allocation247_spill] sm:$0xff]  ;;  %v11288_v48 = vld [vmem:[#allocation248_spill] sm:$0xff] }
 0x781   :  { %3260 = vmatprep.subr.mxu0 %v9018_v3  ;;  %3333 = vmatprep.subr.mxu1 %v9022_v25  ;;  %v11289_v3 = vld [vmem:[#allocation249_spill] sm:$0xff]  ;;  %v11290_v25 = vld [vmem:[#allocation250_spill] sm:$0xff] }
 0x782   :  { %3261 = vmatpush1.msra.mxu0 %v9026_v63  ;;  %3334 = vmatpush1.msra.mxu1 %v9030_v29  ;;  %v11291_v63 = vld [vmem:[#allocation251_spill] sm:$0xff]  ;;  %v11292_v29 = vld [vmem:[#allocation113_spill] sm:$0xff] }
 0x783   :  { %3262 = vmatprep.subr.mxu0 %v9034_v1  ;;  %3335 = vmatprep.subr.mxu1 %v9038_v26  ;;  %v11293_v1 = vld [vmem:[#allocation114_spill] sm:$0xff]  ;;  %v11294_v26 = vld [vmem:[#allocation115_spill] sm:$0xff] }
 0x784   :  { %3263 = vmatpush1.msra.mxu0 %v11284_v60  ;;  %3336 = vmatpush1.msra.mxu1 %v11285_v45  ;;  %v11295_v60 = vld [vmem:[#allocation116_spill] sm:$0xff]  ;;  %v11296_v45 = vld [vmem:[#allocation117_spill] sm:$0xff] }
 0x785   :  { %3264 = vmatprep.subr.mxu0 %v11286_v33  ;;  %3337 = vmatprep.subr.mxu1 %v11287_v34  ;;  %v11297_v33 = vld [vmem:[#allocation118_spill] sm:$0xff]  ;;  %v11298_v34 = vld [vmem:[#allocation119_spill] sm:$0xff] }
 0x786   :  { %3265 = vmatpush1.msra.mxu0 %v11288_v48  ;;  %3338 = vmatpush1.msra.mxu1 %v11289_v3  ;;  %v11299_v48 = vld [vmem:[#allocation120_spill] sm:$0xff]  ;;  %v11300_v3 = vld [vmem:[#allocation121_spill] sm:$0xff] }
 0x787   :  { %3266 = vmatprep.subr.mxu0 %v11290_v25  ;;  %3339 = vmatprep.subr.mxu1 %v11291_v63  ;;  %v11301_v25 = vld [vmem:[#allocation122_spill] sm:$0xff]  ;;  %v11302_v63 = vld [vmem:[#allocation123_spill] sm:$0xff] }
 0x788   :  { %3267 = vmatpush1.msra.mxu0 %v11292_v29  ;;  %3340 = vmatpush1.msra.mxu1 %v11293_v1  ;;  %v11303_v29 = vld [vmem:[#allocation124_spill] sm:$0xff]  ;;  %v11304_v1 = vld [vmem:[#allocation125_spill] sm:$0xff] }
 0x789   :  { %3268 = vmatprep.subr.mxu0 %v11294_v26  ;;  %3341 = vmatprep.subr.mxu1 %v11295_v60  ;;  %v11305_v26 = vld [vmem:[#allocation126_spill] sm:$0xff]  ;;  %v11306_v60 = vld [vmem:[#allocation127_spill] sm:$0xff] }
 0x78a   :  { %3269 = vmatpush1.msra.mxu0 %v11296_v45  ;;  %3342 = vmatpush1.msra.mxu1 %v11297_v33  ;;  %v11307_v45 = vld [vmem:[#allocation128_spill] sm:$0xff]  ;;  %v11308_v33 = vld [vmem:[#allocation129_spill] sm:$0xff] }
 0x78b   :  { %3270 = vmatprep.subr.mxu0 %v11298_v34  ;;  %3343 = vmatprep.subr.mxu1 %v11299_v48  ;;  %v11309_v34 = vld [vmem:[#allocation130_spill] sm:$0xff]  ;;  %v11310_v48 = vld [vmem:[#allocation131_spill] sm:$0xff] }
 0x78c   :  { %3271 = vmatpush1.msra.mxu0 %v11300_v3  ;;  %3344 = vmatpush1.msra.mxu1 %v11301_v25  ;;  %v11311_v3 = vld [vmem:[#allocation132_spill] sm:$0xff]  ;;  %v11312_v25 = vld [vmem:[#allocation133_spill] sm:$0xff] }
 0x78d   :  { %3272 = vmatprep.subr.mxu0 %v11302_v63  ;;  %3345 = vmatprep.subr.mxu1 %v11303_v29  ;;  %v11313_v63 = vld [vmem:[#allocation134_spill] sm:$0xff]  ;;  %v11314_v29 = vld [vmem:[#allocation135_spill] sm:$0xff] }
 0x78e   :  { %3273 = vmatpush1.msra.mxu0 %v11304_v1  ;;  %3346 = vmatpush1.msra.mxu1 %v11305_v26  ;;  %v11315_v1 = vld [vmem:[#allocation136_spill] sm:$0xff]  ;;  %v11316_v26 = vld [vmem:[#allocation137_spill] sm:$0xff] }
 0x78f   :  { %3298 = vmatprep.subr.mxu0 %v11306_v60  ;;  %3371 = vmatprep.subr.mxu1 %v11307_v45  ;;  %v11317_v60 = vld [vmem:[#allocation138_spill] sm:$0xff]  ;;  %v11318_v45 = vld [vmem:[#allocation139_spill] sm:$0xff] }
 0x790   :  { %3299 = vmatpush2.msra.mxu0 %v11308_v33  ;;  %3372 = vmatpush2.msra.mxu1 %v11309_v34  ;;  %v11319_v33 = vld [vmem:[#allocation140_spill] sm:$0xff]  ;;  %v11320_v34 = vld [vmem:[#allocation141_spill] sm:$0xff] }
 0x791   :  { %3300 = vmatprep.subr.mxu0 %v11310_v48  ;;  %3373 = vmatprep.subr.mxu1 %v11311_v3  ;;  %v11321_v48 = vld [vmem:[#allocation142_spill] sm:$0xff]  ;;  %v11322_v3 = vld [vmem:[#allocation143_spill] sm:$0xff] }
 0x792   :  { %3301 = vmatpush2.msra.mxu0 %v11312_v25  ;;  %3374 = vmatpush2.msra.mxu1 %v11313_v63  ;;  %v11323_v25 = vld [vmem:[#allocation144_spill] sm:$0xff] }
 0x793   :  { %3302 = vmatprep.subr.mxu0 %v11314_v29  ;;  %3375 = vmatprep.subr.mxu1 %v11315_v1  ;;  %v11324_v1 = vld [vmem:[#allocation98_spill] sm:$0xff] }
 0x794   :  { %3303 = vmatpush2.msra.mxu0 %v11316_v26  ;;  %3376 = vmatpush2.msra.mxu1 %v11317_v60  ;;  %v11325_v26 = vld [vmem:[#allocation99_spill] sm:$0xff] }
 0x795   :  { %3304 = vmatprep.subr.mxu0 %v11318_v45  ;;  %3377 = vmatprep.subr.mxu1 %v11319_v33  ;;  %v11327_v33 = vld [vmem:[#allocation101_spill] sm:$0xff] }
 0x796   :  { %3305 = vmatpush2.msra.mxu0 %v11320_v34  ;;  %3378 = vmatpush2.msra.mxu1 %v11321_v48 }
 0x797   :  { %3388 = vmatprep.subr.mxu0 %v11322_v3  ;;  %3461 = vmatprep.subr.mxu1 %v11323_v25 }
 0x805   :  { %v2965_v63 = vpop.f32.mrf.mxu0  ;;  %v3038_v29 = vpop.f32.mrf.mxu1 }
 0x806   :  { %v2970_v2 = vadd.f32 %v2965_v63, %v11324_v1  ;;  %v3043_v32 = vadd.f32 %v3038_v29, %v11325_v26 }
 0x807   :  { %v2967_v21 = vpop.f32.mrf.mxu0  ;;  %v3040_v60 = vpop.f32.mrf.mxu1 }
 0x808   :  { %v2971_v45 = vadd.f32 %v2967_v21, %v11326_v16  ;;  %v5079_v31 = vmul.f32 -1.442695, %v2970_v2  ;;  %v3044_v49 = vadd.f32 %v3040_v60, %v11327_v33  ;;  %v5077_v34 = vmul.f32 -1.442695, %v3043_v32  ;;  %v11328_v21 = vld [vmem:[#allocation189_spill] sm:$0xff] }
 0x80a   :  { %v5080_v7 = vmul.f32 -1.442695, %v2971_v45  ;;  %5499 = vpow2.f32 %v5079_v31  ;;  %v5078_v48 = vmul.f32 -1.442695, %v3044_v49  ;;  %v11329_v45 = vld [vmem:[#allocation190_spill] sm:$0xff] }
 0x80b   :  { %5501 = vpow2.f32 %v5077_v34  ;;  %v11330_v34 = vld [vmem:[#allocation191_spill] sm:$0xff] }
 0x80c   :  { %5503 = vpow2.f32 %v5080_v7 }
 0x80d   :  { %5505 = vpow2.f32 %v5078_v48 }
 0x817   :  { %v5500_v25 = vpop.eup %5499 }
 0x818   :  { %v5502_v3 = vpop.eup %5501  ;;  %v3211_v58 = vadd.f32 1.0, %v5500_v25  ;;  %v11331_v25 = vld [vmem:[#allocation192_spill] sm:$0xff] }
 0x819   :  { %v5504_v0 = vpop.eup %5503  ;;  %v3197_v1 = vadd.f32 1.0, %v5502_v3 }
 0x81a   :  { %v5506_v63 = vpop.eup %5505  ;;  %v3212_v29 = vadd.f32 1.0, %v5504_v0  ;;  %5507 = vrcp.f32 %v3211_v58 }
 0x81b   :  { %v3198_v26 = vadd.f32 1.0, %v5506_v63  ;;  %5509 = vrcp.f32 %v3197_v1 }
 0x81c   :  { %5511 = vrcp.f32 %v3212_v29 }
 0x827   :  { %v5508_v0 = vpop.eup %5507 }
 0x828   :  { %v5510_v3 = vpop.eup %5509 }
 0x829   :  { %v5512_v63 = vpop.eup %5511  ;;  %v3203_v29 = vmul.f32 %v5510_v3, %v9208_v40  ;;  %v11333_v3 = vld [vmem:[#allocation146_spill] sm:$0xff] }
 0x82e   :  { %v3111_v16 = vpop.f32.mrf.mxu0  ;;  %v3184_v2 = vpop.f32.mrf.mxu1 }
 0x82f   :  { %v3116_v32 = vadd.f32 %v3111_v16, %v11328_v21  ;;  %v3189_v31 = vadd.f32 %v3184_v2, %v11329_v45 }
 0x830   :  { %v3113_v49 = vpop.f32.mrf.mxu0  ;;  %v3186_v7 = vpop.f32.mrf.mxu1 }
 0x831   :  { %5513 = vtanh.f32 %v3116_v32  ;;  %v5081_v33 = vmul.f32 -1.442695, %v3189_v31  ;;  %v3117_v48 = vadd.f32 %v3113_v49, %v11330_v34  ;;  %v3190_v60 = vadd.f32 %v3186_v7, %v11331_v25 }
 0x832   :  { %5515 = vrcp.f32 %v3198_v26 }
 0x833   :  { %5517 = vpow2.f32 %v5081_v33  ;;  %v5082_v58 = vmul.f32 -1.442695, %v3190_v60 }
 0x834   :  { %5519 = vtanh.f32 %v3117_v48 }
 0x835   :  { %5521 = vpow2.f32 %v5082_v58 }
 0x83e   :  { %v5514_v1 = vpop.eup %5513 }
 0x83f   :  { %v5516_v16 = vpop.eup %5515  ;;  %v3219_v2 = vmul.f32 %v5514_v1, %v5508_v0  ;;  %v11335_v1 = vld [vmem:[#allocation148_spill] sm:$0xff] }
 0x840   :  { %v5518_v21 = vpop.eup %5517  ;;  %v3204_v26 = vmul.f32 %v5516_v16, %v9212_v9  ;;  %v11332_v9 = vld [vmem:[#allocation145_spill] sm:$0xff] }
 0x841   :  { %v5520_v32 = vpop.eup %5519  ;;  %v9550_v45 = vadd.f32 %v3219_v2, %v3203_v29  ;;  %v3229_v31 = vadd.f32 1.0, %v5518_v21  ;;  %v11336_v16 = vld [vmem:[#allocation149_spill] sm:$0xff]  ;;  %v11337_v29 = vld [vmem:[#allocation150_spill] sm:$0xff]  ;;  %v11338_v2 = vld [vmem:[#allocation151_spill] sm:$0xff] }
 0x842   :  { %v5522_v49 = vpop.eup %5521  ;;  %v3220_v7 = vmul.f32 %v5520_v32, %v5512_v63  ;;  %v11334_v63 = vld [vmem:[#allocation147_spill] sm:$0xff]  ;;  %v11339_v21 = vld [vmem:[#allocation152_spill] sm:$0xff]  ;;  %v11340_v32 = vld [vmem:[#allocation153_spill] sm:$0xff] }
 0x843   :  { %5523 = vtanh.f32 %v9550_v45  ;;  %v3230_v33 = vadd.f32 1.0, %v5522_v49  ;;  %v11342_v49 = vld [vmem:[#allocation155_spill] sm:$0xff] }
 0x844   :  { %5525 = vrcp.f32 %v3229_v31  ;;  %v9554_v34 = vadd.f32 %v3220_v7, %v3204_v26  ;;  %v11341_v31 = vld [vmem:[#allocation154_spill] sm:$0xff]  ;;  %v11343_v26 = vld [vmem:[#allocation156_spill] sm:$0xff]  ;;  %v11344_v7 = vld [vmem:[#allocation157_spill] sm:$0xff] }
 0x845   :  { %5527 = vrcp.f32 %v3230_v33  ;;  %v11345_v33 = vld [vmem:[#allocation158_spill] sm:$0xff] }
 0x846   :  { %5529 = vtanh.f32 %v9554_v34 }
 0x850   :  { %v5524_v40 = vpop.eup %5523 }
 0x851   :  { %v5526_v48 = vpop.eup %5525 }
 0x852   :  { %v5528_v25 = vpop.eup %5527  ;;  %v9557_v0 = vmul.f32 %v5526_v48, %v5524_v40  ;;  %v11346_v40 = vld [vmem:[#allocation159_spill] sm:$0xff]  ;;  %v11347_v48 = vld [vmem:[#allocation160_spill] sm:$0xff] }
 0x853   :  { %v5530_v60 = vpop.eup %5529 }
 0x854   :  { %v3238_v58 = vmul.f32 %v5530_v60, %v5528_v25  ;;  %v11348_v25 = vld [vmem:[#allocation161_spill] sm:$0xff]  ;;  %v11349_v60 = vld [vmem:[#allocation162_spill] sm:$0xff] }
 0x856   :  { %5083 = vmatprep.mubr.msk.f32.mxu0 %vm1180_vm1, %v3238_v58  ;;  %5084 = vmatprep.mubr.msk.f32.mxu1 %vm1180_vm1, %v3238_v58 }
 0x857   :  { %3307 = vmatmul.mubr.f32.vlgmr.msra.gmra.mxu0 %v9557_v0  ;;  %3380 = vmatmul.mubr.f32.vlgmr.msra.gmra.mxu1 %v9557_v0 }
 0x858   :  { %3389 = vmatpush1.msra.mxu0 %v9221_v37  ;;  %3462 = vmatpush1.msra.mxu1 %v9224_v23 }
 0x859   :  { %3390 = vmatprep.subr.mxu0 %v9227_v11  ;;  %5085 = vmatprep.mubr.msk.f32.mxu0 %vm1180_vm1, %v3238_v58 }
 0x85a   :  { %3463 = vmatprep.subr.mxu1 %v9231_v47  ;;  %5086 = vmatprep.mubr.msk.f32.mxu1 %vm1180_vm1, %v3238_v58  ;;  %v11350_v58 = vld [vmem:[#allocation163_spill] sm:$0xff] }
 0x85b   :  { %3391 = vmatpush1.msra.mxu0 %v9235_v35  ;;  %3464 = vmatpush1.msra.mxu1 %v9238_v6 }
 0x85c   :  { %3392 = vmatprep.subr.mxu0 %v9241_v8  ;;  %3465 = vmatprep.subr.mxu1 %v9244_v13 }
 0x85d   :  { %3393 = vmatpush1.msra.mxu0 %v9247_v36  ;;  %3466 = vmatpush1.msra.mxu1 %v9250_v56 }
 0x85e   :  { %3394 = vmatprep.subr.mxu0 %v9253_v50  ;;  %3467 = vmatprep.subr.mxu1 %v9256_v10 }
 0x85f   :  { %3395 = vmatpush1.msra.mxu0 %v9259_v41  ;;  %3468 = vmatpush1.msra.mxu1 %v11332_v9 }
 0x860   :  { %3396 = vmatprep.subr.mxu0 %v11333_v3  ;;  %3469 = vmatprep.subr.mxu1 %v11334_v63 }
 0x861   :  { %3397 = vmatpush1.msra.mxu0 %v11335_v1  ;;  %3470 = vmatpush1.msra.mxu1 %v11336_v16 }
 0x862   :  { %3398 = vmatprep.subr.mxu0 %v11337_v29  ;;  %3471 = vmatprep.subr.mxu1 %v11338_v2 }
 0x863   :  { %3399 = vmatpush1.msra.mxu0 %v11339_v21  ;;  %3472 = vmatpush1.msra.mxu1 %v11340_v32  ;;  %v11351_v32 = vld [vmem:[#allocation164_spill] sm:$0xff] }
 0x864   :  { %3400 = vmatprep.subr.mxu0 %v11341_v31  ;;  %3473 = vmatprep.subr.mxu1 %v11342_v49  ;;  %v11352_v31 = vld [vmem:[#allocation165_spill] sm:$0xff]  ;;  %v11353_v49 = vld [vmem:[#allocation166_spill] sm:$0xff] }
 0x865   :  { %3401 = vmatpush1.msra.mxu0 %v11343_v26  ;;  %3474 = vmatpush1.msra.mxu1 %v11344_v7  ;;  %v11354_v26 = vld [vmem:[#allocation167_spill] sm:$0xff]  ;;  %v11355_v7 = vld [vmem:[#allocation168_spill] sm:$0xff] }
 0x866   :  { %3402 = vmatprep.subr.mxu0 %v11345_v33  ;;  %3475 = vmatprep.subr.mxu1 %v11346_v40  ;;  %v11356_v33 = vld [vmem:[#allocation169_spill] sm:$0xff]  ;;  %v11357_v40 = vld [vmem:[#allocation170_spill] sm:$0xff] }
 0x867   :  { %3403 = vmatpush1.msra.mxu0 %v11347_v48  ;;  %3476 = vmatpush1.msra.mxu1 %v11348_v25  ;;  %v11358_v48 = vld [vmem:[#allocation171_spill] sm:$0xff]  ;;  %v11359_v25 = vld [vmem:[#allocation172_spill] sm:$0xff] }
 0x868   :  { %3404 = vmatprep.subr.mxu0 %v11349_v60  ;;  %3477 = vmatprep.subr.mxu1 %v11350_v58  ;;  %v11360_v60 = vld [vmem:[#allocation173_spill] sm:$0xff]  ;;  %v11361_v58 = vld [vmem:[#allocation174_spill] sm:$0xff] }
 0x869   :  { %3405 = vmatpush1.msra.mxu0 %v11351_v32  ;;  %3478 = vmatpush1.msra.mxu1 %v11352_v31  ;;  %v11362_v32 = vld [vmem:[#allocation175_spill] sm:$0xff]  ;;  %v11363_v31 = vld [vmem:[#allocation90_spill] sm:$0xff] }
 0x86a   :  { %3406 = vmatprep.subr.mxu0 %v11353_v49  ;;  %3479 = vmatprep.subr.mxu1 %v11354_v26  ;;  %v11364_v49 = vld [vmem:[#allocation91_spill] sm:$0xff]  ;;  %v11365_v26 = vld [vmem:[#allocation92_spill] sm:$0xff] }
 0x86b   :  { %3407 = vmatpush1.msra.mxu0 %v11355_v7  ;;  %3480 = vmatpush1.msra.mxu1 %v11356_v33  ;;  %v11366_v7 = vld [vmem:[#allocation93_spill] sm:$0xff] }
 0x86c   :  { %3408 = vmatprep.subr.mxu0 %v11357_v40  ;;  %3481 = vmatprep.subr.mxu1 %v11358_v48  ;;  %v11367_v33 = vld [vmem:[#allocation181_spill] sm:$0xff]  ;;  %v11368_v40 = vld [vmem:[#allocation182_spill] sm:$0xff]  ;;  %v11369_v48 = vld [vmem:[#allocation183_spill] sm:$0xff] }
 0x86d   :  { %3409 = vmatpush1.msra.mxu0 %v11359_v25  ;;  %3482 = vmatpush1.msra.mxu1 %v11360_v60  ;;  %v11370_v25 = vld [vmem:[#allocation184_spill] sm:$0xff]  ;;  %v11371_v60 = vld [vmem:[#allocation205_spill] sm:$0xff] }
 0x86e   :  { %3410 = vmatprep.subr.mxu0 %v11361_v58  ;;  %3483 = vmatprep.subr.mxu1 %v11362_v32  ;;  %v11372_v58 = vld [vmem:[#allocation206_spill] sm:$0xff]  ;;  %v11373_v32 = vld [vmem:[#allocation207_spill] sm:$0xff] }
 0x86f   :  { %3411 = vmatpush1.msra.mxu0 %v11363_v31  ;;  %3484 = vmatpush1.msra.mxu1 %v11364_v49  ;;  %v11374_v31 = vld [vmem:[#allocation208_spill] sm:$0xff]  ;;  %v11375_v49 = vld [vmem:[#allocation209_spill] sm:$0xff] }
 0x870   :  { %3412 = vmatprep.subr.mxu0 %v11365_v26  ;;  %3485 = vmatprep.subr.mxu1 %v11366_v7  ;;  %v11376_v26 = vld [vmem:[#allocation210_spill] sm:$0xff]  ;;  %v11377_v7 = vld [vmem:[#allocation211_spill] sm:$0xff] }
 0x871   :  { %3413 = vmatpush1.msra.mxu0 %v11367_v33  ;;  %3486 = vmatpush1.msra.mxu1 %v11368_v40  ;;  %v11378_v33 = vld [vmem:[#allocation212_spill] sm:$0xff]  ;;  %v11379_v40 = vld [vmem:[#allocation213_spill] sm:$0xff] }
 0x872   :  { %3414 = vmatprep.subr.mxu0 %v11369_v48  ;;  %3487 = vmatprep.subr.mxu1 %v11370_v25  ;;  %v11380_v48 = vld [vmem:[#allocation214_spill] sm:$0xff]  ;;  %v11381_v25 = vld [vmem:[#allocation215_spill] sm:$0xff] }
 0x873   :  { %3415 = vmatpush1.msra.mxu0 %v11371_v60  ;;  %3488 = vmatpush1.msra.mxu1 %v11372_v58  ;;  %v11382_v60 = vld [vmem:[#allocation216_spill] sm:$0xff]  ;;  %v11383_v58 = vld [vmem:[#allocation217_spill] sm:$0xff] }
 0x874   :  { %3416 = vmatprep.subr.mxu0 %v11373_v32  ;;  %3489 = vmatprep.subr.mxu1 %v11374_v31  ;;  %v11384_v32 = vld [vmem:[#allocation218_spill] sm:$0xff]  ;;  %v11385_v31 = vld [vmem:[#allocation219_spill] sm:$0xff] }
 0x875   :  { %3417 = vmatpush1.msra.mxu0 %v11375_v49  ;;  %3490 = vmatpush1.msra.mxu1 %v11376_v26  ;;  %v11386_v49 = vld [vmem:[#allocation220_spill] sm:$0xff]  ;;  %v11387_v26 = vld [vmem:[#allocation221_spill] sm:$0xff] }
 0x876   :  { %3418 = vmatprep.subr.mxu0 %v11377_v7  ;;  %3491 = vmatprep.subr.mxu1 %v11378_v33  ;;  %v11388_v7 = vld [vmem:[#allocation222_spill] sm:$0xff]  ;;  %v11389_v33 = vld [vmem:[#allocation223_spill] sm:$0xff] }
 0x877   :  { %3419 = vmatpush1.msra.mxu0 %v11379_v40  ;;  %3492 = vmatpush1.msra.mxu1 %v11380_v48  ;;  %v11390_v40 = vld [vmem:[#allocation224_spill] sm:$0xff] }
 0x878   :  { %3444 = vmatprep.subr.mxu0 %v11381_v25  ;;  %3517 = vmatprep.subr.mxu1 %v11382_v60 }
 0x879   :  { %3445 = vmatpush2.msra.mxu0 %v11383_v58  ;;  %3518 = vmatpush2.msra.mxu1 %v11384_v32 }
 0x87a   :  { %3446 = vmatprep.subr.mxu0 %v11385_v31  ;;  %3519 = vmatprep.subr.mxu1 %v11386_v49 }
 0x87b   :  { %3447 = vmatpush2.msra.mxu0 %v11387_v26  ;;  %3520 = vmatpush2.msra.mxu1 %v11388_v7 }
 0x87c   :  { %3448 = vmatprep.subr.mxu0 %v11389_v33  ;;  %3521 = vmatprep.subr.mxu1 %v11390_v40 }
 0x87d   :  { %3449 = vmatpush2.msra.mxu0 %v9439_v22  ;;  %3522 = vmatpush2.msra.mxu1 %v9442_v28 }
 0x87e   :  { %3450 = vmatprep.subr.mxu0 %v9445_v44  ;;  %3523 = vmatprep.subr.mxu1 %v9448_v14 }
 0x87f   :  { %3451 = vmatpush2.msra.mxu0 %v9451_v18  ;;  %3524 = vmatpush2.msra.mxu1 %v9454_v17 }
 0x880   :  { %3453 = vmatmul.mubr.f32.vlgmr.msra.gmra.mxu0 %v9557_v0  ;;  %3526 = vmatmul.mubr.f32.vlgmr.msra.gmra.mxu1 %v9557_v0  ;;  %v11414_v0 = vld [vmem:[#allocation248_spill] sm:$0xff] }
 0x881   :  { %3585 = vmatprep.subr.mxu0 %v8874_v62  ;;  %3658 = vmatprep.subr.mxu1 %v8878_v53  ;;  %v11391_v62 = vld [vmem:[#allocation86_spill] sm:$0xff]  ;;  %v11392_v53 = vld [vmem:[#allocation87_spill] sm:$0xff] }
 0x882   :  { %3586 = vmatpush1.msra.mxu0 %v8882_v5  ;;  %3659 = vmatpush1.msra.mxu1 %v8886_v4  ;;  %v11393_v5 = vld [vmem:[#allocation88_spill] sm:$0xff]  ;;  %v11394_v4 = vld [vmem:[#allocation89_spill] sm:$0xff] }
 0x883   :  { %3587 = vmatprep.subr.mxu0 %v8890_v20  ;;  %3660 = vmatprep.subr.mxu1 %v8894_v19  ;;  %v11395_v20 = vld [vmem:[#allocation110_spill] sm:$0xff]  ;;  %v11396_v19 = vld [vmem:[#allocation111_spill] sm:$0xff] }
 0x884   :  { %3588 = vmatpush1.msra.mxu0 %v8898_v27  ;;  %3661 = vmatpush1.msra.mxu1 %v8902_v39  ;;  %v11397_v27 = vld [vmem:[#allocation112_spill] sm:$0xff] }
 0x885   :  { %3589 = vmatprep.subr.mxu0 %v8906_v61  ;;  %3662 = vmatprep.subr.mxu1 %v8910_v42  ;;  %v11398_v39 = vld [vmem:[#allocation180_spill] sm:$0xff]  ;;  %v11400_v42 = vld [vmem:[#allocation177_spill] sm:$0xff] }
 0x886   :  { %3590 = vmatpush1.msra.mxu0 %v8914_v55  ;;  %3663 = vmatpush1.msra.mxu1 %v8918_v12  ;;  %v11399_v61 = vld [vmem:[#allocation176_spill] sm:$0xff]  ;;  %v11401_v55 = vld [vmem:[#allocation178_spill] sm:$0xff]  ;;  %v11402_v12 = vld [vmem:[#allocation179_spill] sm:$0xff] }
 0x887   :  { %3591 = vmatprep.subr.mxu0 %v8922_v24  ;;  %3664 = vmatprep.subr.mxu1 %v8926_v38  ;;  %v11403_v24 = vld [vmem:[#allocation201_spill] sm:$0xff]  ;;  %v11404_v38 = vld [vmem:[#allocation202_spill] sm:$0xff] }
 0x888   :  { %3592 = vmatpush1.msra.mxu0 %v8930_v59  ;;  %3665 = vmatpush1.msra.mxu1 %v8934_v46  ;;  %v11405_v59 = vld [vmem:[#allocation203_spill] sm:$0xff]  ;;  %v11406_v46 = vld [vmem:[#allocation204_spill] sm:$0xff] }
 0x889   :  { %3593 = vmatprep.subr.mxu0 %v8938_v57  ;;  %3666 = vmatprep.subr.mxu1 %v8942_v15  ;;  %v11407_v57 = vld [vmem:[#allocation241_spill] sm:$0xff]  ;;  %v11408_v15 = vld [vmem:[#allocation242_spill] sm:$0xff] }
 0x88a   :  { %3594 = vmatpush1.msra.mxu0 %v8946_v52  ;;  %3667 = vmatpush1.msra.mxu1 %v8950_v30  ;;  %v11409_v52 = vld [vmem:[#allocation243_spill] sm:$0xff]  ;;  %v11410_v30 = vld [vmem:[#allocation244_spill] sm:$0xff] }
 0x88b   :  { %3595 = vmatprep.subr.mxu0 %v8954_v54  ;;  %3668 = vmatprep.subr.mxu1 %v8958_v43  ;;  %v11411_v54 = vld [vmem:[#allocation245_spill] sm:$0xff]  ;;  %v11412_v43 = vld [vmem:[#allocation246_spill] sm:$0xff] }
 0x88c   :  { %3596 = vmatpush1.msra.mxu0 %v8962_v51  ;;  %3669 = vmatpush1.msra.mxu1 %v11391_v62  ;;  %v11413_v51 = vld [vmem:[#allocation247_spill] sm:$0xff]  ;;  %v11415_v62 = vld [vmem:[#allocation249_spill] sm:$0xff] }
 0x88d   :  { %3597 = vmatprep.subr.mxu0 %v11392_v53  ;;  %3670 = vmatprep.subr.mxu1 %v11393_v5  ;;  %v11416_v53 = vld [vmem:[#allocation250_spill] sm:$0xff]  ;;  %v11417_v5 = vld [vmem:[#allocation251_spill] sm:$0xff] }
 0x88e   :  { %3598 = vmatpush1.msra.mxu0 %v11394_v4  ;;  %3671 = vmatpush1.msra.mxu1 %v11395_v20  ;;  %v11418_v4 = vld [vmem:[#allocation113_spill] sm:$0xff]  ;;  %v11419_v20 = vld [vmem:[#allocation114_spill] sm:$0xff] }
 0x88f   :  { %3599 = vmatprep.subr.mxu0 %v11396_v19  ;;  %3672 = vmatprep.subr.mxu1 %v11397_v27  ;;  %v11420_v19 = vld [vmem:[#allocation115_spill] sm:$0xff]  ;;  %v11421_v27 = vld [vmem:[#allocation116_spill] sm:$0xff] }
 0x890   :  { %3600 = vmatpush1.msra.mxu0 %v11398_v39  ;;  %3673 = vmatpush1.msra.mxu1 %v11399_v61  ;;  %v11422_v39 = vld [vmem:[#allocation117_spill] sm:$0xff]  ;;  %v11423_v61 = vld [vmem:[#allocation118_spill] sm:$0xff] }
 0x891   :  { %3601 = vmatprep.subr.mxu0 %v11400_v42  ;;  %3674 = vmatprep.subr.mxu1 %v11401_v55  ;;  %v11424_v42 = vld [vmem:[#allocation119_spill] sm:$0xff]  ;;  %v11425_v55 = vld [vmem:[#allocation120_spill] sm:$0xff] }
 0x892   :  { %3602 = vmatpush1.msra.mxu0 %v11402_v12  ;;  %3675 = vmatpush1.msra.mxu1 %v11403_v24  ;;  %v11426_v12 = vld [vmem:[#allocation121_spill] sm:$0xff]  ;;  %v11427_v24 = vld [vmem:[#allocation122_spill] sm:$0xff] }
 0x893   :  { %3603 = vmatprep.subr.mxu0 %v11404_v38  ;;  %3676 = vmatprep.subr.mxu1 %v11405_v59  ;;  %v11428_v38 = vld [vmem:[#allocation123_spill] sm:$0xff]  ;;  %v11429_v59 = vld [vmem:[#allocation124_spill] sm:$0xff] }
 0x894   :  { %3604 = vmatpush1.msra.mxu0 %v11406_v46  ;;  %3677 = vmatpush1.msra.mxu1 %v11407_v57  ;;  %v11430_v46 = vld [vmem:[#allocation125_spill] sm:$0xff]  ;;  %v11431_v57 = vld [vmem:[#allocation126_spill] sm:$0xff] }
 0x895   :  { %3605 = vmatprep.subr.mxu0 %v11408_v15  ;;  %3678 = vmatprep.subr.mxu1 %v11409_v52  ;;  %v11432_v15 = vld [vmem:[#allocation127_spill] sm:$0xff]  ;;  %v11433_v52 = vld [vmem:[#allocation128_spill] sm:$0xff] }
 0x896   :  { %3606 = vmatpush1.msra.mxu0 %v11410_v30  ;;  %3679 = vmatpush1.msra.mxu1 %v11411_v54  ;;  %v11434_v30 = vld [vmem:[#allocation129_spill] sm:$0xff]  ;;  %v11435_v54 = vld [vmem:[#allocation130_spill] sm:$0xff] }
 0x897   :  { %3607 = vmatprep.subr.mxu0 %v11412_v43  ;;  %3680 = vmatprep.subr.mxu1 %v11413_v51  ;;  %v11437_v43 = vld [vmem:[#allocation131_spill] sm:$0xff]  ;;  %v11438_v51 = vld [vmem:[#allocation132_spill] sm:$0xff] }
 0x898   :  { %3608 = vmatpush1.msra.mxu0 %v11414_v0  ;;  %3681 = vmatpush1.msra.mxu1 %v11415_v62  ;;  %v11439_v0 = vld [vmem:[#allocation133_spill] sm:$0xff]  ;;  %v11440_v62 = vld [vmem:[#allocation134_spill] sm:$0xff] }
 0x899   :  { %3609 = vmatprep.subr.mxu0 %v11416_v53  ;;  %3682 = vmatprep.subr.mxu1 %v11417_v5  ;;  %v11441_v53 = vld [vmem:[#allocation135_spill] sm:$0xff]  ;;  %v11442_v5 = vld [vmem:[#allocation136_spill] sm:$0xff] }
 0x89a   :  { %3610 = vmatpush1.msra.mxu0 %v11418_v4  ;;  %3683 = vmatpush1.msra.mxu1 %v11419_v20  ;;  %v11443_v4 = vld [vmem:[#allocation137_spill] sm:$0xff]  ;;  %v11444_v20 = vld [vmem:[#allocation138_spill] sm:$0xff] }
 0x89b   :  { %3611 = vmatprep.subr.mxu0 %v11420_v19  ;;  %3684 = vmatprep.subr.mxu1 %v11421_v27  ;;  %v11445_v19 = vld [vmem:[#allocation139_spill] sm:$0xff]  ;;  %v11446_v27 = vld [vmem:[#allocation140_spill] sm:$0xff] }
 0x89c   :  { %3612 = vmatpush1.msra.mxu0 %v11422_v39  ;;  %3685 = vmatpush1.msra.mxu1 %v11423_v61  ;;  %v11447_v39 = vld [vmem:[#allocation141_spill] sm:$0xff]  ;;  %v11448_v61 = vld [vmem:[#allocation142_spill] sm:$0xff] }
 0x89d   :  { %3613 = vmatprep.subr.mxu0 %v11424_v42  ;;  %3686 = vmatprep.subr.mxu1 %v11425_v55  ;;  %v11449_v42 = vld [vmem:[#allocation143_spill] sm:$0xff]  ;;  %v11450_v55 = vld [vmem:[#allocation144_spill] sm:$0xff] }
 0x89e   :  { %3614 = vmatpush1.msra.mxu0 %v11426_v12  ;;  %3687 = vmatpush1.msra.mxu1 %v11427_v24  ;;  %v4042_v12 = vld [vmem:[%s11436_s12] sm:$0xff]  ;;  %v6574_v24 = vmov 0  }
 0x89f   :  { %3615 = vmatprep.subr.mxu0 %v11428_v38  ;;  %3688 = vmatprep.subr.mxu1 %v11429_v59  ;;  %v6575_v38 = vmov 1  }
 0x8a0   :  { %3616 = vmatpush1.msra.mxu0 %v11430_v46  ;;  %3689 = vmatpush1.msra.mxu1 %v11431_v57 }
 0x8a1   :  { %3641 = vmatprep.subr.mxu0 %v11432_v15  ;;  %3714 = vmatprep.subr.mxu1 %v11433_v52  ;;  %v11451_v15 = vld [vmem:[#allocation102_spill] sm:$0xff] }
 0x8a2   :  { %3642 = vmatpush2.msra.mxu0 %v11434_v30  ;;  %3715 = vmatpush2.msra.mxu1 %v11435_v54  ;;  %v11452_v30 = vld [vmem:[#allocation103_spill] sm:$0xff] }
 0x8a3   :  { %3643 = vmatprep.subr.mxu0 %v11437_v43  ;;  %3716 = vmatprep.subr.mxu1 %v11438_v51  ;;  %v11453_v51 = vld [vmem:[#allocation104_spill] sm:$0xff] }
 0x8a4   :  { %3644 = vmatpush2.msra.mxu0 %v11439_v0  ;;  %3717 = vmatpush2.msra.mxu1 %v11440_v62 }
 0x8a5   :  { %3645 = vmatprep.subr.mxu0 %v11441_v53  ;;  %3718 = vmatprep.subr.mxu1 %v11442_v5  ;;  %v11454_v53 = vld [vmem:[#allocation105_spill] sm:$0xff] }
 0x8a6   :  { %3646 = vmatpush2.msra.mxu0 %v11443_v4  ;;  %3719 = vmatpush2.msra.mxu1 %v11444_v20 }
 0x8a7   :  { %3647 = vmatprep.subr.mxu0 %v11445_v19  ;;  %3720 = vmatprep.subr.mxu1 %v11446_v27 }
 0x8a8   :  { %3648 = vmatpush2.msra.mxu0 %v11447_v39  ;;  %3721 = vmatpush2.msra.mxu1 %v11448_v61 }
 0x8a9   :  { %3731 = vmatprep.subr.mxu0 %v11449_v42  ;;  %3804 = vmatprep.subr.mxu1 %v11450_v55 }
 0x8aa   :  { %5337 = vset.pattern.permute.xlu0 %v6574_v24 }
 0x8ab   :  { %4046 = vperm.xlu0 %5337, %v4042_v12  }
 0x8af   :  { %5338 = vset.pattern.permute.xlu0 %v6575_v38 }
 0x8b0   :  { %4055 = vperm.xlu0 %5338, %v4042_v12  }
 0x917   :  { %v3308_v59 = vpop.f32.mrf.mxu0  ;;  %v3381_v46 = vpop.f32.mrf.mxu1 }
 0x918   :  { %v3313_v52 = vadd.f32 %v3308_v59, %v11451_v15  ;;  %v3386_v54 = vadd.f32 %v3381_v46, %v11452_v30 }
 0x919   :  { %v3310_v57 = vpop.f32.mrf.mxu0  ;;  %v3383_v43 = vpop.f32.mrf.mxu1 }
 0x91a   :  { %v3314_v0 = vadd.f32 %v3310_v57, %v11453_v51  ;;  %v5089_v62 = vmul.f32 -1.442695, %v3313_v52  ;;  %v3387_v5 = vadd.f32 %v3383_v43, %v11454_v53  ;;  %v5087_v4 = vmul.f32 -1.442695, %v3386_v54  ;;  %v11455_v57 = vld [vmem:[#allocation193_spill] sm:$0xff]  ;;  %v11456_v52 = vld [vmem:[#allocation194_spill] sm:$0xff] }
 0x91b   :  { %v11458_v53 = vld [vmem:[#allocation196_spill] sm:$0xff] }
 0x91c   :  { %v5090_v20 = vmul.f32 -1.442695, %v3314_v0  ;;  %5531 = vpow2.f32 %v5089_v62  ;;  %v5088_v19 = vmul.f32 -1.442695, %v3387_v5  ;;  %v11457_v0 = vld [vmem:[#allocation195_spill] sm:$0xff] }
 0x91d   :  { %5533 = vpow2.f32 %v5087_v4 }
 0x91e   :  { %5535 = vpow2.f32 %v5090_v20 }
 0x91f   :  { %5537 = vpow2.f32 %v5088_v19 }
 0x929   :  { %v5532_v27 = vpop.eup %5531 }
 0x92a   :  { %v5534_v39 = vpop.eup %5533  ;;  %v3554_v42 = vadd.f32 1.0, %v5532_v27 }
 0x92b   :  { %v5536_v61 = vpop.eup %5535  ;;  %v3540_v12 = vadd.f32 1.0, %v5534_v39 }
 0x92c   :  { %v5538_v55 = vpop.eup %5537  ;;  %v3555_v24 = vadd.f32 1.0, %v5536_v61  ;;  %5539 = vrcp.f32 %v3554_v42 }
 0x92d   :  { %v3541_v38 = vadd.f32 1.0, %v5538_v55  ;;  %5541 = vrcp.f32 %v3540_v12 }
 0x92e   :  { %5543 = vrcp.f32 %v3555_v24 }
 0x939   :  { %v5540_v20 = vpop.eup %5539 }
 0x93a   :  { %v5542_v19 = vpop.eup %5541 }
 0x93b   :  { %v5544_v27 = vpop.eup %5543  ;;  %v3546_v42 = vmul.f32 %v5542_v19, %v9550_v45  ;;  %v11485_v19 = vld [vmem:[#allocation93_spill] sm:$0xff] }
 0x940   :  { %v3454_v59 = vpop.f32.mrf.mxu0  ;;  %v3527_v46 = vpop.f32.mrf.mxu1 }
 0x941   :  { %v3459_v15 = vadd.f32 %v3454_v59, %v11455_v57  ;;  %v3532_v30 = vadd.f32 %v3527_v46, %v11456_v52 }
 0x942   :  { %v3456_v54 = vpop.f32.mrf.mxu0  ;;  %v3529_v43 = vpop.f32.mrf.mxu1 }
 0x943   :  { %5545 = vtanh.f32 %v3459_v15  ;;  %v5091_v51 = vmul.f32 -1.442695, %v3532_v30  ;;  %v3460_v62 = vadd.f32 %v3456_v54, %v11457_v0  ;;  %v3533_v5 = vadd.f32 %v3529_v43, %v11458_v53  ;;  %v11481_v53 = vld [vmem:[#allocation175_spill] sm:$0xff] }
 0x944   :  { %5547 = vrcp.f32 %v3541_v38 }
 0x945   :  { %5549 = vpow2.f32 %v5091_v51  ;;  %v5092_v4 = vmul.f32 -1.442695, %v3533_v5  ;;  %v11482_v5 = vld [vmem:[#allocation90_spill] sm:$0xff] }
 0x946   :  { %5551 = vtanh.f32 %v3460_v62 }
 0x947   :  { %5553 = vpow2.f32 %v5092_v4  ;;  %v11483_v4 = vld [vmem:[#allocation91_spill] sm:$0xff] }
 0x950   :  { %v5546_v39 = vpop.eup %5545 }
 0x951   :  { %v5548_v61 = vpop.eup %5547  ;;  %v3562_v55 = vmul.f32 %v5546_v39, %v5540_v20  ;;  %v11484_v20 = vld [vmem:[#allocation92_spill] sm:$0xff]  ;;  %v11487_v39 = vld [vmem:[#allocation182_spill] sm:$0xff] }
 0x952   :  { %v5550_v12 = vpop.eup %5549  ;;  %v3547_v38 = vmul.f32 %v5548_v61, %v9554_v34  ;;  %v11472_v34 = vld [vmem:[#allocation166_spill] sm:$0xff]  ;;  %v11488_v61 = vld [vmem:[#allocation183_spill] sm:$0xff] }
 0x953   :  { %v5552_v24 = vpop.eup %5551  ;;  %v9737_v59 = vadd.f32 %v3562_v55, %v3546_v42  ;;  %v3572_v46 = vadd.f32 1.0, %v5550_v12  ;;  %v11489_v42 = vld [vmem:[#allocation184_spill] sm:$0xff]  ;;  %v11490_v55 = vld [vmem:[#allocation205_spill] sm:$0xff]  ;;  %v11491_v12 = vld [vmem:[#allocation206_spill] sm:$0xff] }
 0x954   :  { %v5554_v57 = vpop.eup %5553  ;;  %v3563_v15 = vmul.f32 %v5552_v24, %v5544_v27  ;;  %v11486_v27 = vld [vmem:[#allocation181_spill] sm:$0xff]  ;;  %v11492_v24 = vld [vmem:[#allocation207_spill] sm:$0xff] }
 0x955   :  { %5555 = vtanh.f32 %v9737_v59  ;;  %v3573_v52 = vadd.f32 1.0, %v5554_v57  ;;  %v11494_v57 = vld [vmem:[#allocation209_spill] sm:$0xff] }
 0x956   :  { %5557 = vrcp.f32 %v3572_v46  ;;  %v9741_v30 = vadd.f32 %v3563_v15, %v3547_v38  ;;  %v11493_v46 = vld [vmem:[#allocation208_spill] sm:$0xff]  ;;  %v11495_v38 = vld [vmem:[#allocation210_spill] sm:$0xff]  ;;  %v11496_v15 = vld [vmem:[#allocation211_spill] sm:$0xff] }
 0x957   :  { %5559 = vrcp.f32 %v3573_v52  ;;  %v11497_v52 = vld [vmem:[#allocation212_spill] sm:$0xff] }
 0x958   :  { %5561 = vtanh.f32 %v9741_v30 }
 0x962   :  { %v5556_v45 = vpop.eup %5555 }
 0x963   :  { %v5558_v54 = vpop.eup %5557 }
 0x964   :  { %v5560_v43 = vpop.eup %5559  ;;  %v9744_v62 = vmul.f32 %v5558_v54, %v5556_v45  ;;  %v11498_v45 = vld [vmem:[#allocation213_spill] sm:$0xff] }
 0x965   :  { %v5562_v51 = vpop.eup %5561 }
 0x966   :  { %v3581_v0 = vmul.f32 %v5562_v51, %v5560_v43  ;;  %v3930_v43 = vld [vmem:[%s11499_s21 + $0x28] sm:$0xff] }
 0x968   :  { %5093 = vmatprep.mubr.msk.f32.mxu0 %vm1180_vm1, %v3581_v0  ;;  %5094 = vmatprep.mubr.msk.f32.mxu1 %vm1180_vm1, %v3581_v0 }
 0x969   :  { %3650 = vmatmul.mubr.f32.vlgmr.msra.gmra.mxu0 %v9744_v62  ;;  %3723 = vmatmul.mubr.f32.vlgmr.msra.gmra.mxu1 %v9744_v62 }
 0x96a   :  { %3732 = vmatpush1.msra.mxu0 %v9221_v37  ;;  %3805 = vmatpush1.msra.mxu1 %v9224_v23  ;;  %v11459_v37 = vld [vmem:[#allocation153_spill] sm:$0xff]  ;;  %v11460_v23 = vld [vmem:[#allocation154_spill] sm:$0xff] }
 0x96b   :  { %3733 = vmatprep.subr.mxu0 %v9227_v11  ;;  %5095 = vmatprep.mubr.msk.f32.mxu0 %vm1180_vm1, %v3581_v0  ;;  %v11461_v11 = vld [vmem:[#allocation155_spill] sm:$0xff] }
 0x96c   :  { %3806 = vmatprep.subr.mxu1 %v9231_v47  ;;  %5096 = vmatprep.mubr.msk.f32.mxu1 %vm1180_vm1, %v3581_v0  ;;  %v11462_v47 = vld [vmem:[#allocation156_spill] sm:$0xff] }
 0x96d   :  { %3734 = vmatpush1.msra.mxu0 %v9235_v35  ;;  %3807 = vmatpush1.msra.mxu1 %v9238_v6  ;;  %v11463_v35 = vld [vmem:[#allocation157_spill] sm:$0xff]  ;;  %v11464_v6 = vld [vmem:[#allocation158_spill] sm:$0xff] }
 0x96e   :  { %3735 = vmatprep.subr.mxu0 %v9241_v8  ;;  %3808 = vmatprep.subr.mxu1 %v9244_v13  ;;  %v11465_v8 = vld [vmem:[#allocation159_spill] sm:$0xff]  ;;  %v11466_v13 = vld [vmem:[#allocation160_spill] sm:$0xff] }
 0x96f   :  { %3736 = vmatpush1.msra.mxu0 %v9247_v36  ;;  %3809 = vmatpush1.msra.mxu1 %v9250_v56  ;;  %v11467_v36 = vld [vmem:[#allocation161_spill] sm:$0xff]  ;;  %v11468_v56 = vld [vmem:[#allocation162_spill] sm:$0xff] }
 0x970   :  { %3737 = vmatprep.subr.mxu0 %v9253_v50  ;;  %3810 = vmatprep.subr.mxu1 %v9256_v10  ;;  %v11469_v50 = vld [vmem:[#allocation163_spill] sm:$0xff]  ;;  %v11470_v10 = vld [vmem:[#allocation164_spill] sm:$0xff] }
 0x971   :  { %3738 = vmatpush1.msra.mxu0 %v9259_v41  ;;  %3811 = vmatpush1.msra.mxu1 %v11332_v9  ;;  %v11471_v41 = vld [vmem:[#allocation165_spill] sm:$0xff]  ;;  %v11473_v9 = vld [vmem:[#allocation167_spill] sm:$0xff] }
 0x972   :  { %3739 = vmatprep.subr.mxu0 %v11333_v3  ;;  %3812 = vmatprep.subr.mxu1 %v11334_v63  ;;  %v11474_v3 = vld [vmem:[#allocation168_spill] sm:$0xff]  ;;  %v11475_v63 = vld [vmem:[#allocation169_spill] sm:$0xff] }
 0x973   :  { %3740 = vmatpush1.msra.mxu0 %v11335_v1  ;;  %3813 = vmatpush1.msra.mxu1 %v11336_v16  ;;  %v11476_v1 = vld [vmem:[#allocation170_spill] sm:$0xff]  ;;  %v11477_v16 = vld [vmem:[#allocation171_spill] sm:$0xff] }
 0x974   :  { %3741 = vmatprep.subr.mxu0 %v11337_v29  ;;  %3814 = vmatprep.subr.mxu1 %v11338_v2  ;;  %v11478_v29 = vld [vmem:[#allocation172_spill] sm:$0xff]  ;;  %v11479_v2 = vld [vmem:[#allocation173_spill] sm:$0xff] }
 0x975   :  { %3742 = vmatpush1.msra.mxu0 %v11339_v21  ;;  %3815 = vmatpush1.msra.mxu1 %v11459_v37  ;;  %v11480_v21 = vld [vmem:[#allocation174_spill] sm:$0xff]  ;;  %v5107_v37 = vld [vmem:[#allocation25] ss:$0 sm:$0xff] }
 0x976   :  { %3743 = vmatprep.subr.mxu0 %v11460_v23  ;;  %3816 = vmatprep.subr.mxu1 %v11461_v11  ;;  %v5108_v11 = vld [vmem:[#allocation26] ss:$0 sm:$0xff] }
 0x977   :  { %3744 = vmatpush1.msra.mxu0 %v11462_v47  ;;  %3817 = vmatpush1.msra.mxu1 %v11463_v35  ;;  %v3928_v47 = vld [vmem:[%s11499_s21 + $0x18] sm:$0xff]  ;;  %v3927_v35 = vld [vmem:[%s11499_s21 + $0x10] sm:$0xff] }
 0x978   :  { %3745 = vmatprep.subr.mxu0 %v11464_v6  ;;  %3818 = vmatprep.subr.mxu1 %v11465_v8  ;;  %v4089_v8 = vld [vmem:[#allocation29] sm:$0xff] }
 0x979   :  { %3746 = vmatpush1.msra.mxu0 %v11466_v13  ;;  %3819 = vmatpush1.msra.mxu1 %v11467_v36  ;;  %v5109_v13 = vld [vmem:[#allocation28] ss:$0 sm:$0xff]  ;;  %v3926_v36 = vld [vmem:[%s11499_s21 + $0x8] sm:$0xff] }
 0x97a   :  { %3747 = vmatprep.subr.mxu0 %v11468_v56  ;;  %3820 = vmatprep.subr.mxu1 %v11469_v50  ;;  %v3925_v50 = vld [vmem:[%s11499_s21] sm:$0xff] }
 0x97b   :  { %3748 = vmatpush1.msra.mxu0 %v11470_v10  ;;  %3821 = vmatpush1.msra.mxu1 %v11471_v41  ;;  %v3944_v41 = vld [vmem:[%s11499_s21 + $0x98] sm:$0xff] }
 0x97c   :  { %3749 = vmatprep.subr.mxu0 %v11472_v34  ;;  %3822 = vmatprep.subr.mxu1 %v11473_v9  ;;  %v3943_v9 = vld [vmem:[%s11499_s21 + $0x90] sm:$0xff] }
 0x97d   :  { %3750 = vmatpush1.msra.mxu0 %v11474_v3  ;;  %3823 = vmatpush1.msra.mxu1 %v11475_v63  ;;  %v3942_v3 = vld [vmem:[%s11499_s21 + $0x88] sm:$0xff]  ;;  %v3941_v63 = vld [vmem:[%s11499_s21 + $0x80] sm:$0xff] }
 0x97e   :  { %3751 = vmatprep.subr.mxu0 %v11476_v1  ;;  %3824 = vmatprep.subr.mxu1 %v11477_v16 }
 0x97f   :  { %3752 = vmatpush1.msra.mxu0 %v11478_v29  ;;  %3825 = vmatpush1.msra.mxu1 %v11479_v2  ;;  %v11503_v2 = vld [vmem:[#allocation106_spill] sm:$0xff] }
 0x980   :  { %3753 = vmatprep.subr.mxu0 %v11480_v21  ;;  %3826 = vmatprep.subr.mxu1 %v11481_v53  ;;  %v11504_v53 = vld [vmem:[#allocation107_spill] sm:$0xff] }
 0x981   :  { %3754 = vmatpush1.msra.mxu0 %v11482_v5  ;;  %3827 = vmatpush1.msra.mxu1 %v11483_v4 }
 0x982   :  { %3755 = vmatprep.subr.mxu0 %v11484_v20  ;;  %3828 = vmatprep.subr.mxu1 %v11485_v19  ;;  %v11505_v20 = vld [vmem:[#allocation108_spill] sm:$0xff] }
 0x983   :  { %3756 = vmatpush1.msra.mxu0 %v11486_v27  ;;  %3829 = vmatpush1.msra.mxu1 %v11487_v39  ;;  %v11506_v39 = vld [vmem:[#allocation109_spill] sm:$0xff] }
 0x984   :  { %3757 = vmatprep.subr.mxu0 %v11488_v61  ;;  %3830 = vmatprep.subr.mxu1 %v11489_v42 }
 0x985   :  { %3758 = vmatpush1.msra.mxu0 %v11490_v55  ;;  %3831 = vmatpush1.msra.mxu1 %v11491_v12 }
 0x986   :  { %3759 = vmatprep.subr.mxu0 %v11492_v24  ;;  %3832 = vmatprep.subr.mxu1 %v11493_v46 }
 0x987   :  { %3760 = vmatpush1.msra.mxu0 %v11494_v57  ;;  %3833 = vmatpush1.msra.mxu1 %v11495_v38 }
 0x988   :  { %3761 = vmatprep.subr.mxu0 %v11496_v15  ;;  %3834 = vmatprep.subr.mxu1 %v11497_v52 }
 0x989   :  { %3762 = vmatpush1.msra.mxu0 %v11498_v45  ;;  %3835 = vmatpush1.msra.mxu1 %v11380_v48  ;;  %v11501_v48 = vld [vmem:[#allocation84_spill] sm:$0xff] }
 0x98a   :  { %3787 = vmatprep.subr.mxu0 %v11381_v25  ;;  %3860 = vmatprep.subr.mxu1 %v11382_v60  ;;  %v11502_v60 = vld [vmem:[#allocation85_spill] sm:$0xff] }
 0x98b   :  { %3788 = vmatpush2.msra.mxu0 %v11383_v58  ;;  %3861 = vmatpush2.msra.mxu1 %v11384_v32  ;;  %v11500_v32 = vmov 0.0  }
 0x98c   :  { %3789 = vmatprep.subr.mxu0 %v11385_v31  ;;  %3862 = vmatprep.subr.mxu1 %v11386_v49  ;;  %v3934_v31 = vld [vmem:[%s11499_s21 + $0x48] sm:$0xff]  ;;  %v3933_v49 = vld [vmem:[%s11499_s21 + $0x40] sm:$0xff] }
 0x98d   :  { %3790 = vmatpush2.msra.mxu0 %v11387_v26  ;;  %3863 = vmatpush2.msra.mxu1 %v11388_v7  ;;  %v4047_v26 = vpop.permute.xlu0 %4046  ;;  %v3932_v7 = vld [vmem:[%s11499_s21 + $0x38] sm:$0xff] }
 0x98e   :  { %3791 = vmatprep.subr.mxu0 %v11389_v33  ;;  %3864 = vmatprep.subr.mxu1 %v11390_v40  ;;  %v4043_v33 = vld [vmem:[#allocation23] sm:$0x3]  ;;  %v3931_v40 = vld [vmem:[%s11499_s21 + $0x30] sm:$0xff] }
 0x98f   :  { %3792 = vmatpush2.msra.mxu0 %v9439_v22  ;;  %3865 = vmatpush2.msra.mxu1 %v9442_v28  ;;  %v3940_v28 = vld [vmem:[%s11499_s21 + $0x78] sm:$0xff]  ;;  %v3935_v22 = vld [vmem:[%s11499_s21 + $0x50] sm:$0xff]  ;;  %v4052_v25 = vrot.slane %v4043_v33, %v11501_v48  ;;  %v4061_v58 = vrot.slane %v4043_v33, %v11502_v60  ;;  %v11509_v33 = vld [vmem:[#allocation199_spill] sm:$0xff] }
 0x990   :  { %3793 = vmatprep.subr.mxu0 %v9445_v44  ;;  %3866 = vmatprep.subr.mxu1 %v9448_v14  ;;  %v3939_v44 = vld [vmem:[%s11499_s21 + $0x70] sm:$0xff]  ;;  %v3938_v14 = vld [vmem:[%s11499_s21 + $0x68] sm:$0xff] }
 0x991   :  { %3794 = vmatpush2.msra.mxu0 %v9451_v18  ;;  %3867 = vmatpush2.msra.mxu1 %v9454_v17  ;;  %v3937_v18 = vld [vmem:[%s11499_s21 + $0x60] sm:$0xff]  ;;  %v3936_v17 = vld [vmem:[%s11499_s21 + $0x58] sm:$0xff]  ;;  %v4056_v54 = vpop.permute.xlu0 %4055  ;;  %v4053_v51 = vmul.f32 %v4052_v25, %v4047_v26  ;;  %v11510_v25 = vld [vmem:[#allocation200_spill] sm:$0xff] }
 0x992   :  { %3796 = vmatmul.mubr.f32.vlgmr.msra.gmra.mxu0 %v9744_v62  ;;  %3869 = vmatmul.mubr.f32.vlgmr.msra.gmra.mxu1 %v9744_v62  ;;  %v4062_v0 = vmul.f32 %v4061_v58, %v4056_v54  ;;  %v3929_v62 = vld [vmem:[%s11499_s21 + $0x20] sm:$0xff] }
 0x993   :  { %3955 = vmatprep.subr.mxu0 %v11500_v32  ;;  %5193 = vmatprep.subr.mxu1 %v11500_v32 }
 0x994   :  { %3956 = vmatpush1.msra.mxu0 %v3940_v28  ;;  %v4063_v23 = vadd.f32 %v4062_v0, %v4053_v51  ;;  %5195 = vmatprep.mubr.msk.f32.mxu1 %vm6576_vm2, %v11500_v32 }
 0x995   :  { %3957 = vmatprep.subr.mxu0 %v11500_v32  ;;  %5194 = vmatpush3.msra.mxu1 %v4089_v8 }
 0x996   :  { %3958 = vmatpush1.msra.mxu0 %v3939_v44  ;;  %v4071_v6 = vadd.f32 %v5107_v37, %v4063_v23  ;;  %5198 = vmatprep.subr.mxu1 %v11500_v32 }
 0x997   :  { %3959 = vmatprep.subr.mxu0 %v11500_v32 }
 0x998   :  { %3960 = vmatpush1.msra.mxu0 %v3938_v14  ;;  %v4079_v56 = vmul.f32 %v5108_v11, %v4071_v6 }
 0x999   :  { %3961 = vmatprep.subr.mxu0 %v11500_v32 }
 0x99a   :  { %3962 = vmatpush1.msra.mxu0 %v3937_v18  ;;  %v4087_v10 = vadd.f32 %v5109_v13, %v4079_v56  ;;  %v11507_v18 = vld [vmem:[#allocation197_spill] sm:$0xff] }
 0x99b   :  { %3963 = vmatprep.subr.mxu0 %v11500_v32 }
 0x99c   :  { %3964 = vmatpush1.msra.mxu0 %v3936_v17  ;;  %v4088_v34 = vmax.f32 %v4087_v10, 0.0 }
 0x99d   :  { %3965 = vmatprep.subr.mxu0 %v11500_v32 }
 0x99e   :  { %3966 = vmatpush1.msra.mxu0 %v3935_v22  ;;  %5196 = vmatmul.mubr.msk.f32.vlgmr.msra.gmra.mxu1 %vm501_vm0, %v4088_v34  ;;  %v11508_v22 = vld [vmem:[#allocation198_spill] sm:$0xff] }
 0x99f   :  { %3967 = vmatprep.subr.mxu0 %v11500_v32  ;;  %5202 = vmatprep.mubr.msk.f32.mxu1 %vm6576_vm2, %v11500_v32 }
 0x9a0   :  { %3968 = vmatpush1.msra.mxu0 %v3934_v31 }
 0x9a1   :  { %3969 = vmatprep.subr.mxu0 %v11500_v32 }
 0x9a2   :  { %3970 = vmatpush1.msra.mxu0 %v3933_v49 }
 0x9a3   :  { %3971 = vmatprep.subr.mxu0 %v11500_v32 }
 0x9a4   :  { %3972 = vmatpush1.msra.mxu0 %v3932_v7 }
 0x9a5   :  { %3973 = vmatprep.subr.mxu0 %v11500_v32 }
 0x9a6   :  { %3974 = vmatpush1.msra.mxu0 %v3931_v40 }
 0x9a7   :  { %3975 = vmatprep.subr.mxu0 %v11500_v32 }
 0x9a8   :  { %3976 = vmatpush1.msra.mxu0 %v3930_v43 }
 0x9a9   :  { %3977 = vmatprep.subr.mxu0 %v11500_v32 }
 0x9aa   :  { %3978 = vmatpush1.msra.mxu0 %v3929_v62 }
 0x9ab   :  { %3979 = vmatprep.subr.mxu0 %v11500_v32 }
 0x9ac   :  { %3980 = vmatpush1.msra.mxu0 %v3928_v47 }
 0x9ad   :  { %3981 = vmatprep.subr.mxu0 %v11500_v32 }
 0x9ae   :  { %3982 = vmatpush1.msra.mxu0 %v3927_v35 }
 0x9af   :  { %3983 = vmatprep.subr.mxu0 %v11500_v32 }
 0x9b0   :  { %3984 = vmatpush1.msra.mxu0 %v3926_v36 }
 0x9b1   :  { %3985 = vmatprep.subr.mxu0 %v11500_v32 }
 0x9b2   :  { %3986 = vmatpush1.msra.mxu0 %v3925_v50 }
 0x9b3   :  { %4011 = vmatprep.subr.mxu0 %v11500_v32 }
 0x9b4   :  { %4012 = vmatpush2.msra.mxu0 %v3944_v41 }
 0x9b5   :  { %4013 = vmatprep.subr.mxu0 %v11500_v32 }
 0x9b6   :  { %4014 = vmatpush2.msra.mxu0 %v3943_v9 }
 0x9b7   :  { %4015 = vmatprep.subr.mxu0 %v11500_v32 }
 0x9b8   :  { %4016 = vmatpush2.msra.mxu0 %v3942_v3 }
 0x9b9   :  { %4017 = vmatprep.subr.mxu0 %v11500_v32 }
 0x9ba   :  { %4018 = vmatpush2.msra.mxu0 %v3941_v63 }
 0xa29   :  { %v3651_v1 = vpop.f32.mrf.mxu0  ;;  %v3724_v16 = vpop.f32.mrf.mxu1 }
 0xa2a   :  { %v3656_v21 = vadd.f32 %v3651_v1, %v11503_v2  ;;  %v3729_v5 = vadd.f32 %v3724_v16, %v11504_v53  ;;  %v4294_v2 = vld [vmem:[#allocation38 + $0xb0] sm:$0xff] }
 0xa2b   :  { %v3653_v29 = vpop.f32.mrf.mxu0  ;;  %v3726_v4 = vpop.f32.mrf.mxu1 }
 0xa2c   :  { %v3657_v19 = vadd.f32 %v3653_v29, %v11505_v20  ;;  %v5099_v27 = vmul.f32 -1.442695, %v3656_v21  ;;  %v3730_v61 = vadd.f32 %v3726_v4, %v11506_v39  ;;  %v5097_v42 = vmul.f32 -1.442695, %v3729_v5  ;;  %v4189_v29 = vld [vmem:[#allocation35 + $0x8] sm:$0xff] }
 0xa2d   :  { %5199 = vmatpush3.msra.mxu1 %v4189_v29  ;;  %v5110_v21 = vld [vmem:[#allocation31] ss:$0 sm:$0xff]  ;;  %v5112_v5 = vld [vmem:[#allocation32] ss:$0 sm:$0xff]  ;;  %v5103_v4 = vld [vmem:[#allocation19] ss:$0 sm:$0xff] }
 0xa2e   :  { %v5100_v55 = vmul.f32 -1.442695, %v3657_v19  ;;  %5563 = vpow2.f32 %v5099_v27  ;;  %v5098_v12 = vmul.f32 -1.442695, %v3730_v61  ;;  %5200 = vmatprep.subr.mxu1 %v11500_v32  ;;  %v5113_v19 = vld [vmem:[#allocation34] ss:$0 sm:$0xff] }
 0xa2f   :  { %5565 = vpow2.f32 %v5097_v42  ;;  %v5105_v39 = vld [vmem:[#allocation20] ss:$0 sm:$0xff]  ;;  %v5106_v42 = vld [vmem:[#allocation22] ss:$0 sm:$0xff]  ;;  %v4292_v29 = vld [vmem:[#allocation38 + $0xa0] sm:$0xff] }
 0xa30   :  { %5567 = vpow2.f32 %v5100_v55 }
 0xa31   :  { %5569 = vpow2.f32 %v5098_v12 }
 0xa3b   :  { %v5564_v24 = vpop.eup %5563 }
 0xa3c   :  { %v5566_v46 = vpop.eup %5565  ;;  %v3897_v38 = vadd.f32 1.0, %v5564_v24 }
 0xa3d   :  { %v5568_v57 = vpop.eup %5567  ;;  %v3883_v52 = vadd.f32 1.0, %v5566_v46 }
 0xa3e   :  { %v5570_v15 = vpop.eup %5569  ;;  %v3898_v45 = vadd.f32 1.0, %v5568_v57  ;;  %5571 = vrcp.f32 %v3897_v38 }
 0xa3f   :  { %v3884_v28 = vadd.f32 1.0, %v5570_v15  ;;  %5573 = vrcp.f32 %v3883_v52  ;;  %v4293_v52 = vld [vmem:[#allocation38 + $0xa8] sm:$0xff] }
 0xa40   :  { %5575 = vrcp.f32 %v3898_v45  ;;  %v4291_v45 = vld [vmem:[#allocation38 + $0x98] sm:$0xff] }
 0xa4b   :  { %v5572_v43 = vpop.eup %5571 }
 0xa4c   :  { %v5574_v51 = vpop.eup %5573 }
 0xa4d   :  { %v5576_v0 = vpop.eup %5575  ;;  %v3889_v23 = vmul.f32 %v5574_v51, %v9737_v59  ;;  %v4515_v51 = vld [vmem:[%s11511_s10 + $0x70] sm:$0xff] }
 0xa52   :  { %v3797_v44 = vpop.f32.mrf.mxu0  ;;  %v3870_v14 = vpop.f32.mrf.mxu1 }
 0xa53   :  { %v3802_v17 = vadd.f32 %v3797_v44, %v11507_v18  ;;  %v3875_v31 = vadd.f32 %v3870_v14, %v11508_v22  ;;  %v4288_v44 = vld [vmem:[#allocation38 + $0x80] sm:$0xff]  ;;  %v4287_v14 = vld [vmem:[#allocation38 + $0x78] sm:$0xff]  ;;  %v4285_v18 = vld [vmem:[#allocation38 + $0x68] sm:$0xff] }
 0xa54   :  { %v3799_v49 = vpop.f32.mrf.mxu0  ;;  %v3872_v26 = vpop.f32.mrf.mxu1  ;;  %v4282_v22 = vld [vmem:[#allocation38 + $0x50] sm:$0xff] }
 0xa55   :  { %5577 = vtanh.f32 %v3802_v17  ;;  %v5101_v7 = vmul.f32 -1.442695, %v3875_v31  ;;  %v3803_v40 = vadd.f32 %v3799_v49, %v11509_v33  ;;  %v3876_v58 = vadd.f32 %v3872_v26, %v11510_v25  ;;  %v4284_v17 = vld [vmem:[#allocation38 + $0x60] sm:$0xff]  ;;  %v4281_v31 = vld [vmem:[#allocation38 + $0x48] sm:$0xff]  ;;  %v4279_v49 = vld [vmem:[#allocation38 + $0x38] sm:$0xff] }
 0xa56   :  { %5579 = vrcp.f32 %v3884_v28  ;;  %v4290_v28 = vld [vmem:[#allocation38 + $0x90] sm:$0xff]  ;;  %v4275_v33 = vld [vmem:[#allocation38 + $0x18] sm:$0xff]  ;;  %v4272_v25 = vld [vmem:[#allocation38] sm:$0xff] }
 0xa57   :  { %5581 = vpow2.f32 %v5101_v7  ;;  %v5102_v54 = vmul.f32 -1.442695, %v3876_v58  ;;  %v4278_v26 = vld [vmem:[#allocation38 + $0x30] sm:$0xff]  ;;  %v4276_v7 = vld [vmem:[#allocation38 + $0x20] sm:$0xff] }
 0xa58   :  { %5583 = vtanh.f32 %v3803_v40  ;;  %v4273_v40 = vld [vmem:[#allocation38 + $0x8] sm:$0xff] }
 0xa59   :  { %5585 = vpow2.f32 %v5102_v54  ;;  %v4532_v58 = vld [vmem:[%s11511_s10 + $0xf8] sm:$0xff] }
 0xa5a   :  { %v4516_v54 = vld [vmem:[%s11511_s10 + $0x78] sm:$0xff]  ;;  %5142 = vmatprep.subr.mxu0 %v4532_v58 }
 0xa5e   :  { %v4166_v1 = vpop.f32.mrf.mxu1 }
 0xa5f   :  { %v4167_v53 = vadd.f32 %v5110_v21, %v4166_v1  ;;  %v4283_v21 = vld [vmem:[#allocation38 + $0x58] sm:$0xff] }
 0xa60   :  { %v5197_v16 = vpop.f32.mrf.mxu1 }
 0xa61   :  { %v4177_v20 = vmul.f32 %v5112_v5, %v4167_v53  ;;  %v4295_v16 = vld [vmem:[#allocation38 + $0xb8] sm:$0xff]  ;;  %v4280_v53 = vld [vmem:[#allocation38 + $0x40] sm:$0xff]  ;;  %v4277_v5 = vld [vmem:[#allocation38 + $0x28] sm:$0xff] }
 0xa62   :  { %v5578_v62 = vpop.eup %5577 }
 0xa63   :  { %v5580_v37 = vpop.eup %5579  ;;  %v3905_v11 = vmul.f32 %v5578_v62, %v5572_v43  ;;  %v4185_v12 = vadd.f32 %v5113_v19, %v4177_v20  ;;  %v4531_v43 = vld [vmem:[%s11511_s10 + $0xf0] sm:$0xff]  ;;  %v4514_v62 = vld [vmem:[%s11511_s10 + $0x68] sm:$0xff] }
 0xa64   :  { %v5582_v47 = vpop.eup %5581  ;;  %v3890_v36 = vmul.f32 %v5580_v37, %v9741_v30  ;;  %v4188_v30 = vld [vmem:[#allocation35] sm:$0xff] }
 0xa65   :  { %v5584_v35 = vpop.eup %5583  ;;  %v3907_v6 = vadd.f32 %v3905_v11, %v3889_v23  ;;  %v3915_v8 = vadd.f32 1.0, %v5582_v47  ;;  %5201 = vmatpush3.msra.mxu1 %v4188_v30  ;;  %v4186_v57 = vmax.f32 %v4185_v12, 0.0  ;;  %v4529_v37 = vld [vmem:[%s11511_s10 + $0xe0] sm:$0xff]  ;;  %v4528_v11 = vld [vmem:[%s11511_s10 + $0xd8] sm:$0xff]  ;;  %v4522_v20 = vld [vmem:[%s11511_s10 + $0xa8] sm:$0xff] }
 0xa66   :  { %v5586_v13 = vpop.eup %5585  ;;  %v3906_v56 = vmul.f32 %v5584_v35, %v5576_v0  ;;  %4333 = vmatprep.subr.mxu1 %v4294_v2  ;;  %v4530_v0 = vld [vmem:[%s11511_s10 + $0xe8] sm:$0xff]  ;;  %v4513_v23 = vld [vmem:[%s11511_s10 + $0x60] sm:$0xff]  ;;  %v4512_v47 = vld [vmem:[%s11511_s10 + $0x58] sm:$0xff] }
 0xa67   :  { %5587 = vtanh.f32 %v3907_v6  ;;  %v3916_v50 = vadd.f32 1.0, %v5586_v13  ;;  %v4527_v35 = vld [vmem:[%s11511_s10 + $0xd0] sm:$0xff]  ;;  %v4510_v13 = vld [vmem:[%s11511_s10 + $0x48] sm:$0xff]  ;;  %v4289_v30 = vld [vmem:[#allocation38 + $0x88] sm:$0xff] }
 0xa68   :  { %5589 = vrcp.f32 %v3915_v8  ;;  %v3908_v10 = vadd.f32 %v3906_v56, %v3890_v36  ;;  %v4511_v6 = vld [vmem:[%s11511_s10 + $0x50] sm:$0xff]  ;;  %v4526_v8 = vld [vmem:[%s11511_s10 + $0xc8] sm:$0xff]  ;;  %v4525_v36 = vld [vmem:[%s11511_s10 + $0xc0] sm:$0xff] }
 0xa69   :  { %5591 = vrcp.f32 %v3916_v50  ;;  %v4509_v56 = vld [vmem:[%s11511_s10 + $0x40] sm:$0xff]  ;;  %v4524_v50 = vld [vmem:[%s11511_s10 + $0xb8] sm:$0xff]  ;;  %v4506_v19 = vld [vmem:[%s11511_s10 + $0x28] sm:$0xff] }
 0xa6a   :  { %5593 = vtanh.f32 %v3908_v10  ;;  %v4508_v10 = vld [vmem:[%s11511_s10 + $0x38] sm:$0xff]  ;;  %v4286_v2 = vld [vmem:[#allocation38 + $0x70] sm:$0xff]  ;;  %v4503_v12 = vld [vmem:[%s11511_s10 + $0x10] sm:$0xff] }
 0xa74   :  { %v5588_v41 = vpop.eup %5587 }
 0xa75   :  { %v5590_v34 = vpop.eup %5589 }
 0xa76   :  { %v5592_v9 = vpop.eup %5591  ;;  %v3923_v3 = vmul.f32 %v5590_v34, %v5588_v41  ;;  %v4523_v41 = vld [vmem:[%s11511_s10 + $0xb0] sm:$0xff] }
 0xa77   :  { %v5594_v59 = vpop.eup %5593  ;;  %v4507_v34 = vld [vmem:[%s11511_s10 + $0x30] sm:$0xff] }
 0xa78   :  { %v3924_v63 = vmul.f32 %v5594_v59, %v5592_v9  ;;  %v5114_v9 = vld [vmem:[#allocation37] ss:$0 sm:$0xff] }
 0xa7a   :  { %5104 = vmatprep.mubr.msk.f32.mxu0 %vm1180_vm1, %v3924_v63 }
 0xa7b   :  { %4020 = vmatmul.mubr.f32.vlgmr.msra.gmra.mxu0 %v3923_v3 }
 0xa7c   :  { %5143 = vmatpush3.msra.mxu0 %v4516_v54 }
 0xa7d   :  { %5144 = vmatprep.subr.mxu0 %v4531_v43 }
 0xa7e   :  { %5145 = vmatpush3.msra.mxu0 %v4515_v51 }
 0xa7f   :  { %5146 = vmatprep.subr.mxu0 %v4530_v0 }
 0xa80   :  { %5147 = vmatpush3.msra.mxu0 %v4514_v62 }
 0xa81   :  { %5148 = vmatprep.subr.mxu0 %v4529_v37 }
 0xa82   :  { %5149 = vmatpush3.msra.mxu0 %v4513_v23 }
 0xa83   :  { %5150 = vmatprep.subr.mxu0 %v4528_v11 }
 0xa84   :  { %5151 = vmatpush3.msra.mxu0 %v4512_v47 }
 0xa85   :  { %5152 = vmatprep.subr.mxu0 %v4527_v35  ;;  %v11514_v35 = vld [vmem:[#allocation83_spill] sm:$0xff] }
 0xa86   :  { %5153 = vmatpush3.msra.mxu0 %v4511_v6  ;;  %v4308_v6 = vsub.s32 2, %v11514_v35 }
 0xa87   :  { %5154 = vmatprep.subr.mxu0 %v4526_v8 }
 0xa88   :  { %5155 = vmatpush3.msra.mxu0 %v4510_v13 }
 0xa89   :  { %5156 = vmatprep.subr.mxu0 %v4525_v36 }
 0xa8a   :  { %5157 = vmatpush3.msra.mxu0 %v4509_v56 }
 0xa8b   :  { %5158 = vmatprep.subr.mxu0 %v4524_v50 }
 0xa8c   :  { %5159 = vmatpush3.msra.mxu0 %v4508_v10 }
 0xa8d   :  { %5160 = vmatprep.subr.mxu0 %v4523_v41 }
 0xa8e   :  { %5161 = vmatpush3.msra.mxu0 %v4507_v34 }
 0xa8f   :  { %5162 = vmatprep.subr.mxu0 %v4522_v20  ;;  %v5120_v20 = vld [vmem:[%s11516_s5] ss:$0 sm:$0xff] }
 0xa90   :  { %5163 = vmatpush3.msra.mxu0 %v4506_v19 }
 0xb3b   :  { %v4021_v27 = vpop.f32.mrf.mxu0 }
 0xb3c   :  { %v4022_v61 = vadd.f32 %v5103_v4, %v4021_v27  ;;  %v4274_v4 = vld [vmem:[#allocation38 + $0x10] sm:$0xff] }
 0xb3d   :  { %v4023_v55 = vpop.f32.mrf.mxu0  ;;  %v4521_v27 = vld [vmem:[%s11511_s10 + $0xa0] sm:$0xff] }
 0xb3e   :  { %v4032_v24 = vmul.f32 %v5105_v39, %v4022_v61  ;;  %5164 = vmatprep.subr.mxu0 %v4521_v27  ;;  %v4505_v39 = vld [vmem:[%s11511_s10 + $0x20] sm:$0xff]  ;;  %v4520_v61 = vld [vmem:[%s11511_s10 + $0x98] sm:$0xff]  ;;  %v4519_v55 = vld [vmem:[%s11511_s10 + $0x90] sm:$0xff] }
 0xb3f   :  { %5165 = vmatpush3.msra.mxu0 %v4505_v39  ;;  %v5122_v39 = vld [vmem:[%s11517_s17] ss:$0 sm:$0xff] }
 0xb40   :  { %v4040_v46 = vadd.f32 %v5106_v42, %v4032_v24  ;;  %5166 = vmatprep.subr.mxu0 %v4520_v61  ;;  %v4504_v42 = vld [vmem:[%s11511_s10 + $0x18] sm:$0xff]  ;;  %v4518_v24 = vld [vmem:[%s11511_s10 + $0x88] sm:$0xff]  ;;  %v5121_v61 = vld [vmem:[%s11518_s1] ss:$0 sm:$0xff] }
 0xb41   :  { %5167 = vmatpush3.msra.mxu0 %v4504_v42 }
 0xb42   :  { %v4041_v38 = vmax.f32 %v4040_v46, 0.0  ;;  %5168 = vmatprep.subr.mxu0 %v4519_v55  ;;  %v4502_v46 = vld [vmem:[%s11511_s10 + $0x8] sm:$0xff] }
 0xb43   :  { %5169 = vmatpush3.msra.mxu0 %v4503_v12 }
 0xb44   :  { %v4187_v15 = vadd.f32 %v4186_v57, %v4041_v38  ;;  %v4540_v57 = vld [vmem:[%s11511_s10 + $0x138] sm:$0xff]  ;;  %v4517_v38 = vld [vmem:[%s11511_s10 + $0x80] sm:$0xff]  ;;  %5170 = vmatprep.subr.mxu0 %v4518_v24 }
 0xb45   :  { %5171 = vmatpush3.msra.mxu0 %v4502_v46 }
 0xb46   :  { %5203 = vmatmul.mubr.msk.f32.vlgmr.msra.gmra.mxu1 %vm4197_vm3, %v4187_v15  ;;  %v4501_v15 = vld [vmem:[%s11511_s10] sm:$0xff]  ;;  %5172 = vmatprep.subr.mxu0 %v4517_v38 }
 0xb47   :  { %4334 = vmatpush1.msra.mxu1 %v4293_v52  ;;  %4381 = vmatprep.mubr.f32.mxu1 %v11500_v32  ;;  %v4539_v52 = vld [vmem:[%s11511_s10 + $0x130] sm:$0xff] }
 0xb48   :  { %4335 = vmatprep.subr.mxu1 %v4291_v45  ;;  %5173 = vmatpush3.msra.mxu0 %v4501_v15  ;;  %v4538_v45 = vld [vmem:[%s11511_s10 + $0x128] sm:$0xff] }
 0xb49   :  { %4336 = vmatpush1.msra.mxu1 %v4290_v28  ;;  %v4537_v28 = vld [vmem:[%s11511_s10 + $0x120] sm:$0xff] }
 0xb4a   :  { %4337 = vmatprep.subr.mxu1 %v4288_v44  ;;  %v4536_v44 = vld [vmem:[%s11511_s10 + $0x118] sm:$0xff] }
 0xb4b   :  { %4338 = vmatpush1.msra.mxu1 %v4287_v14  ;;  %v4535_v14 = vld [vmem:[%s11511_s10 + $0x110] sm:$0xff] }
 0xb4c   :  { %4339 = vmatprep.subr.mxu1 %v4285_v18  ;;  %v4534_v18 = vld [vmem:[%s11511_s10 + $0x108] sm:$0xff] }
 0xb4d   :  { %4340 = vmatpush1.msra.mxu1 %v4284_v17  ;;  %v4533_v17 = vld [vmem:[%s11511_s10 + $0x100] sm:$0xff] }
 0xb4e   :  { %4341 = vmatprep.subr.mxu1 %v4282_v22  ;;  %v4296_v22 = vld [vmem:[%s11512_s3] sm:$0x7] }
 0xb4f   :  { %4342 = vmatpush1.msra.mxu1 %v4281_v31  ;;  %v4458_v31 = vld [vmem:[#allocation40] sm:$0x7]  ;;  %v4309_v13 = vrot.slane %v4296_v22, %v4308_v6 }
 0xb50   :  { %4343 = vmatprep.subr.mxu1 %v4279_v49  ;;  %v4301_v49 = vrot.slane %v4296_v22, %v11501_v48  ;;  %v4467_v58 = vrot.slane %v4458_v31, %v11502_v60  ;;  %v4471_v36 = vrot.slane %v4458_v31, %v4308_v6 }
 0xb51   :  { %4344 = vmatpush1.msra.mxu1 %v4278_v26  ;;  %v4463_v26 = vrot.slane %v4458_v31, %v11501_v48 }
 0xb52   :  { %4345 = vmatprep.subr.mxu1 %v4276_v7  ;;  %v4478_v7 = vld [vmem:[#allocation41] sm:$0x7] }
 0xb53   :  { %4346 = vmatpush1.msra.mxu1 %v4275_v33  ;;  %v4305_v33 = vrot.slane %v4296_v22, %v11502_v60  ;;  %v4483_v54 = vrot.slane %v4478_v7, %v11501_v48  ;;  %v4487_v62 = vrot.slane %v4478_v7, %v11502_v60  ;;  %v4491_v10 = vrot.slane %v4478_v7, %v4308_v6 }
 0xb54   :  { %4347 = vmatprep.subr.mxu1 %v4273_v40 }
 0xb55   :  { %4348 = vmatpush1.msra.mxu1 %v4272_v25 }
 0xb56   :  { %5205 = vmatprep.subr.mxu1 %v11500_v32 }
 0xc06   :  { %v4267_v3 = vpop.f32.mrf.mxu1 }
 0xc07   :  { %v4268_v59 = vadd.f32 %v5114_v9, %v4267_v3  ;;  %v4719_v3 = vld [vmem:[%s11513_s11] sm:$0xf] }
 0xc08   :  { %v5204_v63 = vpop.f32.mrf.mxu1 }
 0xc09   :  { %v4271_v1 = vmax.f32 %v4268_v59, 0.0  ;;  %v5929_v59 = vld [vmem:[%s11436_s12] sm:$0xff]  ;;  %v4808_v63 = vld [vmem:[%s6776_s19 + $0x18] sm:$0xff] }
 0xc0b   :  { %5116 = vmatmul.mubr.msk.f32.vlgmr.msra.gmra.mxu1 %vm4313_vm4, %v4271_v1 }
 0xc0c   :  { %5206 = vmatpush3.msra.mxu1 %v4295_v16  ;;  %5221 = vmatprep.mubr.msk.f32.mxu1 %vm6576_vm2, %v11500_v32  ;;  %v4806_v16 = vld [vmem:[%s6776_s19 + $0x8] sm:$0xff] }
 0xc0d   :  { %5207 = vmatprep.subr.mxu1 %v11500_v32 }
 0xc0e   :  { %5208 = vmatpush3.msra.mxu1 %v4292_v29  ;;  %v4805_v29 = vld [vmem:[%s6776_s19] sm:$0xff] }
 0xc0f   :  { %5209 = vmatprep.subr.mxu1 %v11500_v32 }
 0xc10   :  { %5210 = vmatpush3.msra.mxu1 %v4289_v30 }
 0xc11   :  { %5211 = vmatprep.subr.mxu1 %v11500_v32 }
 0xc12   :  { %5212 = vmatpush3.msra.mxu1 %v4286_v2 }
 0xc13   :  { %5213 = vmatprep.subr.mxu1 %v11500_v32 }
 0xc14   :  { %5214 = vmatpush3.msra.mxu1 %v4283_v21 }
 0xc15   :  { %5215 = vmatprep.subr.mxu1 %v11500_v32 }
 0xc16   :  { %5216 = vmatpush3.msra.mxu1 %v4280_v53  ;;  %v5118_v53 = vld [vmem:[%s11515_s0] ss:$0 sm:$0xff] }
 0xc17   :  { %5217 = vmatprep.subr.mxu1 %v11500_v32 }
 0xc18   :  { %5218 = vmatpush3.msra.mxu1 %v4277_v5 }
 0xc19   :  { %5219 = vmatprep.subr.mxu1 %v11500_v32 }
 0xc1a   :  { %5220 = vmatpush3.msra.mxu1 %v4274_v4 }
 0xc1b   :  { %5222 = vmatmul.mubr.msk.f32.vlgmr.msra.gmra.mxu1 %vm4313_vm4, %v4271_v1  ;;  %5224 = vmatprep.subr.mxu1 %v11500_v32  ;;  %v4807_v1 = vld [vmem:[%s6776_s19 + $0x10] sm:$0xff] }
 0xc1c   :  { %5240 = vmatprep.mubr.msk.f32.mxu1 %vm6576_vm2, %v11500_v32  ;;  %5225 = vmatpush3.msra.mxu1 %v4540_v57 }
 0xc1d   :  { %5226 = vmatprep.subr.mxu1 %v11500_v32 }
 0xc1e   :  { %5227 = vmatpush3.msra.mxu1 %v4539_v52 }
 0xc1f   :  { %5228 = vmatprep.subr.mxu1 %v11500_v32 }
 0xc20   :  { %5229 = vmatpush3.msra.mxu1 %v4538_v45 }
 0xc21   :  { %5230 = vmatprep.subr.mxu1 %v11500_v32 }
 0xc22   :  { %5231 = vmatpush3.msra.mxu1 %v4537_v28  ;;  %v5125_v28 = vld [vmem:[%s6781_s9] ss:$0 sm:$0xff]  ;;  %s6577_s9 = smov [#allocation43]  }
 0xc23   :  { %5232 = vmatprep.subr.mxu1 %v11500_v32 }
 0xc24   :  { %5233 = vmatpush3.msra.mxu1 %v4536_v44 }
 0xc25   :  { %5234 = vmatprep.subr.mxu1 %v11500_v32 }
 0xc26   :  { %5235 = vmatpush3.msra.mxu1 %v4535_v14 }
 0xc27   :  { %5236 = vmatprep.subr.mxu1 %v11500_v32 }
 0xc28   :  { %5237 = vmatpush3.msra.mxu1 %v4534_v18 }
 0xc29   :  { %5238 = vmatprep.subr.mxu1 %v11500_v32 }
 0xc2a   :  { %5239 = vmatpush3.msra.mxu1 %v4533_v17 }
 0xc2b   :  { %5243 = vmatprep.subr.mxu1 %v11500_v32 }
 0xccb   :  { %v4383_v40 = vpop.f32.mrf.mxu1 }
 0xccc   :  { %v4384_v25 = vadd.f32 %v4383_v40, %v4301_v49 }
 0xccd   :  { %v4385_v43 = vpop.f32.mrf.mxu1 }
 0xcce   :  { %v4475_v51 = vmul.f32 %v4463_v26, %v4384_v25  ;;  %v4386_v0 = vadd.f32 %v4385_v43, %v4305_v33  ;;  %v4900_v25 = vld [vmem:[%s6786_s8] sm:$0x1]  ;;  %s4932_s8 = sshll.u32 %s6577_s9, 4  ;;  %s4933_s8 = int_to_ptr.vmem [resolvable:$true] %s4932_s8 }
 0xccf   :  { %s6450_s19 = scalar_lea.vmem %s4933_s8, 128  ;;  %p6455_p5 = scmp.lt.s32.totalorder %s4933_s8, %s4933_s8 }
 0xcd0   :  { %v4476_v37 = vmul.f32 %v4467_v58, %v4386_v0  ;;  %v4495_v23 = vadd.f32 %v4483_v54, %v4475_v51  ;;  %v5127_v58 = vmul.f32 -1.442695, %v4900_v25  ;;  %p6451_p4 = scmp.ne.s32.totalorder %s4933_s8, %s6450_s19  ;;  %p6456_p6 = scmp.lt.s32.totalorder %s6450_s19, %s6450_s19 }
 0xcd2   :  { %v4496_v11 = vadd.f32 %v4487_v62, %v4476_v37  ;;  %v4498_v8 = vmax.f32 %v4495_v23, 0.0  ;;  %p6457_p7 = por %p6456_p6, %p6455_p5 }
 0xcd4   :  { %v4499_v47 = vmax.f32 %v4496_v11, 0.0  ;;  %p6458_p8 = pnand %p6457_p7, %p6451_p4 }
 0xcd6   :  { %4615 = vmatprep.mubr.f32.mxu0 %v4499_v47 }
 0xcd7   :  { %4616 = vmatmul.mubr.f32.vlgmr.msra.gmra.mxu0 %v4498_v8 }
 0xcdb   :  { %v4454_v56 = vpop.f32.mrf.mxu1 }
 0xcdc   :  { %v4455_v50 = vadd.f32 %v4454_v56, %v4309_v13 }
 0xcdd   :  { %v5223_v41 = vpop.f32.mrf.mxu1 }
 0xcde   :  { %v4477_v34 = vmul.f32 %v4471_v36, %v4455_v50 }
 0xce0   :  { %v4497_v60 = vadd.f32 %v4491_v10, %v4477_v34 }
 0xce2   :  { %v4500_v9 = vmax.f32 %v4497_v60, 0.0 }
 0xce4   :  { %5241 = vmatmul.mubr.msk.f32.vlgmr.msra.gmra.mxu1 %vm4313_vm4, %v4500_v9 }
 0xce5   :  { %5244 = vmatpush3.msk.msra.mxu1 %vm4730_vm5, %v4719_v3  ;;  %5245 = vmatprep.mubr.msk.f32.mxu1 %vm6576_vm2, %v11500_v32 }
 0xce6   :  { %5248 = vmatprep.subr.mxu1 %v11500_v32 }
 0xce8   :  { %5246 = vmatmul.mubr.msk.f32.vlgmr.msra.gmra.mxu1 %vm4727_vm6, %v5929_v59 }
 0xce9   :  { %5256 = vmatprep.mubr.msk.f32.mxu1 %vm6576_vm2, %v11500_v32  ;;  %5249 = vmatpush3.msra.mxu1 %v4808_v63 }
 0xcea   :  { %5250 = vmatprep.subr.mxu1 %v11500_v32 }
 0xceb   :  { %5251 = vmatpush3.msra.mxu1 %v4807_v1 }
 0xcec   :  { %5252 = vmatprep.subr.mxu1 %v11500_v32 }
 0xced   :  { %5253 = vmatpush3.msra.mxu1 %v4806_v16 }
 0xcee   :  { %5254 = vmatprep.subr.mxu1 %v11500_v32 }
 0xcef   :  { %5255 = vmatpush3.msra.mxu1 %v4805_v29 }
 0xd97   :  { %v5174_v30 = vpop.f32.mrf.mxu0 }
 0xd99   :  { %v5175_v2 = vpop.f32.mrf.mxu0 }
 0xd9a   :  { %v5176_v21 = vadd.f32 %v5175_v2, %v5174_v30 }
 0xd9c   :  { %v4618_v5 = vadd.f32 %v5176_v21, %v5118_v53 }
 0xda4   :  { %v4687_v4 = vpop.f32.mrf.mxu1 }
 0xda5   :  { %v4688_v19 = vadd.f32 %v4687_v4, %v4618_v5 }
 0xda6   :  { %v5242_v27 = vpop.f32.mrf.mxu1 }
 0xda7   :  { %v4698_v42 = vmul.f32 %v5120_v20, %v4688_v19 }
 0xda8   :  { %v4800_v55 = vpop.f32.mrf.mxu1 }
 0xda9   :  { %v4801_v12 = vadd.f32 %v5122_v39, %v4800_v55  ;;  %v4706_v24 = vadd.f32 %v5121_v61, %v4698_v42 }
 0xdaa   :  { %v5247_v46 = vpop.f32.mrf.mxu1 }
 0xdab   :  { %v4804_v32 = vmax.f32 %v4801_v12, 0.0  ;;  %v4707_v57 = vmax.f32 %v4706_v24, 0.0 }
 0xdad   :  { %5257 = vmatmul.mubr.msk.f32.vlgmr.msra.gmra.mxu1 %vm1180_vm1, %v4804_v32  ;;  %v4708_v38 = vsel %vm501_vm0, %v4707_v57, -inf }
 0xdae   :  { %4709 = vmax.xlane.f32.xlu1 %v4708_v38 }
 0xe37   :  { %v4710_v15 = vpop.xlane.xlu1 %4709 }
 0xe38   :  { %v4711_v52 = vsub.f32 %v4707_v57, %v4710_v15 }
 0xe3a   :  { %v4712_v45 = vmul.f32 1.442695, %v4711_v52 }
 0xe3c   :  { %5595 = vpow2.f32 %v4712_v45 }
 0xe49   :  { %v5596_v22 = vpop.eup %5595 }
 0xe4a   :  { %v4714_v31 = vsel %vm501_vm0, %v5596_v22, 0.0 }
 0xe6d   :  { %v4885_v44 = vpop.f32.mrf.mxu1 }
 0xe6e   :  { %v4886_v14 = vadd.f32 %v5125_v28, %v4885_v44 }
 0xe6f   :  { %v5258_v18 = vpop.f32.mrf.mxu1 }
 0xe70   :  { %v4889_v17 = vsel %vm501_vm0, %v4886_v14, -inf }
 0xe71   :  { %4890 = vmax.xlane.f32.xlu1 %v4889_v17 }
 0xe75   :  { %4715 = vadd.xlane.f32.xlu1 %v4714_v31 }
 0xefa   :  { %v4891_v49 = vpop.xlane.xlu1 %4890 }
 0xefb   :  { %v4892_v26 = vsub.f32 %v4886_v14, %v4891_v49 }
 0xefd   :  { %v4893_v7 = vmul.f32 1.442695, %v4892_v26 }
 0xefe   :  { %v4716_v51 = vpop.xlane.xlu1 %4715 }
 0xeff   :  { %5597 = vpow2.f32 %v4893_v7 }
 0xf00   :  { %5599 = vpow2.f32 %v5127_v58 }
 0xf0c   :  { %v5598_v33 = vpop.eup %5597 }
 0xf0d   :  { %v4895_v40 = vsel %vm501_vm0, %v5598_v33, 0.0  ;;  %v5600_v54 = vpop.eup %5599 }
 0xf0e   :  { %4896 = vadd.xlane.f32.xlu0 %v4895_v40  ;;  %v4904_v43 = vadd.f32 1.0, %v5600_v54 }
 0xf10   :  { %5601 = vrcp.f32 %v4904_v43 }
 0xf11   :  { %5603 = vrcp.f32 %v4716_v51 }
 0xf1d   :  { %v5602_v62 = vpop.eup %5601 }
 0xf1e   :  { %v4914_v37 = vsub.f32 1.0, %v5602_v62  ;;  %v5604_v23 = vpop.eup %5603  ;;  %v4911_v47 = vrot.slane %v5602_v62, %v11501_v48 }
 0xf1f   :  { %v4718_v11 = vmul.f32 %v5604_v23, %v5596_v22 }
 0xf20   :  { %v4919_v35 = vrot.slane %v4914_v37, %v11501_v48 }
 0xf22   :  { %v4921_v36 = vmul.f32 %v4919_v35, %v4718_v11 }
 0xf97   :  { %v4897_v0 = vpop.xlane.xlu0 %4896 }
 0xf98   :  { %5605 = vrcp.f32 %v4897_v0 }
 0xfa5   :  { %v5606_v6 = vpop.eup %5605 }
 0xfa6   :  { %v4899_v8 = vmul.f32 %v5606_v6, %v5598_v33 }
 0xfa8   :  { %v4913_v13 = vmul.f32 %v4911_v47, %v4899_v8 }
 0xfaa   :  { %v4922_v56 = vadd.f32 %v4921_v36, %v4913_v13 }
 0xfac   :  { %5607 = vlog2.f32 %v4922_v56 }
 0xfb9   :  { %v5608_v50 = vpop.eup %5607 }
 0xfba   :  { %v4924_v10 = vmul.f32 0.6931472, %v5608_v50 }
 0xfbc   :  { %4925 = vst.msk [vmem:[#allocation43] sm:$0xff] %vm501_vm0, %v4924_v10 }
 0xfbd   :  { %6461 = shalt.err (!%p6458_p8)
}
 0xfbe   :  { %4935 = dma.vmem_to_hbm [thread:$0]  %s4933_s8, 128, %s6791_s29, [#allocation4]  }
 0xfbf   :  { %6498 = dma.done.wait [#allocation4], 128  }
 0xfc0   :  { %6499 = vsyncadd [#allocation4], 4294967168 }
 0xfc1   :  { %4939 = vsyncpa [#allocation3], 1 }
 0xfc2   :  { %4940 = vsyncpa [#allocation6], 1 }
 0xfc3   :  { %4941 = vsyncpa [#allocation9], 1 }
 0xfc4   :  { %4942 = vsyncpa [#allocation12], 1 }
 0xfc5   :  { %4943 = vsyncpa [#allocation15], 1 }
 0xfc6   :  { %4944 = vsyncpa [#allocation18], 1 }
 0xfc7   :  { %4945 = vsyncpa [#allocation21], 1 }
 0xfc8   :  { %4946 = vsyncpa [#allocation24], 1 }
 0xfc9   :  { %4947 = vsyncpa [#allocation27], 1 }
 0xfca   :  { %4948 = vsyncpa [#allocation30], 1 }
 0xfcb   :  { %4949 = vsyncpa [#allocation33], 1 }
 0xfcc   :  { %4950 = vsyncpa [#allocation36], 1 }
 0xfcd   :  { %4951 = vsyncpa [#allocation39], 1 }
 0xfce   :  { %4952 = vsyncpa [#allocation42], 1 }
 0xfcf   :  { %4953 = vsyncpa [#allocation4], 1 }

</bundles_post_ra>
